<compile_context>
chip_gen: v6e
topology: v6e:2x2x1
jax: 0.10.0
libtpu: 0.0.40
codegen_flags: <defaults>
</compile_context>

<pallas_src>
import math
from functools import partial, lru_cache
from collections import namedtuple

import jax
import jax.numpy as jnp
from jax.experimental import pallas as pl
from jax.experimental.pallas import tpu as pltpu

NUM_CLASSES = 21                     # VOC
MBOX = [4, 6, 6, 6, 4, 4]            # default boxes per location, per source
VGG_CFG = [64, 64, 'M', 128, 128, 'M', 256, 256, 256, 'C',
           512, 512, 512, 'M', 512, 512, 512]

VMEM_LIMIT_BYTES = 32 * 1024 * 1024   # explicit scoped-VMEM limit (safe on v5e/v6e/v7x)
VMEM_TILE_BUDGET = 14 * 1024 * 1024   # target per-call block working set
POOL_BLOCK_ELEMS = 1 << 20            # per-block element budget for pooling kernels


def _round_up(x, m):
    return (x + m - 1) // m * m


def _pick_tm(m, cap=512):
    """Row tile: largest preferred tile whose zero-padding waste stays <= ~12.5%."""
    for t in (512, 256, 128, 64, 32, 16):
        if t <= cap and (_round_up(m, t) - m) * 8 <= max(m, 1):
            return t
    return 16


def _mosaic_params(*sems):
    return pltpu.CompilerParams(dimension_semantics=sems,
                                vmem_limit_bytes=VMEM_LIMIT_BYTES)


# --------------------- plain matmul (1x1 convs + stride-2 im2col fallback) ---------------------

def _mm_kernel(a_ref, b_ref, bias_ref, o_ref, *, relu):
    out = jnp.dot(a_ref[...], b_ref[...], preferred_element_type=jnp.float32)
    out = out + bias_ref[...]
    if relu:
        out = jnp.maximum(out, 0.0)
    o_ref[...] = out.astype(o_ref.dtype)


@lru_cache(maxsize=None)
def _make_matmul(m_pad, k_dim, n_pad, tm, relu, out_dtype_name):
    return pl.pallas_call(
        partial(_mm_kernel, relu=relu),
        out_shape=jax.ShapeDtypeStruct((m_pad, n_pad), jnp.dtype(out_dtype_name)),
        grid=(m_pad // tm,),
        in_specs=[
            pl.BlockSpec((tm, k_dim), lambda i: (i, 0)),
            pl.BlockSpec((k_dim, n_pad), lambda i: (0, 0)),   # resident: DMA'd once
            pl.BlockSpec((1, n_pad), lambda i: (0, 0)),
        ],
        out_specs=pl.BlockSpec((tm, n_pad), lambda i: (i, 0)),
        compiler_params=_mosaic_params("parallel"),
    )


def matmul_bias_act(a_bf16, wp, bp, n_true, relu, out_dtype):
    """out_dtype( relu?(a @ wp + bp) )[:, :n_true]; wp/bp are pre-padded at init."""
    m, k = a_bf16.shape
    kw_, n_pad = wp.shape
    assert kw_ == k, (kw_, k)
    tm = _pick_tm(m)
    m_pad = _round_up(m, tm)
    if m_pad // tm == 1 and tm >= 32:
        tm //= 2                       # keep >=2 parallel row blocks (v7x: 2 TCs)
    if m_pad != m:
        a_bf16 = jnp.pad(a_bf16, ((0, m_pad - m), (0, 0)))
    out = _make_matmul(m_pad, k, n_pad, tm, relu,
                       jnp.dtype(out_dtype).name)(a_bf16, wp, bp)
    return out[:m, :n_true]


# --------------------------- implicit-GEMM conv (stride 1) ---------------------------
#
# The padded NHWC activation is flattened to rows of Cin; kernel position (kh, kw)
# then reads the same rows shifted by a constant  off = kh*dil*WP + kw*dil.  Each grid
# step gets its (tm, Cin) row tile plus a (halo, Cin) block of the rows that follow it,
# scatters the KH*KW shifted windows into a VMEM im2col scratch and performs ONE MXU
# matmul against the full weight stack (resident in VMEM).  Rows of the flattened
# padded grid that do not correspond to a real output position are computed with
# wrapped/zero data and cropped afterwards (they never contaminate valid rows).

def _igemm_kernel(a0_ref, a1_ref, b_ref, bias_ref, o_ref, ws_ref, *, offs, cinp, relu):
    tm = a0_ref.shape[0]
    for q, off in enumerate(offs):
        lo = q * cinp
        if off == 0:
            ws_ref[:, lo:lo + cinp] = a0_ref[...]
        elif off == tm:                       # whole window comes from the halo block
            ws_ref[:, lo:lo + cinp] = a1_ref[...]
        else:
            ws_ref[:tm - off, lo:lo + cinp] = a0_ref[off:, :]
            ws_ref[tm - off:, lo:lo + cinp] = a1_ref[:off, :]
    out = jnp.dot(ws_ref[...], b_ref[...], preferred_element_type=jnp.float32)
    out = out + bias_ref[...]
    if relu:
        out = jnp.maximum(out, 0.0)
    o_ref[...] = out.astype(o_ref.dtype)


@lru_cache(maxsize=None)
def _make_igemm(m_pad, cinp, nq, n_pad, tm, halo, tn, offs, relu, out_dtype_name):
    nI, nJ = m_pad // tm, n_pad // tn
    r = tm // halo
    last_halo_blk = m_pad // halo - 1

    def a1_map(j, i):
        # halo rows directly after row tile i; clamped at the array end (only ever
        # used by garbage rows there, proven by construction).
        return (jnp.minimum((i + 1) * r, last_halo_blk), 0)

    return pl.pallas_call(
        partial(_igemm_kernel, offs=offs, cinp=cinp, relu=relu),
        out_shape=jax.ShapeDtypeStruct((m_pad, n_pad), jnp.dtype(out_dtype_name)),
        grid=(nJ, nI),                       # j outer -> weight slice DMA'd once per j
        in_specs=[
            pl.BlockSpec((tm, cinp), lambda j, i: (i, 0)),
            pl.BlockSpec((halo, cinp), a1_map),
            pl.BlockSpec((nq * cinp, tn), lambda j, i: (0, j)),   # full weight stack
            pl.BlockSpec((1, tn), lambda j, i: (0, j)),
        ],
        out_specs=pl.BlockSpec((tm, tn), lambda j, i: (i, j)),
        scratch_shapes=[pltpu.VMEM((tm, nq * cinp), jnp.bfloat16)],
        compiler_params=_mosaic_params("parallel", "parallel"),
    )


def _conv_igemm(xb, p, padding, dilation, OH, OW, relu, out_dtype):
    B, H, W, Cin = xb.shape
    KH, KW = p.kh, p.kw
    HP, WP = H + 2 * padding, W + 2 * padding
    if padding:
        xb = jnp.pad(xb, ((0, 0), (padding, padding), (padding, padding), (0, 0)))
    flat = xb.reshape(B * HP * WP, Cin)

    offs = tuple(kh * dilation * WP + kw * dilation
                 for kh in range(KH) for kw in range(KW))
    max_off = offs[-1]
    halo = max(16, _round_up(max_off, 16))
    m_rows = B * HP * WP
    base = _pick_tm(m_rows)
    tm = halo * max(1, base // halo)
    m_pad = _round_up(m_rows, tm)
    if m_pad // tm == 1 and (tm // halo) % 2 == 0:
        tm //= 2                              # >=2 parallel row blocks for megacore
    cinp = p.cinp
    assert all(o <= halo for o in offs) and halo <= tm and tm % halo == 0

    pad_rows, pad_c = m_pad - m_rows, cinp - Cin
    if pad_rows or pad_c:
        flat = jnp.pad(flat, ((0, pad_rows), (0, pad_c)))

    nq = KH * KW
    out_isz = jnp.dtype(out_dtype).itemsize

    def est(tn_):
        return (2 * tm * cinp * 2 + 2 * halo * cinp * 2     # a0 + a1 (double buffered)
                + 2 * nq * cinp * tn_ * 2                    # weight stack
                + tm * nq * cinp * 2                         # im2col scratch
                + 2 * tm * tn_ * out_isz)                    # output blocks

    tn = p.n_pad
    while tn > 128 and tn % 256 == 0 and est(tn) > VMEM_TILE_BUDGET:
        tn //= 2

    out = _make_igemm(m_pad, cinp, nq, p.n_pad, tm, halo, tn, offs, relu,
                      jnp.dtype(out_dtype).name)(flat, flat, p.wp, p.bp)
    out = out[:m_rows, :p.cout].reshape(B, HP, WP, p.cout)
    return out[:, :OH, :OW, :]


# ------------------------------ conv2d dispatch ------------------------------

ConvP = namedtuple('ConvP', ['wp', 'bp', 'cout', 'cin', 'cinp', 'kh', 'kw', 'n_pad'])


def prep_conv(w, b):
    """Pad + bf16-cast a (Cout,Cin,KH,KW) weight into a matmul-ready matrix, ONCE at init.

    Row layout: (kh, kw, cin_padded) -- matches both the implicit-GEMM window scratch
    and the im2col column layout."""
    cout, cin, kh, kw = w.shape
    cinp = _round_up(cin, 8)
    n_pad = _round_up(cout, 8)
    wt = jnp.transpose(w, (2, 3, 1, 0))                       # (kh, kw, cin, cout)
    if cinp != cin:
        wt = jnp.pad(wt, ((0, 0), (0, 0), (0, cinp - cin), (0, 0)))
    wmat = wt.reshape(kh * kw * cinp, cout).astype(jnp.bfloat16)
    if n_pad != cout:
        wmat = jnp.pad(wmat, ((0, 0), (0, n_pad - cout)))
    bp = jnp.zeros((1, n_pad), jnp.float32).at[0, :cout].set(b)
    return ConvP(wmat, bp, cout, cin, cinp, kh, kw, n_pad)


def conv2d(x, p, stride=1, padding=0, dilation=1, relu=False, out_dtype=jnp.bfloat16):
    """x: (B,H,W,Cin) NHWC; p: ConvP (pre-padded bf16 weights); f32 accumulation."""
    B, H, W, Cin = x.shape
    assert Cin == p.cin
    KH, KW = p.kh, p.kw
    OH = (H + 2 * padding - dilation * (KH - 1) - 1) // stride + 1
    OW = (W + 2 * padding - dilation * (KW - 1) - 1) // stride + 1
    xb = x.astype(jnp.bfloat16)

    if KH == 1 and KW == 1 and stride == 1 and padding == 0:
        a = xb.reshape(B * H * W, Cin)
        if p.cinp != Cin:
            a = jnp.pad(a, ((0, 0), (0, p.cinp - Cin)))
        out = matmul_bias_act(a, p.wp, p.bp, p.cout, relu, out_dtype)
        return out.reshape(B, OH, OW, p.cout)

    if stride == 1:
        return _conv_igemm(xb, p, padding, dilation, OH, OW, relu, out_dtype)

    # stride > 1 fallback (only the two small stride-2 extras): im2col + matmul.
    assert p.cinp == Cin
    xp_ = jnp.pad(xb, ((0, 0), (padding, padding), (padding, padding), (0, 0)))
    shifts = []
    for i in range(KH):
        for j in range(KW):
            hs, ws = i * dilation, j * dilation
            shifts.append(xp_[:, hs:hs + (OH - 1) * stride + 1:stride,
                              ws:ws + (OW - 1) * stride + 1:stride, :])
    cols = jnp.concatenate(shifts, axis=-1).reshape(B * OH * OW, KH * KW * Cin)
    out = matmul_bias_act(cols, p.wp, p.bp, p.cout, relu, out_dtype)
    return out.reshape(B, OH, OW, p.cout)


# ----------------------------------- L2Norm kernel -----------------------------------

def _l2norm_kernel(x_ref, w_ref, o_ref):
    x = x_ref[...]
    denom = jnp.sqrt(jnp.sum(x * x, axis=-1, keepdims=True)) + 1e-10
    o_ref[...] = x * (1.0 / denom) * w_ref[...]


@lru_cache(maxsize=None)
def _make_l2norm(m_pad, tm, c):
    return pl.pallas_call(
        _l2norm_kernel,
        out_shape=jax.ShapeDtypeStruct((m_pad, c), jnp.float32),
        grid=(m_pad // tm,),
        in_specs=[pl.BlockSpec((tm, c), lambda i: (i, 0)),
                  pl.BlockSpec((1, c), lambda i: (0, 0))],
        out_specs=pl.BlockSpec((tm, c), lambda i: (i, 0)),
        compiler_params=_mosaic_params("parallel"),
    )


def l2norm(x, weight):
    """x: (B,H,W,C) NHWC (channel reduction == torch dim=1 on NCHW); weight (C,)."""
    B, H, W, C = x.shape
    M = B * H * W
    tm = _pick_tm(M, cap=256)
    m_pad = _round_up(M, tm)
    x2 = x.astype(jnp.float32).reshape(M, C)
    if m_pad != M:
        x2 = jnp.pad(x2, ((0, m_pad - M), (0, 0)))
    out = _make_l2norm(m_pad, tm, C)(x2, weight.reshape(1, C))
    return out[:M].reshape(B, H, W, C)


# -------------------------------- max-pool kernels ---------------------------------

def _largest_divisor(n, cap):
    cap = max(1, min(n, cap))
    for t in range(cap, 0, -1):
        if n % t == 0:
            return t
    return 1


def _pool2x2_kernel(x_ref, o_ref):
    # x_ref: (tr, 2, OW, 2*C): two input rows per output row, channel-pairs packed.
    c = o_ref.shape[-1]
    a = jnp.maximum(x_ref[:, 0, :, :], x_ref[:, 1, :, :])     # (tr, OW, 2C)
    o_ref[...] = jnp.maximum(a[:, :, :c], a[:, :, c:])


@lru_cache(maxsize=None)
def _make_pool2x2(rows, tr, ow, c, dtype_name):
    return pl.pallas_call(
        _pool2x2_kernel,
        out_shape=jax.ShapeDtypeStruct((rows, ow, c), jnp.dtype(dtype_name)),
        grid=(rows // tr,),
        in_specs=[pl.BlockSpec((tr, 2, ow, 2 * c), lambda i: (i, 0, 0, 0))],
        out_specs=pl.BlockSpec((tr, ow, c), lambda i: (i, 0, 0)),
        compiler_params=_mosaic_params("parallel"),
    )


def maxpool2x2(x, ceil_mode=False):
    """kernel 2, stride 2; single-pass kernel over the contiguous NHWC map.
    Odd sizes: ceil_mode pads with -inf (torch 'C'), else the extra row/col is dropped."""
    B, H, W, C = x.shape
    if (H % 2) or (W % 2):
        if ceil_mode:
            neg = float(jnp.finfo(x.dtype).min)
            x = jnp.pad(x, ((0, 0), (0, H % 2), (0, W % 2), (0, 0)),
                        constant_values=neg)
        else:
            x = x[:, :H - H % 2, :W - W % 2, :]
        B, H, W, C = x.shape
    OH, OW = H // 2, W // 2
    rows = B * OH
    xr = x.reshape(rows, 2, OW, 2 * C)       # pure contiguous reshape (free)
    cap = max(1, POOL_BLOCK_ELEMS // (2 * W * C))
    tr = _largest_divisor(rows, cap)
    if rows // tr == 1 and rows % 2 == 0:
        tr = rows // 2                        # 2 parallel blocks for megacore
    out = _make_pool2x2(rows, tr, OW, C, str(x.dtype))(xr)
    return out.reshape(B, OH, OW, C)


def _pool3x3_kernel(x_ref, o_ref):
    h, w = o_ref.shape[1], o_ref.shape[2]
    acc = x_ref[:, 0:h, 0:w, :]
    for i in range(3):
        for j in range(3):
            if i == 0 and j == 0:
                continue
            acc = jnp.maximum(acc, x_ref[:, i:i + h, j:j + w, :])
    o_ref[...] = acc


@lru_cache(maxsize=None)
def _make_pool3x3(b, h, w, c, dtype_name):
    return pl.pallas_call(
        _pool3x3_kernel,
        out_shape=jax.ShapeDtypeStruct((b, h, w, c), jnp.dtype(dtype_name)),
        grid=(b,),
        in_specs=[pl.BlockSpec((1, h + 2, w + 2, c), lambda i: (i, 0, 0, 0))],
        out_specs=pl.BlockSpec((1, h, w, c), lambda i: (i, 0, 0, 0)),
        compiler_params=_mosaic_params("parallel"),
    )


def maxpool3x3_s1_p1(x):
    """kernel 3, stride 1, pad 1 (pool5) in a single kernel per batch element."""
    B, H, W, C = x.shape
    neg = float(jnp.finfo(x.dtype).min)
    xp = jnp.pad(x, ((0, 0), (1, 1), (1, 1), (0, 0)), constant_values=neg)
    return _make_pool3x3(B, H, W, C, str(x.dtype))(xp)


# ------------------------------------- SSD model ------------------------------------

class SSDPallas:
    def __init__(self, phase, size, num_classes, key):
        self.phase = phase
        self.size = size
        self.num_classes = num_classes
        self._key = key
        self._kidx = 0

        # ---- VGG base; ReLU after every conv is fused into the conv matmul ----
        self.vgg_ops = []
        self.vgg_split = None
        in_ch, n_convs = 3, 0
        for v in VGG_CFG:
            if v == 'M':
                self.vgg_ops.append(('pool2', False))
            elif v == 'C':
                self.vgg_ops.append(('pool2', True))            # ceil_mode pool
            else:
                n_convs += 1
                is_l2_src = (n_convs == 10)                      # conv4_3 feeds L2Norm
                p = prep_conv(*self._conv(in_ch, v, 3))
                od = jnp.float32 if is_l2_src else jnp.bfloat16
                self.vgg_ops.append(('conv', p, 1, 1, 1, True, od))
                in_ch = v
                if is_l2_src:
                    self.vgg_split = len(self.vgg_ops)
        self.vgg_ops.append(('pool3',))                                               # pool5
        self.vgg_ops.append(('conv', prep_conv(*self._conv(512, 1024, 3)),
                             1, 6, 6, True, jnp.bfloat16))                            # conv6 (dilated)
        self.vgg_ops.append(('conv', prep_conv(*self._conv(1024, 1024, 1)),
                             1, 0, 1, True, jnp.bfloat16))                            # conv7

        # L2Norm(512, 20)
        self.l2norm_weight = jnp.full((512,), 20.0, jnp.float32)

        # ---- extras: (cin, cout, kernel, stride, pad); F.relu fused into the matmul ----
        extra_cfg = [
            (1024, 256, 1, 1, 0),
            (256, 512, 3, 2, 1),
            (512, 128, 1, 1, 0),
            (128, 256, 3, 2, 1),
            (256, 128, 1, 1, 0),
            # TODO(synk): SSD300 uses padding=0 for the last two 3x3 extras;
            # padding=1 keeps the 1x1 feature maps valid at this small input size.
            (128, 256, 3, 1, 1),
            (256, 128, 1, 1, 0),
            (128, 256, 3, 1, 1),
        ]
        self.extras = [(prep_conv(*self._conv(ci, co, k)), s, p)
                       for ci, co, k, s, p in extra_cfg]

        # ---- multibox heads: loc + conf per source fused into ONE conv (Cout concat) ----
        src_ch = [512, 1024, 512, 256, 256, 256]
        loc_raw = [self._conv(c, MBOX[i] * 4, 3) for i, c in enumerate(src_ch)]
        conf_raw = [self._conv(c, MBOX[i] * num_classes, 3) for i, c in enumerate(src_ch)]
        self.heads = []
        for i in range(len(src_ch)):
            lw, lb = loc_raw[i]
            cw, cb = conf_raw[i]
            w = jnp.concatenate([lw, cw], axis=0)
            b = jnp.concatenate([lb, cb], axis=0)
            self.heads.append((prep_conv(w, b), MBOX[i] * 4))

    # deterministic parameter init (He-normal weights, small normal biases)
    def _next_key(self):
        self._kidx += 1
        return jax.random.fold_in(self._key, self._kidx)

    def _conv(self, cin, cout, k):
        std = math.sqrt(2.0 / (cin * k * k))
        w = std * jax.random.normal(self._next_key(), (cout, cin, k, k), jnp.float32)
        b = 0.01 * jax.random.normal(self._next_key(), (cout,), jnp.float32)
        return (w, b)

    @staticmethod
    def _apply_vgg(op, x):
        kind = op[0]
        if kind == 'conv':
            _, p, stride, pad, dil, relu, od = op
            return conv2d(x, p, stride=stride, padding=pad, dilation=dil,
                          relu=relu, out_dtype=od)
        if kind == 'pool2':
            return maxpool2x2(x, ceil_mode=op[1])
        if kind == 'pool3':
            return maxpool3x3_s1_p1(x)
        raise ValueError(kind)

    def __call__(self, x_nchw):
        x = jnp.transpose(x_nchw, (0, 2, 3, 1)).astype(jnp.float32)  # NCHW -> NHWC
        sources, loc, conf = [], [], []

        # apply vgg up to conv4_3 (relu fused), then L2Norm source
        for op in self.vgg_ops[:self.vgg_split]:
            x = self._apply_vgg(op, x)
        sources.append(l2norm(x, self.l2norm_weight))

        # apply vgg through fc7
        for op in self.vgg_ops[self.vgg_split:]:
            x = self._apply_vgg(op, x)
        sources.append(x)

        # apply extra layers (relu fused), sources collected at odd indices
        for k, (p, stride, pad) in enumerate(self.extras):
            x = conv2d(x, p, stride=stride, padding=pad, relu=True,
                       out_dtype=jnp.bfloat16)
            if k % 2 == 1:
                sources.append(x)

        # fused loc+conf heads; NHWC conv output already equals NCHW.permute(0,2,3,1)
        for src, (p, lc) in zip(sources, self.heads):
            out = conv2d(src, p, stride=1, padding=1, relu=False,
                         out_dtype=jnp.float32)
            B = out.shape[0]
            loc.append(out[..., :lc].reshape(B, -1))
            conf.append(out[..., lc:].reshape(B, -1))
        loc = jnp.concatenate(loc, axis=1)
        conf = jnp.concatenate(conf, axis=1)

        if self.phase == 'test':
            # TODO(synk): Detect (prior-box decode + NMS) and softmax post-processing
            # have no clean Pallas equivalent; only the 'train' branch is implemented.
            raise NotImplementedError("test phase (Detect/NMS) not implemented")
        return (loc.reshape(loc.shape[0], -1, 4),
                conf.reshape(conf.shape[0], -1, self.num_classes))


if __name__ == "__main__":
    key = jax.random.PRNGKey(0)
    model = SSDPallas('train', 32, NUM_CLASSES, key)

    # small input: batch=2, 3 channels (required by VGG cfg), 32x32 spatial
    x = jax.random.normal(jax.random.fold_in(key, 12345), (2, 3, 32, 32), jnp.float32)

    loc, conf = model(x)
    jax.block_until_ready((loc, conf))

    # source maps: 4x4, 2x2, 1x1, 1x1, 1x1, 1x1 with mbox [4,6,6,6,4,4] -> 108 priors
    assert loc.shape == (2, 108, 4), loc.shape
    assert conf.shape == (2, 108, NUM_CLASSES), conf.shape
    assert bool(jnp.all(jnp.isfinite(loc))) and bool(jnp.all(jnp.isfinite(conf)))
    print("KERNEL_OK")
</pallas_src>

<mosaic_0001>
module attributes {stable_mosaic.version = 11 : i64} {
  func.func @_igemm_kernel(%arg0: i32, %arg1: i32, %arg2: memref<480x8xbf16, #tpu.memory_space<vmem>>, %arg3: memref<80x8xbf16, #tpu.memory_space<vmem>>, %arg4: memref<72x64xbf16, #tpu.memory_space<vmem>>, %arg5: memref<1x64xf32, #tpu.memory_space<vmem>>, %arg6: memref<480x64xbf16, #tpu.memory_space<vmem>>, %arg7: memref<480x72xbf16, #tpu.memory_space<vmem>>) attributes {dimension_semantics = [#tpu.dimension_semantics<parallel>, #tpu.dimension_semantics<parallel>], iteration_bounds = array<i64: 1, 5>, scalar_prefetch = 0 : i64, scratch_operands = 1 : i64, tpu.core_type = #tpu.core_type<tc>, window_params = [{transform_indices = @transform_0, window_bounds = array<i64: 480, 8>}, {transform_indices = @transform_1, window_bounds = array<i64: 80, 8>}, {transform_indices = @transform_2, window_bounds = array<i64: 72, 64>}, {transform_indices = @transform_3, window_bounds = array<i64: 1, 64>}, {transform_indices = @transform_4, window_bounds = array<i64: 480, 64>}]} {
    %c0 = arith.constant 0 : index
    %c0_0 = arith.constant 0 : index
    %0 = vector.load %arg2[%c0, %c0_0] : memref<480x8xbf16, #tpu.memory_space<vmem>>, vector<480x8xbf16>
    %c0_1 = arith.constant 0 : index
    %c0_2 = arith.constant 0 : index
    %1 = vector.load %arg7[%c0_1, %c0_2] : memref<480x72xbf16, #tpu.memory_space<vmem>>, vector<480x8xbf16>
    tpu.vector_store %arg7[%c0_1, %c0_2], %0 {strides = array<i32>} : memref<480x72xbf16, #tpu.memory_space<vmem>>, vector<480x8xbf16>,
    %c1 = arith.constant 1 : index
    %c0_3 = arith.constant 0 : index
    %2 = vector.load %arg2[%c1, %c0_3] : memref<480x8xbf16, #tpu.memory_space<vmem>>, vector<479x8xbf16>
    %c0_4 = arith.constant 0 : index
    %c8 = arith.constant 8 : index
    %3 = vector.load %arg7[%c0_4, %c8] : memref<480x72xbf16, #tpu.memory_space<vmem>>, vector<479x8xbf16>
    tpu.vector_store %arg7[%c0_4, %c8], %2 {strides = array<i32>} : memref<480x72xbf16, #tpu.memory_space<vmem>>, vector<479x8xbf16>,
    %c0_5 = arith.constant 0 : index
    %c0_6 = arith.constant 0 : index
    %4 = vector.load %arg3[%c0_5, %c0_6] : memref<80x8xbf16, #tpu.memory_space<vmem>>, vector<1x8xbf16>
    %c479 = arith.constant 479 : index
    %c8_7 = arith.constant 8 : index
    %5 = vector.load %arg7[%c479, %c8_7] : memref<480x72xbf16, #tpu.memory_space<vmem>>, vector<1x8xbf16>
    tpu.vector_store %arg7[%c479, %c8_7], %4 {strides = array<i32>} : memref<480x72xbf16, #tpu.memory_space<vmem>>, vector<1x8xbf16>,
    %c2 = arith.constant 2 : index
    %c0_8 = arith.constant 0 : index
    %6 = vector.load %arg2[%c2, %c0_8] : memref<480x8xbf16, #tpu.memory_space<vmem>>, vector<478x8xbf16>
    %c0_9 = arith.constant 0 : index
    %c16 = arith.constant 16 : index
    %7 = vector.load %arg7[%c0_9, %c16] : memref<480x72xbf16, #tpu.memory_space<vmem>>, vector<478x8xbf16>
    tpu.vector_store %arg7[%c0_9, %c16], %6 {strides = array<i32>} : memref<480x72xbf16, #tpu.memory_space<vmem>>, vector<478x8xbf16>,
    %c0_10 = arith.constant 0 : index
    %c0_11 = arith.constant 0 : index
    %8 = vector.load %arg3[%c0_10, %c0_11] : memref<80x8xbf16, #tpu.memory_space<vmem>>, vector<2x8xbf16>
    %c478 = arith.constant 478 : index
    %c16_12 = arith.constant 16 : index
    %9 = vector.load %arg7[%c478, %c16_12] : memref<480x72xbf16, #tpu.memory_space<vmem>>, vector<2x8xbf16>
    tpu.vector_store %arg7[%c478, %c16_12], %8 {strides = array<i32>} : memref<480x72xbf16, #tpu.memory_space<vmem>>, vector<2x8xbf16>,
    %c34 = arith.constant 34 : index
    %c0_13 = arith.constant 0 : index
    %10 = vector.load %arg2[%c34, %c0_13] : memref<480x8xbf16, #tpu.memory_space<vmem>>, vector<446x8xbf16>
    %c0_14 = arith.constant 0 : index
    %c24 = arith.constant 24 : index
    %11 = vector.load %arg7[%c0_14, %c24] : memref<480x72xbf16, #tpu.memory_space<vmem>>, vector<446x8xbf16>
    tpu.vector_store %arg7[%c0_14, %c24], %10 {strides = array<i32>} : memref<480x72xbf16, #tpu.memory_space<vmem>>, vector<446x8xbf16>,
    %c0_15 = arith.constant 0 : index
    %c0_16 = arith.constant 0 : index
    %12 = vector.load %arg3[%c0_15, %c0_16] : memref<80x8xbf16, #tpu.memory_space<vmem>>, vector<34x8xbf16>
    %c446 = arith.constant 446 : index
    %c24_17 = arith.constant 24 : index
    %13 = vector.load %arg7[%c446, %c24_17] : memref<480x72xbf16, #tpu.memory_space<vmem>>, vector<34x8xbf16>
    tpu.vector_store %arg7[%c446, %c24_17], %12 {strides = array<i32>} : memref<480x72xbf16, #tpu.memory_space<vmem>>, vector<34x8xbf16>,
    %c35 = arith.constant 35 : index
    %c0_18 = arith.constant 0 : index
    %14 = vector.load %arg2[%c35, %c0_18] : memref<480x8xbf16, #tpu.memory_space<vmem>>, vector<445x8xbf16>
    %c0_19 = arith.constant 0 : index
    %c32 = arith.constant 32 : index
    %15 = vector.load %arg7[%c0_19, %c32] : memref<480x72xbf16, #tpu.memory_space<vmem>>, vector<445x8xbf16>
    tpu.vector_store %arg7[%c0_19, %c32], %14 {strides = array<i32>} : memref<480x72xbf16, #tpu.memory_space<vmem>>, vector<445x8xbf16>,
    %c0_20 = arith.constant 0 : index
    %c0_21 = arith.constant 0 : index
    %16 = vector.load %arg3[%c0_20, %c0_21] : memref<80x8xbf16, #tpu.memory_space<vmem>>, vector<35x8xbf16>
    %c445 = arith.constant 445 : index
    %c32_22 = arith.constant 32 : index
    %17 = vector.load %arg7[%c445, %c32_22] : memref<480x72xbf16, #tpu.memory_space<vmem>>, vector<35x8xbf16>
    tpu.vector_store %arg7[%c445, %c32_22], %16 {strides = array<i32>} : memref<480x72xbf16, #tpu.memory_space<vmem>>, vector<35x8xbf16>,
    %c36 = arith.constant 36 : index
    %c0_23 = arith.constant 0 : index
    %18 = vector.load %arg2[%c36, %c0_23] : memref<480x8xbf16, #tpu.memory_space<vmem>>, vector<444x8xbf16>
    %c0_24 = arith.constant 0 : index
    %c40 = arith.constant 40 : index
    %19 = vector.load %arg7[%c0_24, %c40] : memref<480x72xbf16, #tpu.memory_space<vmem>>, vector<444x8xbf16>
    tpu.vector_store %arg7[%c0_24, %c40], %18 {strides = array<i32>} : memref<480x72xbf16, #tpu.memory_space<vmem>>, vector<444x8xbf16>,
    %c0_25 = arith.constant 0 : index
    %c0_26 = arith.constant 0 : index
    %20 = vector.load %arg3[%c0_25, %c0_26] : memref<80x8xbf16, #tpu.memory_space<vmem>>, vector<36x8xbf16>
    %c444 = arith.constant 444 : index
    %c40_27 = arith.constant 40 : index
    %21 = vector.load %arg7[%c444, %c40_27] : memref<480x72xbf16, #tpu.memory_space<vmem>>, vector<36x8xbf16>
    tpu.vector_store %arg7[%c444, %c40_27], %20 {strides = array<i32>} : memref<480x72xbf16, #tpu.memory_space<vmem>>, vector<36x8xbf16>,
    %c68 = arith.constant 68 : index
    %c0_28 = arith.constant 0 : index
    %22 = vector.load %arg2[%c68, %c0_28] : memref<480x8xbf16, #tpu.memory_space<vmem>>, vector<412x8xbf16>
    %c0_29 = arith.constant 0 : index
    %c48 = arith.constant 48 : index
    %23 = vector.load %arg7[%c0_29, %c48] : memref<480x72xbf16, #tpu.memory_space<vmem>>, vector<412x8xbf16>
    tpu.vector_store %arg7[%c0_29, %c48], %22 {strides = array<i32>} : memref<480x72xbf16, #tpu.memory_space<vmem>>, vector<412x8xbf16>,
    %c0_30 = arith.constant 0 : index
    %c0_31 = arith.constant 0 : index
    %24 = vector.load %arg3[%c0_30, %c0_31] : memref<80x8xbf16, #tpu.memory_space<vmem>>, vector<68x8xbf16>
    %c412 = arith.constant 412 : index
    %c48_32 = arith.constant 48 : index
    %25 = vector.load %arg7[%c412, %c48_32] : memref<480x72xbf16, #tpu.memory_space<vmem>>, vector<68x8xbf16>
    tpu.vector_store %arg7[%c412, %c48_32], %24 {strides = array<i32>} : memref<480x72xbf16, #tpu.memory_space<vmem>>, vector<68x8xbf16>,
    %c69 = arith.constant 69 : index
    %c0_33 = arith.constant 0 : index
    %26 = vector.load %arg2[%c69, %c0_33] : memref<480x8xbf16, #tpu.memory_space<vmem>>, vector<411x8xbf16>
    %c0_34 = arith.constant 0 : index
    %c56 = arith.constant 56 : index
    %27 = vector.load %arg7[%c0_34, %c56] : memref<480x72xbf16, #tpu.memory_space<vmem>>, vector<411x8xbf16>
    tpu.vector_store %arg7[%c0_34, %c56], %26 {strides = array<i32>} : memref<480x72xbf16, #tpu.memory_space<vmem>>, vector<411x8xbf16>,
    %c0_35 = arith.constant 0 : index
    %c0_36 = arith.constant 0 : index
    %28 = vector.load %arg3[%c0_35, %c0_36] : memref<80x8xbf16, #tpu.memory_space<vmem>>, vector<69x8xbf16>
    %c411 = arith.constant 411 : index
    %c56_37 = arith.constant 56 : index
    %29 = vector.load %arg7[%c411, %c56_37] : memref<480x72xbf16, #tpu.memory_space<vmem>>, vector<69x8xbf16>
    tpu.vector_store %arg7[%c411, %c56_37], %28 {strides = array<i32>} : memref<480x72xbf16, #tpu.memory_space<vmem>>, vector<69x8xbf16>,
    %c70 = arith.constant 70 : index
    %c0_38 = arith.constant 0 : index
    %30 = vector.load %arg2[%c70, %c0_38] : memref<480x8xbf16, #tpu.memory_space<vmem>>, vector<410x8xbf16>
    %c0_39 = arith.constant 0 : index
    %c64 = arith.constant 64 : index
    %31 = vector.load %arg7[%c0_39, %c64] : memref<480x72xbf16, #tpu.memory_space<vmem>>, vector<410x8xbf16>
    tpu.vector_store %arg7[%c0_39, %c64], %30 {strides = array<i32>} : memref<480x72xbf16, #tpu.memory_space<vmem>>, vector<410x8xbf16>,
    %c0_40 = arith.constant 0 : index
    %c0_41 = arith.constant 0 : index
    %32 = vector.load %arg3[%c0_40, %c0_41] : memref<80x8xbf16, #tpu.memory_space<vmem>>, vector<70x8xbf16>
    %c410 = arith.constant 410 : index
    %c64_42 = arith.constant 64 : index
    %33 = vector.load %arg7[%c410, %c64_42] : memref<480x72xbf16, #tpu.memory_space<vmem>>, vector<70x8xbf16>
    tpu.vector_store %arg7[%c410, %c64_42], %32 {strides = array<i32>} : memref<480x72xbf16, #tpu.memory_space<vmem>>, vector<70x8xbf16>,
    %c0_43 = arith.constant 0 : index
    %c0_44 = arith.constant 0 : index
    %34 = vector.load %arg7[%c0_43, %c0_44] : memref<480x72xbf16, #tpu.memory_space<vmem>>, vector<480x72xbf16>
    %c0_45 = arith.constant 0 : index
    %c0_46 = arith.constant 0 : index
    %35 = vector.load %arg4[%c0_45, %c0_46] : memref<72x64xbf16, #tpu.memory_space<vmem>>, vector<72x64xbf16>
    %cst = arith.constant dense<0.000000e+00> : vector<480x64xf32>
    %36 = tpu.matmul %34, %35, %cst {dimension_numbers = #tpu.dot_dimension_numbers<[1], [0], [0], [1], [0, 0, 1, 1], [], []>} : vector<480x72xbf16>, vector<72x64xbf16>, vector<480x64xf32> -> vector<480x64xf32>
    %c0_47 = arith.constant 0 : index
    %c0_48 = arith.constant 0 : index
    %37 = vector.load %arg5[%c0_47, %c0_48] : memref<1x64xf32, #tpu.memory_space<vmem>>, vector<1x64xf32>
    %38 = vector.broadcast %37 : vector<1x64xf32> to vector<480x64xf32>
    %39 = arith.addf %36, %38 : vector<480x64xf32>
    %cst_49 = arith.constant 0.000000e+00 : f32
    %40 = vector.broadcast %cst_49 : f32 to vector<480x64xf32>
    %41 = arith.maximumf %39, %40 : vector<480x64xf32>
    %42 = arith.truncf %41 : vector<480x64xf32> to vector<480x64xbf16>
    %c0_50 = arith.constant 0 : index
    %c0_51 = arith.constant 0 : index
    %43 = vector.load %arg6[%c0_50, %c0_51] : memref<480x64xbf16, #tpu.memory_space<vmem>>, vector<480x64xbf16>
    tpu.vector_store %arg6[%c0_50, %c0_51], %42 {strides = array<i32>} : memref<480x64xbf16, #tpu.memory_space<vmem>>, vector<480x64xbf16>,
    return
  }
  func.func @transform_0(%arg0: i32, %arg1: i32) -> (i32, i32) {
    %c0_i32 = arith.constant 0 : i32
    %c0_i32_0 = arith.constant 0 : i32
    return %arg1, %c0_i32 : i32, i32
  }
  func.func @transform_1(%arg0: i32, %arg1: i32) -> (i32, i32) {
    %c1_i32 = arith.constant 1 : i32
    %0 = arith.addi %arg1, %c1_i32 : i32
    %c6_i32 = arith.constant 6 : i32
    %1 = arith.muli %0, %c6_i32 : i32
    %c29_i32 = arith.constant 29 : i32
    %2 = arith.minsi %1, %c29_i32 : i32
    %c0_i32 = arith.constant 0 : i32
    %c0_i32_0 = arith.constant 0 : i32
    return %2, %c0_i32 : i32, i32
  }
  func.func @transform_2(%arg0: i32, %arg1: i32) -> (i32, i32) {
    %c0_i32 = arith.constant 0 : i32
    %c0_i32_0 = arith.constant 0 : i32
    return %c0_i32, %arg0 : i32, i32
  }
  func.func @transform_3(%arg0: i32, %arg1: i32) -> (i32, i32) {
    %c0_i32 = arith.constant 0 : i32
    %c0_i32_0 = arith.constant 0 : i32
    return %c0_i32, %arg0 : i32, i32
  }
  func.func @transform_4(%arg0: i32, %arg1: i32) -> (i32, i32) {
    %c0_i32 = arith.constant 0 : i32
    return %arg1, %arg0 : i32, i32
  }
}

</mosaic_0001>

<bundles_post_ra>
// kernel: tpu_custom_call.1
= control target key start
LH: loop header
LB: loop body
LE: loop exit
PB: predicated region body
PF: predicated region fallthrough
CT: control target
= control target key end

     0   :  { %s7489_s15 = smov 0   ;;  %s7491_s16 = smov 0   ;;  %s10803_s0 = inlined_call_operand.vmem [shape: bf16[2400,8], index: 0, kind: input, shape index: {}]   ;;  %s10804_s1 = inlined_call_operand.vmem [shape: bf16[2400,8], index: 1, kind: input, shape index: {}]   ;;  %s10805_s2 = inlined_call_operand.vmem [shape: bf16[72,64], index: 2, kind: input, shape index: {}]   ;;  %s10806_s3 = inlined_call_operand.vmem [shape: f32[1,64], index: 3, kind: input, shape index: {}]   ;;  %s10807_s4 = inlined_call_operand.vmem [shape: bf16[2400,64], index: 4, kind: output, shape index: {}]  }
   0x1   :  { %s7493_s17 = smov 0  }
   0x2 LB: > { %s23_s18 = sadd.s32 1, %s7450_s16  ;;  %p7051_p0 = scmp.ge.s32.totalorder %s7454_s17, 1  ;;  %s7454_s17 = sphi %s7493_s17, %s14_s17   ;;  %s7450_s16 = sphi %s7491_s16, %s10826_s16   ;;  %s7446_s15 = sphi %s7489_s15, %s10825_s15  }
   0x3   : > { %p24_p1 = scmp.ge.s32.totalorder %s23_s18, 5  ;;  %p221_p2 = scmp.lt.s32.totalorder %s7454_s17, 6 }
   0x5   : > { %s10828_s18 = smov (%p24_p1, %s23_s18), 0  ;;  %p222_p3 = pnand %p7051_p0, %p221_p2 }
   0x6   : > { %s266_s19 = smul.u32 (!%p222_p3), 60, %s7446_s15  ;;  %s7456_s24 = smov (!%p222_p3), 8  }
   0x7   : > { %225 = sbr.rel (%p222_p3) target bundleno = 1327 (0x52f), region = 36  ;;  %s272_s25 = sadd.s32 (!%p222_p3), 1, %s7446_s15 }
   0x8   : > { %p267_p4 = scmp.lt.s32.totalorder (!%p222_p3), %s266_s19, 299  ;;  %s7858_s26 = smul.u32 (!%p222_p3), 6, %s272_s25 }
   0x9   : > { %s7457_s7 = smov (!%p222_p3), 16   ;;  %s7458_s8 = smov (!%p222_p3), 24  }
   0xa   : > { %p274_p5 = scmp.lt.s32.totalorder (!%p222_p3), %s7858_s26, 29  ;;  %s7459_s9 = smov (!%p222_p3), 32  }
   0xb   : > { %s7460_s10 = smov (!%p222_p3), 40   ;;  %s7461_s11 = smov (!%p222_p3), 48  }
   0xc   : > { %s10830_s19 = smov (!%p267_p4, %s266_s19), 299  ;;  %vm484_vm0 = vsmask.f32 3328  ;;  %vm485_vm1 = vsmask.f32 7440  ;;  %vm363_vm3 = vcmask 60416  }
   0xd   : > { %s7052_s20 = sshll.u32 %s10830_s19, 2  ;;  %vm7529_vm2 = vmor %vm484_vm0, %vm485_vm1  ;;  %s10832_s26 = smov (!%p274_p5, %s7858_s26), 29  ;;  %vm1465_vm4 = vcmask 1042432   ;;  %vm1466_vm5 = vcmask 1046532   ;;  %vm1266_vm6 = vcmask 126016   ;;  %vm1827_vm9 = vcmask 191616  }
   0xe   : > { %s7518_s23 = scalar_lea.vmem %s10803_s0, %s7052_s20  ;;  %s276_s27 = smul.u32 10, %s10832_s26  ;;  %vm8036_vm7 = vmor %vm1465_vm4, %vm1466_vm5  ;;  %vm1339_vm10 = vcmask 126019   ;;  %vm1340_vm11 = vsmask.f32 7950  ;;  %vm1895_vm13 = vcmask 191619   ;;  %vm1887_vm14 = vcmask 190592  }
   0xf   : > { %v426_v0 = vld [vmem:[%s7518_s23 + $0x8] sm:$0xf]  ;;  %v427_v1 = vld [vmem:[%s7518_s23 + $0xc] sm:$0xf]  ;;  %v424_v2 = vld [vmem:[%s7518_s23] sm:$0xf] }
  0x10   : > { %v507_v3 = vshll.u32 %v426_v0, 16  ;;  %v511_v4 = vshrl.u32 %v426_v0, 16  ;;  %v517_v5 = vshll.u32 %v427_v1, 16  ;;  %v521_v6 = vshrl.u32 %v427_v1, 16  ;;  %v425_v7 = vld [vmem:[%s7518_s23 + $0x4] sm:$0xf]  ;;  %vm1327_vm8 = vmand %vm1266_vm6, %vm484_vm0 }
  0x11   : > { %v488_v8 = vshrl.u32 %v424_v2, 16  ;;  %v491_v9 = vshll.u32 %v424_v2, 16  ;;  %v497_v10 = vshll.u32 %v425_v7, 16  ;;  %v501_v11 = vshrl.u32 %v425_v7, 16  ;;  %v428_v12 = vld [vmem:[%s7518_s23 + $0x10] sm:$0xf]  ;;  %vm8355_vm12 = vmand %vm1339_vm10, %vm1340_vm11 }
  0x12   : > { %v509_v13 = vrot.slane %v507_v3, 5  ;;  %v513_v14 = vrot.slane %v511_v4, 4  ;;  %v519_v15 = vrot.slane %v517_v5, 5  ;;  %v523_v16 = vrot.slane %v521_v6, 4  ;;  %v429_v17 = vld [vmem:[%s7518_s23 + $0x14] sm:$0xf] }
  0x13   : > { %v490_v18 = vrot.slane %v488_v8, 4  ;;  %v493_v19 = vrot.slane %v491_v9, 5  ;;  %v499_v20 = vrot.slane %v497_v10, 5  ;;  %v503_v21 = vrot.slane %v501_v11, 4  ;;  %v430_v22 = vld [vmem:[%s7518_s23 + $0x18] sm:$0xf] }
  0x14   : > { %v514_v23 = vor.u32 %v513_v14, %v509_v13  ;;  %v524_v24 = vor.u32 %v523_v16, %v519_v15  ;;  %v527_v25 = vshll.u32 %v428_v12, 16  ;;  %v531_v26 = vshrl.u32 %v428_v12, 16  ;;  %v431_v36 = vld [vmem:[%s7518_s23 + $0x1c] sm:$0xf]  ;;  %v432_v41 = vld [vmem:[%s7518_s23 + $0x20] sm:$0xf] }
  0x15   : > { %v494_v28 = vor.u32 %v493_v19, %v490_v18  ;;  %v504_v29 = vor.u32 %v503_v21, %v499_v20  ;;  %v537_v30 = vshll.u32 %v429_v17, 16  ;;  %v541_v31 = vshrl.u32 %v429_v17, 16  ;;  %v433_v46 = vld [vmem:[%s7518_s23 + $0x24] sm:$0xf]  ;;  %v434_v58 = vld [vmem:[%s7518_s23 + $0x28] sm:$0xf] }
  0x16   : > { %v515_v32 = vrot.slane %v514_v23, 4  ;;  %v525_v33 = vrot.slane %v524_v24, 4  ;;  %v529_v34 = vrot.slane %v527_v25, 5  ;;  %v547_v35 = vshll.u32 %v430_v22, 16  ;;  %v435_v0 = vld [vmem:[%s7518_s23 + $0x2c] sm:$0xf] }
  0x17   : > { %v495_v37 = vrot.slane %v494_v28, 4  ;;  %v505_v38 = vrot.slane %v504_v29, 4  ;;  %v539_v39 = vrot.slane %v537_v30, 5  ;;  %v543_v40 = vrot.slane %v541_v31, 4  ;;  %v436_v9 = vld [vmem:[%s7518_s23 + $0x30] sm:$0xf] }
  0x18   : > { %v520_v42 = vsel %vm7529_vm2, %v515_v32, %v519_v15  ;;  %v530_v43 = vsel %vm7529_vm2, %v525_v33, %v529_v34  ;;  %v549_v44 = vrot.slane %v547_v35, 5  ;;  %v551_v45 = vshrl.u32 %v430_v22, 16  ;;  %v437_v17 = vld [vmem:[%s7518_s23 + $0x34] sm:$0xf]  ;;  %v438_v22 = vld [vmem:[%s7518_s23 + $0x38] sm:$0xf] }
  0x19   : > { %1090 = vrot.lane.b32.xlu1 %v520_v42, %s7456_s24  ;;  %v500_v47 = vsel %vm7529_vm2, %v495_v37, %v499_v20  ;;  %v510_v48 = vsel %vm7529_vm2, %v505_v38, %v509_v13  ;;  %v544_v49 = vor.u32 %v543_v40, %v539_v39  ;;  %v533_v50 = vrot.slane %v531_v26, 4  ;;  %v439_v32 = vld [vmem:[%s7518_s23 + $0x3c] sm:$0xf]  ;;  %v440_v37 = vld [vmem:[%s7518_s23 + $0x40] sm:$0xf]  ;;  %p7948_p6 = scmp.lt.s32.totalorder %s276_s27, 299 }
  0x1a   : > { %1086 = vrot.lane.b32.xlu0 %v500_v47, %s7456_s24  ;;  %v557_v51 = vshll.u32 %v431_v36, 16  ;;  %v561_v52 = vshrl.u32 %v431_v36, 16  ;;  %v567_v53 = vshll.u32 %v432_v41, 16  ;;  %v571_v54 = vshrl.u32 %v432_v41, 16 }
  0x1b   : > { %v545_v55 = vrot.slane %v544_v49, 4  ;;  %v534_v56 = vor.u32 %v533_v50, %v529_v34  ;;  %v553_v57 = vrot.slane %v551_v45, 4  ;;  %v577_v59 = vshll.u32 %v433_v46, 16  ;;  %v441_v50 = vld [vmem:[%s7518_s23 + $0x44] sm:$0xf]  ;;  %s10834_s27 = smov (!%p7948_p6, %s276_s27), 299 }
  0x1c   : > { %v559_v60 = vrot.slane %v557_v51, 5  ;;  %v563_v61 = vrot.slane %v561_v52, 4  ;;  %v569_v62 = vrot.slane %v567_v53, 5  ;;  %v581_v63 = vshrl.u32 %v433_v46, 16  ;;  %s7053_s29 = sshll.u32 %s10834_s27, 2 }
  0x1d   : > { %1092 = vrot.lane.b32.xlu1 %v530_v43, %s7456_s24  ;;  %v550_v1 = vsel %vm7529_vm2, %v545_v55, %v549_v44  ;;  %v535_v2 = vrot.slane %v534_v56, 4  ;;  %v554_v3 = vor.u32 %v553_v57, %v549_v44  ;;  %v579_v4 = vrot.slane %v577_v59, 5  ;;  %v442_v55 = vld [vmem:[%s7518_s23 + $0x48] sm:$0xf]  ;;  %s8006_s6 = scalar_lea.vmem %s10804_s1, %s7053_s29  ;;  %s7463_s29 = smov 64  }
  0x1e   : > { %1088 = vrot.lane.b32.xlu0 %v510_v48, %s7456_s24  ;;  %v564_v5 = vor.u32 %v563_v61, %v559_v60  ;;  %v583_v6 = vrot.slane %v581_v63, 4  ;;  %v587_v7 = vshll.u32 %v434_v58, 16  ;;  %v591_v8 = vshrl.u32 %v434_v58, 16 }
  0x1f   : > { %v540_v10 = vsel %vm7529_vm2, %v535_v2, %v539_v39  ;;  %v555_v11 = vrot.slane %v554_v3, 4  ;;  %v573_v12 = vrot.slane %v571_v54, 4  ;;  %v597_v13 = vshll.u32 %v435_v0, 16 }
  0x20   : > { %v565_v14 = vrot.slane %v564_v5, 4  ;;  %v584_v15 = vor.u32 %v583_v6, %v579_v4  ;;  %v601_v16 = vshrl.u32 %v435_v0, 16  ;;  %v589_v18 = vrot.slane %v587_v7, 5  ;;  %v443_v0 = vld [vmem:[%s7518_s23 + $0x4c] sm:$0xf] }
  0x21   : > { %1096 = vrot.lane.b32.xlu1 %v550_v1, %s7456_s24  ;;  %v574_v19 = vor.u32 %v573_v12, %v569_v62  ;;  %v599_v20 = vrot.slane %v597_v13, 5  ;;  %v607_v21 = vshll.u32 %v436_v9, 16  ;;  %v611_v26 = vshrl.u32 %v436_v9, 16  ;;  %v444_v5 = vld [vmem:[%s7518_s23 + $0x50] sm:$0xf] }
  0x22   : > { %1094 = vrot.lane.b32.xlu0 %v540_v10, %s7456_s24  ;;  %v570_v23 = vsel %vm7529_vm2, %v565_v14, %v569_v62  ;;  %v585_v24 = vrot.slane %v584_v15, 4  ;;  %v603_v25 = vrot.slane %v601_v16, 4  ;;  %v560_v28 = vsel %vm7529_vm2, %v555_v11, %v559_v60 }
  0x23   : > { %v575_v29 = vrot.slane %v574_v19, 4  ;;  %v593_v30 = vrot.slane %v591_v8, 4  ;;  %v617_v31 = vshll.u32 %v437_v17, 16  ;;  %v609_v34 = vrot.slane %v607_v21, 5 }
  0x24   : > { %v604_v33 = vor.u32 %v603_v25, %v599_v20  ;;  %v621_v35 = vshrl.u32 %v437_v17, 16  ;;  %v627_v36 = vshll.u32 %v438_v22, 16  ;;  %v590_v38 = vsel %vm7529_vm2, %v585_v24, %v589_v18  ;;  %v445_v17 = vld [vmem:[%s7518_s23 + $0x54] sm:$0xf] }
  0x25   : > { %1100 = vrot.lane.b32.xlu1 %v570_v23, %s7456_s24  ;;  %v580_v39 = vsel %vm7529_vm2, %v575_v29, %v579_v4  ;;  %v594_v40 = vor.u32 %v593_v30, %v589_v18  ;;  %v619_v41 = vrot.slane %v617_v31, 5  ;;  %v631_v44 = vshrl.u32 %v438_v22, 16  ;;  %v446_v22 = vld [vmem:[%s7518_s23 + $0x58] sm:$0xf]  ;;  %v447_v31 = vld [vmem:[%s7518_s23 + $0x5c] sm:$0xf] }
  0x26   : > { %1098 = vrot.lane.b32.xlu0 %v560_v28, %s7456_s24  ;;  %v605_v42 = vrot.slane %v604_v33, 4  ;;  %v623_v43 = vrot.slane %v621_v35, 4  ;;  %v613_v45 = vrot.slane %v611_v26, 4  ;;  %v637_v47 = vshll.u32 %v439_v32, 16 }
  0x27   : > { %v595_v46 = vrot.slane %v594_v40, 4  ;;  %v641_v48 = vshrl.u32 %v439_v32, 16  ;;  %v647_v49 = vshll.u32 %v440_v37, 16  ;;  %v629_v53 = vrot.slane %v627_v36, 5  ;;  %v448_v36 = vld [vmem:[%s7518_s23 + $0x60] sm:$0xf] }
  0x28   : > { %v610_v51 = vsel %vm7529_vm2, %v605_v42, %v609_v34  ;;  %v624_v52 = vor.u32 %v623_v43, %v619_v41  ;;  %v614_v54 = vor.u32 %v613_v45, %v609_v34  ;;  %v639_v57 = vrot.slane %v637_v47, 5 }
  0x29   : > { %1104 = vrot.lane.b32.xlu1 %v590_v38, %s7456_s24  ;;  %v600_v56 = vsel %vm7529_vm2, %v595_v46, %v599_v20  ;;  %v643_v58 = vrot.slane %v641_v48, 4  ;;  %v651_v59 = vshrl.u32 %v440_v37, 16  ;;  %v633_v62 = vrot.slane %v631_v44, 4 }
  0x2a   : > { %1102 = vrot.lane.b32.xlu0 %v580_v39, %s7456_s24  ;;  %v625_v60 = vrot.slane %v624_v52, 4  ;;  %v615_v61 = vrot.slane %v614_v54, 4  ;;  %v657_v63 = vshll.u32 %v441_v50, 16  ;;  %v649_v2 = vrot.slane %v647_v49, 5  ;;  %v449_v49 = vld [vmem:[%s7518_s23 + $0x64] sm:$0xf] }
  0x2b   : > { %v644_v1 = vor.u32 %v643_v58, %v639_v57  ;;  %v661_v3 = vshrl.u32 %v441_v50, 16  ;;  %v667_v4 = vshll.u32 %v442_v55, 16  ;;  %v634_v6 = vor.u32 %v633_v62, %v629_v53 }
  0x2c   : > { %v7581_v7 = vrot.slane %v657_v63, 5  ;;  %v671_v8 = vshrl.u32 %v442_v55, 16  ;;  %v630_v9 = vsel %vm7529_vm2, %v625_v60, %v629_v53  ;;  %v653_v12 = vrot.slane %v651_v59, 4  ;;  %v450_v60 = vld [vmem:[%s7518_s23 + $0x68] sm:$0xf] }
  0x2d   : > { %1108 = vrot.lane.b32.xlu1 %v610_v51, %s7456_s24  ;;  %v645_v10 = vrot.slane %v644_v1, 4  ;;  %v663_v11 = vrot.slane %v661_v3, 4  ;;  %v620_v13 = vsel %vm7529_vm2, %v615_v61, %v619_v41  ;;  %v677_v14 = vshll.u32 %v443_v0, 16  ;;  %v452_v3 = vld [vmem:[%s7518_s23 + $0x70] sm:$0xf] }
  0x2e   : > { %1106 = vrot.lane.b32.xlu0 %v600_v56, %s7456_s24  ;;  %v681_v15 = vshrl.u32 %v443_v0, 16  ;;  %v687_v16 = vshll.u32 %v444_v5, 16  ;;  %v635_v18 = vrot.slane %v634_v6, 4  ;;  %v669_v20 = vrot.slane %v667_v4, 5 }
  0x2f   : > { %v664_v19 = vor.u32 %v663_v11, %v7581_v7  ;;  %v654_v21 = vor.u32 %v653_v12, %v649_v2  ;;  %v7592_v23 = vrot.slane %v677_v14, 5  ;;  %v691_v25 = vshrl.u32 %v444_v5, 16  ;;  %v303_v14 = vld [vmem:[%s7518_s23] sm:$0xf] }
  0x30   : > { %v683_v24 = vrot.slane %v681_v15, 4  ;;  %v650_v26 = vsel %vm7529_vm2, %v645_v10, %v649_v2  ;;  %v7597_v28 = vrot.slane %v687_v16, 5  ;;  %v673_v29 = vrot.slane %v671_v8, 4  ;;  %v451_v2 = vld [vmem:[%s7518_s23 + $0x6c] sm:$0xf] }
  0x31   : > { %1112 = vrot.lane.b32.xlu1 %v630_v9, %s7456_s24  ;;  %v697_v30 = vshll.u32 %v445_v17, 16  ;;  %v665_v32 = vrot.slane %v664_v19, 4  ;;  %v701_v34 = vshrl.u32 %v445_v17, 16  ;;  %v707_v35 = vshll.u32 %v446_v22, 16  ;;  %v453_v8 = vld [vmem:[%s7518_s23 + $0x74] sm:$0xf] }
  0x32   : > { %1110 = vrot.lane.b32.xlu0 %v620_v13, %s7456_s24  ;;  %v684_v33 = vor.u32 %v683_v24, %v7592_v23  ;;  %v640_v37 = vsel %vm7529_vm2, %v635_v18, %v639_v57  ;;  %v655_v38 = vrot.slane %v654_v21, 4  ;;  %v674_v39 = vor.u32 %v673_v29, %v669_v20  ;;  %v305_v9 = vld [vmem:[%s7518_s23 + $0x8] sm:$0xf]  ;;  %v454_v18 = vld [vmem:[%s7518_s23 + $0x78] sm:$0xf] }
  0x33   : > { %v7605_v40 = vrot.slane %v697_v30, 5  ;;  %v703_v42 = vrot.slane %v701_v34, 4  ;;  %v711_v43 = vshrl.u32 %v446_v22, 16  ;;  %v693_v44 = vrot.slane %v691_v25, 4  ;;  %366 = vst.msk [vmem:[#allocation2 + $0x8] sm:$0xf] %vm363_vm3, %v305_v9 }
  0x34   : > { %v685_v41 = vrot.slane %v684_v33, 4  ;;  %v675_v45 = vrot.slane %v674_v39, 4  ;;  %v717_v46 = vshll.u32 %v447_v31, 16  ;;  %v721_v47 = vshrl.u32 %v447_v31, 16  ;;  %364 = vst.msk [vmem:[#allocation2] sm:$0xf] %vm363_vm3, %v303_v14 }
  0x35   : > { %1116 = vrot.lane.b32.xlu1 %v650_v26, %s7456_s24  ;;  %v727_v48 = vshll.u32 %v448_v36, 16  ;;  %v670_v50 = vsel %vm7529_vm2, %v665_v32, %v669_v20  ;;  %v704_v51 = vor.u32 %v703_v42, %v7605_v40  ;;  %v709_v52 = vrot.slane %v707_v35, 5  ;;  %v304_v24 = vld [vmem:[%s7518_s23 + $0x4] sm:$0xf]  ;;  %v308_v42 = vld [vmem:[%s7518_s23 + $0x14] sm:$0xf] }
  0x36   : > { %1114 = vrot.lane.b32.xlu0 %v640_v37, %s7456_s24  ;;  %v694_v53 = vor.u32 %v693_v44, %v7597_v28  ;;  %v660_v54 = vsel %vm7529_vm2, %v655_v38, %v7581_v7  ;;  %v7617_v55 = vrot.slane %v717_v46, 5  ;;  %v723_v56 = vrot.slane %v721_v47, 4  ;;  %365 = vst.msk [vmem:[#allocation2 + $0x4] sm:$0xf] %vm363_vm3, %v304_v24  ;;  %v455_v37 = vld [vmem:[%s7518_s23 + $0x7c] sm:$0xf] }
  0x37   : > { %v731_v57 = vshrl.u32 %v448_v36, 16  ;;  %v690_v58 = vsel %vm7529_vm2, %v685_v41, %v7597_v28  ;;  %v713_v59 = vrot.slane %v711_v43, 4  ;;  %v737_v61 = vshll.u32 %v449_v49, 16  ;;  %v307_v43 = vld [vmem:[%s7518_s23 + $0x10] sm:$0xf] }
  0x38   : > { %v680_v62 = vsel %vm7529_vm2, %v675_v45, %v7592_v23  ;;  %v724_v63 = vor.u32 %v723_v56, %v7617_v55  ;;  %v7628_v0 = vrot.slane %v727_v48, 5  ;;  %v741_v1 = vshrl.u32 %v449_v49, 16  ;;  %v306_v23 = vld [vmem:[%s7518_s23 + $0xc] sm:$0xf]  ;;  %v456_v48 = vld [vmem:[%s7518_s23 + $0x80] sm:$0xf] }
  0x39   : > { %1120 = vrot.lane.b32.xlu1 %v670_v50, %s7456_s24  ;;  %v705_v4 = vrot.slane %v704_v51, 4  ;;  %v695_v5 = vrot.slane %v694_v53, 4  ;;  %v714_v6 = vor.u32 %v713_v59, %v709_v52  ;;  %v7633_v7 = vrot.slane %v737_v61, 5  ;;  %367 = vst.msk [vmem:[#allocation2 + $0xc] sm:$0xf] %vm363_vm3, %v306_v23 }
  0x3a   : > { %1118 = vrot.lane.b32.xlu0 %v660_v54, %s7456_s24  ;;  %v743_v10 = vrot.slane %v741_v1, 4  ;;  %v747_v11 = vshll.u32 %v450_v60, 16  ;;  %v751_v12 = vshrl.u32 %v450_v60, 16  ;;  %v733_v13 = vrot.slane %v731_v57, 4  ;;  %369 = vst.msk [vmem:[#allocation2 + $0x14] sm:$0xf] %vm363_vm3, %v308_v42 }
  0x3b   : > { %v725_v15 = vrot.slane %v724_v63, 4  ;;  %v757_v16 = vshll.u32 %v451_v2, 16  ;;  %v761_v17 = vshrl.u32 %v451_v2, 16  ;;  %v715_v19 = vrot.slane %v714_v6, 4  ;;  %368 = vst.msk [vmem:[#allocation2 + $0x10] sm:$0xf] %vm363_vm3, %v307_v43 }
  0x3c   : > { %v744_v20 = vor.u32 %v743_v10, %v7633_v7  ;;  %v734_v21 = vor.u32 %v733_v13, %v7628_v0  ;;  %v767_v22 = vshll.u32 %v452_v3, 16  ;;  %v710_v25 = vsel %vm7529_vm2, %v705_v4, %v709_v52  ;;  %v457_v53 = vld [vmem:[%s7518_s23 + $0x84] sm:$0xf]  ;;  %v310_v56 = vld [vmem:[%s7518_s23 + $0x1c] sm:$0xf] }
  0x3d   : > { %1124 = vrot.lane.b32.xlu1 %v690_v58, %s7456_s24  ;;  %v700_v26 = vsel %vm7529_vm2, %v695_v5, %v7605_v40  ;;  %v7652_v28 = vrot.slane %v757_v16, 5  ;;  %v763_v29 = vrot.slane %v761_v17, 4  ;;  %v749_v30 = vrot.slane %v747_v11, 5  ;;  %v309_v57 = vld [vmem:[%s7518_s23 + $0x18] sm:$0xf] }
  0x3e   : > { %1122 = vrot.lane.b32.xlu0 %v680_v62, %s7456_s24  ;;  %v771_v31 = vshrl.u32 %v452_v3, 16  ;;  %v753_v32 = vrot.slane %v751_v12, 4  ;;  %v777_v33 = vshll.u32 %v453_v8, 16  ;;  %v745_v34 = vrot.slane %v744_v20, 4  ;;  %371 = vst.msk [vmem:[#allocation2 + $0x1c] sm:$0xf] %vm363_vm3, %v310_v56 }
  0x3f   : > { %v781_v35 = vshrl.u32 %v453_v8, 16  ;;  %v787_v36 = vshll.u32 %v454_v18, 16  ;;  %v730_v38 = vsel %vm7529_vm2, %v725_v15, %v7628_v0  ;;  %v720_v39 = vsel %vm7529_vm2, %v715_v19, %v7617_v55  ;;  %370 = vst.msk [vmem:[#allocation2 + $0x18] sm:$0xf] %vm363_vm3, %v309_v57  ;;  %v458_v1 = vld [vmem:[%s7518_s23 + $0x88] sm:$0xf] }
  0x40   : > { %v735_v40 = vrot.slane %v734_v21, 4  ;;  %v7664_v41 = vrot.slane %v767_v22, 5  ;;  %v764_v44 = vor.u32 %v763_v29, %v7652_v28  ;;  %v7670_v45 = vrot.slane %v777_v33, 5  ;;  %v459_v8 = vld [vmem:[%s7518_s23 + $0x8c] sm:$0xf] }
  0x41   : > { %1128 = vrot.lane.b32.xlu1 %v710_v25, %s7456_s24  ;;  %v783_v46 = vrot.slane %v781_v35, 4  ;;  %v791_v47 = vshrl.u32 %v454_v18, 16  ;;  %v754_v49 = vor.u32 %v753_v32, %v749_v30  ;;  %v773_v50 = vrot.slane %v771_v31, 4  ;;  %v312_v9 = vld [vmem:[%s7518_s23 + $0x24] sm:$0xf] }
  0x42   : > { %1126 = vrot.lane.b32.xlu0 %v700_v26, %s7456_s24  ;;  %v797_v51 = vshll.u32 %v455_v37, 16  ;;  %v801_v52 = vshrl.u32 %v455_v37, 16  ;;  %v750_v54 = vsel %vm7529_vm2, %v745_v34, %v749_v30  ;;  %v7678_v55 = vrot.slane %v787_v36, 5  ;;  %v7701_v13 = vld [vmem:[%s7518_s23 + $0x90] sm:$0xf] }
  0x43   : > { %v807_v60 = vshll.u32 %v456_v48, 16  ;;  %v811_v61 = vshrl.u32 %v456_v48, 16  ;;  %v765_v62 = vrot.slane %v764_v44, 4  ;;  %v784_v63 = vor.u32 %v783_v46, %v7670_v45  ;;  %373 = vst.msk [vmem:[#allocation2 + $0x24] sm:$0xf] %vm363_vm3, %v312_v9 }
  0x44   : > { %v7683_v58 = vrot.slane %v797_v51, 5  ;;  %v803_v59 = vrot.slane %v801_v52, 4  ;;  %v793_v0 = vrot.slane %v791_v47, 4  ;;  %v817_v2 = vshll.u32 %v457_v53, 16  ;;  %v311_v14 = vld [vmem:[%s7518_s23 + $0x20] sm:$0xf] }
  0x45   : > { %1132 = vrot.lane.b32.xlu1 %v730_v38, %s7456_s24  ;;  %v740_v3 = vsel %vm7529_vm2, %v735_v40, %v7633_v7  ;;  %v755_v4 = vrot.slane %v754_v49, 4  ;;  %v774_v5 = vor.u32 %v773_v50, %v7664_v41  ;;  %v821_v6 = vshrl.u32 %v457_v53, 16  ;;  %v461_v17 = vld [vmem:[%s7518_s23 + $0x94] sm:$0xf]  ;;  %372 = vst.msk [vmem:[#allocation2 + $0x20] sm:$0xf] %vm363_vm3, %v311_v14 }
  0x46   : > { %1130 = vrot.lane.b32.xlu0 %v720_v39, %s7456_s24  ;;  %v804_v10 = vor.u32 %v803_v59, %v7683_v58  ;;  %v794_v11 = vor.u32 %v793_v0, %v7678_v55  ;;  %v7698_v12 = vrot.slane %v817_v2, 5  ;;  %v7706_v7 = vrot.slane %v807_v60, 5  ;;  %v314_v22 = vld [vmem:[%s7518_s23 + $0x2c] sm:$0xf]  ;;  %v313_v29 = vld [vmem:[%s7518_s23 + $0x28] sm:$0xf] }
  0x47   : > { %v823_v15 = vrot.slane %v821_v6, 4  ;;  %v813_v16 = vrot.slane %v811_v61, 4  ;;  %v770_v18 = vsel %vm7529_vm2, %v765_v62, %v7664_v41  ;;  %v785_v19 = vrot.slane %v784_v63, 4  ;;  %375 = vst.msk [vmem:[#allocation2 + $0x2c] sm:$0xf] %vm363_vm3, %v314_v22 }
  0x48   : > { %v837_v20 = vshll.u32 %v459_v8, 16  ;;  %v841_v21 = vshrl.u32 %v459_v8, 16  ;;  %v760_v23 = vsel %vm7529_vm2, %v755_v4, %v7652_v28  ;;  %v775_v24 = vrot.slane %v774_v5, 4  ;;  %374 = vst.msk [vmem:[#allocation2 + $0x28] sm:$0xf] %vm363_vm3, %v313_v29 }
  0x49   : > { %1136 = vrot.lane.b32.xlu1 %v750_v54, %s7456_s24  ;;  %v827_v25 = vshll.u32 %v458_v1, 16  ;;  %v831_v26 = vshrl.u32 %v458_v1, 16  ;;  %v805_v30 = vrot.slane %v804_v10, 4  ;;  %v795_v31 = vrot.slane %v794_v11, 4  ;;  %v316_v36 = vld [vmem:[%s7518_s23 + $0x34] sm:$0xf] }
  0x4a   : > { %1134 = vrot.lane.b32.xlu0 %v740_v3, %s7456_s24  ;;  %v824_v32 = vor.u32 %v823_v15, %v7698_v12  ;;  %v847_v33 = vshll.u32 %v7701_v13, 16  ;;  %v814_v28 = vor.u32 %v813_v16, %v7706_v7  ;;  %v7725_v34 = vrot.slane %v837_v20, 5  ;;  %v463_v40 = vld [vmem:[%s7518_s23 + $0x9c] sm:$0xf]  ;;  %377 = vst.msk [vmem:[#allocation2 + $0x34] sm:$0xf] %vm363_vm3, %v316_v36 }
  0x4b   : > { %v843_v35 = vrot.slane %v841_v21, 4  ;;  %v790_v37 = vsel %vm7529_vm2, %v785_v19, %v7678_v55  ;;  %v857_v38 = vshll.u32 %v461_v17, 16  ;;  %v861_v39 = vshrl.u32 %v461_v17, 16  ;;  %v315_v41 = vld [vmem:[%s7518_s23 + $0x30] sm:$0xf] }
  0x4c   : > { %v780_v42 = vsel %vm7529_vm2, %v775_v24, %v7670_v45  ;;  %v829_v43 = vrot.slane %v827_v25, 5  ;;  %v851_v44 = vshrl.u32 %v7701_v13, 16  ;;  %v833_v46 = vrot.slane %v831_v26, 4  ;;  %v462_v47 = vld [vmem:[%s7518_s23 + $0x98] sm:$0xf] }
  0x4d   : > { %1140 = vrot.lane.b32.xlu1 %v770_v18, %s7456_s24  ;;  %376 = vst.msk [vmem:[#allocation2 + $0x30] sm:$0xf] %vm363_vm3, %v315_v41  ;;  %v810_v48 = vsel %vm7529_vm2, %v805_v30, %v7706_v7  ;;  %v800_v49 = vsel %vm7529_vm2, %v795_v31, %v7683_v58  ;;  %v825_v50 = vrot.slane %v824_v32, 4  ;;  %v7747_v51 = vrot.slane %v847_v33, 5  ;;  %v465_v45 = vld [vmem:[%s7518_s23 + $0xa4] sm:$0xf] }
  0x4e   : > { %1138 = vrot.lane.b32.xlu0 %v760_v23, %s7456_s24  ;;  %v318_v52 = vld [vmem:[%s7518_s23 + $0x3c] sm:$0xf]  ;;  %v815_v53 = vrot.slane %v814_v28, 4  ;;  %v844_v54 = vor.u32 %v843_v35, %v7725_v34  ;;  %v877_v55 = vshll.u32 %v463_v40, 16  ;;  %v881_v56 = vshrl.u32 %v463_v40, 16 }
  0x4f   : > { %379 = vst.msk [vmem:[#allocation2 + $0x3c] sm:$0xf] %vm363_vm3, %v318_v52  ;;  %v317_v57 = vld [vmem:[%s7518_s23 + $0x38] sm:$0xf]  ;;  %v7756_v58 = vrot.slane %v857_v38, 5  ;;  %v863_v59 = vrot.slane %v861_v39, 4  ;;  %v834_v63 = vor.u32 %v833_v46, %v829_v43  ;;  %v830_v8 = vsel %vm7529_vm2, %v825_v50, %v829_v43 }
  0x50   : > { %v867_v60 = vshll.u32 %v462_v47, 16  ;;  %v871_v61 = vshrl.u32 %v462_v47, 16  ;;  %v464_v62 = vld [vmem:[%s7518_s23 + $0xa0] sm:$0xf]  ;;  %378 = vst.msk [vmem:[#allocation2 + $0x38] sm:$0xf] %vm363_vm3, %v317_v57  ;;  %v820_v14 = vsel %vm7529_vm2, %v815_v53, %v7698_v12 }
  0x51   : > { %1144 = vrot.lane.b32.xlu1 %v790_v37, %s7456_s24  ;;  %v853_v0 = vrot.slane %v851_v44, 4  ;;  %v7760_v1 = vrot.slane %v877_v55, 5  ;;  %v883_v2 = vrot.slane %v881_v56, 4  ;;  %v320_v3 = vld [vmem:[%s7518_s23 + $0x44] sm:$0xf]  ;;  %v897_v5 = vshll.u32 %v465_v45, 16 }
  0x52   : > { %1142 = vrot.lane.b32.xlu0 %v780_v42, %s7456_s24  ;;  %v466_v4 = vld [vmem:[%s7518_s23 + $0xa8] sm:$0xf]  ;;  %381 = vst.msk [vmem:[#allocation2 + $0x44] sm:$0xf] %vm363_vm3, %v320_v3  ;;  %v319_v6 = vld [vmem:[%s7518_s23 + $0x40] sm:$0xf]  ;;  %v864_v15 = vor.u32 %v863_v59, %v7756_v58 }
  0x53   : > { %v887_v9 = vshll.u32 %v464_v62, 16  ;;  %v891_v10 = vshrl.u32 %v464_v62, 16  ;;  %v901_v11 = vshrl.u32 %v465_v45, 16  ;;  %v467_v13 = vld [vmem:[%s7518_s23 + $0xac] sm:$0xf]  ;;  %v845_v7 = vrot.slane %v844_v54, 4 }
  0x54   : > { %380 = vst.msk [vmem:[#allocation2 + $0x40] sm:$0xf] %vm363_vm3, %v319_v6  ;;  %v869_v16 = vrot.slane %v867_v60, 5  ;;  %v322_v17 = vld [vmem:[%s7518_s23 + $0x4c] sm:$0xf]  ;;  %v835_v18 = vrot.slane %v834_v63, 4  ;;  %v854_v19 = vor.u32 %v853_v0, %v7747_v51  ;;  %v884_v20 = vor.u32 %v883_v2, %v7760_v1 }
  0x55   : > { %1148 = vrot.lane.b32.xlu1 %v810_v48, %s7456_s24  ;;  %v873_v21 = vrot.slane %v871_v61, 4  ;;  %383 = vst.msk [vmem:[#allocation2 + $0x4c] sm:$0xf] %vm363_vm3, %v322_v17  ;;  %v321_v22 = vld [vmem:[%s7518_s23 + $0x48] sm:$0xf]  ;;  %v7781_v23 = vrot.slane %v897_v5, 5  ;;  %v850_v33 = vsel %vm7529_vm2, %v845_v7, %v7747_v51 }
  0x56   : > { %1146 = vrot.lane.b32.xlu0 %v800_v49, %s7456_s24  ;;  %v903_v24 = vrot.slane %v901_v11, 4  ;;  %v907_v12 = vshll.u32 %v466_v4, 16  ;;  %v917_v25 = vshll.u32 %v467_v13, 16  ;;  %382 = vst.msk [vmem:[#allocation2 + $0x48] sm:$0xf] %vm363_vm3, %v321_v22  ;;  %v7785_v26 = vrot.slane %v887_v9, 5 }
  0x57   : > { %v911_v29 = vshrl.u32 %v466_v4, 16  ;;  %v893_v30 = vrot.slane %v891_v10, 4  ;;  %v921_v31 = vshrl.u32 %v467_v13, 16  ;;  %v324_v32 = vld [vmem:[%s7518_s23 + $0x54] sm:$0xf]  ;;  %v865_v28 = vrot.slane %v864_v15, 4 }
  0x58   : > { %385 = vst.msk [vmem:[#allocation2 + $0x54] sm:$0xf] %vm363_vm3, %v324_v32  ;;  %v323_v35 = vld [vmem:[%s7518_s23 + $0x50] sm:$0xf]  ;;  %v840_v36 = vsel %vm7529_vm2, %v835_v18, %v7725_v34  ;;  %v855_v37 = vrot.slane %v854_v19, 4  ;;  %v874_v38 = vor.u32 %v873_v21, %v869_v16  ;;  %v885_v40 = vrot.slane %v884_v20, 4 }
  0x59   : > { %1152 = vrot.lane.b32.xlu1 %v830_v8, %s7456_s24  ;;  %v469_v39 = vld [vmem:[%s7518_s23 + $0xb4] sm:$0xf]  ;;  %384 = vst.msk [vmem:[#allocation2 + $0x50] sm:$0xf] %vm363_vm3, %v323_v35  ;;  %v904_v41 = vor.u32 %v903_v24, %v7781_v23  ;;  %v7800_v42 = vrot.slane %v907_v12, 5  ;;  %v7803_v44 = vrot.slane %v917_v25, 5  ;;  %v894_v46 = vor.u32 %v893_v30, %v7785_v26 }
  0x5a   : > { %1150 = vrot.lane.b32.xlu0 %v820_v14, %s7456_s24  ;;  %v468_v43 = vld [vmem:[%s7518_s23 + $0xb0] sm:$0xf]  ;;  %v923_v34 = vrot.slane %v921_v31, 4  ;;  %v913_v47 = vrot.slane %v911_v29, 4  ;;  %v326_v48 = vld [vmem:[%s7518_s23 + $0x5c] sm:$0xf]  ;;  %v870_v50 = vsel %vm7529_vm2, %v865_v28, %v869_v16  ;;  %v860_v53 = vsel %vm7529_vm2, %v855_v37, %v7756_v58 }
  0x5b   : > { %v325_v49 = vld [vmem:[%s7518_s23 + $0x58] sm:$0xf]  ;;  %v937_v45 = vshll.u32 %v469_v39, 16  ;;  %v941_v52 = vshrl.u32 %v469_v39, 16  ;;  %387 = vst.msk [vmem:[#allocation2 + $0x5c] sm:$0xf] %vm363_vm3, %v326_v48  ;;  %v890_v59 = vsel %vm7529_vm2, %v885_v40, %v7785_v26 }
  0x5c   : > { %v470_v51 = vld [vmem:[%s7518_s23 + $0xb8] sm:$0xf]  ;;  %386 = vst.msk [vmem:[#allocation2 + $0x58] sm:$0xf] %vm363_vm3, %v325_v49  ;;  %v875_v54 = vrot.slane %v874_v38, 4  ;;  %v927_v55 = vshll.u32 %v468_v43, 16  ;;  %v924_v0 = vor.u32 %v923_v34, %v7803_v44  ;;  %v914_v58 = vor.u32 %v913_v47, %v7800_v42 }
  0x5d   : > { %1156 = vrot.lane.b32.xlu1 %v850_v33, %s7456_s24  ;;  %v931_v56 = vshrl.u32 %v468_v43, 16  ;;  %v471_v57 = vld [vmem:[%s7518_s23 + $0xbc] sm:$0xf]  ;;  %v905_v60 = vrot.slane %v904_v41, 4  ;;  %v328_v61 = vld [vmem:[%s7518_s23 + $0x64] sm:$0xf] }
  0x5e   : > { %1154 = vrot.lane.b32.xlu0 %v840_v36, %s7456_s24  ;;  %v327_v62 = vld [vmem:[%s7518_s23 + $0x60] sm:$0xf]  ;;  %v895_v63 = vrot.slane %v894_v46, 4  ;;  %v947_v2 = vshll.u32 %v470_v51, 16  ;;  %v473_v3 = vld [vmem:[%s7518_s23 + $0xc4] sm:$0xf]  ;;  %v880_v10 = vsel %vm7529_vm2, %v875_v54, %v7760_v1 }
  0x5f   : > { %389 = vst.msk [vmem:[#allocation2 + $0x64] sm:$0xf] %vm363_vm3, %v328_v61  ;;  %388 = vst.msk [vmem:[#allocation2 + $0x60] sm:$0xf] %vm363_vm3, %v327_v62  ;;  %v7831_v4 = vrot.slane %v937_v45, 5  ;;  %v943_v5 = vrot.slane %v941_v52, 4  ;;  %v910_v15 = vsel %vm7529_vm2, %v905_v60, %v7800_v42 }
  0x60   : > { %v472_v6 = vld [vmem:[%s7518_s23 + $0xc0] sm:$0xf]  ;;  %v957_v8 = vshll.u32 %v471_v57, 16  ;;  %v961_v9 = vshrl.u32 %v471_v57, 16  ;;  %v929_v11 = vrot.slane %v927_v55, 5  ;;  %v951_v13 = vshrl.u32 %v470_v51, 16 }
  0x61   : > { %1160 = vrot.lane.b32.xlu1 %v870_v50, %s7456_s24  ;;  %v933_v14 = vrot.slane %v931_v56, 4  ;;  %v330_v7 = vld [vmem:[%s7518_s23 + $0x6c] sm:$0xf]  ;;  %v474_v16 = vld [vmem:[%s7518_s23 + $0xc8] sm:$0xf]  ;;  %v977_v17 = vshll.u32 %v473_v3, 16  ;;  %v900_v1 = vsel %vm7529_vm2, %v895_v63, %v7781_v23  ;;  %v944_v12 = vor.u32 %v943_v5, %v7831_v4 }
  0x62   : > { %1158 = vrot.lane.b32.xlu0 %v860_v53, %s7456_s24  ;;  %v981_v18 = vshrl.u32 %v473_v3, 16  ;;  %391 = vst.msk [vmem:[#allocation2 + $0x6c] sm:$0xf] %vm363_vm3, %v330_v7  ;;  %v329_v19 = vld [vmem:[%s7518_s23 + $0x68] sm:$0xf]  ;;  %v925_v20 = vrot.slane %v924_v0, 4 }
  0x63   : > { %v915_v21 = vrot.slane %v914_v58, 4  ;;  %v7849_v22 = vrot.slane %v947_v2, 5  ;;  %v475_v24 = vld [vmem:[%s7518_s23 + $0xcc] sm:$0xf]  ;;  %390 = vst.msk [vmem:[#allocation2 + $0x68] sm:$0xf] %vm363_vm3, %v329_v19  ;;  %v934_v31 = vor.u32 %v933_v14, %v929_v11 }
  0x64   : > { %v7855_v25 = vrot.slane %v957_v8, 5  ;;  %v963_v26 = vrot.slane %v961_v9, 4  ;;  %v967_v29 = vshll.u32 %v472_v6, 16  ;;  %v332_v30 = vld [vmem:[%s7518_s23 + $0x74] sm:$0xf]  ;;  %v971_v23 = vshrl.u32 %v472_v6, 16 }
  0x65   : > { %1164 = vrot.lane.b32.xlu1 %v890_v59, %s7456_s24  ;;  %v953_v32 = vrot.slane %v951_v13, 4  ;;  %v987_v33 = vshll.u32 %v474_v16, 16  ;;  %393 = vst.msk [vmem:[#allocation2 + $0x74] sm:$0xf] %vm363_vm3, %v332_v30  ;;  %v331_v28 = vld [vmem:[%s7518_s23 + $0x70] sm:$0xf]  ;;  %v930_v39 = vsel %vm7529_vm2, %v925_v20, %v929_v11  ;;  %v920_v43 = vsel %vm7529_vm2, %v915_v21, %v7803_v44 }
  0x66   : > { %1162 = vrot.lane.b32.xlu0 %v880_v10, %s7456_s24  ;;  %v7862_v35 = vrot.slane %v977_v17, 5  ;;  %v983_v36 = vrot.slane %v981_v18, 4  ;;  %v997_v37 = vshll.u32 %v475_v24, 16  ;;  %v1001_v38 = vshrl.u32 %v475_v24, 16  ;;  %392 = vst.msk [vmem:[#allocation2 + $0x70] sm:$0xf] %vm363_vm3, %v331_v28 }
  0x67   : > { %v991_v40 = vshrl.u32 %v474_v16, 16  ;;  %v476_v41 = vld [vmem:[%s7518_s23 + $0xd0] sm:$0xf]  ;;  %v334_v42 = vld [vmem:[%s7518_s23 + $0x7c] sm:$0xf]  ;;  %v945_v46 = vrot.slane %v944_v12, 4  ;;  %v964_v34 = vor.u32 %v963_v26, %v7855_v25  ;;  %v954_v51 = vor.u32 %v953_v32, %v7849_v22 }
  0x68   : > { %v969_v47 = vrot.slane %v967_v29, 5  ;;  %v477_v48 = vld [vmem:[%s7518_s23 + $0xd4] sm:$0xf]  ;;  %395 = vst.msk [vmem:[#allocation2 + $0x7c] sm:$0xf] %vm363_vm3, %v334_v42  ;;  %v935_v50 = vrot.slane %v934_v31, 4  ;;  %v984_v44 = vor.u32 %v983_v36, %v7862_v35 }
  0x69   : > { %1168 = vrot.lane.b32.xlu1 %v910_v15, %s7456_s24  ;;  %v333_v49 = vld [vmem:[%s7518_s23 + $0x78] sm:$0xf]  ;;  %v7879_v45 = vrot.slane %v987_v33, 5  ;;  %v973_v52 = vrot.slane %v971_v23, 4  ;;  %v7884_v53 = vrot.slane %v997_v37, 5  ;;  %v1003_v54 = vrot.slane %v1001_v38, 4 }
  0x6a   : > { %1166 = vrot.lane.b32.xlu0 %v900_v1, %s7456_s24  ;;  %394 = vst.msk [vmem:[#allocation2 + $0x78] sm:$0xf] %vm363_vm3, %v333_v49  ;;  %v1007_v55 = vshll.u32 %v476_v41, 16  ;;  %v336_v56 = vld [vmem:[%s7518_s23 + $0x84] sm:$0xf]  ;;  %v1011_v57 = vshrl.u32 %v476_v41, 16  ;;  %v950_v63 = vsel %vm7529_vm2, %v945_v46, %v7849_v22  ;;  %v940_v58 = vsel %vm7529_vm2, %v935_v50, %v7831_v4 }
  0x6b   : > { %v993_v59 = vrot.slane %v991_v40, 4  ;;  %v1017_v60 = vshll.u32 %v477_v48, 16  ;;  %v1021_v61 = vshrl.u32 %v477_v48, 16  ;;  %397 = vst.msk [vmem:[#allocation2 + $0x84] sm:$0xf] %vm363_vm3, %v336_v56  ;;  %v965_v0 = vrot.slane %v964_v34, 4 }
  0x6c   : > { %v335_v62 = vld [vmem:[%s7518_s23 + $0x80] sm:$0xf]  ;;  %v955_v2 = vrot.slane %v954_v51, 4  ;;  %v974_v3 = vor.u32 %v973_v52, %v969_v47  ;;  %v479_v5 = vld [vmem:[%s7518_s23 + $0xdc] sm:$0xf]  ;;  %v985_v8 = vrot.slane %v984_v44, 4  ;;  %v1004_v9 = vor.u32 %v1003_v54, %v7884_v53 }
  0x6d   : > { %1172 = vrot.lane.b32.xlu1 %v930_v39, %s7456_s24  ;;  %396 = vst.msk [vmem:[#allocation2 + $0x80] sm:$0xf] %vm363_vm3, %v335_v62  ;;  %v338_v6 = vld [vmem:[%s7518_s23 + $0x8c] sm:$0xf]  ;;  %v7906_v10 = vrot.slane %v1007_v55, 5  ;;  %v994_v4 = vor.u32 %v993_v59, %v7879_v45  ;;  %v7913_v14 = vrot.slane %v1017_v60, 5  ;;  %v970_v17 = vsel %vm7529_vm2, %v965_v0, %v969_v47 }
  0x6e   : > { %1170 = vrot.lane.b32.xlu0 %v920_v43, %s7456_s24  ;;  %v478_v11 = vld [vmem:[%s7518_s23 + $0xd8] sm:$0xf]  ;;  %399 = vst.msk [vmem:[#allocation2 + $0x8c] sm:$0xf] %vm363_vm3, %v338_v6  ;;  %v337_v13 = vld [vmem:[%s7518_s23 + $0x88] sm:$0xf]  ;;  %v960_v21 = vsel %vm7529_vm2, %v955_v2, %v7855_v25  ;;  %v990_v29 = vsel %vm7529_vm2, %v985_v8, %v7879_v45 }
  0x6f   : > { %v1023_v7 = vrot.slane %v1021_v61, 4  ;;  %v1013_v15 = vrot.slane %v1011_v57, 4  ;;  %v480_v16 = vld [vmem:[%s7518_s23 + $0xe0] sm:$0xf]  ;;  %398 = vst.msk [vmem:[#allocation2 + $0x88] sm:$0xf] %vm363_vm3, %v337_v13 }
  0x70   : > { %v1037_v18 = vshll.u32 %v479_v5, 16  ;;  %v1041_v19 = vshrl.u32 %v479_v5, 16  ;;  %v481_v1 = vld [vmem:[%s7518_s23 + $0xe4] sm:$0xf]  ;;  %v340_v20 = vld [vmem:[%s7518_s23 + $0x94] sm:$0xf] }
  0x71   : > { %1176 = vrot.lane.b32.xlu1 %v950_v63, %s7456_s24  ;;  %v975_v22 = vrot.slane %v974_v3, 4  ;;  %v1027_v24 = vshll.u32 %v478_v11, 16  ;;  %v1031_v12 = vshrl.u32 %v478_v11, 16  ;;  %401 = vst.msk [vmem:[#allocation2 + $0x94] sm:$0xf] %vm363_vm3, %v340_v20  ;;  %v1005_v30 = vrot.slane %v1004_v9, 4 }
  0x72   : > { %1174 = vrot.lane.b32.xlu0 %v940_v58, %s7456_s24  ;;  %v339_v26 = vld [vmem:[%s7518_s23 + $0x90] sm:$0xf]  ;;  %v995_v31 = vrot.slane %v994_v4, 4  ;;  %v1024_v25 = vor.u32 %v1023_v7, %v7913_v14  ;;  %v1014_v23 = vor.u32 %v1013_v15, %v7906_v10  ;;  %v1047_v32 = vshll.u32 %v480_v16, 16  ;;  %v342_v33 = vld [vmem:[%s7518_s23 + $0x9c] sm:$0xf] }
  0x73   : > { %400 = vst.msk [vmem:[#allocation2 + $0x90] sm:$0xf] %vm363_vm3, %v339_v26  ;;  %v7937_v28 = vrot.slane %v1037_v18, 5  ;;  %v1043_v36 = vrot.slane %v1041_v19, 4  ;;  %v1057_v37 = vshll.u32 %v481_v1, 16  ;;  %v1061_v38 = vshrl.u32 %v481_v1, 16 }
  0x74   : > { %403 = vst.msk [vmem:[#allocation2 + $0x9c] sm:$0xf] %vm363_vm3, %v342_v33  ;;  %v341_v39 = vld [vmem:[%s7518_s23 + $0x98] sm:$0xf]  ;;  %v980_v40 = vsel %vm7529_vm2, %v975_v22, %v7862_v35  ;;  %v1029_v41 = vrot.slane %v1027_v24, 5  ;;  %v1051_v42 = vshrl.u32 %v480_v16, 16  ;;  %v1010_v47 = vsel %vm7529_vm2, %v1005_v30, %v7906_v10 }
  0x75   : > { %1180 = vrot.lane.b32.xlu1 %v970_v17, %s7456_s24  ;;  %v1033_v43 = vrot.slane %v1031_v12, 4  ;;  %402 = vst.msk [vmem:[#allocation2 + $0x98] sm:$0xf] %vm363_vm3, %v341_v39  ;;  %v482_v46 = vld [vmem:[%s7518_s23 + $0xe8] sm:$0xf]  ;;  %v1000_v35 = vsel %vm7529_vm2, %v995_v31, %v7884_v53  ;;  %v1025_v48 = vrot.slane %v1024_v25, 4  ;;  %v1044_v52 = vor.u32 %v1043_v36, %v7937_v28 }
  0x76   : > { %1178 = vrot.lane.b32.xlu0 %v960_v21, %s7456_s24  ;;  %v344_v34 = vld [vmem:[%s7518_s23 + $0xa4] sm:$0xf]  ;;  %v1049_v49 = vrot.slane %v1047_v32, 5  ;;  %v483_v50 = vld [vmem:[%s7518_s23 + $0xec] sm:$0xf]  ;;  %v1015_v45 = vrot.slane %v1014_v23, 4 }
  0x77   : > { %405 = vst.msk [vmem:[#allocation2 + $0xa4] sm:$0xf] %vm363_vm3, %v344_v34  ;;  %v343_v51 = vld [vmem:[%s7518_s23 + $0xa0] sm:$0xf]  ;;  %v7965_v44 = vrot.slane %v1057_v37, 5  ;;  %v1063_v54 = vrot.slane %v1061_v38, 4  ;;  %v1034_v55 = vor.u32 %v1033_v43, %v1029_v41  ;;  %v1030_v0 = vsel %vm7529_vm2, %v1025_v48, %v1029_v41 }
  0x78   : > { %404 = vst.msk [vmem:[#allocation2 + $0xa0] sm:$0xf] %vm363_vm3, %v343_v51  ;;  %v346_v53 = vld [vmem:[%s7518_s23 + $0xac] sm:$0xf]  ;;  %v1067_v56 = vshll.u32 %v482_v46, 16  ;;  %v1071_v57 = vshrl.u32 %v482_v46, 16  ;;  %v1020_v58 = vsel %vm7529_vm2, %v1015_v45, %v7913_v14 }
  0x79   : > { %1184 = vrot.lane.b32.xlu1 %v990_v29, %s7456_s24  ;;  %v1053_v59 = vrot.slane %v1051_v42, 4  ;;  %407 = vst.msk [vmem:[#allocation2 + $0xac] sm:$0xf] %vm363_vm3, %v346_v53  ;;  %v345_v60 = vld [vmem:[%s7518_s23 + $0xa8] sm:$0xf]  ;;  %v1077_v61 = vshll.u32 %v483_v50, 16  ;;  %v1064_v3 = vor.u32 %v1063_v54, %v7965_v44 }
  0x7a   : > { %1182 = vrot.lane.b32.xlu0 %v980_v40, %s7456_s24  ;;  %406 = vst.msk [vmem:[#allocation2 + $0xa8] sm:$0xf] %vm363_vm3, %v345_v60  ;;  %v1081_v62 = vshrl.u32 %v483_v50, 16  ;;  %v348_v63 = vld [vmem:[%s7518_s23 + $0xb4] sm:$0xf]  ;;  %v1045_v2 = vrot.slane %v1044_v52, 4 }
  0x7b   : > { %409 = vst.msk [vmem:[#allocation2 + $0xb4] sm:$0xf] %vm363_vm3, %v348_v63  ;;  %v347_v5 = vld [vmem:[%s7518_s23 + $0xb0] sm:$0xf]  ;;  %v1035_v6 = vrot.slane %v1034_v55, 4  ;;  %v1069_v8 = vrot.slane %v1067_v56, 5  ;;  %v1054_v9 = vor.u32 %v1053_v59, %v1049_v49 }
  0x7c   : > { %v1073_v10 = vrot.slane %v1071_v57, 4  ;;  %408 = vst.msk [vmem:[#allocation2 + $0xb0] sm:$0xf] %vm363_vm3, %v347_v5  ;;  %v350_v11 = vld [vmem:[%s7518_s23 + $0xbc] sm:$0xf]  ;;  %v1079_v4 = vrot.slane %v1077_v61, 5  ;;  %v1050_v7 = vsel %vm7529_vm2, %v1045_v2, %v1049_v49 }
  0x7d   : > { %1188 = vrot.lane.b32.xlu1 %v1010_v47, %s7456_s24  ;;  %v349_v13 = vld [vmem:[%s7518_s23 + $0xb8] sm:$0xf]  ;;  %v1083_v14 = vrot.slane %v1081_v62, 4  ;;  %411 = vst.msk [vmem:[#allocation2 + $0xbc] sm:$0xf] %vm363_vm3, %v350_v11  ;;  %v1065_v15 = vrot.slane %v1064_v3, 4  ;;  %v1040_v16 = vsel %vm7529_vm2, %v1035_v6, %v7937_v28 }
  0x7e   : > { %1186 = vrot.lane.b32.xlu0 %v1000_v35, %s7456_s24  ;;  %410 = vst.msk [vmem:[#allocation2 + $0xb8] sm:$0xf] %vm363_vm3, %v349_v13  ;;  %v1055_v17 = vrot.slane %v1054_v9, 4  ;;  %v1074_v18 = vor.u32 %v1073_v10, %v1069_v8  ;;  %v352_v19 = vld [vmem:[%s7518_s23 + $0xc4] sm:$0xf]  ;;  %vm2344_vm15 = vcmask 257216  }
  0x7f   : > { %413 = vst.msk [vmem:[#allocation2 + $0xc4] sm:$0xf] %vm363_vm3, %v352_v19  ;;  %v351_v1 = vld [vmem:[%s7518_s23 + $0xc0] sm:$0xf]  ;;  %v1084_v20 = vor.u32 %v1083_v14, %v1079_v4  ;;  %v1070_v22 = vsel %vm7529_vm2, %v1065_v15, %v1069_v8  ;;  %v1346_v24 = vld [vmem:[%s7518_s23 + $0x4] sm:$0xf] }
  0x80   : > { %v1345_v21 = vld [vmem:[%s7518_s23] sm:$0xe]  ;;  %412 = vst.msk [vmem:[#allocation2 + $0xc0] sm:$0xf] %vm363_vm3, %v351_v1  ;;  %v354_v12 = vld [vmem:[%s7518_s23 + $0xcc] sm:$0xf]  ;;  %v1060_v29 = vsel %vm7529_vm2, %v1055_v17, %v7965_v44 }
  0x81   : > { %1192 = vrot.lane.b32.xlu1 %v1030_v0, %s7456_s24  ;;  %v353_v26 = vld [vmem:[%s7518_s23 + $0xc8] sm:$0xf]  ;;  %v1075_v30 = vrot.slane %v1074_v18, 4  ;;  %v1331_v31 = vld [vmem:[%s8006_s6] sm:$0x1]  ;;  %v1085_v23 = vrot.slane %v1084_v20, 4 }
  0x82   : > { %1190 = vrot.lane.b32.xlu0 %v1020_v58, %s7456_s24  ;;  %v1347_v25 = vld [vmem:[%s7518_s23 + $0x8] sm:$0xf]  ;;  %415 = vst.msk [vmem:[#allocation2 + $0xcc] sm:$0xf] %vm363_vm3, %v354_v12  ;;  %414 = vst.msk [vmem:[#allocation2 + $0xc8] sm:$0xf] %vm363_vm3, %v353_v26 }
  0x83   : > { %v1348_v32 = vld [vmem:[%s7518_s23 + $0xc] sm:$0xf]  ;;  %v356_v33 = vld [vmem:[%s7518_s23 + $0xd4] sm:$0xf]  ;;  %v7055_v28 = vrot.slane %v1345_v21, 9  ;;  %v1470_v36 = vrot.slane %v1346_v24, 5  ;;  %v1080_v41 = vsel %vm7529_vm2, %v1075_v30, %v1079_v4 }
  0x84   : > { %v1333_v37 = vshll.u32 %v1331_v31, 16  ;;  %v1473_v38 = vrot.slane %v1347_v25, 5  ;;  %417 = vst.msk [vmem:[#allocation2 + $0xd4] sm:$0xf] %vm363_vm3, %v356_v33  ;;  %v355_v39 = vld [vmem:[%s7518_s23 + $0xd0] sm:$0xf] }
  0x85   : > { %1196 = vrot.lane.b32.xlu1 %v1050_v7, %s7456_s24  ;;  %v1349_v43 = vld [vmem:[%s7518_s23 + $0x10] sm:$0xf]  ;;  %416 = vst.msk [vmem:[#allocation2 + $0xd0] sm:$0xf] %vm363_vm3, %v355_v39  ;;  %v358_v34 = vld [vmem:[%s7518_s23 + $0xdc] sm:$0xf]  ;;  %v1471_v35 = vsel %vm8036_vm7, %v7055_v28, %v1470_v36 }
  0x86   : > { %1194 = vrot.lane.b32.xlu0 %v1040_v16, %s7456_s24  ;;  %v357_v47 = vld [vmem:[%s7518_s23 + $0xd8] sm:$0xf]  ;;  %v1476_v27 = vrot.slane %v1348_v32, 5  ;;  %419 = vst.msk [vmem:[#allocation2 + $0xdc] sm:$0xf] %vm363_vm3, %v358_v34  ;;  %v1335_v48 = vrot.slane %v1333_v37, 5 }
  0x87   : > { %418 = vst.msk [vmem:[#allocation2 + $0xd8] sm:$0xf] %vm363_vm3, %v357_v47  ;;  %v1475_v49 = vrot.slane %v1473_v38, 4  ;;  %v1350_v50 = vld [vmem:[%s7518_s23 + $0x14] sm:$0xf]  ;;  %v1479_v51 = vrot.slane %v1349_v43, 5 }
  0x88   : > { %v1472_v52 = vrot.slane %v1470_v36, 4  ;;  %v1351_v44 = vld [vmem:[%s7518_s23 + $0x18] sm:$0xf]  ;;  %v360_v54 = vld [vmem:[%s7518_s23 + $0xe4] sm:$0xf]  ;;  %v1482_v56 = vrot.slane %v1350_v50, 5 }
  0x89   : > { %1200 = vrot.lane.b32.xlu1 %v1070_v22, %s7456_s24  ;;  %421 = vst.msk [vmem:[#allocation2 + $0xe4] sm:$0xf] %vm363_vm3, %v360_v54  ;;  %v359_v55 = vld [vmem:[%s7518_s23 + $0xe0] sm:$0xf]  ;;  %v1477_v57 = vsel %vm8036_vm7, %v1475_v49, %v1476_v27  ;;  %v1481_v59 = vrot.slane %v1479_v51, 4  ;;  %v1485_v60 = vrot.slane %v1351_v44, 5 }
  0x8a   : > { %1198 = vrot.lane.b32.xlu0 %v1060_v29, %s7456_s24  ;;  %420 = vst.msk [vmem:[#allocation2 + $0xe0] sm:$0xf] %vm363_vm3, %v359_v55  ;;  %v362_v61 = vld [vmem:[%s7518_s23 + $0xec] sm:$0xf]  ;;  %v361_v62 = vld [vmem:[%s7518_s23 + $0xe8] sm:$0xf]  ;;  %v1474_v0 = vsel %vm8036_vm7, %v1472_v52, %v1473_v38 }
  0x8b   : > { %v1091_v40 = vpop.permute.xlu1 %1090  ;;  %v1478_v58 = vrot.slane %v1476_v27, 4  ;;  %v1352_v2 = vld [vmem:[%s7518_s23 + $0x1c] sm:$0xf]  ;;  %v1353_v3 = vld [vmem:[%s7518_s23 + $0x20] sm:$0xf]  ;;  %v1483_v6 = vsel %vm8036_vm7, %v1481_v59, %v1482_v56  ;;  %v1487_v8 = vrot.slane %v1485_v60, 4 }
  0x8c   : > { %1269 = vst.msk [vmem:[#allocation2 + $0x8] sm:$0xf] %vm1266_vm6, %v1091_v40  ;;  %v1087_v46 = vpop.permute.xlu0 %1086  ;;  %v1488_v9 = vrot.slane %v1352_v2, 5  ;;  %v1491_v10 = vrot.slane %v1353_v3, 5  ;;  %v1484_v4 = vrot.slane %v1482_v56, 4  ;;  %vm2440_vm4 = vcmask 257219  }
  0x8d   : > { %1267 = vst.msk [vmem:[#allocation2] sm:$0xf] %vm1266_vm6, %v1087_v46  ;;  %1204 = vrot.lane.b32.xlu1 %v1085_v23, %s7456_s24  ;;  %v1480_v13 = vsel %vm8036_vm7, %v1478_v58, %v1479_v51  ;;  %v1354_v14 = vld [vmem:[%s7518_s23 + $0x24] sm:$0xf]  ;;  %v1355_v7 = vld [vmem:[%s7518_s23 + $0x28] sm:$0xf] }
  0x8e   : > { %1202 = vrot.lane.b32.xlu0 %v1080_v41, %s7456_s24  ;;  %423 = vst.msk [vmem:[#allocation2 + $0xec] sm:$0xf] %vm363_vm3, %v362_v61  ;;  %422 = vst.msk [vmem:[#allocation2 + $0xe8] sm:$0xf] %vm363_vm3, %v361_v62  ;;  %v1489_v16 = vsel %vm8036_vm7, %v1487_v8, %v1488_v9  ;;  %v1493_v17 = vrot.slane %v1491_v10, 4  ;;  %v1494_v18 = vrot.slane %v1354_v14, 5  ;;  %v1486_v20 = vsel %vm8036_vm7, %v1484_v4, %v1485_v60 }
  0x8f   : > { %v1093_v45 = vpop.permute.xlu1 %1092  ;;  %v1497_v19 = vrot.slane %v1355_v7, 5  ;;  %v1490_v21 = vrot.slane %v1488_v9, 4  ;;  %v1356_v22 = vld [vmem:[%s7518_s23 + $0x2c] sm:$0xf]  ;;  %v1357_v24 = vld [vmem:[%s7518_s23 + $0x30] sm:$0xf] }
  0x90   : > { %1270 = vst.msk [vmem:[#allocation2 + $0xc] sm:$0xf] %vm1266_vm6, %v1093_v45  ;;  %v1089_v53 = vpop.permute.xlu0 %1088  ;;  %v1495_v26 = vsel %vm8036_vm7, %v1493_v17, %v1494_v18  ;;  %v1500_v30 = vrot.slane %v1356_v22, 5  ;;  %v1503_v31 = vrot.slane %v1357_v24, 5  ;;  %v1496_v32 = vrot.slane %v1494_v18, 4 }
  0x91   : > { %1268 = vst.msk [vmem:[#allocation2 + $0x4] sm:$0xf] %vm1266_vm6, %v1089_v53  ;;  %1647 = vrot.lane.b32.xlu1 %v1471_v35, %s7457_s7  ;;  %v1499_v29 = vrot.slane %v1497_v19, 4  ;;  %v1492_v23 = vsel %vm8036_vm7, %v1490_v21, %v1491_v10  ;;  %v1358_v33 = vld [vmem:[%s7518_s23 + $0x34] sm:$0xf]  ;;  %vm2400_vm3 = vcmask 256192  }
  0x92   : > { %1336 = vrot.lane.b32.xlu0 %v1335_v48, %s7456_s24  ;;  %v1359_v28 = vld [vmem:[%s7518_s23 + $0x38] sm:$0xf]  ;;  %v1505_v38 = vrot.slane %v1503_v31, 4  ;;  %v1506_v39 = vrot.slane %v1358_v33, 5  ;;  %v1498_v43 = vsel %vm8036_vm7, %v1496_v32, %v1497_v19  ;;  %v1502_v46 = vrot.slane %v1500_v30, 4  ;;  %s7462_s24 = smov 56  }
  0x93   : > { %v1097_v63 = vpop.permute.xlu1 %1096  ;;  %v1501_v37 = vsel %vm8036_vm7, %v1499_v29, %v1500_v30  ;;  %v1509_v40 = vrot.slane %v1359_v28, 5  ;;  %v1360_v34 = vld [vmem:[%s7518_s23 + $0x3c] sm:$0xf]  ;;  %v1361_v47 = vld [vmem:[%s7518_s23 + $0x40] sm:$0xf]  ;;  %vm3232_vm5 = vcmask 322816  }
  0x94   : > { %1272 = vst.msk [vmem:[#allocation2 + $0x14] sm:$0xf] %vm1266_vm6, %v1097_v63  ;;  %v1095_v5 = vpop.permute.xlu0 %1094  ;;  %v1507_v35 = vsel %vm8036_vm7, %v1505_v38, %v1506_v39  ;;  %v1512_v49 = vrot.slane %v1360_v34, 5  ;;  %v1515_v50 = vrot.slane %v1361_v47, 5  ;;  %v1504_v45 = vsel %vm8036_vm7, %v1502_v46, %v1503_v31  ;;  %v1362_v44 = vld [vmem:[%s7518_s23 + $0x44] sm:$0xf] }
  0x95   : > { %1271 = vst.msk [vmem:[#allocation2 + $0x10] sm:$0xf] %vm1266_vm6, %v1095_v5  ;;  %1651 = vrot.lane.b32.xlu1 %v1477_v57, %s7457_s7  ;;  %v1511_v48 = vrot.slane %v1509_v40, 4  ;;  %v1508_v52 = vrot.slane %v1506_v39, 4  ;;  %v1363_v54 = vld [vmem:[%s7518_s23 + $0x48] sm:$0xf] }
  0x96   : > { %1649 = vrot.lane.b32.xlu0 %v1474_v0, %s7457_s7  ;;  %v1517_v56 = vrot.slane %v1515_v50, 4  ;;  %v1518_v57 = vrot.slane %v1362_v44, 5  ;;  %v1521_v59 = vrot.slane %v1363_v54, 5  ;;  %v1514_v62 = vrot.slane %v1512_v49, 4  ;;  %v1364_v63 = vld [vmem:[%s7518_s23 + $0x4c] sm:$0xf] }
  0x97   : > { %v1101_v11 = vpop.permute.xlu1 %1100  ;;  %v1513_v55 = vsel %vm8036_vm7, %v1511_v48, %v1512_v49  ;;  %v1510_v61 = vsel %vm8036_vm7, %v1508_v52, %v1509_v40  ;;  %v1365_v0 = vld [vmem:[%s7518_s23 + $0x50] sm:$0xf]  ;;  %v1524_v5 = vrot.slane %v1364_v63, 5  ;;  %vm2502_vm0 = vsmask.f32 2304 }
  0x98   : > { %1274 = vst.msk [vmem:[#allocation2 + $0x1c] sm:$0xf] %vm1266_vm6, %v1101_v11  ;;  %v1099_v15 = vpop.permute.xlu0 %1098  ;;  %v1519_v2 = vsel %vm8036_vm7, %v1517_v56, %v1518_v57  ;;  %v1523_v3 = vrot.slane %v1521_v59, 4  ;;  %v1516_v9 = vsel %vm8036_vm7, %v1514_v62, %v1515_v50  ;;  %v1520_v10 = vrot.slane %v1518_v57, 4  ;;  %v1366_v11 = vld [vmem:[%s7518_s23 + $0x54] sm:$0xf] }
  0x99   : > { %1273 = vst.msk [vmem:[#allocation2 + $0x18] sm:$0xf] %vm1266_vm6, %v1099_v15  ;;  %1655 = vrot.lane.b32.xlu1 %v1483_v6, %s7457_s7  ;;  %v1527_v6 = vrot.slane %v1365_v0, 5  ;;  %v1530_v15 = vrot.slane %v1366_v11, 5  ;;  %v1526_v19 = vrot.slane %v1524_v5, 4  ;;  %vm3361_vm11 = vcmask 322818  }
  0x9a   : > { %1653 = vrot.lane.b32.xlu0 %v1480_v13, %s7457_s7  ;;  %v1367_v13 = vld [vmem:[%s7518_s23 + $0x58] sm:$0xf]  ;;  %v1525_v14 = vsel %vm8036_vm7, %v1523_v3, %v1524_v5  ;;  %v1522_v18 = vsel %vm8036_vm7, %v1520_v10, %v1521_v59  ;;  %vm2503_vm1 = vsmask.f32 6416 }
  0x9b   : > { %v1105_v1 = vpop.permute.xlu1 %1104  ;;  %v1529_v7 = vrot.slane %v1527_v6, 4  ;;  %v1528_v30 = vsel %vm8036_vm7, %v1526_v19, %v1527_v6  ;;  %v1532_v31 = vrot.slane %v1530_v15, 4  ;;  %vm8676_vm2 = vmor %vm2502_vm0, %vm2503_vm1  ;;  %vm6293_vm1 = vcmask 1043456  }
  0x9c   : > { %1276 = vst.msk [vmem:[#allocation2 + $0x24] sm:$0xf] %vm1266_vm6, %v1105_v1  ;;  %v1103_v12 = vpop.permute.xlu0 %1102  ;;  %v1368_v1 = vld [vmem:[%s7518_s23 + $0x5c] sm:$0xf] }
  0x9d   : > { %1275 = vst.msk [vmem:[#allocation2 + $0x20] sm:$0xf] %vm1266_vm6, %v1103_v12  ;;  %1659 = vrot.lane.b32.xlu1 %v1489_v16, %s7457_s7  ;;  %v1533_v16 = vrot.slane %v1367_v13, 5  ;;  %v1531_v22 = vsel %vm8036_vm7, %v1529_v7, %v1530_v15  ;;  %v1536_v12 = vrot.slane %v1368_v1, 5 }
  0x9e   : > { %1657 = vrot.lane.b32.xlu0 %v1486_v20, %s7457_s7  ;;  %v1369_v20 = vld [vmem:[%s7518_s23 + $0x60] sm:$0xf] }
  0x9f   : > { %v1109_v25 = vpop.permute.xlu1 %1108  ;;  %v1535_v24 = vrot.slane %v1533_v16, 4  ;;  %v1534_v39 = vsel %vm8036_vm7, %v1532_v31, %v1533_v16  ;;  %v1538_v40 = vrot.slane %v1536_v12, 4 }
  0xa0   : > { %1278 = vst.msk [vmem:[#allocation2 + $0x2c] sm:$0xf] %vm1266_vm6, %v1109_v25  ;;  %v1107_v36 = vpop.permute.xlu0 %1106  ;;  %v1370_v25 = vld [vmem:[%s7518_s23 + $0x64] sm:$0xf] }
  0xa1   : > { %1277 = vst.msk [vmem:[#allocation2 + $0x28] sm:$0xf] %vm1266_vm6, %v1107_v36  ;;  %1663 = vrot.lane.b32.xlu1 %v1495_v26, %s7457_s7  ;;  %v1539_v26 = vrot.slane %v1369_v20, 5  ;;  %v1537_v33 = vsel %vm8036_vm7, %v1535_v24, %v1536_v12  ;;  %v1542_v36 = vrot.slane %v1370_v25, 5 }
  0xa2   : > { %1661 = vrot.lane.b32.xlu0 %v1492_v23, %s7457_s7  ;;  %v1371_v23 = vld [vmem:[%s7518_s23 + $0x68] sm:$0xf] }
  0xa3   : > { %v1113_v41 = vpop.permute.xlu1 %1112  ;;  %v1541_v28 = vrot.slane %v1539_v26, 4  ;;  %v1540_v49 = vsel %vm8036_vm7, %v1538_v40, %v1539_v26  ;;  %v1544_v50 = vrot.slane %v1542_v36, 4 }
  0xa4   : > { %1280 = vst.msk [vmem:[#allocation2 + $0x34] sm:$0xf] %vm1266_vm6, %v1113_v41  ;;  %v1111_v27 = vpop.permute.xlu0 %1110  ;;  %v1372_v41 = vld [vmem:[%s7518_s23 + $0x6c] sm:$0xf] }
  0xa5   : > { %1279 = vst.msk [vmem:[#allocation2 + $0x30] sm:$0xf] %vm1266_vm6, %v1111_v27  ;;  %1667 = vrot.lane.b32.xlu1 %v1501_v37, %s7457_s7  ;;  %v1545_v37 = vrot.slane %v1371_v23, 5  ;;  %v1543_v34 = vsel %vm8036_vm7, %v1541_v28, %v1542_v36  ;;  %v1548_v27 = vrot.slane %v1372_v41, 5 }
  0xa6   : > { %1665 = vrot.lane.b32.xlu0 %v1498_v43, %s7457_s7  ;;  %v1373_v43 = vld [vmem:[%s7518_s23 + $0x70] sm:$0xf] }
  0xa7   : > { %v1117_v51 = vpop.permute.xlu1 %1116  ;;  %v1547_v47 = vrot.slane %v1545_v37, 4  ;;  %v1546_v57 = vsel %vm8036_vm7, %v1544_v50, %v1545_v37  ;;  %v1550_v59 = vrot.slane %v1548_v27, 4 }
  0xa8   : > { %1282 = vst.msk [vmem:[#allocation2 + $0x3c] sm:$0xf] %vm1266_vm6, %v1117_v51  ;;  %v1115_v53 = vpop.permute.xlu0 %1114  ;;  %v1374_v51 = vld [vmem:[%s7518_s23 + $0x74] sm:$0xf] }
  0xa9   : > { %1281 = vst.msk [vmem:[#allocation2 + $0x38] sm:$0xf] %vm1266_vm6, %v1115_v53  ;;  %1671 = vrot.lane.b32.xlu1 %v1507_v35, %s7457_s7  ;;  %v1551_v35 = vrot.slane %v1373_v43, 5  ;;  %v1549_v44 = vsel %vm8036_vm7, %v1547_v47, %v1548_v27  ;;  %v1554_v53 = vrot.slane %v1374_v51, 5 }
  0xaa   : > { %1669 = vrot.lane.b32.xlu0 %v1504_v45, %s7457_s7  ;;  %v1375_v45 = vld [vmem:[%s7518_s23 + $0x78] sm:$0xf] }
  0xab   : > { %v1121_v60 = vpop.permute.xlu1 %1120  ;;  %v1553_v54 = vrot.slane %v1551_v35, 4  ;;  %v1552_v5 = vsel %vm8036_vm7, %v1550_v59, %v1551_v35  ;;  %v1556_v6 = vrot.slane %v1554_v53, 4 }
  0xac   : > { %1284 = vst.msk [vmem:[#allocation2 + $0x44] sm:$0xf] %vm1266_vm6, %v1121_v60  ;;  %v1119_v58 = vpop.permute.xlu0 %1118  ;;  %v1376_v60 = vld [vmem:[%s7518_s23 + $0x7c] sm:$0xf] }
  0xad   : > { %1283 = vst.msk [vmem:[#allocation2 + $0x40] sm:$0xf] %vm1266_vm6, %v1119_v58  ;;  %1675 = vrot.lane.b32.xlu1 %v1513_v55, %s7457_s7  ;;  %v1557_v55 = vrot.slane %v1375_v45, 5  ;;  %v1555_v63 = vsel %vm8036_vm7, %v1553_v54, %v1554_v53  ;;  %v1560_v58 = vrot.slane %v1376_v60, 5 }
  0xae   : > { %1673 = vrot.lane.b32.xlu0 %v1510_v61, %s7457_s7  ;;  %v1377_v61 = vld [vmem:[%s7518_s23 + $0x80] sm:$0xf] }
  0xaf   : > { %v1125_v8 = vpop.permute.xlu1 %1124  ;;  %v1559_v0 = vrot.slane %v1557_v55, 4  ;;  %v1558_v15 = vsel %vm8036_vm7, %v1556_v6, %v1557_v55  ;;  %v1562_v16 = vrot.slane %v1560_v58, 4 }
  0xb0   : > { %1286 = vst.msk [vmem:[#allocation2 + $0x4c] sm:$0xf] %vm1266_vm6, %v1125_v8  ;;  %v1123_v4 = vpop.permute.xlu0 %1122  ;;  %v1378_v8 = vld [vmem:[%s7518_s23 + $0x84] sm:$0xf] }
  0xb1   : > { %1285 = vst.msk [vmem:[#allocation2 + $0x48] sm:$0xf] %vm1266_vm6, %v1123_v4  ;;  %1679 = vrot.lane.b32.xlu1 %v1519_v2, %s7457_s7  ;;  %v1563_v2 = vrot.slane %v1377_v61, 5  ;;  %v1561_v11 = vsel %vm8036_vm7, %v1559_v0, %v1560_v58  ;;  %v1566_v4 = vrot.slane %v1378_v8, 5 }
  0xb2   : > { %1677 = vrot.lane.b32.xlu0 %v1516_v9, %s7457_s7  ;;  %v1379_v9 = vld [vmem:[%s7518_s23 + $0x88] sm:$0xf] }
  0xb3   : > { %v1129_v17 = vpop.permute.xlu1 %1128  ;;  %v1565_v13 = vrot.slane %v1563_v2, 4  ;;  %v1564_v12 = vsel %vm8036_vm7, %v1562_v16, %v1563_v2  ;;  %v1568_v26 = vrot.slane %v1566_v4, 4 }
  0xb4   : > { %1288 = vst.msk [vmem:[#allocation2 + $0x54] sm:$0xf] %vm1266_vm6, %v1129_v17  ;;  %v1127_v21 = vpop.permute.xlu0 %1126  ;;  %v1380_v17 = vld [vmem:[%s7518_s23 + $0x8c] sm:$0xf] }
  0xb5   : > { %1287 = vst.msk [vmem:[#allocation2 + $0x50] sm:$0xf] %vm1266_vm6, %v1127_v21  ;;  %1683 = vrot.lane.b32.xlu1 %v1525_v14, %s7457_s7  ;;  %v1569_v14 = vrot.slane %v1379_v9, 5  ;;  %v1567_v1 = vsel %vm8036_vm7, %v1565_v13, %v1566_v4  ;;  %v1572_v21 = vrot.slane %v1380_v17, 5 }
  0xb6   : > { %1681 = vrot.lane.b32.xlu0 %v1522_v18, %s7457_s7  ;;  %v1381_v18 = vld [vmem:[%s7518_s23 + $0x90] sm:$0xf] }
  0xb7   : > { %v1133_v29 = vpop.permute.xlu1 %1132  ;;  %v1571_v20 = vrot.slane %v1569_v14, 4  ;;  %v1570_v36 = vsel %vm8036_vm7, %v1568_v26, %v1569_v14  ;;  %v1574_v37 = vrot.slane %v1572_v21, 4 }
  0xb8   : > { %1290 = vst.msk [vmem:[#allocation2 + $0x5c] sm:$0xf] %vm1266_vm6, %v1133_v29  ;;  %v1131_v32 = vpop.permute.xlu0 %1130  ;;  %v1382_v29 = vld [vmem:[%s7518_s23 + $0x94] sm:$0xf] }
  0xb9   : > { %1289 = vst.msk [vmem:[#allocation2 + $0x58] sm:$0xf] %vm1266_vm6, %v1131_v32  ;;  %1687 = vrot.lane.b32.xlu1 %v1531_v22, %s7457_s7  ;;  %v1575_v22 = vrot.slane %v1381_v18, 5  ;;  %v1573_v25 = vsel %vm8036_vm7, %v1571_v20, %v1572_v21  ;;  %v1578_v32 = vrot.slane %v1382_v29, 5 }
  0xba   : > { %1685 = vrot.lane.b32.xlu0 %v1528_v30, %s7457_s7  ;;  %v1383_v30 = vld [vmem:[%s7518_s23 + $0x98] sm:$0xf] }
  0xbb   : > { %v1137_v38 = vpop.permute.xlu1 %1136  ;;  %v1577_v23 = vrot.slane %v1575_v22, 4  ;;  %v1576_v27 = vsel %vm8036_vm7, %v1574_v37, %v1575_v22  ;;  %v1580_v35 = vrot.slane %v1578_v32, 4 }
  0xbc   : > { %1292 = vst.msk [vmem:[#allocation2 + $0x64] sm:$0xf] %vm1266_vm6, %v1137_v38  ;;  %v1135_v46 = vpop.permute.xlu0 %1134  ;;  %v1384_v38 = vld [vmem:[%s7518_s23 + $0x9c] sm:$0xf] }
  0xbd   : > { %1291 = vst.msk [vmem:[#allocation2 + $0x60] sm:$0xf] %vm1266_vm6, %v1135_v46  ;;  %1691 = vrot.lane.b32.xlu1 %v1537_v33, %s7457_s7  ;;  %v1581_v33 = vrot.slane %v1383_v30, 5  ;;  %v1579_v41 = vsel %vm8036_vm7, %v1577_v23, %v1578_v32  ;;  %v1584_v46 = vrot.slane %v1384_v38, 5 }
  0xbe   : > { %1689 = vrot.lane.b32.xlu0 %v1534_v39, %s7457_s7  ;;  %v1385_v39 = vld [vmem:[%s7518_s23 + $0xa0] sm:$0xf] }
  0xbf   : > { %v1141_v48 = vpop.permute.xlu1 %1140  ;;  %v1583_v43 = vrot.slane %v1581_v33, 4  ;;  %v1582_v53 = vsel %vm8036_vm7, %v1580_v35, %v1581_v33  ;;  %v1586_v55 = vrot.slane %v1584_v46, 4 }
  0xc0   : > { %1294 = vst.msk [vmem:[#allocation2 + $0x6c] sm:$0xf] %vm1266_vm6, %v1141_v48  ;;  %v1139_v52 = vpop.permute.xlu0 %1138  ;;  %v1386_v48 = vld [vmem:[%s7518_s23 + $0xa4] sm:$0xf] }
  0xc1   : > { %1293 = vst.msk [vmem:[#allocation2 + $0x68] sm:$0xf] %vm1266_vm6, %v1139_v52  ;;  %1695 = vrot.lane.b32.xlu1 %v1543_v34, %s7457_s7  ;;  %v1587_v34 = vrot.slane %v1385_v39, 5  ;;  %v1585_v51 = vsel %vm8036_vm7, %v1583_v43, %v1584_v46  ;;  %v1590_v52 = vrot.slane %v1386_v48, 5 }
  0xc2   : > { %1693 = vrot.lane.b32.xlu0 %v1540_v49, %s7457_s7  ;;  %v1387_v49 = vld [vmem:[%s7518_s23 + $0xa8] sm:$0xf] }
  0xc3   : > { %v1145_v56 = vpop.permute.xlu1 %1144  ;;  %v1589_v45 = vrot.slane %v1587_v34, 4  ;;  %v1588_v58 = vsel %vm8036_vm7, %v1586_v55, %v1587_v34  ;;  %v1592_v2 = vrot.slane %v1590_v52, 4 }
  0xc4   : > { %1296 = vst.msk [vmem:[#allocation2 + $0x74] sm:$0xf] %vm1266_vm6, %v1145_v56  ;;  %v1143_v62 = vpop.permute.xlu0 %1142  ;;  %v1388_v56 = vld [vmem:[%s7518_s23 + $0xac] sm:$0xf] }
  0xc5   : > { %1295 = vst.msk [vmem:[#allocation2 + $0x70] sm:$0xf] %vm1266_vm6, %v1143_v62  ;;  %1699 = vrot.lane.b32.xlu1 %v1549_v44, %s7457_s7  ;;  %v1593_v44 = vrot.slane %v1387_v49, 5  ;;  %v1591_v60 = vsel %vm8036_vm7, %v1589_v45, %v1590_v52  ;;  %v1596_v62 = vrot.slane %v1388_v56, 5 }
  0xc6   : > { %1697 = vrot.lane.b32.xlu0 %v1546_v57, %s7457_s7  ;;  %v1389_v57 = vld [vmem:[%s7518_s23 + $0xb0] sm:$0xf] }
  0xc7   : > { %v1149_v3 = vpop.permute.xlu1 %1148  ;;  %v1595_v61 = vrot.slane %v1593_v44, 4  ;;  %v1594_v4 = vsel %vm8036_vm7, %v1592_v2, %v1593_v44  ;;  %v1598_v14 = vrot.slane %v1596_v62, 4 }
  0xc8   : > { %1298 = vst.msk [vmem:[#allocation2 + $0x7c] sm:$0xf] %vm1266_vm6, %v1149_v3  ;;  %v1147_v10 = vpop.permute.xlu0 %1146  ;;  %v1390_v3 = vld [vmem:[%s7518_s23 + $0xb4] sm:$0xf] }
  0xc9   : > { %1297 = vst.msk [vmem:[#allocation2 + $0x78] sm:$0xf] %vm1266_vm6, %v1147_v10  ;;  %1703 = vrot.lane.b32.xlu1 %v1555_v63, %s7457_s7  ;;  %v1599_v63 = vrot.slane %v1389_v57, 5  ;;  %v1597_v8 = vsel %vm8036_vm7, %v1595_v61, %v1596_v62  ;;  %v1602_v10 = vrot.slane %v1390_v3, 5 }
  0xca   : > { %1701 = vrot.lane.b32.xlu0 %v1552_v5, %s7457_s7  ;;  %v1391_v5 = vld [vmem:[%s7518_s23 + $0xb8] sm:$0xf] }
  0xcb   : > { %v1153_v7 = vpop.permute.xlu1 %1152  ;;  %v1601_v9 = vrot.slane %v1599_v63, 4  ;;  %v1600_v21 = vsel %vm8036_vm7, %v1598_v14, %v1599_v63  ;;  %v1604_v22 = vrot.slane %v1602_v10, 4  ;;  %v1328_v14 = vld [vmem:[#allocation2 + $0xec] sm:$0xf] }
  0xcc   : > { %1300 = vst.msk [vmem:[#allocation2 + $0x84] sm:$0xf] %vm1266_vm6, %v1153_v7  ;;  %v1151_v19 = vpop.permute.xlu0 %1150  ;;  %v1392_v7 = vld [vmem:[%s7518_s23 + $0xbc] sm:$0xf] }
  0xcd   : > { %1299 = vst.msk [vmem:[#allocation2 + $0x80] sm:$0xf] %vm1266_vm6, %v1151_v19  ;;  %1707 = vrot.lane.b32.xlu1 %v1561_v11, %s7457_s7  ;;  %v1605_v11 = vrot.slane %v1391_v5, 5  ;;  %v1603_v17 = vsel %vm8036_vm7, %v1601_v9, %v1602_v10  ;;  %v1608_v19 = vrot.slane %v1392_v7, 5 }
  0xce   : > { %1705 = vrot.lane.b32.xlu0 %v1558_v15, %s7457_s7  ;;  %v1393_v15 = vld [vmem:[%s7518_s23 + $0xc0] sm:$0xf] }
  0xcf   : > { %v1157_v24 = vpop.permute.xlu1 %1156  ;;  %v1607_v18 = vrot.slane %v1605_v11, 4  ;;  %v1606_v32 = vsel %vm8036_vm7, %v1604_v22, %v1605_v11  ;;  %v1610_v33 = vrot.slane %v1608_v19, 4 }
  0xd0   : > { %1302 = vst.msk [vmem:[#allocation2 + $0x8c] sm:$0xf] %vm1266_vm6, %v1157_v24  ;;  %v1155_v31 = vpop.permute.xlu0 %1154  ;;  %v1394_v24 = vld [vmem:[%s7518_s23 + $0xc4] sm:$0xf] }
  0xd1   : > { %1301 = vst.msk [vmem:[#allocation2 + $0x88] sm:$0xf] %vm1266_vm6, %v1155_v31  ;;  %1711 = vrot.lane.b32.xlu1 %v1567_v1, %s7457_s7  ;;  %v1611_v1 = vrot.slane %v1393_v15, 5  ;;  %v1609_v29 = vsel %vm8036_vm7, %v1607_v18, %v1608_v19  ;;  %v1614_v31 = vrot.slane %v1394_v24, 5  ;;  %v1889_v24 = vld [vmem:[%s8006_s6] sm:$0x1] }
  0xd2   : > { %1709 = vrot.lane.b32.xlu0 %v1564_v12, %s7457_s7  ;;  %v1395_v12 = vld [vmem:[%s7518_s23 + $0xc8] sm:$0xf] }
  0xd3   : > { %v1161_v28 = vpop.permute.xlu1 %1160  ;;  %v1613_v30 = vrot.slane %v1611_v1, 4  ;;  %v1612_v46 = vsel %vm8036_vm7, %v1610_v33, %v1611_v1  ;;  %v1616_v34 = vrot.slane %v1614_v31, 4  ;;  %v1898_v1 = vld [vmem:[%s7518_s23 + $0x14] sm:$0xf] }
  0xd4   : > { %1304 = vst.msk [vmem:[#allocation2 + $0x94] sm:$0xf] %vm1266_vm6, %v1161_v28  ;;  %v1159_v40 = vpop.permute.xlu0 %1158  ;;  %v1396_v28 = vld [vmem:[%s7518_s23 + $0xcc] sm:$0xf] }
  0xd5   : > { %1303 = vst.msk [vmem:[#allocation2 + $0x90] sm:$0xf] %vm1266_vm6, %v1159_v40  ;;  %1715 = vrot.lane.b32.xlu1 %v1573_v25, %s7457_s7  ;;  %v1617_v25 = vrot.slane %v1395_v12, 5  ;;  %v1615_v38 = vsel %vm8036_vm7, %v1613_v30, %v1614_v31  ;;  %v1620_v40 = vrot.slane %v1396_v28, 5  ;;  %v1899_v12 = vld [vmem:[%s7518_s23 + $0x18] sm:$0xf] }
  0xd6   : > { %1713 = vrot.lane.b32.xlu0 %v1570_v36, %s7457_s7  ;;  %v1397_v36 = vld [vmem:[%s7518_s23 + $0xd0] sm:$0xf]  ;;  %v1900_v31 = vld [vmem:[%s7518_s23 + $0x1c] sm:$0xf] }
  0xd7   : > { %v1165_v47 = vpop.permute.xlu1 %1164  ;;  %v1619_v39 = vrot.slane %v1617_v25, 4  ;;  %v1618_v52 = vsel %vm8036_vm7, %v1616_v34, %v1617_v25  ;;  %v1622_v44 = vrot.slane %v1620_v40, 4 }
  0xd8   : > { %1306 = vst.msk [vmem:[#allocation2 + $0x9c] sm:$0xf] %vm1266_vm6, %v1165_v47  ;;  %v1163_v50 = vpop.permute.xlu0 %1162  ;;  %v1398_v47 = vld [vmem:[%s7518_s23 + $0xd4] sm:$0xf] }
  0xd9   : > { %1305 = vst.msk [vmem:[#allocation2 + $0x98] sm:$0xf] %vm1266_vm6, %v1163_v50  ;;  %1719 = vrot.lane.b32.xlu1 %v1579_v41, %s7457_s7  ;;  %v1623_v41 = vrot.slane %v1397_v36, 5  ;;  %v1621_v48 = vsel %vm8036_vm7, %v1619_v39, %v1620_v40  ;;  %v1626_v50 = vrot.slane %v1398_v47, 5 }
  0xda   : > { %1717 = vrot.lane.b32.xlu0 %v1576_v27, %s7457_s7  ;;  %v1399_v27 = vld [vmem:[%s7518_s23 + $0xd8] sm:$0xf] }
  0xdb   : > { %v1169_v54 = vpop.permute.xlu1 %1168  ;;  %v1625_v49 = vrot.slane %v1623_v41, 4  ;;  %v1624_v62 = vsel %vm8036_vm7, %v1622_v44, %v1623_v41  ;;  %v1628_v63 = vrot.slane %v1626_v50, 4  ;;  %v1901_v41 = vld [vmem:[%s7518_s23 + $0x20] sm:$0xf]  ;;  %v1904_v44 = vld [vmem:[%s7518_s23 + $0x2c] sm:$0xf] }
  0xdc   : > { %1308 = vst.msk [vmem:[#allocation2 + $0xa4] sm:$0xf] %vm1266_vm6, %v1169_v54  ;;  %v1167_v59 = vpop.permute.xlu0 %1166  ;;  %v1400_v54 = vld [vmem:[%s7518_s23 + $0xdc] sm:$0xf] }
  0xdd   : > { %1307 = vst.msk [vmem:[#allocation2 + $0xa0] sm:$0xf] %vm1266_vm6, %v1167_v59  ;;  %1723 = vrot.lane.b32.xlu1 %v1585_v51, %s7457_s7  ;;  %v1629_v51 = vrot.slane %v1399_v27, 5  ;;  %v1627_v56 = vsel %vm8036_vm7, %v1625_v49, %v1626_v50  ;;  %v1632_v59 = vrot.slane %v1400_v54, 5 }
  0xde   : > { %1721 = vrot.lane.b32.xlu0 %v1582_v53, %s7457_s7  ;;  %v1401_v53 = vld [vmem:[%s7518_s23 + $0xe0] sm:$0xf] }
  0xdf   : > { %v1173_v0 = vpop.permute.xlu1 %1172  ;;  %v1631_v57 = vrot.slane %v1629_v51, 4  ;;  %v1630_v10 = vsel %vm8036_vm7, %v1628_v63, %v1629_v51  ;;  %v1634_v11 = vrot.slane %v1632_v59, 4  ;;  %v1906_v63 = vld [vmem:[%s7518_s23 + $0x34] sm:$0xf] }
  0xe0   : > { %1310 = vst.msk [vmem:[#allocation2 + $0xac] sm:$0xf] %vm1266_vm6, %v1173_v0  ;;  %v1171_v6 = vpop.permute.xlu0 %1170  ;;  %v1402_v0 = vld [vmem:[%s7518_s23 + $0xe4] sm:$0xf] }
  0xe1   : > { %1309 = vst.msk [vmem:[#allocation2 + $0xa8] sm:$0xf] %vm1266_vm6, %v1171_v6  ;;  %1727 = vrot.lane.b32.xlu1 %v1591_v60, %s7457_s7  ;;  %v1635_v60 = vrot.slane %v1401_v53, 5  ;;  %v1633_v3 = vsel %vm8036_vm7, %v1631_v57, %v1632_v59  ;;  %v1638_v6 = vrot.slane %v1402_v0, 5  ;;  %v2029_v57 = vrot.slane %v1904_v44, 5 }
  0xe2   : > { %1725 = vrot.lane.b32.xlu0 %v1588_v58, %s7457_s7  ;;  %v1403_v58 = vld [vmem:[%s7518_s23 + $0xe8] sm:$0xf] }
  0xe3   : > { %v1177_v13 = vpop.permute.xlu1 %1176  ;;  %v1637_v5 = vrot.slane %v1635_v60, 4  ;;  %v1636_v18 = vsel %vm8036_vm7, %v1634_v11, %v1635_v60  ;;  %v1640_v19 = vrot.slane %v1638_v6, 4  ;;  %v1908_v11 = vld [vmem:[%s7518_s23 + $0x3c] sm:$0xf] }
  0xe4   : > { %1312 = vst.msk [vmem:[#allocation2 + $0xb4] sm:$0xf] %vm1266_vm6, %v1177_v13  ;;  %v1175_v16 = vpop.permute.xlu0 %1174  ;;  %v1404_v13 = vld [vmem:[%s7518_s23 + $0xec] sm:$0xf] }
  0xe5   : > { %1311 = vst.msk [vmem:[#allocation2 + $0xb0] sm:$0xf] %vm1266_vm6, %v1175_v16  ;;  %1731 = vrot.lane.b32.xlu1 %v1597_v8, %s7457_s7  ;;  %v1641_v8 = vrot.slane %v1403_v58, 5  ;;  %v1639_v7 = vsel %vm8036_vm7, %v1637_v5, %v1638_v6  ;;  %v1644_v16 = vrot.slane %v1404_v13, 5  ;;  %v2035_v5 = vrot.slane %v1906_v63, 5 }
  0xe6   : > { %1729 = vrot.lane.b32.xlu0 %v1594_v4, %s7457_s7 }
  0xe7   : > { %v1181_v20 = vpop.permute.xlu1 %1180  ;;  %v1643_v15 = vrot.slane %v1641_v8, 4  ;;  %v1642_v30 = vsel %vm8036_vm7, %v1640_v19, %v1641_v8  ;;  %v1646_v28 = vrot.slane %v1644_v16, 4  ;;  %v1909_v19 = vld [vmem:[%s7518_s23 + $0x40] sm:$0xf] }
  0xe8   : > { %1314 = vst.msk [vmem:[#allocation2 + $0xbc] sm:$0xf] %vm1266_vm6, %v1181_v20  ;;  %v1179_v26 = vpop.permute.xlu0 %1178 }
  0xe9   : > { %1313 = vst.msk [vmem:[#allocation2 + $0xb8] sm:$0xf] %vm1266_vm6, %v1179_v26  ;;  %1735 = vrot.lane.b32.xlu1 %v1603_v17, %s7457_s7  ;;  %v1645_v22 = vsel %vm8036_vm7, %v1643_v15, %v1644_v16  ;;  %v2011_v26 = vrot.slane %v1898_v1, 5  ;;  %v2041_v15 = vrot.slane %v1908_v11, 5  ;;  %v1910_v1 = vld [vmem:[%s7518_s23 + $0x44] sm:$0xf] }
  0xea   : > { %1733 = vrot.lane.b32.xlu0 %v1600_v21, %s7457_s7 }
  0xeb   : > { %v1185_v23 = vpop.permute.xlu1 %1184  ;;  %v2013_v36 = vrot.slane %v2011_v26, 4 }
  0xec   : > { %1316 = vst.msk [vmem:[#allocation2 + $0xc4] sm:$0xf] %vm1266_vm6, %v1185_v23  ;;  %v1183_v37 = vpop.permute.xlu0 %1182  ;;  %v1897_v23 = vld [vmem:[%s7518_s23 + $0x10] sm:$0xe] }
  0xed   : > { %1315 = vst.msk [vmem:[#allocation2 + $0xc0] sm:$0xf] %vm1266_vm6, %v1183_v37  ;;  %1739 = vrot.lane.b32.xlu1 %v1609_v29, %s7457_s7  ;;  %v2014_v37 = vrot.slane %v1899_v12, 5  ;;  %v7056_v40 = vrot.slane %v1897_v23, 9  ;;  %v2047_v12 = vrot.slane %v1910_v1, 5 }
  0xee   : > { %1737 = vrot.lane.b32.xlu0 %v1606_v32, %s7457_s7  ;;  %v1891_v32 = vrot.slane %v1889_v24, 5  ;;  %v2044_v24 = vrot.slane %v1909_v19, 5 }
  0xef   : > { %v1189_v43 = vpop.permute.xlu1 %1188  ;;  %v2015_v27 = vsel %vm8036_vm7, %v2013_v36, %v2014_v37  ;;  %v2012_v51 = vsel %vm8036_vm7, %v7056_v40, %v2011_v26  ;;  %v2049_v33 = vrot.slane %v2047_v12, 4  ;;  %v1913_v40 = vld [vmem:[%s7518_s23 + $0x50] sm:$0xf] }
  0xf0   : > { %1318 = vst.msk [vmem:[#allocation2 + $0xcc] sm:$0xf] %vm1266_vm6, %v1189_v43  ;;  %v1187_v35 = vpop.permute.xlu0 %1186  ;;  %v1902_v43 = vld [vmem:[%s7518_s23 + $0x24] sm:$0xf] }
  0xf1   : > { %1317 = vst.msk [vmem:[#allocation2 + $0xc8] sm:$0xf] %vm1266_vm6, %v1187_v35  ;;  %1743 = vrot.lane.b32.xlu1 %v1615_v38, %s7457_s7  ;;  %v2017_v38 = vrot.slane %v1900_v31, 5  ;;  %v2023_v49 = vrot.slane %v1902_v43, 5  ;;  %v1911_v31 = vld [vmem:[%s7518_s23 + $0x48] sm:$0xf] }
  0xf2   : > { %1741 = vrot.lane.b32.xlu0 %v1612_v46, %s7457_s7 }
  0xf3   : > { %v1193_v45 = vpop.permute.xlu1 %1192  ;;  %v2019_v35 = vrot.slane %v2017_v38, 4 }
  0xf4   : > { %1320 = vst.msk [vmem:[#allocation2 + $0xd4] sm:$0xf] %vm1266_vm6, %v1193_v45  ;;  %v1191_v55 = vpop.permute.xlu0 %1190  ;;  %v2016_v45 = vrot.slane %v2014_v37, 4 }
  0xf5   : > { %1319 = vst.msk [vmem:[#allocation2 + $0xd0] sm:$0xf] %vm1266_vm6, %v1191_v55  ;;  %1747 = vrot.lane.b32.xlu1 %v1621_v48, %s7457_s7  ;;  %v2020_v48 = vrot.slane %v1901_v41, 5  ;;  %v2025_v55 = vrot.slane %v2023_v49, 4  ;;  %v1914_v41 = vld [vmem:[%s7518_s23 + $0x54] sm:$0xf] }
  0xf6   : > { %1745 = vrot.lane.b32.xlu0 %v1618_v52, %s7457_s7  ;;  %v1903_v52 = vld [vmem:[%s7518_s23 + $0x28] sm:$0xf]  ;;  %v2018_v60 = vsel %vm8036_vm7, %v2016_v45, %v2017_v38 }
  0xf7   : > { %v1197_v61 = vpop.permute.xlu1 %1196  ;;  %v2021_v53 = vsel %vm8036_vm7, %v2019_v35, %v2020_v48 }
  0xf8   : > { %1322 = vst.msk [vmem:[#allocation2 + $0xdc] sm:$0xf] %vm1266_vm6, %v1197_v61  ;;  %v1195_v2 = vpop.permute.xlu0 %1194  ;;  %v2022_v61 = vrot.slane %v2020_v48, 4 }
  0xf9   : > { %1321 = vst.msk [vmem:[#allocation2 + $0xd8] sm:$0xf] %vm1266_vm6, %v1195_v2  ;;  %1751 = vrot.lane.b32.xlu1 %v1627_v56, %s7457_s7  ;;  %v2026_v56 = vrot.slane %v1903_v52, 5  ;;  %v2031_v2 = vrot.slane %v2029_v57, 4 }
  0xfa   : > { %1749 = vrot.lane.b32.xlu0 %v1624_v62, %s7457_s7  ;;  %v1905_v62 = vld [vmem:[%s7518_s23 + $0x30] sm:$0xf]  ;;  %v2024_v8 = vsel %vm8036_vm7, %v2022_v61, %v2023_v49 }
  0xfb   : > { %v1201_v9 = vpop.permute.xlu1 %1200  ;;  %v2027_v58 = vsel %vm8036_vm7, %v2025_v55, %v2026_v56 }
  0xfc   : > { %1324 = vst.msk [vmem:[#allocation2 + $0xe4] sm:$0xf] %vm1266_vm6, %v1201_v9  ;;  %v1199_v4 = vpop.permute.xlu0 %1198  ;;  %v2028_v9 = vrot.slane %v2026_v56, 4 }
  0xfd   : > { %1323 = vst.msk [vmem:[#allocation2 + $0xe0] sm:$0xf] %vm1266_vm6, %v1199_v4  ;;  %1755 = vrot.lane.b32.xlu1 %v1633_v3, %s7457_s7  ;;  %v2032_v3 = vrot.slane %v1905_v62, 5 }
  0xfe   : > { %1753 = vrot.lane.b32.xlu0 %v1630_v10, %s7457_s7  ;;  %v1907_v10 = vld [vmem:[%s7518_s23 + $0x38] sm:$0xf] }
  0xff   : > { %v1205_v17 = vpop.permute.xlu1 %1204  ;;  %v2033_v4 = vsel %vm8036_vm7, %v2031_v2, %v2032_v3 }
 0x100   : > { %v1329_v20 = vsel %vm1327_vm8, %v1205_v17, %v1328_v14  ;;  %v1203_v21 = vpop.permute.xlu0 %1202  ;;  %v2037_v14 = vrot.slane %v2035_v5, 4  ;;  %v2030_v17 = vsel %vm8036_vm7, %v2028_v9, %v2029_v57 }
 0x101   : > { %1330 = vst [vmem:[#allocation2 + $0xec] sm:$0xf] %v1329_v20  ;;  %1325 = vst.msk [vmem:[#allocation2 + $0xe8] sm:$0xf] %vm1266_vm6, %v1203_v21  ;;  %1759 = vrot.lane.b32.xlu1 %v1639_v7, %s7457_s7  ;;  %v2038_v7 = vrot.slane %v1907_v10, 5  ;;  %vm3483_vm6 = vcmask 1041408  }
 0x102   : > { %1757 = vrot.lane.b32.xlu0 %v1636_v18, %s7457_s7  ;;  %v2034_v18 = vrot.slane %v2032_v3, 4 }
 0x103   : > { %v1648_v29 = vpop.permute.xlu1 %1647  ;;  %v2039_v21 = vsel %vm8036_vm7, %v2037_v14, %v2038_v7 }
 0x104   : > { %1828 = vst.msk [vmem:[#allocation2] sm:$0xf] %vm1827_vm9, %v1648_v29  ;;  %v1337_v25 = vpop.permute.xlu0 %1336  ;;  %v2036_v29 = vsel %vm8036_vm7, %v2034_v18, %v2035_v5 }
 0x105   : > { %1763 = vrot.lane.b32.xlu1 %v1645_v22, %s7457_s7  ;;  %v2043_v22 = vrot.slane %v2041_v15, 4 }
 0x106   : > { %1761 = vrot.lane.b32.xlu0 %v1642_v30, %s7457_s7  ;;  %v2040_v30 = vrot.slane %v2038_v7, 4 }
 0x107   : > { %v1652_v39 = vpop.permute.xlu1 %1651 }
 0x108   : > { %v1342_v46 = vld [vmem:[#allocation2 + $0xec] sm:$0x8]  ;;  %1830 = vst.msk [vmem:[#allocation2 + $0x8] sm:$0xf] %vm1827_vm9, %v1652_v39  ;;  %v1650_v34 = vpop.permute.xlu0 %1649  ;;  %v2042_v38 = vsel %vm8036_vm7, %v2040_v30, %v2041_v15  ;;  %v2046_v39 = vrot.slane %v2044_v24, 4 }
 0x109   : > { %v1343_v47 = vsel %vm8355_vm12, %v1337_v25, %v1342_v46  ;;  %1829 = vst.msk [vmem:[#allocation2 + $0x4] sm:$0xf] %vm1827_vm9, %v1650_v34  ;;  %1892 = vrot.lane.b32.xlu1 %v1891_v32, %s7457_s7  ;;  %v1912_v25 = vld [vmem:[%s7518_s23 + $0x4c] sm:$0xf]  ;;  %v2045_v32 = vsel %vm8036_vm7, %v2043_v22, %v2044_v24  ;;  %vm3362_vm12 = vsmask.f32 7946 }
 0x10a   : > { %1344 = vst [vmem:[#allocation2 + $0xec] sm:$0x8] %v1343_v47  ;;  %1765 = vrot.lane.b32.xlu0 %v1646_v28, %s7457_s7  ;;  %v2050_v28 = vrot.slane %v1911_v31, 5  ;;  %v2053_v36 = vrot.slane %v1912_v25, 5  ;;  %v2056_v47 = vrot.slane %v1913_v40, 5  ;;  %v2048_v48 = vsel %vm8036_vm7, %v2046_v39, %v2047_v12  ;;  %s10550_s7 = scalar_lea.vmem %s10807_s4, %s7052_s20 }
 0x10b   : > { %v1656_v50 = vpop.permute.xlu1 %1655 }
 0x10c   : > { %1832 = vst.msk [vmem:[#allocation2 + $0x10] sm:$0xf] %vm1827_vm9, %v1656_v50  ;;  %v1654_v54 = vpop.permute.xlu0 %1653  ;;  %v2051_v46 = vsel %vm8036_vm7, %v2049_v33, %v2050_v28  ;;  %v2055_v34 = vrot.slane %v2053_v36, 4  ;;  %v2052_v49 = vrot.slane %v2050_v28, 4  ;;  %v1915_v50 = vld [vmem:[%s7518_s23 + $0x58] sm:$0xf] }
 0x10d   : > { %1831 = vst.msk [vmem:[#allocation2 + $0xc] sm:$0xf] %vm1827_vm9, %v1654_v54  ;;  %2178 = vrot.lane.b32.xlu1 %v2015_v27, %s7458_s8  ;;  %v2059_v27 = vrot.slane %v1914_v41, 5  ;;  %v2062_v54 = vrot.slane %v1915_v50, 5  ;;  %v2058_v57 = vrot.slane %v2056_v47, 4 }
 0x10e   : > { %2176 = vrot.lane.b32.xlu0 %v2012_v51, %s7458_s8  ;;  %v1916_v51 = vld [vmem:[%s7518_s23 + $0x5c] sm:$0xf]  ;;  %v2057_v52 = vsel %vm8036_vm7, %v2055_v34, %v2056_v47  ;;  %v2054_v56 = vsel %vm8036_vm7, %v2052_v49, %v2053_v36 }
 0x10f   : > { %v1660_v59 = vpop.permute.xlu1 %1659  ;;  %v2061_v44 = vrot.slane %v2059_v27, 4  ;;  %v2060_v3 = vsel %vm8036_vm7, %v2058_v57, %v2059_v27  ;;  %v2064_v5 = vrot.slane %v2062_v54, 4 }
 0x110   : > { %1834 = vst.msk [vmem:[#allocation2 + $0x18] sm:$0xf] %vm1827_vm9, %v1660_v59  ;;  %v1658_v0 = vpop.permute.xlu0 %1657  ;;  %v1917_v59 = vld [vmem:[%s7518_s23 + $0x60] sm:$0xf] }
 0x111   : > { %1833 = vst.msk [vmem:[#allocation2 + $0x14] sm:$0xf] %vm1827_vm9, %v1658_v0  ;;  %2182 = vrot.lane.b32.xlu1 %v2021_v53, %s7458_s8  ;;  %v2065_v53 = vrot.slane %v1916_v51, 5  ;;  %v2063_v62 = vsel %vm8036_vm7, %v2061_v44, %v2062_v54  ;;  %v2068_v0 = vrot.slane %v1917_v59, 5 }
 0x112   : > { %2180 = vrot.lane.b32.xlu0 %v2018_v60, %s7458_s8  ;;  %v1918_v60 = vld [vmem:[%s7518_s23 + $0x64] sm:$0xf] }
 0x113   : > { %v1664_v6 = vpop.permute.xlu1 %1663  ;;  %v2067_v63 = vrot.slane %v2065_v53, 4  ;;  %v2066_v7 = vsel %vm8036_vm7, %v2064_v5, %v2065_v53  ;;  %v2070_v15 = vrot.slane %v2068_v0, 4 }
 0x114   : > { %1836 = vst.msk [vmem:[#allocation2 + $0x20] sm:$0xf] %vm1827_vm9, %v1664_v6  ;;  %v1662_v13 = vpop.permute.xlu0 %1661  ;;  %v1919_v6 = vld [vmem:[%s7518_s23 + $0x68] sm:$0xf] }
 0x115   : > { %1835 = vst.msk [vmem:[#allocation2 + $0x1c] sm:$0xf] %vm1827_vm9, %v1662_v13  ;;  %2186 = vrot.lane.b32.xlu1 %v2027_v58, %s7458_s8  ;;  %v2071_v58 = vrot.slane %v1918_v60, 5  ;;  %v2069_v10 = vsel %vm8036_vm7, %v2067_v63, %v2068_v0  ;;  %v2074_v13 = vrot.slane %v1919_v6, 5 }
 0x116   : > { %2184 = vrot.lane.b32.xlu0 %v2024_v8, %s7458_s8  ;;  %v1920_v8 = vld [vmem:[%s7518_s23 + $0x6c] sm:$0xf] }
 0x117   : > { %v1668_v16 = vpop.permute.xlu1 %1667  ;;  %v2073_v11 = vrot.slane %v2071_v58, 4  ;;  %v2072_v24 = vsel %vm8036_vm7, %v2070_v15, %v2071_v58  ;;  %v2076_v12 = vrot.slane %v2074_v13, 4 }
 0x118   : > { %1838 = vst.msk [vmem:[#allocation2 + $0x28] sm:$0xf] %vm1827_vm9, %v1668_v16  ;;  %v1666_v20 = vpop.permute.xlu0 %1665  ;;  %v1921_v16 = vld [vmem:[%s7518_s23 + $0x70] sm:$0xf] }
 0x119   : > { %1837 = vst.msk [vmem:[#allocation2 + $0x24] sm:$0xf] %vm1827_vm9, %v1666_v20  ;;  %2190 = vrot.lane.b32.xlu1 %v2033_v4, %s7458_s8  ;;  %v2077_v4 = vrot.slane %v1920_v8, 5  ;;  %v2075_v19 = vsel %vm8036_vm7, %v2073_v11, %v2074_v13  ;;  %v2080_v20 = vrot.slane %v1921_v16, 5 }
 0x11a   : > { %2188 = vrot.lane.b32.xlu0 %v2030_v17, %s7458_s8  ;;  %v1922_v17 = vld [vmem:[%s7518_s23 + $0x74] sm:$0xf] }
 0x11b   : > { %v1672_v26 = vpop.permute.xlu1 %1671  ;;  %v2079_v1 = vrot.slane %v2077_v4, 4  ;;  %v2078_v28 = vsel %vm8036_vm7, %v2076_v12, %v2077_v4  ;;  %v2082_v36 = vrot.slane %v2080_v20, 4 }
 0x11c   : > { %1840 = vst.msk [vmem:[#allocation2 + $0x30] sm:$0xf] %vm1827_vm9, %v1672_v26  ;;  %v1670_v23 = vpop.permute.xlu0 %1669  ;;  %v1923_v26 = vld [vmem:[%s7518_s23 + $0x78] sm:$0xf] }
 0x11d   : > { %1839 = vst.msk [vmem:[#allocation2 + $0x2c] sm:$0xf] %vm1827_vm9, %v1670_v23  ;;  %2194 = vrot.lane.b32.xlu1 %v2039_v21, %s7458_s8  ;;  %v2083_v21 = vrot.slane %v1922_v17, 5  ;;  %v2081_v31 = vsel %vm8036_vm7, %v2079_v1, %v2080_v20  ;;  %v2086_v23 = vrot.slane %v1923_v26, 5 }
 0x11e   : > { %2192 = vrot.lane.b32.xlu0 %v2036_v29, %s7458_s8  ;;  %v1924_v29 = vld [vmem:[%s7518_s23 + $0x7c] sm:$0xf] }
 0x11f   : > { %v1676_v37 = vpop.permute.xlu1 %1675  ;;  %v2085_v25 = vrot.slane %v2083_v21, 4  ;;  %v2084_v47 = vsel %vm8036_vm7, %v2082_v36, %v2083_v21  ;;  %v2088_v27 = vrot.slane %v2086_v23, 4 }
 0x120   : > { %1842 = vst.msk [vmem:[#allocation2 + $0x38] sm:$0xf] %vm1827_vm9, %v1676_v37  ;;  %v1674_v43 = vpop.permute.xlu0 %1673  ;;  %v1925_v37 = vld [vmem:[%s7518_s23 + $0x80] sm:$0xf] }
 0x121   : > { %1841 = vst.msk [vmem:[#allocation2 + $0x34] sm:$0xf] %vm1827_vm9, %v1674_v43  ;;  %2198 = vrot.lane.b32.xlu1 %v2045_v32, %s7458_s8  ;;  %v2089_v32 = vrot.slane %v1924_v29, 5  ;;  %v2087_v40 = vsel %vm8036_vm7, %v2085_v25, %v2086_v23  ;;  %v2092_v43 = vrot.slane %v1925_v37, 5 }
 0x122   : > { %2196 = vrot.lane.b32.xlu0 %v2042_v38, %s7458_s8  ;;  %v1926_v38 = vld [vmem:[%s7518_s23 + $0x84] sm:$0xf] }
 0x123   : > { %v1680_v35 = vpop.permute.xlu1 %1679  ;;  %v2091_v41 = vrot.slane %v2089_v32, 4  ;;  %v2090_v54 = vsel %vm8036_vm7, %v2088_v27, %v2089_v32  ;;  %v2094_v53 = vrot.slane %v2092_v43, 4 }
 0x124   : > { %1844 = vst.msk [vmem:[#allocation2 + $0x40] sm:$0xf] %vm1827_vm9, %v1680_v35  ;;  %v1678_v45 = vpop.permute.xlu0 %1677  ;;  %v1927_v35 = vld [vmem:[%s7518_s23 + $0x88] sm:$0xf] }
 0x125   : > { %1843 = vst.msk [vmem:[#allocation2 + $0x3c] sm:$0xf] %vm1827_vm9, %v1678_v45  ;;  %2202 = vrot.lane.b32.xlu1 %v2051_v46, %s7458_s8  ;;  %v2095_v46 = vrot.slane %v1926_v38, 5  ;;  %v2093_v50 = vsel %vm8036_vm7, %v2091_v41, %v2092_v43  ;;  %v2098_v45 = vrot.slane %v1927_v35, 5 }
 0x126   : > { %2200 = vrot.lane.b32.xlu0 %v2048_v48, %s7458_s8  ;;  %v1928_v48 = vld [vmem:[%s7518_s23 + $0x8c] sm:$0xf] }
 0x127   : > { %v1684_v55 = vpop.permute.xlu1 %1683  ;;  %v2097_v51 = vrot.slane %v2095_v46, 4  ;;  %v2096_v0 = vsel %vm8036_vm7, %v2094_v53, %v2095_v46  ;;  %v2100_v58 = vrot.slane %v2098_v45, 4 }
 0x128   : > { %1846 = vst.msk [vmem:[#allocation2 + $0x48] sm:$0xf] %vm1827_vm9, %v1684_v55  ;;  %v1682_v61 = vpop.permute.xlu0 %1681  ;;  %v1929_v55 = vld [vmem:[%s7518_s23 + $0x90] sm:$0xf] }
 0x129   : > { %1845 = vst.msk [vmem:[#allocation2 + $0x44] sm:$0xf] %vm1827_vm9, %v1682_v61  ;;  %2206 = vrot.lane.b32.xlu1 %v2057_v52, %s7458_s8  ;;  %v2101_v52 = vrot.slane %v1928_v48, 5  ;;  %v2099_v59 = vsel %vm8036_vm7, %v2097_v51, %v2098_v45  ;;  %v2104_v61 = vrot.slane %v1929_v55, 5 }
 0x12a   : > { %2204 = vrot.lane.b32.xlu0 %v2054_v56, %s7458_s8  ;;  %v1930_v56 = vld [vmem:[%s7518_s23 + $0x94] sm:$0xf] }
 0x12b   : > { %v1688_v2 = vpop.permute.xlu1 %1687  ;;  %v2103_v60 = vrot.slane %v2101_v52, 4  ;;  %v2102_v13 = vsel %vm8036_vm7, %v2100_v58, %v2101_v52  ;;  %v2106_v4 = vrot.slane %v2104_v61, 4 }
 0x12c   : > { %1848 = vst.msk [vmem:[#allocation2 + $0x50] sm:$0xf] %vm1827_vm9, %v1688_v2  ;;  %v1686_v9 = vpop.permute.xlu0 %1685  ;;  %v1931_v2 = vld [vmem:[%s7518_s23 + $0x98] sm:$0xf] }
 0x12d   : > { %1847 = vst.msk [vmem:[#allocation2 + $0x4c] sm:$0xf] %vm1827_vm9, %v1686_v9  ;;  %2210 = vrot.lane.b32.xlu1 %v2063_v62, %s7458_s8  ;;  %v2107_v62 = vrot.slane %v1930_v56, 5  ;;  %v2105_v6 = vsel %vm8036_vm7, %v2103_v60, %v2104_v61  ;;  %v2110_v9 = vrot.slane %v1931_v2, 5 }
 0x12e   : > { %2208 = vrot.lane.b32.xlu0 %v2060_v3, %s7458_s8  ;;  %v1932_v3 = vld [vmem:[%s7518_s23 + $0x9c] sm:$0xf] }
 0x12f   : > { %v1692_v14 = vpop.permute.xlu1 %1691  ;;  %v2109_v8 = vrot.slane %v2107_v62, 4  ;;  %v2108_v20 = vsel %vm8036_vm7, %v2106_v4, %v2107_v62  ;;  %v2112_v21 = vrot.slane %v2110_v9, 4 }
 0x130   : > { %1850 = vst.msk [vmem:[#allocation2 + $0x58] sm:$0xf] %vm1827_vm9, %v1692_v14  ;;  %v1690_v18 = vpop.permute.xlu0 %1689  ;;  %v1933_v14 = vld [vmem:[%s7518_s23 + $0xa0] sm:$0xf] }
 0x131   : > { %1849 = vst.msk [vmem:[#allocation2 + $0x54] sm:$0xf] %vm1827_vm9, %v1690_v18  ;;  %2214 = vrot.lane.b32.xlu1 %v2069_v10, %s7458_s8  ;;  %v2113_v10 = vrot.slane %v1932_v3, 5  ;;  %v2111_v16 = vsel %vm8036_vm7, %v2109_v8, %v2110_v9  ;;  %v2116_v18 = vrot.slane %v1933_v14, 5 }
 0x132   : > { %2212 = vrot.lane.b32.xlu0 %v2066_v7, %s7458_s8  ;;  %v1934_v7 = vld [vmem:[%s7518_s23 + $0xa4] sm:$0xf] }
 0x133   : > { %v1696_v22 = vpop.permute.xlu1 %1695  ;;  %v2115_v17 = vrot.slane %v2113_v10, 4  ;;  %v2114_v23 = vsel %vm8036_vm7, %v2112_v21, %v2113_v10  ;;  %v2118_v32 = vrot.slane %v2116_v18, 4 }
 0x134   : > { %1852 = vst.msk [vmem:[#allocation2 + $0x60] sm:$0xf] %vm1827_vm9, %v1696_v22  ;;  %v1694_v30 = vpop.permute.xlu0 %1693  ;;  %v1935_v22 = vld [vmem:[%s7518_s23 + $0xa8] sm:$0xf] }
 0x135   : > { %1851 = vst.msk [vmem:[#allocation2 + $0x5c] sm:$0xf] %vm1827_vm9, %v1694_v30  ;;  %2218 = vrot.lane.b32.xlu1 %v2075_v19, %s7458_s8  ;;  %v2119_v19 = vrot.slane %v1934_v7, 5  ;;  %v2117_v26 = vsel %vm8036_vm7, %v2115_v17, %v2116_v18  ;;  %v2122_v30 = vrot.slane %v1935_v22, 5 }
 0x136   : > { %2216 = vrot.lane.b32.xlu0 %v2072_v24, %s7458_s8  ;;  %v1936_v24 = vld [vmem:[%s7518_s23 + $0xac] sm:$0xf] }
 0x137   : > { %v1700_v33 = vpop.permute.xlu1 %1699  ;;  %v2121_v29 = vrot.slane %v2119_v19, 4  ;;  %v2120_v43 = vsel %vm8036_vm7, %v2118_v32, %v2119_v19  ;;  %v2124_v46 = vrot.slane %v2122_v30, 4 }
 0x138   : > { %1854 = vst.msk [vmem:[#allocation2 + $0x68] sm:$0xf] %vm1827_vm9, %v1700_v33  ;;  %v1698_v39 = vpop.permute.xlu0 %1697  ;;  %v1937_v33 = vld [vmem:[%s7518_s23 + $0xb0] sm:$0xf] }
 0x139   : > { %1853 = vst.msk [vmem:[#allocation2 + $0x64] sm:$0xf] %vm1827_vm9, %v1698_v39  ;;  %2222 = vrot.lane.b32.xlu1 %v2081_v31, %s7458_s8  ;;  %v2125_v31 = vrot.slane %v1936_v24, 5  ;;  %v2123_v37 = vsel %vm8036_vm7, %v2121_v29, %v2122_v30  ;;  %v2128_v39 = vrot.slane %v1937_v33, 5 }
 0x13a   : > { %2220 = vrot.lane.b32.xlu0 %v2078_v28, %s7458_s8  ;;  %v1938_v28 = vld [vmem:[%s7518_s23 + $0xb4] sm:$0xf] }
 0x13b   : > { %v1704_v34 = vpop.permute.xlu1 %1703  ;;  %v2127_v38 = vrot.slane %v2125_v31, 4  ;;  %v2126_v45 = vsel %vm8036_vm7, %v2124_v46, %v2125_v31  ;;  %v2130_v52 = vrot.slane %v2128_v39, 4  ;;  %v1952_v46 = vld [vmem:[%s7518_s23 + $0xec] sm:$0xf] }
 0x13c   : > { %1856 = vst.msk [vmem:[#allocation2 + $0x70] sm:$0xf] %vm1827_vm9, %v1704_v34  ;;  %v1702_v49 = vpop.permute.xlu0 %1701  ;;  %v1939_v34 = vld [vmem:[%s7518_s23 + $0xb8] sm:$0xf] }
 0x13d   : > { %1855 = vst.msk [vmem:[#allocation2 + $0x6c] sm:$0xf] %vm1827_vm9, %v1702_v49  ;;  %2226 = vrot.lane.b32.xlu1 %v2087_v40, %s7458_s8  ;;  %v2131_v40 = vrot.slane %v1938_v28, 5  ;;  %v2129_v35 = vsel %vm8036_vm7, %v2127_v38, %v2128_v39  ;;  %v2134_v49 = vrot.slane %v1939_v34, 5  ;;  %v8618_v34 = vld [vmem:[%s8006_s6] sm:$0xf] }
 0x13e   : > { %2224 = vrot.lane.b32.xlu0 %v2084_v47, %s7458_s8  ;;  %v1940_v47 = vld [vmem:[%s7518_s23 + $0xbc] sm:$0xf] }
 0x13f   : > { %v1708_v44 = vpop.permute.xlu1 %1707  ;;  %v2133_v48 = vrot.slane %v2131_v40, 4  ;;  %v2132_v61 = vsel %vm8036_vm7, %v2130_v52, %v2131_v40  ;;  %v2136_v62 = vrot.slane %v2134_v49, 4  ;;  %v2173_v52 = vrot.slane %v1952_v46, 5 }
 0x140   : > { %1858 = vst.msk [vmem:[#allocation2 + $0x78] sm:$0xf] %vm1827_vm9, %v1708_v44  ;;  %v1706_v57 = vpop.permute.xlu0 %1705  ;;  %v1941_v44 = vld [vmem:[%s7518_s23 + $0xc0] sm:$0xf] }
 0x141   : > { %1857 = vst.msk [vmem:[#allocation2 + $0x74] sm:$0xf] %vm1827_vm9, %v1706_v57  ;;  %2230 = vrot.lane.b32.xlu1 %v2093_v50, %s7458_s8  ;;  %v2137_v50 = vrot.slane %v1940_v47, 5  ;;  %v2135_v55 = vsel %vm8036_vm7, %v2133_v48, %v2134_v49  ;;  %v2140_v57 = vrot.slane %v1941_v44, 5  ;;  %v2446_v48 = vld [vmem:[%s7518_s23 + $0x10] sm:$0xe] }
 0x142   : > { %2228 = vrot.lane.b32.xlu0 %v2090_v54, %s7458_s8  ;;  %v1942_v54 = vld [vmem:[%s7518_s23 + $0xc4] sm:$0xf]  ;;  %v2412_v44 = vrot.slane %v8618_v34, 5 }
 0x143   : > { %v1712_v63 = vpop.permute.xlu1 %1711  ;;  %v2139_v56 = vrot.slane %v2137_v50, 4  ;;  %v2138_v9 = vsel %vm8036_vm7, %v2136_v62, %v2137_v50  ;;  %v2142_v10 = vrot.slane %v2140_v57, 4 }
 0x144   : > { %1860 = vst.msk [vmem:[#allocation2 + $0x80] sm:$0xf] %vm1827_vm9, %v1712_v63  ;;  %v1710_v5 = vpop.permute.xlu0 %1709  ;;  %v1943_v63 = vld [vmem:[%s7518_s23 + $0xc8] sm:$0xf] }
 0x145   : > { %1859 = vst.msk [vmem:[#allocation2 + $0x7c] sm:$0xf] %vm1827_vm9, %v1710_v5  ;;  %2234 = vrot.lane.b32.xlu1 %v2099_v59, %s7458_s8  ;;  %v2143_v59 = vrot.slane %v1942_v54, 5  ;;  %v2141_v2 = vsel %vm8036_vm7, %v2139_v56, %v2140_v57  ;;  %v2146_v5 = vrot.slane %v1943_v63, 5  ;;  %v2403_v54 = vld [vmem:[%s8006_s6 + $0x4] sm:$0xf] }
 0x146   : > { %2232 = vrot.lane.b32.xlu0 %v2096_v0, %s7458_s8  ;;  %v1944_v0 = vld [vmem:[%s7518_s23 + $0xcc] sm:$0xf]  ;;  %v2509_v56 = vshll.u32 %v2446_v48, 16  ;;  %v2448_v63 = vld [vmem:[%s7518_s23 + $0x18] sm:$0xf] }
 0x147   : > { %v1716_v11 = vpop.permute.xlu1 %1715  ;;  %v2145_v3 = vrot.slane %v2143_v59, 4  ;;  %v2144_v18 = vsel %vm8036_vm7, %v2142_v10, %v2143_v59  ;;  %v2148_v19 = vrot.slane %v2146_v5, 4 }
 0x148   : > { %1862 = vst.msk [vmem:[#allocation2 + $0x88] sm:$0xf] %vm1827_vm9, %v1716_v11  ;;  %v1714_v15 = vpop.permute.xlu0 %1713  ;;  %v1945_v11 = vld [vmem:[%s7518_s23 + $0xd0] sm:$0xf]  ;;  %v2511_v10 = vrot.slane %v2509_v56, 6 }
 0x149   : > { %1861 = vst.msk [vmem:[#allocation2 + $0x84] sm:$0xf] %vm1827_vm9, %v1714_v15  ;;  %2238 = vrot.lane.b32.xlu1 %v2105_v6, %s7458_s8  ;;  %v2149_v6 = vrot.slane %v1944_v0, 5  ;;  %v2147_v14 = vsel %vm8036_vm7, %v2145_v3, %v2146_v5  ;;  %v2152_v15 = vrot.slane %v1945_v11, 5  ;;  %v2414_v3 = vrot.slane %v2403_v54, 5 }
 0x14a   : > { %2236 = vrot.lane.b32.xlu0 %v2102_v13, %s7458_s8  ;;  %v1946_v13 = vld [vmem:[%s7518_s23 + $0xd4] sm:$0xf] }
 0x14b   : > { %v1720_v1 = vpop.permute.xlu1 %1719  ;;  %v2151_v7 = vrot.slane %v2149_v6, 4  ;;  %v2150_v30 = vsel %vm8036_vm7, %v2148_v19, %v2149_v6  ;;  %v2154_v31 = vrot.slane %v2152_v15, 4  ;;  %v2450_v6 = vld [vmem:[%s7518_s23 + $0x20] sm:$0xf] }
 0x14c   : > { %1864 = vst.msk [vmem:[#allocation2 + $0x90] sm:$0xf] %vm1827_vm9, %v1720_v1  ;;  %v1718_v12 = vpop.permute.xlu0 %1717  ;;  %v1947_v1 = vld [vmem:[%s7518_s23 + $0xd8] sm:$0xf] }
 0x14d   : > { %1863 = vst.msk [vmem:[#allocation2 + $0x8c] sm:$0xf] %vm1827_vm9, %v1718_v12  ;;  %2242 = vrot.lane.b32.xlu1 %v2111_v16, %s7458_s8  ;;  %v2155_v16 = vrot.slane %v1946_v13, 5  ;;  %v2153_v22 = vsel %vm8036_vm7, %v2151_v7, %v2152_v15  ;;  %v2158_v12 = vrot.slane %v1947_v1, 5  ;;  %v2528_v7 = vshll.u32 %v2448_v63, 16 }
 0x14e   : > { %2240 = vrot.lane.b32.xlu0 %v2108_v20, %s7458_s8  ;;  %v1948_v20 = vld [vmem:[%s7518_s23 + $0xdc] sm:$0xf] }
 0x14f   : > { %v1724_v25 = vpop.permute.xlu1 %1723  ;;  %v2157_v24 = vrot.slane %v2155_v16, 4  ;;  %v2156_v39 = vsel %vm8036_vm7, %v2154_v31, %v2155_v16  ;;  %v2160_v40 = vrot.slane %v2158_v12, 4  ;;  %v2449_v16 = vld [vmem:[%s7518_s23 + $0x1c] sm:$0xf] }
 0x150   : > { %1866 = vst.msk [vmem:[#allocation2 + $0x98] sm:$0xf] %vm1827_vm9, %v1724_v25  ;;  %v1722_v36 = vpop.permute.xlu0 %1721  ;;  %v1949_v25 = vld [vmem:[%s7518_s23 + $0xe0] sm:$0xf] }
 0x151   : > { %1865 = vst.msk [vmem:[#allocation2 + $0x94] sm:$0xf] %vm1827_vm9, %v1722_v36  ;;  %2246 = vrot.lane.b32.xlu1 %v2117_v26, %s7458_s8  ;;  %v2161_v26 = vrot.slane %v1948_v20, 5  ;;  %v2159_v33 = vsel %vm8036_vm7, %v2157_v24, %v2158_v12  ;;  %v2164_v36 = vrot.slane %v1949_v25, 5  ;;  %v2416_v24 = vrot.slane %v2414_v3, 4 }
 0x152   : > { %2244 = vrot.lane.b32.xlu0 %v2114_v23, %s7458_s8  ;;  %v1950_v23 = vld [vmem:[%s7518_s23 + $0xe4] sm:$0xf]  ;;  %v2530_v25 = vrot.slane %v2528_v7, 6 }
 0x153   : > { %v1728_v41 = vpop.permute.xlu1 %1727  ;;  %v2163_v28 = vrot.slane %v2161_v26, 4  ;;  %v2162_v50 = vsel %vm8036_vm7, %v2160_v40, %v2161_v26 }
 0x154   : > { %1868 = vst.msk [vmem:[#allocation2 + $0xa0] sm:$0xf] %vm1827_vm9, %v1728_v41  ;;  %v1726_v27 = vpop.permute.xlu0 %1725  ;;  %v1951_v41 = vld [vmem:[%s7518_s23 + $0xe8] sm:$0xf] }
 0x155   : > { %1867 = vst.msk [vmem:[#allocation2 + $0x9c] sm:$0xf] %vm1827_vm9, %v1726_v27  ;;  %2250 = vrot.lane.b32.xlu1 %v2123_v37, %s7458_s8  ;;  %v2167_v37 = vrot.slane %v1950_v23, 5  ;;  %v2165_v47 = vsel %vm8036_vm7, %v2163_v28, %v2164_v36  ;;  %v2535_v23 = vshrl.u32 %v2449_v16, 16  ;;  %v2406_v28 = vld [vmem:[%s8006_s6 + $0x10] sm:$0x1] }
 0x156   : > { %2248 = vrot.lane.b32.xlu0 %v2120_v43, %s7458_s8 }
 0x157   : > { %v1732_v51 = vpop.permute.xlu1 %1731  ;;  %v2169_v27 = vrot.slane %v2167_v37, 4 }
 0x158   : > { %1870 = vst.msk [vmem:[#allocation2 + $0xa8] sm:$0xf] %vm1827_vm9, %v1732_v51  ;;  %v1730_v53 = vpop.permute.xlu0 %1729  ;;  %v2166_v51 = vrot.slane %v2164_v36, 4 }
 0x159   : > { %1869 = vst.msk [vmem:[#allocation2 + $0xa4] sm:$0xf] %vm1827_vm9, %v1730_v53  ;;  %2254 = vrot.lane.b32.xlu1 %v2129_v35, %s7458_s8  ;;  %v2170_v35 = vrot.slane %v1951_v41, 5  ;;  %v8632_v53 = vld [vmem:[%s8006_s6 + $0x8] sm:$0xf] }
 0x15a   : > { %2252 = vrot.lane.b32.xlu0 %v2126_v45, %s7458_s8  ;;  %v2168_v62 = vsel %vm8036_vm7, %v2166_v51, %v2167_v37  ;;  %v2417_v5 = vrot.slane %v8632_v53, 5  ;;  %v2537_v51 = vrot.slane %v2535_v23, 5 }
 0x15b   : > { %v1736_v60 = vpop.permute.xlu1 %1735  ;;  %v2171_v57 = vsel %vm8036_vm7, %v2169_v27, %v2170_v35  ;;  %v2172_v59 = vrot.slane %v2170_v35, 4 }
 0x15c   : > { %1872 = vst.msk [vmem:[#allocation2 + $0xb0] sm:$0xf] %vm1827_vm9, %v1736_v60  ;;  %v1734_v58 = vpop.permute.xlu0 %1733  ;;  %v2447_v60 = vld [vmem:[%s7518_s23 + $0x14] sm:$0xf]  ;;  %v2419_v20 = vrot.slane %v2417_v5, 4 }
 0x15d   : > { %1871 = vst.msk [vmem:[#allocation2 + $0xac] sm:$0xf] %vm1827_vm9, %v1734_v58  ;;  %2258 = vrot.lane.b32.xlu1 %v2135_v55, %s7458_s8  ;;  %v2506_v55 = vshrl.u32 %v2446_v48, 16  ;;  %v2175_v58 = vrot.slane %v2173_v52, 4  ;;  %v2515_v11 = vshrl.u32 %v2447_v60, 16  ;;  %v2518_v13 = vshll.u32 %v2447_v60, 16 }
 0x15e   : > { %2256 = vrot.lane.b32.xlu0 %v2132_v61, %s7458_s8  ;;  %v2453_v48 = vld [vmem:[%s7518_s23 + $0x2c] sm:$0xf] }
 0x15f   : > { %v1740_v8 = vpop.permute.xlu1 %1739  ;;  %v2517_v26 = vrot.slane %v2515_v11, 5 }
 0x160   : > { %1874 = vst.msk [vmem:[#allocation2 + $0xb8] sm:$0xf] %vm1827_vm9, %v1740_v8  ;;  %v1738_v4 = vpop.permute.xlu0 %1737  ;;  %v2405_v8 = vld [vmem:[%s8006_s6 + $0xc] sm:$0xf] }
 0x161   : > { %1873 = vst.msk [vmem:[#allocation2 + $0xb4] sm:$0xf] %vm1827_vm9, %v1738_v4  ;;  %2262 = vrot.lane.b32.xlu1 %v2141_v2, %s7458_s8  ;;  %v2413_v2 = vrot.slane %v2412_v44, 4  ;;  %v2174_v4 = vsel %vm8036_vm7, %v2172_v59, %v2173_v52  ;;  %v2454_v52 = vld [vmem:[%s7518_s23 + $0x30] sm:$0xf] }
 0x162   : > { %2260 = vrot.lane.b32.xlu0 %v2138_v9, %s7458_s8  ;;  %v2508_v9 = vrot.slane %v2506_v55, 5  ;;  %v2423_v55 = vrot.slane %v2406_v28, 5 }
 0x163   : > { %v1744_v17 = vpop.permute.xlu1 %1743  ;;  %v2415_v1 = vsel %vm8036_vm7, %v2413_v2, %v2414_v3 }
 0x164   : > { %1876 = vst.msk [vmem:[#allocation2 + $0xc0] sm:$0xf] %vm1827_vm9, %v1744_v17  ;;  %v1742_v21 = vpop.permute.xlu0 %1741  ;;  %v2545_v17 = vshrl.u32 %v2450_v6, 16  ;;  %v2512_v12 = vor.u32 %v2511_v10, %v2508_v9 }
 0x165   : > { %1875 = vst.msk [vmem:[#allocation2 + $0xbc] sm:$0xf] %vm1827_vm9, %v1742_v21  ;;  %2266 = vrot.lane.b32.xlu1 %v2147_v14, %s7458_s8  ;;  %v2525_v14 = vshrl.u32 %v2448_v63, 16  ;;  %v2420_v21 = vrot.slane %v2405_v8, 5  ;;  %v2455_v63 = vld [vmem:[%s7518_s23 + $0x34] sm:$0xf] }
 0x166   : > { %2264 = vrot.lane.b32.xlu0 %v2144_v18, %s7458_s8  ;;  %v2548_v18 = vshll.u32 %v2450_v6, 16  ;;  %v2547_v36 = vrot.slane %v2545_v17, 5  ;;  %v2513_v27 = vrot.slane %v2512_v12, 4  ;;  %v2456_v6 = vld [vmem:[%s7518_s23 + $0x38] sm:$0xf]  ;;  %v2595_v17 = vshrl.u32 %v2455_v63, 16 }
 0x167   : > { %v1748_v29 = vpop.permute.xlu1 %1747  ;;  %v2527_v31 = vrot.slane %v2525_v14, 5  ;;  %v2421_v46 = vsel %vm8036_vm7, %v2419_v20, %v2420_v21  ;;  %v2422_v35 = vrot.slane %v2420_v21, 4  ;;  %v2457_v21 = vld [vmem:[%s7518_s23 + $0x3c] sm:$0xf] }
 0x168   : > { %1878 = vst.msk [vmem:[#allocation2 + $0xc8] sm:$0xf] %vm1827_vm9, %v1748_v29  ;;  %v1746_v32 = vpop.permute.xlu0 %1745  ;;  %v2520_v29 = vrot.slane %v2518_v13, 6  ;;  %v2550_v37 = vrot.slane %v2548_v18, 6  ;;  %v2597_v28 = vrot.slane %v2595_v17, 5 }
 0x169   : > { %1877 = vst.msk [vmem:[#allocation2 + $0xc4] sm:$0xf] %vm1827_vm9, %v1746_v32  ;;  %2270 = vrot.lane.b32.xlu1 %v2153_v22, %s7458_s8  ;;  %v2451_v22 = vld [vmem:[%s7518_s23 + $0x24] sm:$0xf]  ;;  %v2538_v32 = vshll.u32 %v2449_v16, 16  ;;  %v2424_v9 = vsel %vm8036_vm7, %v2422_v35, %v2423_v55 }
 0x16a   : > { %2268 = vrot.lane.b32.xlu0 %v2150_v30, %s7458_s8  ;;  %v2452_v30 = vld [vmem:[%s7518_s23 + $0x28] sm:$0xf]  ;;  %v8680_v56 = vor.u32 %v2550_v37, %v2547_v36  ;;  %v2459_v36 = vld [vmem:[%s7518_s23 + $0x44] sm:$0xf] }
 0x16b   : > { %v1752_v38 = vpop.permute.xlu1 %1751  ;;  %v2565_v41 = vshrl.u32 %v2452_v30, 16  ;;  %v2460_v37 = vld [vmem:[%s7518_s23 + $0x48] sm:$0xf] }
 0x16c   : > { %1880 = vst.msk [vmem:[#allocation2 + $0xd0] sm:$0xf] %vm1827_vm9, %v1752_v38  ;;  %v1750_v43 = vpop.permute.xlu0 %1749  ;;  %v2555_v38 = vshrl.u32 %v2451_v22, 16  ;;  %v2553_v11 = vrot.slane %v8680_v56, 4  ;;  %v2648_v55 = vshll.u32 %v2460_v37, 16 }
 0x16d   : > { %1879 = vst.msk [vmem:[#allocation2 + $0xcc] sm:$0xf] %vm1827_vm9, %v1750_v43  ;;  %2274 = vrot.lane.b32.xlu1 %v2159_v33, %s7458_s8  ;;  %v2568_v43 = vshll.u32 %v2452_v30, 16 }
 0x16e   : > { %2272 = vrot.lane.b32.xlu0 %v2156_v39, %s7458_s8  ;;  %v2558_v39 = vshll.u32 %v2451_v22, 16  ;;  %v2608_v22 = vshll.u32 %v2456_v6, 16 }
 0x16f   : > { %v1756_v49 = vpop.permute.xlu1 %1755  ;;  %v2570_v60 = vrot.slane %v2568_v43, 6 }
 0x170   : > { %1882 = vst.msk [vmem:[#allocation2 + $0xd8] sm:$0xf] %vm1827_vm9, %v1756_v49  ;;  %v1754_v45 = vpop.permute.xlu0 %1753  ;;  %v2521_v49 = vor.u32 %v2520_v29, %v2517_v26  ;;  %v2560_v59 = vrot.slane %v2558_v39, 6  ;;  %v2610_v43 = vrot.slane %v2608_v22, 6 }
 0x171   : > { %1881 = vst.msk [vmem:[#allocation2 + $0xd4] sm:$0xf] %vm1827_vm9, %v1754_v45  ;;  %2278 = vrot.lane.b32.xlu1 %v2165_v47, %s7458_s8  ;;  %v2418_v47 = vsel %vm8036_vm7, %v2416_v24, %v2417_v5  ;;  %v2540_v45 = vrot.slane %v2538_v32, 6  ;;  %vm3484_vm7 = vcmask 1045508  }
 0x172   : > { %2276 = vrot.lane.b32.xlu0 %v2162_v50, %s7458_s8  ;;  %v2531_v50 = vor.u32 %v2530_v25, %v2527_v31  ;;  %v2522_v2 = vsel %vm8676_vm2, %v2513_v27, %v2521_v49  ;;  %v2523_v10 = vrot.slane %v2521_v49, 4  ;;  %v2635_v49 = vshrl.u32 %v2459_v36, 16  ;;  %vm9000_vm8 = vmor %vm3483_vm6, %vm3484_vm7 }
 0x173   : > { %v1760_v61 = vpop.permute.xlu1 %1759  ;;  %v2541_v5 = vor.u32 %v2540_v45, %v2537_v51  ;;  %v2645_v51 = vshrl.u32 %v2460_v37, 16  ;;  %vm3877_vm6 = vcmask 386368   ;;  %vm3917_vm7 = vcmask 388418  }
 0x174   : > { %1884 = vst.msk [vmem:[#allocation2 + $0xe0] sm:$0xf] %vm1827_vm9, %v1760_v61  ;;  %v1758_v0 = vpop.permute.xlu0 %1757  ;;  %v2575_v61 = vshrl.u32 %v2453_v48, 16  ;;  %v2533_v3 = vrot.slane %v2531_v50, 4  ;;  %v2532_v29 = vsel %vm8676_vm2, %v2523_v10, %v2531_v50  ;;  %v2638_v50 = vshll.u32 %v2459_v36, 16 }
 0x175   : > { %1883 = vst.msk [vmem:[#allocation2 + $0xdc] sm:$0xf] %vm1827_vm9, %v1758_v0  ;;  %2282 = vrot.lane.b32.xlu1 %v2171_v57, %s7458_s8  ;;  %v2557_v57 = vrot.slane %v2555_v38, 5  ;;  %v2585_v0 = vshrl.u32 %v2454_v52, 16  ;;  %v2543_v30 = vrot.slane %v2541_v5, 4 }
 0x176   : > { %2280 = vrot.lane.b32.xlu0 %v2168_v62, %s7458_s8  ;;  %v2578_v62 = vshll.u32 %v2453_v48, 16  ;;  %v2542_v20 = vsel %vm8676_vm2, %v2533_v3, %v2541_v5  ;;  %v2647_v3 = vrot.slane %v2645_v51, 5 }
 0x177   : > { %v1764_v15 = vpop.permute.xlu1 %1763  ;;  %v2561_v13 = vor.u32 %v2560_v59, %v2557_v57  ;;  %v2587_v42 = vrot.slane %v2585_v0, 5  ;;  %v2552_v48 = vsel %vm8676_vm2, %v2543_v30, %v8680_v56 }
 0x178   : > { %1886 = vst.msk [vmem:[#allocation2 + $0xe8] sm:$0xf] %vm1827_vm9, %v1764_v15  ;;  %v1762_v19 = vpop.permute.xlu0 %1761  ;;  %v2577_v15 = vrot.slane %v2575_v61, 5  ;;  %v2580_v16 = vrot.slane %v2578_v62, 6 }
 0x179   : > { %1885 = vst.msk [vmem:[#allocation2 + $0xe4] sm:$0xf] %vm1827_vm9, %v1762_v19  ;;  %2286 = vrot.lane.b32.xlu1 %v2175_v58, %s7458_s8  ;;  %v2588_v58 = vshll.u32 %v2454_v52, 16  ;;  %v2598_v19 = vshll.u32 %v2455_v63, 16  ;;  %v2563_v31 = vrot.slane %v2561_v13, 4  ;;  %v2562_v23 = vsel %vm8676_vm2, %v2553_v11, %v2561_v13 }
 0x17a   : > { %2284 = vrot.lane.b32.xlu0 %v2174_v4, %s7458_s8  ;;  %v2458_v4 = vld [vmem:[%s7518_s23 + $0x40] sm:$0xf]  ;;  %vm3288_vm9 = vcmask 321792  }
 0x17b   : > { %v1893_v33 = vpop.permute.xlu1 %1892  ;;  %v2590_v18 = vrot.slane %v2588_v58, 6  ;;  %v2625_v24 = vshrl.u32 %v2458_v4, 16  ;;  %v2628_v12 = vshll.u32 %v2458_v4, 16  ;;  %v2600_v39 = vrot.slane %v2598_v19, 6  ;;  %vm3289_vm10 = vmand %vm3288_vm9, %vm2502_vm0 }
 0x17c   : > { %1896 = vst.msk [vmem:[#allocation2 + $0xec] sm:$0x8] %vm1895_vm13, %v1893_v33  ;;  %v1766_v40 = vpop.permute.xlu0 %1765  ;;  %v2581_v33 = vor.u32 %v2580_v16, %v2577_v15  ;;  %v2637_v58 = vrot.slane %v2635_v49, 5  ;;  %v2463_v15 = vld [vmem:[%s7518_s23 + $0x54] sm:$0xf]  ;;  %vm9284_vm13 = vmand %vm3361_vm11, %vm3362_vm12  ;;  %vm4338_vm9 = vcmask 454016  }
 0x17d   : > { %1888 = vst.msk [vmem:[#allocation2 + $0xec] sm:$0x7] %vm1887_vm14, %v1766_v40  ;;  %2427 = vrot.lane.b32.xlu1 %v2415_v1, %s7458_s8  ;;  %v2605_v1 = vshrl.u32 %v2456_v6, 16  ;;  %v2591_v38 = vor.u32 %v2590_v18, %v2587_v42  ;;  %v2630_v27 = vrot.slane %v2628_v12, 6  ;;  %v2601_v56 = vor.u32 %v2600_v39, %v2597_v28  ;;  %v2464_v16 = vld [vmem:[%s7518_s23 + $0x58] sm:$0xf] }
 0x17e   : > { %2425 = vrot.lane.b32.xlu0 %v2412_v44, %s7458_s8  ;;  %v2567_v44 = vrot.slane %v2565_v41, 5  ;;  %v2615_v41 = vshrl.u32 %v2457_v21, 16  ;;  %v2678_v30 = vshll.u32 %v2463_v15, 16  ;;  %vm3821_vm14 = vcmask 388416  }
 0x17f   : > { %v2179_v54 = vpop.permute.xlu1 %2178  ;;  %v2607_v40 = vrot.slane %v2605_v1, 5  ;;  %v2593_v59 = vrot.slane %v2591_v38, 4  ;;  %v2603_v42 = vrot.slane %v2601_v56, 4  ;;  %vm4525_vm0 = vsmask.f32 5392 }
 0x180   : > { %2346 = vst.msk [vmem:[#allocation2 + $0x4] sm:$0xf] %vm2344_vm15, %v2179_v54  ;;  %v2177_v34 = vpop.permute.xlu0 %2176  ;;  %v2571_v7 = vor.u32 %v2570_v60, %v2567_v44  ;;  %v2461_v54 = vld [vmem:[%s7518_s23 + $0x4c] sm:$0xf]  ;;  %v2462_v44 = vld [vmem:[%s7518_s23 + $0x50] sm:$0xf] }
 0x181   : > { %2345 = vst.msk [vmem:[#allocation2] sm:$0xf] %vm2344_vm15, %v2177_v34  ;;  %2431 = vrot.lane.b32.xlu1 %v2421_v46, %s7458_s8  ;;  %v2618_v46 = vshll.u32 %v2457_v21, 16  ;;  %v2583_v34 = vrot.slane %v2581_v33, 4  ;;  %v2611_v60 = vor.u32 %v2610_v43, %v2607_v40  ;;  %v2617_v61 = vrot.slane %v2615_v41, 5 }
 0x182   : > { %2429 = vrot.lane.b32.xlu0 %v2418_v47, %s7458_s8  ;;  %v2573_v32 = vrot.slane %v2571_v7, 4  ;;  %v2627_v47 = vrot.slane %v2625_v24, 5  ;;  %v2572_v52 = vsel %vm8676_vm2, %v2563_v31, %v2571_v7  ;;  %v2655_v5 = vshrl.u32 %v2461_v54, 16 }
 0x183   : > { %v2183_v8 = vpop.permute.xlu1 %2182  ;;  %v2620_v62 = vrot.slane %v2618_v46, 6  ;;  %v2665_v10 = vshrl.u32 %v2462_v44, 16  ;;  %v2668_v11 = vshll.u32 %v2462_v44, 16  ;;  %v2602_v13 = vsel %vm8676_vm2, %v2593_v59, %v2601_v56 }
 0x184   : > { %2348 = vst.msk [vmem:[#allocation2 + $0xc] sm:$0xf] %vm2344_vm15, %v2183_v8  ;;  %v2181_v14 = vpop.permute.xlu0 %2180  ;;  %v2582_v57 = vsel %vm8676_vm2, %v2573_v32, %v2581_v33  ;;  %v8724_v63 = vor.u32 %v2630_v27, %v2627_v47  ;;  %v2650_v8 = vrot.slane %v2648_v55, 6  ;;  %v2592_v4 = vsel %vm8676_vm2, %v2583_v34, %v2591_v38  ;;  %v2467_v27 = vld [vmem:[%s7518_s23 + $0x64] sm:$0xf] }
 0x185   : > { %2347 = vst.msk [vmem:[#allocation2 + $0x8] sm:$0xf] %vm2344_vm15, %v2181_v14  ;;  %3064 = vrot.lane.b32.xlu1 %v2522_v2, %s7459_s9  ;;  %v2640_v2 = vrot.slane %v2638_v50, 6  ;;  %v2613_v14 = vrot.slane %v2611_v60, 4  ;;  %v2621_v7 = vor.u32 %v2620_v62, %v2617_v61  ;;  %v2657_v1 = vrot.slane %v2655_v5, 5 }
 0x186   : > { %2433 = vrot.lane.b32.xlu0 %v2424_v9, %s7458_s8  ;;  %v2658_v9 = vshll.u32 %v2461_v54, 16  ;;  %v2633_v18 = vrot.slane %v8724_v63, 4  ;;  %v2651_v22 = vor.u32 %v2650_v8, %v2647_v3  ;;  %v2667_v12 = vrot.slane %v2665_v10, 5  ;;  %v2469_v62 = vld [vmem:[%s7518_s23 + $0x6c] sm:$0xf] }
 0x187   : > { %v2187_v26 = vpop.permute.xlu1 %2186  ;;  %v2641_v19 = vor.u32 %v2640_v2, %v2637_v58  ;;  %v2685_v31 = vshrl.u32 %v2464_v16, 16  ;;  %v2688_v32 = vshll.u32 %v2464_v16, 16  ;;  %v2612_v37 = vsel %vm8676_vm2, %v2603_v42, %v2611_v60  ;;  %v2470_v5 = vld [vmem:[%s7518_s23 + $0x70] sm:$0xf] }
 0x188   : > { %2350 = vst.msk [vmem:[#allocation2 + $0x14] sm:$0xf] %vm2344_vm15, %v2187_v26  ;;  %v2185_v25 = vpop.permute.xlu0 %2184  ;;  %v2660_v24 = vrot.slane %v2658_v9, 6  ;;  %v2670_v26 = vrot.slane %v2668_v11, 6  ;;  %v2623_v39 = vrot.slane %v2621_v7, 4  ;;  %v2653_v41 = vrot.slane %v2651_v22, 4 }
 0x189   : > { %2349 = vst.msk [vmem:[#allocation2 + $0x10] sm:$0xf] %vm2344_vm15, %v2185_v25  ;;  %3068 = vrot.lane.b32.xlu1 %v2542_v20, %s7459_s9  ;;  %v2466_v20 = vld [vmem:[%s7518_s23 + $0x60] sm:$0xf]  ;;  %v2622_v25 = vsel %vm8676_vm2, %v2613_v14, %v2621_v7  ;;  %v2642_v38 = vsel %vm8676_vm2, %v2633_v18, %v2641_v19  ;;  %v2643_v46 = vrot.slane %v2641_v19, 4  ;;  %v2680_v49 = vrot.slane %v2678_v30, 6 }
 0x18a   : > { %3066 = vrot.lane.b32.xlu0 %v2532_v29, %s7459_s9  ;;  %v2675_v29 = vshrl.u32 %v2463_v15, 16  ;;  %v2705_v33 = vshrl.u32 %v2466_v20, 16  ;;  %v2708_v28 = vshll.u32 %v2466_v20, 16  ;;  %v2661_v43 = vor.u32 %v2660_v24, %v2657_v1  ;;  %v2472_v24 = vld [vmem:[%s7518_s23 + $0x78] sm:$0xf] }
 0x18b   : > { %v2191_v35 = vpop.permute.xlu1 %2190  ;;  %v2671_v47 = vor.u32 %v2670_v26, %v2667_v12  ;;  %v2687_v50 = vrot.slane %v2685_v31, 5  ;;  %v2632_v59 = vsel %vm8676_vm2, %v2623_v39, %v8724_v63  ;;  %v2715_v56 = vshrl.u32 %v2467_v27, 16 }
 0x18c   : > { %2352 = vst.msk [vmem:[#allocation2 + $0x1c] sm:$0xf] %vm2344_vm15, %v2191_v35  ;;  %v2189_v45 = vpop.permute.xlu0 %2188  ;;  %v2468_v35 = vld [vmem:[%s7518_s23 + $0x68] sm:$0xf]  ;;  %v2707_v54 = vrot.slane %v2705_v33, 5  ;;  %v2710_v55 = vrot.slane %v2708_v28, 6  ;;  %v2652_v61 = vsel %vm8676_vm2, %v2643_v46, %v2651_v22  ;;  %v2662_v58 = vsel %vm8676_vm2, %v2653_v41, %v2661_v43 }
 0x18d   : > { %2351 = vst.msk [vmem:[#allocation2 + $0x18] sm:$0xf] %vm2344_vm15, %v2189_v45  ;;  %3072 = vrot.lane.b32.xlu1 %v2562_v23, %s7459_s9  ;;  %v2465_v23 = vld [vmem:[%s7518_s23 + $0x5c] sm:$0xf]  ;;  %v2690_v45 = vrot.slane %v2688_v32, 6  ;;  %v2718_v34 = vshll.u32 %v2467_v27, 16 }
 0x18e   : > { %3070 = vrot.lane.b32.xlu0 %v2552_v48, %s7459_s9  ;;  %v2677_v48 = vrot.slane %v2675_v29, 5  ;;  %v2695_v51 = vshrl.u32 %v2465_v23, 16  ;;  %v2725_v44 = vshrl.u32 %v2468_v35, 16  ;;  %v2673_v2 = vrot.slane %v2671_v47, 4  ;;  %v2471_v22 = vld [vmem:[%s7518_s23 + $0x74] sm:$0xf] }
 0x18f   : > { %v2195_v0 = vpop.permute.xlu1 %2194  ;;  %v2663_v3 = vrot.slane %v2661_v43, 4  ;;  %v8768_v10 = vor.u32 %v2710_v55, %v2707_v54  ;;  %v2735_v7 = vshrl.u32 %v2469_v62, 16  ;;  %v2745_v42 = vshrl.u32 %v2470_v5, 16  ;;  %v2473_v41 = vld [vmem:[%s7518_s23 + $0x7c] sm:$0xf] }
 0x190   : > { %2354 = vst.msk [vmem:[#allocation2 + $0x24] sm:$0xf] %vm2344_vm15, %v2195_v0  ;;  %v2193_v6 = vpop.permute.xlu0 %2192  ;;  %v2728_v0 = vshll.u32 %v2468_v35, 16  ;;  %v2681_v63 = vor.u32 %v2680_v49, %v2677_v48  ;;  %v2697_v8 = vrot.slane %v2695_v51, 5  ;;  %v2727_v14 = vrot.slane %v2725_v44, 5 }
 0x191   : > { %2353 = vst.msk [vmem:[#allocation2 + $0x20] sm:$0xf] %vm2344_vm15, %v2193_v6  ;;  %3076 = vrot.lane.b32.xlu1 %v2582_v57, %s7459_s9  ;;  %v2691_v6 = vor.u32 %v2690_v45, %v2687_v50  ;;  %v2748_v18 = vshll.u32 %v2470_v5, 16  ;;  %v2672_v1 = vsel %vm8676_vm2, %v2663_v3, %v2671_v47  ;;  %v2713_v29 = vrot.slane %v8768_v10, 4  ;;  %v2475_v55 = vld [vmem:[%s7518_s23 + $0x84] sm:$0xf] }
 0x192   : > { %3074 = vrot.lane.b32.xlu0 %v2572_v52, %s7459_s9  ;;  %v2698_v52 = vshll.u32 %v2465_v23, 16  ;;  %v2730_v16 = vrot.slane %v2728_v0, 6  ;;  %v2682_v19 = vsel %vm8676_vm2, %v2673_v2, %v2681_v63  ;;  %v2683_v26 = vrot.slane %v2681_v63, 4 }
 0x193   : > { %v2199_v17 = vpop.permute.xlu1 %2198  ;;  %v2693_v20 = vrot.slane %v2691_v6, 4  ;;  %v2737_v31 = vrot.slane %v2735_v7, 5  ;;  %v2747_v28 = vrot.slane %v2745_v42, 5  ;;  %v2765_v39 = vshrl.u32 %v2472_v24, 16  ;;  %v2478_v7 = vld [vmem:[%s7518_s23 + $0x90] sm:$0xf] }
 0x194   : > { %2356 = vst.msk [vmem:[#allocation2 + $0x2c] sm:$0xf] %vm2344_vm15, %v2199_v17  ;;  %v2197_v21 = vpop.permute.xlu0 %2196  ;;  %v2700_v9 = vrot.slane %v2698_v52, 6  ;;  %v2738_v17 = vshll.u32 %v2469_v62, 16  ;;  %v2731_v32 = vor.u32 %v2730_v16, %v2727_v14  ;;  %v2768_v43 = vshll.u32 %v2472_v24, 16 }
 0x195   : > { %2355 = vst.msk [vmem:[#allocation2 + $0x28] sm:$0xf] %vm2344_vm15, %v2197_v21  ;;  %3080 = vrot.lane.b32.xlu1 %v2602_v13, %s7459_s9  ;;  %v2717_v13 = vrot.slane %v2715_v56, 5  ;;  %v2692_v35 = vsel %vm8676_vm2, %v2683_v26, %v2691_v6  ;;  %v2775_v44 = vshrl.u32 %v2473_v41, 16  ;;  %v2795_v63 = vshrl.u32 %v2475_v55, 16 }
 0x196   : > { %3078 = vrot.lane.b32.xlu0 %v2592_v4, %s7459_s9  ;;  %v2720_v4 = vrot.slane %v2718_v34, 6  ;;  %v2701_v21 = vor.u32 %v2700_v9, %v2697_v8  ;;  %v2740_v33 = vrot.slane %v2738_v17, 6  ;;  %v2733_v51 = vrot.slane %v2731_v32, 4  ;;  %v2477_v9 = vld [vmem:[%s7518_s23 + $0x8c] sm:$0xf] }
 0x197   : > { %v2203_v36 = vpop.permute.xlu1 %2202  ;;  %v2767_v34 = vrot.slane %v2765_v39, 5  ;;  %v2798_v3 = vshll.u32 %v2475_v55, 16  ;;  %v2777_v16 = vrot.slane %v2775_v44, 5  ;;  %v2825_v26 = vshrl.u32 %v2478_v7, 16 }
 0x198   : > { %2358 = vst.msk [vmem:[#allocation2 + $0x34] sm:$0xf] %vm2344_vm15, %v2203_v36  ;;  %v2201_v40 = vpop.permute.xlu0 %2200  ;;  %v2721_v30 = vor.u32 %v2720_v4, %v2717_v13  ;;  %v2750_v36 = vrot.slane %v2748_v18, 6  ;;  %v2703_v49 = vrot.slane %v2701_v21, 4  ;;  %v2741_v45 = vor.u32 %v2740_v33, %v2737_v31  ;;  %v2480_v33 = vld [vmem:[%s7518_s23 + $0x98] sm:$0xf] }
 0x199   : > { %2357 = vst.msk [vmem:[#allocation2 + $0x30] sm:$0xf] %vm2344_vm15, %v2201_v40  ;;  %3084 = vrot.lane.b32.xlu1 %v2622_v25, %s7459_s9  ;;  %v2474_v25 = vld [vmem:[%s7518_s23 + $0x80] sm:$0xf]  ;;  %v2702_v40 = vsel %vm8676_vm2, %v2693_v20, %v2701_v21  ;;  %v2815_v21 = vshrl.u32 %v2477_v9, 16  ;;  %vm5815_vm11 = vcmask 585216  }
 0x19a   : > { %3082 = vrot.lane.b32.xlu0 %v2612_v37, %s7459_s9  ;;  %v2755_v37 = vshrl.u32 %v2471_v22, 16  ;;  %v2785_v46 = vshrl.u32 %v2474_v25, 16  ;;  %v2788_v47 = vshll.u32 %v2474_v25, 16  ;;  %v2722_v48 = vsel %vm8676_vm2, %v2713_v29, %v2721_v30 }
 0x19b   : > { %v2207_v57 = vpop.permute.xlu1 %2206  ;;  %v2723_v52 = vrot.slane %v2721_v30, 4  ;;  %v2751_v54 = vor.u32 %v2750_v36, %v2747_v28  ;;  %v2712_v2 = vsel %vm8676_vm2, %v2703_v49, %v8768_v10  ;;  %v2742_v13 = vsel %vm8676_vm2, %v2733_v51, %v2741_v45 }
 0x19c   : > { %2360 = vst.msk [vmem:[#allocation2 + $0x3c] sm:$0xf] %vm2344_vm15, %v2207_v57  ;;  %v2205_v60 = vpop.permute.xlu0 %2204  ;;  %v2476_v57 = vld [vmem:[%s7518_s23 + $0x88] sm:$0xf]  ;;  %v2787_v62 = vrot.slane %v2785_v46, 5  ;;  %v2790_v0 = vrot.slane %v2788_v47, 6 }
 0x19d   : > { %2359 = vst.msk [vmem:[#allocation2 + $0x38] sm:$0xf] %vm2344_vm15, %v2205_v60  ;;  %3088 = vrot.lane.b32.xlu1 %v2642_v38, %s7459_s9  ;;  %v2758_v38 = vshll.u32 %v2471_v22, 16  ;;  %v2770_v60 = vrot.slane %v2768_v43, 6  ;;  %v2805_v5 = vshrl.u32 %v2476_v57, 16  ;;  %v2732_v8 = vsel %vm8676_vm2, %v2723_v52, %v2731_v32 }
 0x19e   : > { %3086 = vrot.lane.b32.xlu0 %v2632_v59, %s7459_s9  ;;  %v2757_v59 = vrot.slane %v2755_v37, 5  ;;  %v2753_v4 = vrot.slane %v2751_v54, 4  ;;  %v2743_v14 = vrot.slane %v2741_v45, 4  ;;  %v8812_v42 = vor.u32 %v2790_v0, %v2787_v62  ;;  %v2479_v32 = vld [vmem:[%s7518_s23 + $0x94] sm:$0xf] }
 0x19f   : > { %v2211_v11 = vpop.permute.xlu1 %2210  ;;  %v2760_v56 = vrot.slane %v2758_v38, 6  ;;  %v2807_v20 = vrot.slane %v2805_v5, 5  ;;  %v2828_v29 = vshll.u32 %v2478_v7, 16  ;;  %v2817_v39 = vrot.slane %v2815_v21, 5  ;;  %v2483_v5 = vld [vmem:[%s7518_s23 + $0xa4] sm:$0xf] }
 0x1a0   : > { %2362 = vst.msk [vmem:[#allocation2 + $0x44] sm:$0xf] %vm2344_vm15, %v2211_v11  ;;  %v2209_v15 = vpop.permute.xlu0 %2208  ;;  %v2808_v11 = vshll.u32 %v2476_v57, 16  ;;  %v2752_v31 = vsel %vm8676_vm2, %v2743_v14, %v2751_v54  ;;  %v2793_v37 = vrot.slane %v8812_v42, 4  ;;  %v2827_v46 = vrot.slane %v2825_v26, 5 }
 0x1a1   : > { %2361 = vst.msk [vmem:[#allocation2 + $0x40] sm:$0xf] %vm2344_vm15, %v2209_v15  ;;  %3092 = vrot.lane.b32.xlu1 %v2662_v58, %s7459_s9  ;;  %v2761_v10 = vor.u32 %v2760_v56, %v2757_v59  ;;  %v2771_v15 = vor.u32 %v2770_v60, %v2767_v34  ;;  %v2830_v47 = vrot.slane %v2828_v29, 6  ;;  %v2848_v51 = vshll.u32 %v2480_v33, 16  ;;  %v2482_v57 = vld [vmem:[%s7518_s23 + $0xa0] sm:$0xf] }
 0x1a2   : > { %3090 = vrot.lane.b32.xlu0 %v2652_v61, %s7459_s9  ;;  %v2778_v61 = vshll.u32 %v2473_v41, 16  ;;  %v2810_v24 = vrot.slane %v2808_v11, 6  ;;  %vm6202_vm12 = vcmask 588800  }
 0x1a3   : > { %v2215_v12 = vpop.permute.xlu1 %2214  ;;  %v2762_v30 = vsel %vm8676_vm2, %v2753_v4, %v2761_v10  ;;  %v2773_v25 = vrot.slane %v2771_v15, 4  ;;  %v2763_v36 = vrot.slane %v2761_v10, 4  ;;  %v2831_v60 = vor.u32 %v2830_v47, %v2827_v46  ;;  %v2488_v46 = vld [vmem:[%s7518_s23 + $0xb8] sm:$0xf] }
 0x1a4   : > { %2364 = vst.msk [vmem:[#allocation2 + $0x4c] sm:$0xf] %vm2344_vm15, %v2215_v12  ;;  %v2213_v23 = vpop.permute.xlu0 %2212  ;;  %v2780_v17 = vrot.slane %v2778_v61, 6  ;;  %v2818_v12 = vshll.u32 %v2477_v9, 16  ;;  %v2811_v41 = vor.u32 %v2810_v24, %v2807_v20  ;;  %v2484_v61 = vld [vmem:[%s7518_s23 + $0xa8] sm:$0xf] }
 0x1a5   : > { %2363 = vst.msk [vmem:[#allocation2 + $0x48] sm:$0xf] %vm2344_vm15, %v2213_v23  ;;  %3096 = vrot.lane.b32.xlu1 %v2682_v19, %s7459_s9  ;;  %v2797_v19 = vrot.slane %v2795_v63, 5  ;;  %v2772_v52 = vsel %vm8676_vm2, %v2763_v36, %v2771_v15  ;;  %v2850_v63 = vrot.slane %v2848_v51, 6  ;;  %v2888_v4 = vshll.u32 %v2484_v61, 16 }
 0x1a6   : > { %3094 = vrot.lane.b32.xlu0 %v2672_v1, %s7459_s9  ;;  %v2800_v1 = vrot.slane %v2798_v3, 6  ;;  %v2781_v23 = vor.u32 %v2780_v17, %v2777_v16  ;;  %v2820_v43 = vrot.slane %v2818_v12, 6  ;;  %v2813_v56 = vrot.slane %v2811_v41, 4  ;;  %v2485_v17 = vld [vmem:[%s7518_s23 + $0xac] sm:$0xf] }
 0x1a7   : > { %v2219_v27 = vpop.permute.xlu1 %2218  ;;  %v2833_v15 = vrot.slane %v2831_v60, 4  ;;  %v2486_v20 = vld [vmem:[%s7518_s23 + $0xb0] sm:$0xf] }
 0x1a8   : > { %2366 = vst.msk [vmem:[#allocation2 + $0x54] sm:$0xf] %vm2344_vm15, %v2219_v27  ;;  %v2217_v50 = vpop.permute.xlu0 %2216  ;;  %v2801_v38 = vor.u32 %v2800_v1, %v2797_v19  ;;  %v2835_v27 = vshrl.u32 %v2479_v32, 16  ;;  %v2782_v49 = vsel %vm8676_vm2, %v2773_v25, %v2781_v23  ;;  %v2783_v55 = vrot.slane %v2781_v23, 4 }
 0x1a9   : > { %2365 = vst.msk [vmem:[#allocation2 + $0x50] sm:$0xf] %vm2344_vm15, %v2217_v50  ;;  %3100 = vrot.lane.b32.xlu1 %v2702_v40, %s7459_s9  ;;  %v2481_v50 = vld [vmem:[%s7518_s23 + $0x9c] sm:$0xf]  ;;  %v2821_v34 = vor.u32 %v2820_v43, %v2817_v39  ;;  %v2875_v19 = vshrl.u32 %v2483_v5, 16  ;;  %v2878_v1 = vshll.u32 %v2483_v5, 16 }
 0x1aa   : > { %3098 = vrot.lane.b32.xlu0 %v2692_v35, %s7459_s9  ;;  %v2838_v35 = vshll.u32 %v2479_v32, 16  ;;  %v2802_v54 = vsel %vm8676_vm2, %v2793_v37, %v2801_v38  ;;  %v2803_v44 = vrot.slane %v2801_v38, 4  ;;  %v2837_v62 = vrot.slane %v2835_v27, 5  ;;  %v2487_v38 = vld [vmem:[%s7518_s23 + $0xb4] sm:$0xf] }
 0x1ab   : > { %v2223_v58 = vpop.permute.xlu1 %2222  ;;  %v2858_v3 = vshll.u32 %v2481_v50, 16  ;;  %v2792_v11 = vsel %vm8676_vm2, %v2783_v55, %v8812_v42  ;;  %v2822_v14 = vsel %vm8676_vm2, %v2813_v56, %v2821_v34  ;;  %v2823_v16 = vrot.slane %v2821_v34, 4 }
 0x1ac   : > { %2368 = vst.msk [vmem:[#allocation2 + $0x5c] sm:$0xf] %vm2344_vm15, %v2223_v58  ;;  %v2221_v6 = vpop.permute.xlu0 %2220  ;;  %v2840_v0 = vrot.slane %v2838_v35, 6  ;;  %v2812_v7 = vsel %vm8676_vm2, %v2803_v44, %v2811_v41  ;;  %v2898_v25 = vshll.u32 %v2485_v17, 16  ;;  %v2905_v32 = vshrl.u32 %v2486_v20, 16 }
 0x1ad   : > { %2367 = vst.msk [vmem:[#allocation2 + $0x58] sm:$0xf] %vm2344_vm15, %v2221_v6  ;;  %3104 = vrot.lane.b32.xlu1 %v2722_v48, %s7459_s9  ;;  %v2845_v48 = vshrl.u32 %v2480_v33, 16  ;;  %v2865_v6 = vshrl.u32 %v2482_v57, 16  ;;  %v2908_v33 = vshll.u32 %v2486_v20, 16  ;;  %v2877_v36 = vrot.slane %v2875_v19, 5 }
 0x1ae   : > { %3102 = vrot.lane.b32.xlu0 %v2712_v2, %s7459_s9  ;;  %v2855_v2 = vshrl.u32 %v2481_v50, 16  ;;  %v2841_v42 = vor.u32 %v2840_v0, %v2837_v62  ;;  %v2880_v37 = vrot.slane %v2878_v1, 6  ;;  %v2907_v51 = vrot.slane %v2905_v32, 5  ;;  %v2489_v44 = vld [vmem:[%s7518_s23 + $0xbc] sm:$0xf] }
 0x1af   : > { %v2227_v18 = vpop.permute.xlu1 %2226  ;;  %v2847_v58 = vrot.slane %v2845_v48, 5  ;;  %v2867_v24 = vrot.slane %v2865_v6, 5 }
 0x1b0   : > { %2370 = vst.msk [vmem:[#allocation2 + $0x64] sm:$0xf] %vm2344_vm15, %v2227_v18  ;;  %v2225_v22 = vpop.permute.xlu0 %2224  ;;  %v2857_v18 = vrot.slane %v2855_v2, 5  ;;  %v2842_v39 = vsel %vm8676_vm2, %v2833_v15, %v2841_v42  ;;  %v2843_v27 = vrot.slane %v2841_v42, 4  ;;  %v2881_v55 = vor.u32 %v2880_v37, %v2877_v36  ;;  %v2490_v2 = vld [vmem:[%s7518_s23 + $0xc0] sm:$0xf] }
 0x1b1   : > { %2369 = vst.msk [vmem:[#allocation2 + $0x60] sm:$0xf] %vm2344_vm15, %v2225_v22  ;;  %3108 = vrot.lane.b32.xlu1 %v2742_v13, %s7459_s9  ;;  %v2885_v13 = vshrl.u32 %v2484_v61, 16  ;;  %v2851_v21 = vor.u32 %v2850_v63, %v2847_v58  ;;  %v2860_v22 = vrot.slane %v2858_v3, 6  ;;  %v2948_v15 = vshll.u32 %v2490_v2, 16 }
 0x1b2   : > { %3106 = vrot.lane.b32.xlu0 %v2732_v8, %s7459_s9  ;;  %v2868_v8 = vshll.u32 %v2482_v57, 16  ;;  %v2925_v57 = vshrl.u32 %v2488_v46, 16  ;;  %v2883_v58 = vrot.slane %v2881_v55, 4  ;;  %v2491_v42 = vld [vmem:[%s7518_s23 + $0xc4] sm:$0xf] }
 0x1b3   : > { %v2231_v28 = vpop.permute.xlu1 %2230  ;;  %v2887_v29 = vrot.slane %v2885_v13, 5  ;;  %v2861_v41 = vor.u32 %v2860_v22, %v2857_v18  ;;  %v2852_v61 = vsel %vm8676_vm2, %v2843_v27, %v2851_v21  ;;  %v2950_v32 = vrot.slane %v2948_v15, 6 }
 0x1b4   : > { %2372 = vst.msk [vmem:[#allocation2 + $0x6c] sm:$0xf] %vm2344_vm15, %v2231_v28  ;;  %v2229_v40 = vpop.permute.xlu0 %2228  ;;  %v2870_v12 = vrot.slane %v2868_v8, 6  ;;  %v2832_v28 = vsel %vm8676_vm2, %v2823_v16, %v2831_v60 }
 0x1b5   : > { %2371 = vst.msk [vmem:[#allocation2 + $0x68] sm:$0xf] %vm2344_vm15, %v2229_v40  ;;  %3112 = vrot.lane.b32.xlu1 %v2762_v30, %s7459_s9  ;;  %v2890_v30 = vrot.slane %v2888_v4, 6  ;;  %v2853_v40 = vrot.slane %v2851_v21, 4  ;;  %v2863_v62 = vrot.slane %v2861_v41, 4  ;;  %v2935_v4 = vshrl.u32 %v2489_v44, 16 }
 0x1b6   : > { %3110 = vrot.lane.b32.xlu0 %v2752_v31, %s7459_s9  ;;  %v2895_v31 = vshrl.u32 %v2485_v17, 16  ;;  %v2871_v43 = vor.u32 %v2870_v12, %v2867_v24  ;;  %v2493_v12 = vld [vmem:[%s7518_s23 + $0xcc] sm:$0xf] }
 0x1b7   : > { %v2235_v45 = vpop.permute.xlu1 %2234  ;;  %v2891_v35 = vor.u32 %v2890_v30, %v2887_v29  ;;  %v2862_v56 = vsel %vm8676_vm2, %v2853_v40, %v2861_v41  ;;  %v2937_v30 = vrot.slane %v2935_v4, 5  ;;  %v2978_v40 = vshll.u32 %v2493_v12, 16 }
 0x1b8   : > { %2374 = vst.msk [vmem:[#allocation2 + $0x74] sm:$0xf] %vm2344_vm15, %v2235_v45  ;;  %v2233_v59 = vpop.permute.xlu0 %2232  ;;  %v2897_v48 = vrot.slane %v2895_v31, 5  ;;  %v2910_v45 = vrot.slane %v2908_v33, 6  ;;  %v2873_v34 = vrot.slane %v2871_v43, 4  ;;  %v2872_v17 = vsel %vm8676_vm2, %v2863_v62, %v2871_v43 }
 0x1b9   : > { %2373 = vst.msk [vmem:[#allocation2 + $0x70] sm:$0xf] %vm2344_vm15, %v2233_v59  ;;  %3116 = vrot.lane.b32.xlu1 %v2782_v49, %s7459_s9  ;;  %v2900_v49 = vrot.slane %v2898_v25, 6  ;;  %v2928_v59 = vshll.u32 %v2488_v46, 16  ;;  %v2893_v0 = vrot.slane %v2891_v35, 4  ;;  %v2892_v21 = vsel %vm8676_vm2, %v2883_v58, %v2891_v35 }
 0x1ba   : > { %3114 = vrot.lane.b32.xlu0 %v2772_v52, %s7459_s9  ;;  %v2915_v52 = vshrl.u32 %v2487_v38, 16  ;;  %v2911_v5 = vor.u32 %v2910_v45, %v2907_v51  ;;  %v2494_v25 = vld [vmem:[%s7518_s23 + $0xd0] sm:$0xf]  ;;  %v2955_v33 = vshrl.u32 %v2491_v42, 16 }
 0x1bb   : > { %v2239_v9 = vpop.permute.xlu1 %2238  ;;  %v2901_v3 = vor.u32 %v2900_v49, %v2897_v48  ;;  %v2930_v13 = vrot.slane %v2928_v59, 6  ;;  %v2985_v43 = vshrl.u32 %v2494_v25, 16  ;;  %v2988_v46 = vshll.u32 %v2494_v25, 16  ;;  %v2495_v48 = vld [vmem:[%s7518_s23 + $0xd4] sm:$0xf] }
 0x1bc   : > { %2376 = vst.msk [vmem:[#allocation2 + $0x7c] sm:$0xf] %vm2344_vm15, %v2239_v9  ;;  %v2237_v10 = vpop.permute.xlu0 %2236  ;;  %v2917_v6 = vrot.slane %v2915_v52, 5  ;;  %v2492_v9 = vld [vmem:[%s7518_s23 + $0xc8] sm:$0xf]  ;;  %v2913_v22 = vrot.slane %v2911_v5, 4 }
 0x1bd   : > { %2375 = vst.msk [vmem:[#allocation2 + $0x78] sm:$0xf] %vm2344_vm15, %v2237_v10  ;;  %3120 = vrot.lane.b32.xlu1 %v2802_v54, %s7459_s9  ;;  %v2918_v54 = vshll.u32 %v2487_v38, 16  ;;  %v2938_v10 = vshll.u32 %v2489_v44, 16  ;;  %v2965_v18 = vshrl.u32 %v2492_v9, 16  ;;  %v2968_v19 = vshll.u32 %v2492_v9, 16 }
 0x1be   : > { %3118 = vrot.lane.b32.xlu0 %v2792_v11, %s7459_s9  ;;  %v2927_v11 = vrot.slane %v2925_v57, 5  ;;  %v2902_v20 = vsel %vm8676_vm2, %v2893_v0, %v2901_v3  ;;  %v2903_v24 = vrot.slane %v2901_v3, 4  ;;  %v2957_v51 = vrot.slane %v2955_v33, 5  ;;  %v2496_v52 = vld [vmem:[%s7518_s23 + $0xd8] sm:$0xf] }
 0x1bf   : > { %v2243_v26 = vpop.permute.xlu1 %2242  ;;  %v2920_v8 = vrot.slane %v2918_v54, 6  ;;  %v2940_v31 = vrot.slane %v2938_v10, 6  ;;  %v2967_v37 = vrot.slane %v2965_v18, 5  ;;  %v2970_v38 = vrot.slane %v2968_v19, 6  ;;  %v2500_v19 = vld [vmem:[%s7518_s23 + $0xe8] sm:$0xf] }
 0x1c0   : > { %2378 = vst.msk [vmem:[#allocation2 + $0x84] sm:$0xf] %vm2344_vm15, %v2243_v26  ;;  %v2241_v23 = vpop.permute.xlu0 %2240  ;;  %v2931_v29 = vor.u32 %v2930_v13, %v2927_v11  ;;  %v2912_v27 = vsel %vm8676_vm2, %v2903_v24, %v2911_v5  ;;  %v2987_v44 = vrot.slane %v2985_v43, 5  ;;  %v2998_v62 = vshll.u32 %v2495_v48, 16  ;;  %v2497_v5 = vld [vmem:[%s7518_s23 + $0xdc] sm:$0xf] }
 0x1c1   : > { %2377 = vst.msk [vmem:[#allocation2 + $0x80] sm:$0xf] %vm2344_vm15, %v2241_v23  ;;  %3124 = vrot.lane.b32.xlu1 %v2822_v14, %s7459_s9  ;;  %v2882_v14 = vsel %vm8676_vm2, %v2873_v34, %v2881_v55  ;;  %v2921_v26 = vor.u32 %v2920_v8, %v2917_v6  ;;  %v2941_v49 = vor.u32 %v2940_v31, %v2937_v30  ;;  %v3005_v0 = vshrl.u32 %v2496_v52, 16  ;;  %v2498_v13 = vld [vmem:[%s7518_s23 + $0xe0] sm:$0xf] }
 0x1c2   : > { %3122 = vrot.lane.b32.xlu0 %v2812_v7, %s7459_s9  ;;  %v2945_v7 = vshrl.u32 %v2490_v2, 16  ;;  %v2933_v35 = vrot.slane %v2931_v29, 4  ;;  %v8906_v57 = vor.u32 %v2970_v38, %v2967_v37  ;;  %v3008_v58 = vshll.u32 %v2496_v52, 16  ;;  %v2501_v37 = vld [vmem:[%s7518_s23 + $0xec] sm:$0xf] }
 0x1c3   : > { %v2247_v47 = vpop.permute.xlu1 %2246  ;;  %v2923_v55 = vrot.slane %v2921_v26, 4  ;;  %v2943_v9 = vrot.slane %v2941_v49, 4  ;;  %v3000_v15 = vrot.slane %v2998_v62, 6  ;;  %v3018_v18 = vshll.u32 %v2497_v5, 16 }
 0x1c4   : > { %2380 = vst.msk [vmem:[#allocation2 + $0x8c] sm:$0xf] %vm2344_vm15, %v2247_v47  ;;  %v2245_v50 = vpop.permute.xlu0 %2244  ;;  %v2947_v23 = vrot.slane %v2945_v7, 5  ;;  %v2922_v47 = vsel %vm8676_vm2, %v2913_v22, %v2921_v26  ;;  %v2942_v2 = vsel %vm8676_vm2, %v2933_v35, %v2941_v49  ;;  %v2973_v11 = vrot.slane %v8906_v57, 4  ;;  %v2499_v26 = vld [vmem:[%s7518_s23 + $0xe4] sm:$0xf] }
 0x1c5   : > { %2379 = vst.msk [vmem:[#allocation2 + $0x88] sm:$0xf] %vm2344_vm15, %v2245_v50  ;;  %3128 = vrot.lane.b32.xlu1 %v2842_v39, %s7459_s9  ;;  %v2975_v39 = vshrl.u32 %v2493_v12, 16  ;;  %v2932_v8 = vsel %vm8676_vm2, %v2923_v55, %v2931_v29  ;;  %v3045_v25 = vshrl.u32 %v2500_v19, 16  ;;  %v3055_v49 = vshrl.u32 %v2501_v37, 16 }
 0x1c6   : > { %3126 = vrot.lane.b32.xlu0 %v2832_v28, %s7459_s9  ;;  %v2958_v28 = vshll.u32 %v2491_v42, 16  ;;  %v2951_v50 = vor.u32 %v2950_v32, %v2947_v23  ;;  %v3015_v42 = vshrl.u32 %v2497_v5, 16  ;;  %v3048_v23 = vshll.u32 %v2500_v19, 16 }
 0x1c7   : > { %v2251_v60 = vpop.permute.xlu1 %2250  ;;  %v2977_v59 = vrot.slane %v2975_v39, 5  ;;  %v3047_v35 = vrot.slane %v3045_v25, 5  ;;  %v3057_v62 = vrot.slane %v3055_v49, 5 }
 0x1c8   : > { %2382 = vst.msk [vmem:[#allocation2 + $0x94] sm:$0xf] %vm2344_vm15, %v2251_v60  ;;  %v2249_v63 = vpop.permute.xlu0 %2248  ;;  %v2960_v45 = vrot.slane %v2958_v28, 6  ;;  %v2990_v60 = vrot.slane %v2988_v46, 6  ;;  %v2952_v24 = vsel %vm8676_vm2, %v2943_v9, %v2951_v50  ;;  %v3017_v28 = vrot.slane %v3015_v42, 5 }
 0x1c9   : > { %2381 = vst.msk [vmem:[#allocation2 + $0x90] sm:$0xf] %vm2344_vm15, %v2249_v63  ;;  %3132 = vrot.lane.b32.xlu1 %v2862_v56, %s7459_s9  ;;  %v2980_v56 = vrot.slane %v2978_v40, 6  ;;  %v2953_v63 = vrot.slane %v2951_v50, 4  ;;  %v3035_v40 = vshrl.u32 %v2499_v26, 16  ;;  %v3058_v50 = vshll.u32 %v2501_v37, 16 }
 0x1ca   : > { %3130 = vrot.lane.b32.xlu0 %v2852_v61, %s7459_s9  ;;  %v2995_v61 = vshrl.u32 %v2495_v48, 16  ;;  %v2961_v3 = vor.u32 %v2960_v45, %v2957_v51  ;;  %v3050_v48 = vrot.slane %v3048_v23, 6 }
 0x1cb   : > { %v2255_v16 = vpop.permute.xlu1 %2254  ;;  %v2981_v10 = vor.u32 %v2980_v56, %v2977_v59  ;;  %v3037_v55 = vrot.slane %v3035_v40, 5  ;;  %v3294_v59 = vld [vmem:[%s8006_s6 + $0x4] sm:$0xf] }
 0x1cc   : > { %2384 = vst.msk [vmem:[#allocation2 + $0x9c] sm:$0xf] %vm2344_vm15, %v2255_v16  ;;  %v2253_v1 = vpop.permute.xlu0 %2252  ;;  %v2997_v7 = vrot.slane %v2995_v61, 5  ;;  %v3007_v16 = vrot.slane %v3005_v0, 5  ;;  %v2963_v12 = vrot.slane %v2961_v3, 4  ;;  %v3051_v61 = vor.u32 %v3050_v48, %v3047_v35 }
 0x1cd   : > { %2383 = vst.msk [vmem:[#allocation2 + $0x98] sm:$0xf] %vm2344_vm15, %v2253_v1  ;;  %3136 = vrot.lane.b32.xlu1 %v2882_v14, %s7459_s9  ;;  %v2991_v14 = vor.u32 %v2990_v60, %v2987_v44  ;;  %v2962_v1 = vsel %vm8676_vm2, %v2953_v63, %v2961_v3  ;;  %v2982_v30 = vsel %vm8676_vm2, %v2973_v11, %v2981_v10  ;;  %v3060_v0 = vrot.slane %v3058_v50, 6 }
 0x1ce   : > { %3134 = vrot.lane.b32.xlu0 %v2872_v17, %s7459_s9  ;;  %v3010_v17 = vrot.slane %v3008_v58, 6  ;;  %v3001_v32 = vor.u32 %v3000_v15, %v2997_v7  ;;  %v2972_v46 = vsel %vm8676_vm2, %v2963_v12, %v8906_v57  ;;  %v3293_v58 = vld [vmem:[%s8006_s6] sm:$0xf]  ;;  %v3311_v63 = vshll.u32 %v3294_v59, 16 }
 0x1cf   : > { %v2259_v36 = vpop.permute.xlu1 %2258  ;;  %v2993_v31 = vrot.slane %v2991_v14, 4  ;;  %v3053_v15 = vrot.slane %v3051_v61, 4 }
 0x1d0   : > { %2386 = vst.msk [vmem:[#allocation2 + $0xa4] sm:$0xf] %vm2344_vm15, %v2259_v36  ;;  %v2257_v41 = vpop.permute.xlu0 %2256  ;;  %v3011_v33 = vor.u32 %v3010_v17, %v3007_v16  ;;  %v3020_v36 = vrot.slane %v3018_v18, 6  ;;  %v3003_v44 = vrot.slane %v3001_v32, 4  ;;  %v3061_v16 = vor.u32 %v3060_v0, %v3057_v62  ;;  %v3371_v0 = vld [vmem:[%s7518_s23 + $0x10] sm:$0xc] }
 0x1d1   : > { %2385 = vst.msk [vmem:[#allocation2 + $0xa0] sm:$0xf] %vm2344_vm15, %v2257_v41  ;;  %3140 = vrot.lane.b32.xlu1 %v2902_v20, %s7459_s9  ;;  %v3025_v20 = vshrl.u32 %v2498_v13, 16  ;;  %v3038_v41 = vshll.u32 %v2499_v26, 16  ;;  %v3002_v51 = vsel %vm8676_vm2, %v2993_v31, %v3001_v32  ;;  %v3313_v42 = vrot.slane %v3311_v63, 6 }
 0x1d2   : > { %3138 = vrot.lane.b32.xlu0 %v2892_v21, %s7459_s9  ;;  %v3028_v21 = vshll.u32 %v2498_v13, 16  ;;  %v3013_v45 = vrot.slane %v3011_v33, 4  ;;  %v3021_v52 = vor.u32 %v3020_v36, %v3017_v28  ;;  %v3012_v11 = vsel %vm8676_vm2, %v3003_v44, %v3011_v33 }
 0x1d3   : > { %v2263_v54 = vpop.permute.xlu1 %2262  ;;  %v3027_v38 = vrot.slane %v3025_v20, 5  ;;  %v3040_v57 = vrot.slane %v3038_v41, 6  ;;  %v3062_v25 = vsel %vm8676_vm2, %v3053_v15, %v3061_v16 }
 0x1d4   : > { %2388 = vst.msk [vmem:[#allocation2 + $0xac] sm:$0xf] %vm2344_vm15, %v2263_v54  ;;  %v2261_v34 = vpop.permute.xlu0 %2260  ;;  %v3030_v39 = vrot.slane %v3028_v21, 6  ;;  %v3022_v3 = vsel %vm8676_vm2, %v3013_v45, %v3021_v52  ;;  %v3023_v13 = vrot.slane %v3021_v52, 4  ;;  %v3372_v45 = vld [vmem:[%s7518_s23 + $0x14] sm:$0xf] }
 0x1d5   : > { %2387 = vst.msk [vmem:[#allocation2 + $0xa8] sm:$0xf] %vm2344_vm15, %v2261_v34  ;;  %3144 = vrot.lane.b32.xlu1 %v2922_v47, %s7459_s9  ;;  %v2983_v47 = vrot.slane %v2981_v10, 4  ;;  %v3302_v10 = vshll.u32 %v3293_v58, 16 }
 0x1d6   : > { %3142 = vrot.lane.b32.xlu0 %v2912_v27, %s7459_s9  ;;  %v3031_v54 = vor.u32 %v3030_v39, %v3027_v38 }
 0x1d7   : > { %v2267_v6 = vpop.permute.xlu1 %2266  ;;  %v2992_v34 = vsel %vm8676_vm2, %v2983_v47, %v2991_v14  ;;  %v3296_v14 = vld [vmem:[%s8006_s6 + $0xc] sm:$0xf] }
 0x1d8   : > { %2390 = vst.msk [vmem:[#allocation2 + $0xb4] sm:$0xf] %vm2344_vm15, %v2267_v6  ;;  %v2265_v4 = vpop.permute.xlu0 %2264  ;;  %v3033_v5 = vrot.slane %v3031_v54, 4  ;;  %v3041_v6 = vor.u32 %v3040_v57, %v3037_v55  ;;  %v3328_v20 = vshrl.u32 %v3296_v14, 16  ;;  %v3331_v21 = vshll.u32 %v3296_v14, 16 }
 0x1d9   : > { %2389 = vst.msk [vmem:[#allocation2 + $0xb0] sm:$0xf] %vm2344_vm15, %v2265_v4  ;;  %3148 = vrot.lane.b32.xlu1 %v2942_v2, %s7459_s9  ;;  %v3308_v2 = vshrl.u32 %v3294_v59, 16  ;;  %v3299_v4 = vshrl.u32 %v3293_v58, 16  ;;  %v3488_v59 = vrot.slane %v3372_v45, 6 }
 0x1da   : > { %3146 = vrot.lane.b32.xlu0 %v2932_v8, %s7459_s9  ;;  %v3295_v8 = vld [vmem:[%s8006_s6 + $0x8] sm:$0xf]  ;;  %v3043_v12 = vrot.slane %v3041_v6, 4  ;;  %v3330_v28 = vrot.slane %v3328_v20, 5  ;;  %v3333_v36 = vrot.slane %v3331_v21, 6 }
 0x1db   : > { %v2271_v22 = vpop.permute.xlu1 %2270  ;;  %v3310_v17 = vrot.slane %v3308_v2, 5  ;;  %v3318_v18 = vshrl.u32 %v3295_v8, 16  ;;  %v3321_v19 = vshll.u32 %v3295_v8, 16  ;;  %v3301_v26 = vrot.slane %v3299_v4, 5 }
 0x1dc   : > { %2392 = vst.msk [vmem:[#allocation2 + $0xbc] sm:$0xf] %vm2344_vm15, %v2271_v22  ;;  %v2269_v29 = vpop.permute.xlu0 %2268  ;;  %v3052_v40 = vsel %vm8676_vm2, %v3043_v12, %v3051_v61  ;;  %v3334_v35 = vor.u32 %v3333_v36, %v3330_v28  ;;  %v3374_v61 = vld [vmem:[%s7518_s23 + $0x1c] sm:$0xf]  ;;  %v3490_v2 = vrot.slane %v3488_v59, 4 }
 0x1dd   : > { %2391 = vst.msk [vmem:[#allocation2 + $0xb8] sm:$0xf] %vm2344_vm15, %v2269_v29  ;;  %3152 = vrot.lane.b32.xlu1 %v2962_v1, %s7459_s9  ;;  %v3042_v1 = vsel %vm8676_vm2, %v3033_v5, %v3041_v6  ;;  %v3304_v29 = vrot.slane %v3302_v10, 6  ;;  %v3314_v23 = vor.u32 %v3313_v42, %v3310_v17  ;;  %v3320_v32 = vrot.slane %v3318_v18, 5  ;;  %v3377_v42 = vld [vmem:[%s7518_s23 + $0x28] sm:$0xf] }
 0x1de   : > { %3150 = vrot.lane.b32.xlu0 %v2952_v24, %s7459_s9  ;;  %v3032_v24 = vsel %vm8676_vm2, %v3023_v13, %v3031_v54  ;;  %v3323_v33 = vrot.slane %v3321_v19, 6  ;;  %v3336_v55 = vrot.slane %v3334_v35, 4  ;;  %v3376_v13 = vld [vmem:[%s7518_s23 + $0x24] sm:$0xf]  ;;  %v3378_v18 = vld [vmem:[%s7518_s23 + $0x2c] sm:$0xf] }
 0x1df   : > { %v2275_v43 = vpop.permute.xlu1 %2274  ;;  %v3305_v41 = vor.u32 %v3304_v29, %v3301_v26  ;;  %v3316_v47 = vrot.slane %v3314_v23, 4  ;;  %v3503_v21 = vrot.slane %v3377_v42, 6  ;;  %v3379_v29 = vld [vmem:[%s7518_s23 + $0x30] sm:$0xf] }
 0x1e0   : > { %2394 = vst.msk [vmem:[#allocation2 + $0xc4] sm:$0xf] %vm2344_vm15, %v2275_v43  ;;  %v2273_v27 = vpop.permute.xlu0 %2272 }
 0x1e1   : > { %2393 = vst.msk [vmem:[#allocation2 + $0xc0] sm:$0xf] %vm2344_vm15, %v2273_v27  ;;  %3156 = vrot.lane.b32.xlu1 %v2982_v30, %s7459_s9  ;;  %v3297_v30 = vld [vmem:[%s8006_s6 + $0x10] sm:$0x3]  ;;  %v3324_v27 = vor.u32 %v3323_v33, %v3320_v32  ;;  %v3509_v32 = vrot.slane %v3379_v29, 6 }
 0x1e2   : > { %3154 = vrot.lane.b32.xlu0 %v2972_v46, %s7459_s9  ;;  %v3338_v37 = vshrl.u32 %v3297_v30, 16  ;;  %v3341_v38 = vshll.u32 %v3297_v30, 16  ;;  %v3063_v46 = vrot.slane %v3061_v16, 4  ;;  %v3380_v30 = vld [vmem:[%s7518_s23 + $0x34] sm:$0xf] }
 0x1e3   : > { %v2279_v56 = vpop.permute.xlu1 %2278  ;;  %v3325_v54 = vsel %vm8676_vm2, %v3316_v47, %v3324_v27  ;;  %v3326_v44 = vrot.slane %v3324_v27, 4  ;;  %v3512_v33 = vrot.slane %v3380_v30, 6 }
 0x1e4   : > { %2396 = vst.msk [vmem:[#allocation2 + $0xcc] sm:$0xf] %vm2344_vm15, %v2279_v56  ;;  %v2277_v60 = vpop.permute.xlu0 %2276  ;;  %v3340_v48 = vrot.slane %v3338_v37, 5  ;;  %v3343_v49 = vrot.slane %v3341_v38, 6  ;;  %v3505_v37 = vrot.slane %v3503_v21, 4 }
 0x1e5   : > { %2395 = vst.msk [vmem:[#allocation2 + $0xc8] sm:$0xf] %vm2344_vm15, %v2277_v60  ;;  %3160 = vrot.lane.b32.xlu1 %v3002_v51, %s7459_s9  ;;  %v3306_v51 = vrot.slane %v3305_v41, 4  ;;  %v3373_v60 = vld [vmem:[%s7518_s23 + $0x18] sm:$0xf]  ;;  %v3335_v6 = vsel %vm8676_vm2, %v3326_v44, %v3334_v35 }
 0x1e6   : > { %3158 = vrot.lane.b32.xlu0 %v2992_v34, %s7459_s9  ;;  %v3344_v57 = vor.u32 %v3343_v49, %v3340_v48  ;;  %v3491_v63 = vrot.slane %v3373_v60, 6  ;;  %v3381_v38 = vld [vmem:[%s7518_s23 + $0x38] sm:$0xf]  ;;  %v3511_v48 = vrot.slane %v3509_v32, 4  ;;  %v3383_v49 = vld [vmem:[%s7518_s23 + $0x40] sm:$0xf] }
 0x1e7   : > { %v2283_v9 = vpop.permute.xlu1 %2282  ;;  %v3315_v34 = vsel %vm8676_vm2, %v3306_v51, %v3314_v23  ;;  %v3386_v44 = vld [vmem:[%s7518_s23 + $0x4c] sm:$0xf] }
 0x1e8   : > { %2398 = vst.msk [vmem:[#allocation2 + $0xd4] sm:$0xf] %vm2344_vm15, %v2283_v9  ;;  %v2281_v7 = vpop.permute.xlu0 %2280  ;;  %v3345_v58 = vsel %vm8676_vm2, %v3336_v55, %v3344_v57  ;;  %v7057_v9 = vrot.slane %v3371_v0, 10  ;;  %v3492_v53 = vsel %vm9000_vm8, %v3490_v2, %v3491_v63  ;;  %v3493_v17 = vrot.slane %v3491_v63, 4 }
 0x1e9   : > { %2397 = vst.msk [vmem:[#allocation2 + $0xd0] sm:$0xf] %vm2344_vm15, %v2281_v7  ;;  %3164 = vrot.lane.b32.xlu1 %v3022_v3, %s7459_s9  ;;  %v3494_v3 = vrot.slane %v3374_v61, 6  ;;  %v3500_v7 = vrot.slane %v3376_v13, 6 }
 0x1ea   : > { %3162 = vrot.lane.b32.xlu0 %v3012_v11, %s7459_s9  ;;  %v3375_v11 = vld [vmem:[%s7518_s23 + $0x20] sm:$0xf]  ;;  %v3489_v16 = vsel %vm9000_vm8, %v7057_v9, %v3488_v59  ;;  %v3513_v59 = vsel %vm9000_vm8, %v3511_v48, %v3512_v33 }
 0x1eb   : > { %v2287_v22 = vpop.permute.xlu1 %2286  ;;  %v3496_v10 = vrot.slane %v3494_v3, 4  ;;  %v3497_v14 = vrot.slane %v3375_v11, 6  ;;  %v3502_v20 = vrot.slane %v3500_v7, 4  ;;  %v3495_v12 = vsel %vm9000_vm8, %v3493_v17, %v3494_v3 }
 0x1ec   : > { %2401 = vst.msk [vmem:[#allocation2 + $0xdc] sm:$0x7] %vm2400_vm3, %v2287_v22  ;;  %v2285_v31 = vpop.permute.xlu0 %2284  ;;  %v3506_v22 = vrot.slane %v3378_v18, 6  ;;  %vm5501_vm3 = vcmask 1040384  }
 0x1ed   : > { %2399 = vst.msk [vmem:[#allocation2 + $0xd8] sm:$0xf] %vm2344_vm15, %v2285_v31  ;;  %3168 = vrot.lane.b32.xlu1 %v3042_v1, %s7459_s9  ;;  %v3498_v1 = vsel %vm9000_vm8, %v3496_v10, %v3497_v14  ;;  %v3499_v26 = vrot.slane %v3497_v14, 4 }
 0x1ee   : > { %3166 = vrot.lane.b32.xlu0 %v3032_v24, %s7459_s9  ;;  %v3508_v23 = vrot.slane %v3506_v22, 4  ;;  %v3507_v35 = vsel %vm9000_vm8, %v3505_v37, %v3506_v22 }
 0x1ef   : > { %v2428_v39 = vpop.permute.xlu1 %2427  ;;  %v3501_v36 = vsel %vm9000_vm8, %v3499_v26, %v3500_v7 }
 0x1f0   : > { %2442 = vst.msk [vmem:[#allocation2 + $0xe0] sm:$0xf] %vm2344_vm15, %v2428_v39  ;;  %v2426_v43 = vpop.permute.xlu0 %2425  ;;  %v3382_v39 = vld [vmem:[%s7518_s23 + $0x3c] sm:$0xf] }
 0x1f1   : > { %2441 = vst.msk [vmem:[#allocation2 + $0xdc] sm:$0x8] %vm2440_vm4, %v2426_v43  ;;  %3172 = vrot.lane.b32.xlu1 %v3062_v25, %s7459_s9  ;;  %v3504_v25 = vsel %vm9000_vm8, %v3502_v20, %v3503_v21  ;;  %v3514_v43 = vrot.slane %v3512_v33, 4  ;;  %v3518_v47 = vrot.slane %v3382_v39, 6  ;;  %vm5502_vm4 = vcmask 1044484  }
 0x1f2   : > { %3170 = vrot.lane.b32.xlu0 %v3052_v40, %s7459_s9 }
 0x1f3   : > { %v2432_v50 = vpop.permute.xlu1 %2431 }
 0x1f4   : > { %2444 = vst.msk [vmem:[#allocation2 + $0xe8] sm:$0xf] %vm2344_vm15, %v2432_v50  ;;  %v2430_v52 = vpop.permute.xlu0 %2429  ;;  %v3384_v50 = vld [vmem:[%s7518_s23 + $0x44] sm:$0xf] }
 0x1f5   : > { %2443 = vst.msk [vmem:[#allocation2 + $0xe4] sm:$0xf] %vm2344_vm15, %v2430_v52  ;;  %3346 = vrot.lane.b32.xlu1 %v3305_v41, %s7459_s9  ;;  %v3510_v41 = vsel %vm9000_vm8, %v3508_v23, %v3509_v32  ;;  %v3520_v52 = vrot.slane %v3518_v47, 4  ;;  %v3524_v55 = vrot.slane %v3384_v50, 6 }
 0x1f6   : > { %3174 = vrot.lane.b32.xlu0 %v3063_v46, %s7459_s9  ;;  %v3515_v46 = vrot.slane %v3381_v38, 6 }
 0x1f7   : > { %v3065_v56 = vpop.permute.xlu1 %3064 }
 0x1f8   : > { %3233 = vst.msk [vmem:[#allocation2] sm:$0xf] %vm3232_vm5, %v3065_v56  ;;  %v2434_v62 = vpop.permute.xlu0 %2433  ;;  %v3516_v45 = vsel %vm9000_vm8, %v3514_v43, %v3515_v46  ;;  %v3517_v56 = vrot.slane %v3515_v46, 4 }
 0x1f9   : > { %2445 = vst.msk [vmem:[#allocation2 + $0xec] sm:$0xf] %vm2344_vm15, %v2434_v62  ;;  %3350 = vrot.lane.b32.xlu1 %v3325_v54, %s7459_s9  ;;  %v3521_v54 = vrot.slane %v3383_v49, 6  ;;  %v3526_v62 = vrot.slane %v3524_v55, 4  ;;  %vm4524_vm15 = vsmask.f32 1280 }
 0x1fa   : > { %3348 = vrot.lane.b32.xlu0 %v3315_v34, %s7459_s9  ;;  %v3385_v34 = vld [vmem:[%s7518_s23 + $0x48] sm:$0xf]  ;;  %v3519_v63 = vsel %vm9000_vm8, %v3517_v56, %v3518_v47  ;;  %vm9408_vm2 = vmor %vm4524_vm15, %vm4525_vm0 }
 0x1fb   : > { %v3069_v5 = vpop.permute.xlu1 %3068  ;;  %v3522_v61 = vsel %vm9000_vm8, %v3520_v52, %v3521_v54  ;;  %v3527_v0 = vrot.slane %v3385_v34, 6  ;;  %v3523_v3 = vrot.slane %v3521_v54, 4 }
 0x1fc   : > { %3235 = vst.msk [vmem:[#allocation2 + $0x8] sm:$0xf] %vm3232_vm5, %v3069_v5  ;;  %v3067_v4 = vpop.permute.xlu0 %3066  ;;  %v3387_v5 = vld [vmem:[%s7518_s23 + $0x50] sm:$0xf] }
 0x1fd   : > { %3234 = vst.msk [vmem:[#allocation2 + $0x4] sm:$0xf] %vm3232_vm5, %v3067_v4  ;;  %3354 = vrot.lane.b32.xlu1 %v3345_v58, %s7459_s9  ;;  %v3530_v58 = vrot.slane %v3386_v44, 6  ;;  %v3528_v11 = vsel %vm9000_vm8, %v3526_v62, %v3527_v0  ;;  %v3533_v4 = vrot.slane %v3387_v5, 6  ;;  %v3525_v14 = vsel %vm9000_vm8, %v3523_v3, %v3524_v55 }
 0x1fe   : > { %3352 = vrot.lane.b32.xlu0 %v3335_v6, %s7459_s9  ;;  %v3388_v6 = vld [vmem:[%s7518_s23 + $0x54] sm:$0xf]  ;;  %v3529_v7 = vrot.slane %v3527_v0, 4 }
 0x1ff   : > { %v3073_v15 = vpop.permute.xlu1 %3072  ;;  %v3532_v13 = vrot.slane %v3530_v58, 4  ;;  %v3535_v22 = vrot.slane %v3533_v4, 4 }
 0x200   : > { %3237 = vst.msk [vmem:[#allocation2 + $0x10] sm:$0xf] %vm3232_vm5, %v3073_v15  ;;  %v3071_v19 = vpop.permute.xlu0 %3070  ;;  %v3389_v15 = vld [vmem:[%s7518_s23 + $0x58] sm:$0xf]  ;;  %v3531_v21 = vsel %vm9000_vm8, %v3529_v7, %v3530_v58 }
 0x201   : > { %3236 = vst.msk [vmem:[#allocation2 + $0xc] sm:$0xf] %vm3232_vm5, %v3071_v19  ;;  %3655 = vrot.lane.b32.xlu1 %v3492_v53, %s7460_s10  ;;  %v3536_v53 = vrot.slane %v3388_v6, 6  ;;  %v3534_v42 = vsel %vm9000_vm8, %v3532_v13, %v3533_v4  ;;  %v3539_v19 = vrot.slane %v3389_v15, 6 }
 0x202   : > { %3653 = vrot.lane.b32.xlu0 %v3489_v16, %s7460_s10  ;;  %v3390_v16 = vld [vmem:[%s7518_s23 + $0x5c] sm:$0xf] }
 0x203   : > { %v3077_v24 = vpop.permute.xlu1 %3076  ;;  %v3538_v18 = vrot.slane %v3536_v53, 4  ;;  %v3537_v32 = vsel %vm9000_vm8, %v3535_v22, %v3536_v53  ;;  %v3541_v33 = vrot.slane %v3539_v19, 4 }
 0x204   : > { %3239 = vst.msk [vmem:[#allocation2 + $0x18] sm:$0xf] %vm3232_vm5, %v3077_v24  ;;  %v3075_v31 = vpop.permute.xlu0 %3074  ;;  %v3391_v24 = vld [vmem:[%s7518_s23 + $0x60] sm:$0xf] }
 0x205   : > { %3238 = vst.msk [vmem:[#allocation2 + $0x14] sm:$0xf] %vm3232_vm5, %v3075_v31  ;;  %3659 = vrot.lane.b32.xlu1 %v3498_v1, %s7460_s10  ;;  %v3542_v1 = vrot.slane %v3390_v16, 6  ;;  %v3540_v29 = vsel %vm9000_vm8, %v3538_v18, %v3539_v19  ;;  %v3545_v31 = vrot.slane %v3391_v24, 6 }
 0x206   : > { %3657 = vrot.lane.b32.xlu0 %v3495_v12, %s7460_s10  ;;  %v3392_v12 = vld [vmem:[%s7518_s23 + $0x64] sm:$0xf] }
 0x207   : > { %v3081_v28 = vpop.permute.xlu1 %3080  ;;  %v3544_v30 = vrot.slane %v3542_v1, 4  ;;  %v3543_v46 = vsel %vm9000_vm8, %v3541_v33, %v3542_v1  ;;  %v3547_v47 = vrot.slane %v3545_v31, 4 }
 0x208   : > { %3241 = vst.msk [vmem:[#allocation2 + $0x20] sm:$0xf] %vm3232_vm5, %v3081_v28  ;;  %v3079_v40 = vpop.permute.xlu0 %3078  ;;  %v3393_v28 = vld [vmem:[%s7518_s23 + $0x68] sm:$0xf] }
 0x209   : > { %3240 = vst.msk [vmem:[#allocation2 + $0x1c] sm:$0xf] %vm3232_vm5, %v3079_v40  ;;  %3663 = vrot.lane.b32.xlu1 %v3504_v25, %s7460_s10  ;;  %v3548_v25 = vrot.slane %v3392_v12, 6  ;;  %v3546_v38 = vsel %vm9000_vm8, %v3544_v30, %v3545_v31  ;;  %v3551_v40 = vrot.slane %v3393_v28, 6 }
 0x20a   : > { %3661 = vrot.lane.b32.xlu0 %v3501_v36, %s7460_s10  ;;  %v3394_v36 = vld [vmem:[%s7518_s23 + $0x6c] sm:$0xf] }
 0x20b   : > { %v3085_v27 = vpop.permute.xlu1 %3084  ;;  %v3550_v39 = vrot.slane %v3548_v25, 4  ;;  %v3549_v54 = vsel %vm9000_vm8, %v3547_v47, %v3548_v25  ;;  %v3553_v55 = vrot.slane %v3551_v40, 4 }
 0x20c   : > { %3243 = vst.msk [vmem:[#allocation2 + $0x28] sm:$0xf] %vm3232_vm5, %v3085_v27  ;;  %v3083_v51 = vpop.permute.xlu0 %3082  ;;  %v3395_v27 = vld [vmem:[%s7518_s23 + $0x70] sm:$0xf] }
 0x20d   : > { %3242 = vst.msk [vmem:[#allocation2 + $0x24] sm:$0xf] %vm3232_vm5, %v3083_v51  ;;  %3667 = vrot.lane.b32.xlu1 %v3510_v41, %s7460_s10  ;;  %v3554_v41 = vrot.slane %v3394_v36, 6  ;;  %v3552_v49 = vsel %vm9000_vm8, %v3550_v39, %v3551_v40  ;;  %v3557_v51 = vrot.slane %v3395_v27, 6 }
 0x20e   : > { %3665 = vrot.lane.b32.xlu0 %v3507_v35, %s7460_s10  ;;  %v3396_v35 = vld [vmem:[%s7518_s23 + $0x74] sm:$0xf] }
 0x20f   : > { %v3089_v57 = vpop.permute.xlu1 %3088  ;;  %v3556_v50 = vrot.slane %v3554_v41, 4  ;;  %v3555_v0 = vsel %vm9000_vm8, %v3553_v55, %v3554_v41  ;;  %v3559_v58 = vrot.slane %v3557_v51, 4 }
 0x210   : > { %3245 = vst.msk [vmem:[#allocation2 + $0x30] sm:$0xf] %vm3232_vm5, %v3089_v57  ;;  %v3087_v60 = vpop.permute.xlu0 %3086  ;;  %v3397_v57 = vld [vmem:[%s7518_s23 + $0x78] sm:$0xf] }
 0x211   : > { %3244 = vst.msk [vmem:[#allocation2 + $0x2c] sm:$0xf] %vm3232_vm5, %v3087_v60  ;;  %3671 = vrot.lane.b32.xlu1 %v3516_v45, %s7460_s10  ;;  %v3560_v45 = vrot.slane %v3396_v35, 6  ;;  %v3558_v34 = vsel %vm9000_vm8, %v3556_v50, %v3557_v51  ;;  %v3563_v60 = vrot.slane %v3397_v57, 6 }
 0x212   : > { %3669 = vrot.lane.b32.xlu0 %v3513_v59, %s7460_s10  ;;  %v3398_v59 = vld [vmem:[%s7518_s23 + $0x7c] sm:$0xf] }
 0x213   : > { %v3093_v2 = vpop.permute.xlu1 %3092  ;;  %v3562_v44 = vrot.slane %v3560_v45, 4  ;;  %v3561_v4 = vsel %vm9000_vm8, %v3559_v58, %v3560_v45  ;;  %v3565_v53 = vrot.slane %v3563_v60, 4 }
 0x214   : > { %3247 = vst.msk [vmem:[#allocation2 + $0x38] sm:$0xf] %vm3232_vm5, %v3093_v2  ;;  %v3091_v9 = vpop.permute.xlu0 %3090  ;;  %v3399_v2 = vld [vmem:[%s7518_s23 + $0x80] sm:$0xf] }
 0x215   : > { %3246 = vst.msk [vmem:[#allocation2 + $0x34] sm:$0xf] %vm3232_vm5, %v3091_v9  ;;  %3675 = vrot.lane.b32.xlu1 %v3522_v61, %s7460_s10  ;;  %v3566_v61 = vrot.slane %v3398_v59, 6  ;;  %v3564_v5 = vsel %vm9000_vm8, %v3562_v44, %v3563_v60  ;;  %v3569_v9 = vrot.slane %v3399_v2, 6 }
 0x216   : > { %3673 = vrot.lane.b32.xlu0 %v3519_v63, %s7460_s10  ;;  %v3400_v63 = vld [vmem:[%s7518_s23 + $0x84] sm:$0xf] }
 0x217   : > { %v3097_v10 = vpop.permute.xlu1 %3096  ;;  %v3568_v6 = vrot.slane %v3566_v61, 4  ;;  %v3567_v19 = vsel %vm9000_vm8, %v3565_v53, %v3566_v61  ;;  %v3571_v1 = vrot.slane %v3569_v9, 4 }
 0x218   : > { %3249 = vst.msk [vmem:[#allocation2 + $0x40] sm:$0xf] %vm3232_vm5, %v3097_v10  ;;  %v3095_v17 = vpop.permute.xlu0 %3094  ;;  %v3401_v10 = vld [vmem:[%s7518_s23 + $0x88] sm:$0xf] }
 0x219   : > { %3248 = vst.msk [vmem:[#allocation2 + $0x3c] sm:$0xf] %vm3232_vm5, %v3095_v17  ;;  %3679 = vrot.lane.b32.xlu1 %v3528_v11, %s7460_s10  ;;  %v3572_v11 = vrot.slane %v3400_v63, 6  ;;  %v3570_v15 = vsel %vm9000_vm8, %v3568_v6, %v3569_v9  ;;  %v3575_v17 = vrot.slane %v3401_v10, 6 }
 0x21a   : > { %3677 = vrot.lane.b32.xlu0 %v3525_v14, %s7460_s10  ;;  %v3402_v14 = vld [vmem:[%s7518_s23 + $0x8c] sm:$0xf] }
 0x21b   : > { %v3101_v20 = vpop.permute.xlu1 %3100  ;;  %v3574_v16 = vrot.slane %v3572_v11, 4  ;;  %v3573_v31 = vsel %vm9000_vm8, %v3571_v1, %v3572_v11  ;;  %v3577_v25 = vrot.slane %v3575_v17, 4 }
 0x21c   : > { %3251 = vst.msk [vmem:[#allocation2 + $0x48] sm:$0xf] %vm3232_vm5, %v3101_v20  ;;  %v3099_v26 = vpop.permute.xlu0 %3098  ;;  %v3403_v20 = vld [vmem:[%s7518_s23 + $0x90] sm:$0xf] }
 0x21d   : > { %3250 = vst.msk [vmem:[#allocation2 + $0x44] sm:$0xf] %vm3232_vm5, %v3099_v26  ;;  %3683 = vrot.lane.b32.xlu1 %v3534_v42, %s7460_s10  ;;  %v3578_v42 = vrot.slane %v3402_v14, 6  ;;  %v3576_v24 = vsel %vm9000_vm8, %v3574_v16, %v3575_v17  ;;  %v3581_v26 = vrot.slane %v3403_v20, 6 }
 0x21e   : > { %3681 = vrot.lane.b32.xlu0 %v3531_v21, %s7460_s10  ;;  %v3404_v21 = vld [vmem:[%s7518_s23 + $0x94] sm:$0xf] }
 0x21f   : > { %v3105_v23 = vpop.permute.xlu1 %3104  ;;  %v3580_v12 = vrot.slane %v3578_v42, 4  ;;  %v3579_v40 = vsel %vm9000_vm8, %v3577_v25, %v3578_v42  ;;  %v3583_v41 = vrot.slane %v3581_v26, 4 }
 0x220   : > { %3253 = vst.msk [vmem:[#allocation2 + $0x50] sm:$0xf] %vm3232_vm5, %v3105_v23  ;;  %v3103_v37 = vpop.permute.xlu0 %3102  ;;  %v3405_v23 = vld [vmem:[%s7518_s23 + $0x98] sm:$0xf] }
 0x221   : > { %3252 = vst.msk [vmem:[#allocation2 + $0x4c] sm:$0xf] %vm3232_vm5, %v3103_v37  ;;  %3687 = vrot.lane.b32.xlu1 %v3540_v29, %s7460_s10  ;;  %v3584_v29 = vrot.slane %v3404_v21, 6  ;;  %v3582_v28 = vsel %vm9000_vm8, %v3580_v12, %v3581_v26  ;;  %v3587_v37 = vrot.slane %v3405_v23, 6 }
 0x222   : > { %3685 = vrot.lane.b32.xlu0 %v3537_v32, %s7460_s10  ;;  %v3406_v32 = vld [vmem:[%s7518_s23 + $0x9c] sm:$0xf] }
 0x223   : > { %v3109_v43 = vpop.permute.xlu1 %3108  ;;  %v3586_v36 = vrot.slane %v3584_v29, 4  ;;  %v3585_v51 = vsel %vm9000_vm8, %v3583_v41, %v3584_v29  ;;  %v3589_v45 = vrot.slane %v3587_v37, 4 }
 0x224   : > { %3255 = vst.msk [vmem:[#allocation2 + $0x58] sm:$0xf] %vm3232_vm5, %v3109_v43  ;;  %v3107_v48 = vpop.permute.xlu0 %3106  ;;  %v3407_v43 = vld [vmem:[%s7518_s23 + $0xa0] sm:$0xf] }
 0x225   : > { %3254 = vst.msk [vmem:[#allocation2 + $0x54] sm:$0xf] %vm3232_vm5, %v3107_v48  ;;  %3691 = vrot.lane.b32.xlu1 %v3546_v38, %s7460_s10  ;;  %v3590_v38 = vrot.slane %v3406_v32, 6  ;;  %v3588_v27 = vsel %vm9000_vm8, %v3586_v36, %v3587_v37  ;;  %v3593_v48 = vrot.slane %v3407_v43, 6 }
 0x226   : > { %3689 = vrot.lane.b32.xlu0 %v3543_v46, %s7460_s10  ;;  %v3408_v46 = vld [vmem:[%s7518_s23 + $0xa4] sm:$0xf] }
 0x227   : > { %v3113_v52 = vpop.permute.xlu1 %3112  ;;  %v3592_v35 = vrot.slane %v3590_v38, 4  ;;  %v3591_v60 = vsel %vm9000_vm8, %v3589_v45, %v3590_v38  ;;  %v3595_v61 = vrot.slane %v3593_v48, 4 }
 0x228   : > { %3257 = vst.msk [vmem:[#allocation2 + $0x60] sm:$0xf] %vm3232_vm5, %v3113_v52  ;;  %v3111_v56 = vpop.permute.xlu0 %3110  ;;  %v3409_v52 = vld [vmem:[%s7518_s23 + $0xa8] sm:$0xf] }
 0x229   : > { %3256 = vst.msk [vmem:[#allocation2 + $0x5c] sm:$0xf] %vm3232_vm5, %v3111_v56  ;;  %3695 = vrot.lane.b32.xlu1 %v3552_v49, %s7460_s10  ;;  %v3596_v49 = vrot.slane %v3408_v46, 6  ;;  %v3594_v57 = vsel %vm9000_vm8, %v3592_v35, %v3593_v48  ;;  %v3599_v56 = vrot.slane %v3409_v52, 6 }
 0x22a   : > { %3693 = vrot.lane.b32.xlu0 %v3549_v54, %s7460_s10  ;;  %v3410_v54 = vld [vmem:[%s7518_s23 + $0xac] sm:$0xf] }
 0x22b   : > { %v3117_v62 = vpop.permute.xlu1 %3116  ;;  %v3598_v59 = vrot.slane %v3596_v49, 4  ;;  %v3597_v9 = vsel %vm9000_vm8, %v3595_v61, %v3596_v49  ;;  %v3601_v11 = vrot.slane %v3599_v56, 4 }
 0x22c   : > { %3259 = vst.msk [vmem:[#allocation2 + $0x68] sm:$0xf] %vm3232_vm5, %v3117_v62  ;;  %v3115_v3 = vpop.permute.xlu0 %3114  ;;  %v3411_v62 = vld [vmem:[%s7518_s23 + $0xb0] sm:$0xf] }
 0x22d   : > { %3258 = vst.msk [vmem:[#allocation2 + $0x64] sm:$0xf] %vm3232_vm5, %v3115_v3  ;;  %3699 = vrot.lane.b32.xlu1 %v3558_v34, %s7460_s10  ;;  %v3602_v34 = vrot.slane %v3410_v54, 6  ;;  %v3600_v2 = vsel %vm9000_vm8, %v3598_v59, %v3599_v56  ;;  %v3605_v3 = vrot.slane %v3411_v62, 6 }
 0x22e   : > { %3697 = vrot.lane.b32.xlu0 %v3555_v0, %s7460_s10  ;;  %v3412_v0 = vld [vmem:[%s7518_s23 + $0xb4] sm:$0xf] }
 0x22f   : > { %v3121_v13 = vpop.permute.xlu1 %3120  ;;  %v3604_v63 = vrot.slane %v3602_v34, 4  ;;  %v3603_v17 = vsel %vm9000_vm8, %v3601_v11, %v3602_v34  ;;  %v3607_v42 = vrot.slane %v3605_v3, 4 }
 0x230   : > { %3261 = vst.msk [vmem:[#allocation2 + $0x70] sm:$0xf] %vm3232_vm5, %v3121_v13  ;;  %v3119_v7 = vpop.permute.xlu0 %3118  ;;  %v3413_v13 = vld [vmem:[%s7518_s23 + $0xb8] sm:$0xf] }
 0x231   : > { %3260 = vst.msk [vmem:[#allocation2 + $0x6c] sm:$0xf] %vm3232_vm5, %v3119_v7  ;;  %3703 = vrot.lane.b32.xlu1 %v3564_v5, %s7460_s10  ;;  %v3608_v5 = vrot.slane %v3412_v0, 6  ;;  %v3606_v10 = vsel %vm9000_vm8, %v3604_v63, %v3605_v3  ;;  %v3611_v7 = vrot.slane %v3413_v13, 6 }
 0x232   : > { %3701 = vrot.lane.b32.xlu0 %v3561_v4, %s7460_s10  ;;  %v3414_v4 = vld [vmem:[%s7518_s23 + $0xbc] sm:$0xf] }
 0x233   : > { %v3125_v18 = vpop.permute.xlu1 %3124  ;;  %v3610_v14 = vrot.slane %v3608_v5, 4  ;;  %v3609_v26 = vsel %vm9000_vm8, %v3607_v42, %v3608_v5  ;;  %v3613_v29 = vrot.slane %v3611_v7, 4 }
 0x234   : > { %3263 = vst.msk [vmem:[#allocation2 + $0x78] sm:$0xf] %vm3232_vm5, %v3125_v18  ;;  %v3123_v22 = vpop.permute.xlu0 %3122  ;;  %v3415_v18 = vld [vmem:[%s7518_s23 + $0xc0] sm:$0xf] }
 0x235   : > { %3262 = vst.msk [vmem:[#allocation2 + $0x74] sm:$0xf] %vm3232_vm5, %v3123_v22  ;;  %3707 = vrot.lane.b32.xlu1 %v3570_v15, %s7460_s10  ;;  %v3614_v15 = vrot.slane %v3414_v4, 6  ;;  %v3612_v20 = vsel %vm9000_vm8, %v3610_v14, %v3611_v7  ;;  %v3617_v22 = vrot.slane %v3415_v18, 6 }
 0x236   : > { %3705 = vrot.lane.b32.xlu0 %v3567_v19, %s7460_s10  ;;  %v3416_v19 = vld [vmem:[%s7518_s23 + $0xc4] sm:$0xf] }
 0x237   : > { %v3129_v30 = vpop.permute.xlu1 %3128  ;;  %v3616_v21 = vrot.slane %v3614_v15, 4  ;;  %v3615_v37 = vsel %vm9000_vm8, %v3613_v29, %v3614_v15  ;;  %v3619_v38 = vrot.slane %v3617_v22, 4  ;;  %v3879_v15 = vld [vmem:[%s8006_s6] sm:$0xf] }
 0x238   : > { %3265 = vst.msk [vmem:[#allocation2 + $0x80] sm:$0xf] %vm3232_vm5, %v3129_v30  ;;  %v3127_v33 = vpop.permute.xlu0 %3126  ;;  %v3417_v30 = vld [vmem:[%s7518_s23 + $0xc8] sm:$0xf]  ;;  %v3889_v18 = vrot.slane %v3879_v15, 6 }
 0x239   : > { %3264 = vst.msk [vmem:[#allocation2 + $0x7c] sm:$0xf] %vm3232_vm5, %v3127_v33  ;;  %3711 = vrot.lane.b32.xlu1 %v3576_v24, %s7460_s10  ;;  %v3620_v24 = vrot.slane %v3416_v19, 6  ;;  %v3618_v23 = vsel %vm9000_vm8, %v3616_v21, %v3617_v22  ;;  %v3623_v33 = vrot.slane %v3417_v30, 6  ;;  %v3881_v19 = vld [vmem:[%s8006_s6 + $0x8] sm:$0xf] }
 0x23a   : > { %3709 = vrot.lane.b32.xlu0 %v3573_v31, %s7460_s10  ;;  %v3418_v31 = vld [vmem:[%s7518_s23 + $0xcc] sm:$0xf]  ;;  %v3880_v22 = vld [vmem:[%s8006_s6 + $0x4] sm:$0xf]  ;;  %v3894_v30 = vrot.slane %v3881_v19, 6 }
 0x23b   : > { %v3133_v39 = vpop.permute.xlu1 %3132  ;;  %v3622_v32 = vrot.slane %v3620_v24, 4  ;;  %v3621_v48 = vsel %vm9000_vm8, %v3619_v38, %v3620_v24  ;;  %v3625_v49 = vrot.slane %v3623_v33, 4  ;;  %v3931_v15 = vld [vmem:[%s7518_s23 + $0x40] sm:$0xf] }
 0x23c   : > { %3267 = vst.msk [vmem:[#allocation2 + $0x88] sm:$0xf] %vm3232_vm5, %v3133_v39  ;;  %v3131_v47 = vpop.permute.xlu0 %3130  ;;  %v3419_v39 = vld [vmem:[%s7518_s23 + $0xd0] sm:$0xf]  ;;  %v4050_v19 = vrot.slane %v3931_v15, 6 }
 0x23d   : > { %3266 = vst.msk [vmem:[#allocation2 + $0x84] sm:$0xf] %vm3232_vm5, %v3131_v47  ;;  %3715 = vrot.lane.b32.xlu1 %v3582_v28, %s7460_s10  ;;  %v3626_v28 = vrot.slane %v3418_v31, 6  ;;  %v3624_v43 = vsel %vm9000_vm8, %v3622_v32, %v3623_v33  ;;  %v3629_v47 = vrot.slane %v3419_v39, 6  ;;  %v3890_v31 = vrot.slane %v3889_v18, 4 }
 0x23e   : > { %3713 = vrot.lane.b32.xlu0 %v3579_v40, %s7460_s10  ;;  %v3420_v40 = vld [vmem:[%s7518_s23 + $0xd4] sm:$0xf] }
 0x23f   : > { %v3137_v50 = vpop.permute.xlu1 %3136  ;;  %v3628_v46 = vrot.slane %v3626_v28, 4  ;;  %v3627_v56 = vsel %vm9000_vm8, %v3625_v49, %v3626_v28  ;;  %v3631_v34 = vrot.slane %v3629_v47, 4 }
 0x240   : > { %3269 = vst.msk [vmem:[#allocation2 + $0x90] sm:$0xf] %vm3232_vm5, %v3137_v50  ;;  %v3135_v55 = vpop.permute.xlu0 %3134  ;;  %v3421_v50 = vld [vmem:[%s7518_s23 + $0xd8] sm:$0xf] }
 0x241   : > { %3268 = vst.msk [vmem:[#allocation2 + $0x8c] sm:$0xf] %vm3232_vm5, %v3135_v55  ;;  %3719 = vrot.lane.b32.xlu1 %v3588_v27, %s7460_s10  ;;  %v3632_v27 = vrot.slane %v3420_v40, 6  ;;  %v3630_v52 = vsel %vm9000_vm8, %v3628_v46, %v3629_v47  ;;  %v3635_v55 = vrot.slane %v3421_v50, 6  ;;  %v3924_v46 = vld [vmem:[%s7518_s23 + $0x24] sm:$0xf] }
 0x242   : > { %3717 = vrot.lane.b32.xlu0 %v3585_v51, %s7460_s10  ;;  %v3422_v51 = vld [vmem:[%s7518_s23 + $0xdc] sm:$0xf]  ;;  %v3925_v47 = vld [vmem:[%s7518_s23 + $0x28] sm:$0xf] }
 0x243   : > { %v3141_v44 = vpop.permute.xlu1 %3140  ;;  %v3634_v54 = vrot.slane %v3632_v27, 4  ;;  %v3633_v3 = vsel %vm9000_vm8, %v3631_v34, %v3632_v27  ;;  %v3637_v5 = vrot.slane %v3635_v55, 4  ;;  %v3927_v34 = vld [vmem:[%s7518_s23 + $0x30] sm:$0xf] }
 0x244   : > { %3271 = vst.msk [vmem:[#allocation2 + $0x98] sm:$0xf] %vm3232_vm5, %v3141_v44  ;;  %v3139_v58 = vpop.permute.xlu0 %3138  ;;  %v3423_v44 = vld [vmem:[%s7518_s23 + $0xe0] sm:$0xf] }
 0x245   : > { %3270 = vst.msk [vmem:[#allocation2 + $0x94] sm:$0xf] %vm3232_vm5, %v3139_v58  ;;  %3723 = vrot.lane.b32.xlu1 %v3594_v57, %s7460_s10  ;;  %v3638_v57 = vrot.slane %v3422_v51, 6  ;;  %v3636_v62 = vsel %vm9000_vm8, %v3634_v54, %v3635_v55  ;;  %v3641_v58 = vrot.slane %v3423_v44, 6 }
 0x246   : > { %3721 = vrot.lane.b32.xlu0 %v3591_v60, %s7460_s10  ;;  %v3424_v60 = vld [vmem:[%s7518_s23 + $0xe4] sm:$0xf] }
 0x247   : > { %v3145_v6 = vpop.permute.xlu1 %3144  ;;  %v3640_v0 = vrot.slane %v3638_v57, 4  ;;  %v3639_v14 = vsel %vm9000_vm8, %v3637_v5, %v3638_v57  ;;  %v3643_v7 = vrot.slane %v3641_v58, 4  ;;  %v3929_v5 = vld [vmem:[%s7518_s23 + $0x38] sm:$0xf] }
 0x248   : > { %3273 = vst.msk [vmem:[#allocation2 + $0xa0] sm:$0xf] %vm3232_vm5, %v3145_v6  ;;  %v3143_v53 = vpop.permute.xlu0 %3142  ;;  %v3425_v6 = vld [vmem:[%s7518_s23 + $0xe8] sm:$0xf] }
 0x249   : > { %3272 = vst.msk [vmem:[#allocation2 + $0x9c] sm:$0xf] %vm3232_vm5, %v3143_v53  ;;  %3727 = vrot.lane.b32.xlu1 %v3600_v2, %s7460_s10  ;;  %v3644_v2 = vrot.slane %v3424_v60, 6  ;;  %v3642_v11 = vsel %vm9000_vm8, %v3640_v0, %v3641_v58  ;;  %v3647_v4 = vrot.slane %v3425_v6, 6  ;;  %v3426_v53 = vld [vmem:[%s7518_s23 + $0xec] sm:$0xf] }
 0x24a   : > { %3725 = vrot.lane.b32.xlu0 %v3597_v9, %s7460_s10  ;;  %v4038_v0 = vrot.slane %v3927_v34, 6 }
 0x24b   : > { %v3149_v16 = vpop.permute.xlu1 %3148  ;;  %v3646_v13 = vrot.slane %v3644_v2, 4  ;;  %v3649_v21 = vrot.slane %v3647_v4, 4 }
 0x24c   : > { %3275 = vst.msk [vmem:[#allocation2 + $0xa8] sm:$0xf] %vm3232_vm5, %v3149_v16  ;;  %v3147_v1 = vpop.permute.xlu0 %3146 }
 0x24d   : > { %3274 = vst.msk [vmem:[#allocation2 + $0xa4] sm:$0xf] %vm3232_vm5, %v3147_v1  ;;  %3731 = vrot.lane.b32.xlu1 %v3606_v10, %s7460_s10  ;;  %v3648_v42 = vsel %vm9000_vm8, %v3646_v13, %v3647_v4  ;;  %v4044_v4 = vrot.slane %v3929_v5, 6 }
 0x24e   : > { %3729 = vrot.lane.b32.xlu0 %v3603_v17, %s7460_s10  ;;  %v3650_v17 = vrot.slane %v3426_v53, 6 }
 0x24f   : > { %v3153_v12 = vpop.permute.xlu1 %3152 }
 0x250   : > { %3277 = vst.msk [vmem:[#allocation2 + $0xb0] sm:$0xf] %vm3232_vm5, %v3153_v12  ;;  %v3151_v25 = vpop.permute.xlu0 %3150  ;;  %v3290_v12 = vld [vmem:[#allocation2 + $0xdc] sm:$0x7]  ;;  %v3652_v29 = vrot.slane %v3650_v17, 4  ;;  %v3651_v33 = vsel %vm9000_vm8, %v3649_v21, %v3650_v17 }
 0x251   : > { %3276 = vst.msk [vmem:[#allocation2 + $0xac] sm:$0xf] %vm3232_vm5, %v3151_v25  ;;  %3735 = vrot.lane.b32.xlu1 %v3612_v20, %s7460_s10  ;;  %v3645_v20 = vsel %vm9000_vm8, %v3643_v7, %v3644_v2  ;;  %v3891_v25 = vrot.slane %v3880_v22, 6  ;;  %v3930_v7 = vld [vmem:[%s7518_s23 + $0x3c] sm:$0xf] }
 0x252   : > { %3733 = vrot.lane.b32.xlu0 %v3609_v26, %s7460_s10  ;;  %v3932_v22 = vld [vmem:[%s7518_s23 + $0x44] sm:$0xf] }
 0x253   : > { %v3157_v36 = vpop.permute.xlu1 %3156  ;;  %v3892_v39 = vsel %vm9000_vm8, %v3890_v31, %v3891_v25  ;;  %v3893_v40 = vrot.slane %v3891_v25, 4 }
 0x254   : > { %3279 = vst.msk [vmem:[#allocation2 + $0xb8] sm:$0xf] %vm3232_vm5, %v3157_v36  ;;  %v3155_v41 = vpop.permute.xlu0 %3154  ;;  %v3896_v36 = vrot.slane %v3894_v30, 4 }
 0x255   : > { %3278 = vst.msk [vmem:[#allocation2 + $0xb4] sm:$0xf] %vm3232_vm5, %v3155_v41  ;;  %3739 = vrot.lane.b32.xlu1 %v3618_v23, %s7460_s10  ;;  %v3882_v23 = vld [vmem:[%s8006_s6 + $0xc] sm:$0xf]  ;;  %v3895_v55 = vsel %vm9000_vm8, %v3893_v40, %v3894_v30  ;;  %v4053_v30 = vrot.slane %v3932_v22, 6 }
 0x256   : > { %3737 = vrot.lane.b32.xlu0 %v3615_v37, %s7460_s10  ;;  %v3897_v37 = vrot.slane %v3882_v23, 6 }
 0x257   : > { %v3161_v35 = vpop.permute.xlu1 %3160 }
 0x258   : > { %3281 = vst.msk [vmem:[#allocation2 + $0xc0] sm:$0xf] %vm3232_vm5, %v3161_v35  ;;  %v3159_v45 = vpop.permute.xlu0 %3158  ;;  %v3883_v35 = vld [vmem:[%s8006_s6 + $0x10] sm:$0x3]  ;;  %v3898_v49 = vsel %vm9000_vm8, %v3896_v36, %v3897_v37  ;;  %v3899_v57 = vrot.slane %v3897_v37, 4 }
 0x259   : > { %3280 = vst.msk [vmem:[#allocation2 + $0xbc] sm:$0xf] %vm3232_vm5, %v3159_v45  ;;  %3743 = vrot.lane.b32.xlu1 %v3624_v43, %s7460_s10  ;;  %v3923_v43 = vld [vmem:[%s7518_s23 + $0x20] sm:$0xc]  ;;  %v4029_v45 = vrot.slane %v3924_v46, 6 }
 0x25a   : > { %3741 = vrot.lane.b32.xlu0 %v3621_v48, %s7460_s10  ;;  %v7058_v51 = vrot.slane %v3923_v43, 10  ;;  %v9351_v37 = vld [vmem:[%s7518_s23 + $0x58] sm:$0xf]  ;;  %v4472_v43 = vld [vmem:[%s7518_s23 + $0x20] sm:$0xc] }
 0x25b   : > { %v3165_v59 = vpop.permute.xlu1 %3164 }
 0x25c   : > { %3283 = vst.msk [vmem:[#allocation2 + $0xc8] sm:$0xf] %vm3232_vm5, %v3165_v59  ;;  %v3163_v61 = vpop.permute.xlu0 %3162  ;;  %v3900_v59 = vrot.slane %v3883_v35, 6  ;;  %v4030_v60 = vsel %vm9000_vm8, %v7058_v51, %v4029_v45  ;;  %v3936_v35 = vld [vmem:[%s7518_s23 + $0x54] sm:$0xf] }
 0x25d   : > { %3282 = vst.msk [vmem:[#allocation2 + $0xc4] sm:$0xf] %vm3232_vm5, %v3163_v61  ;;  %3747 = vrot.lane.b32.xlu1 %v3630_v52, %s7460_s10  ;;  %v4032_v52 = vrot.slane %v3925_v47, 6  ;;  %v3939_v51 = vld [vmem:[%s7518_s23 + $0x60] sm:$0xf] }
 0x25e   : > { %3745 = vrot.lane.b32.xlu0 %v3627_v56, %s7460_s10  ;;  %v3926_v56 = vld [vmem:[%s7518_s23 + $0x2c] sm:$0xf]  ;;  %v3901_v2 = vsel %vm9000_vm8, %v3899_v57, %v3900_v59  ;;  %v4065_v57 = vrot.slane %v3936_v35, 6  ;;  %v4473_v59 = vld [vmem:[%s7518_s23 + $0x24] sm:$0xf] }
 0x25f   : > { %v3169_v63 = vpop.permute.xlu1 %3168  ;;  %v4034_v61 = vrot.slane %v4032_v52, 4  ;;  %v4537_v5 = vshrl.u32 %v4473_v59, 16 }
 0x260   : > { %3285 = vst.msk [vmem:[#allocation2 + $0xd0] sm:$0xf] %vm3232_vm5, %v3169_v63  ;;  %v3167_v9 = vpop.permute.xlu0 %3166  ;;  %v4031_v63 = vrot.slane %v4029_v45, 4  ;;  %v4528_v45 = vshrl.u32 %v4472_v43, 16 }
 0x261   : > { %3284 = vst.msk [vmem:[#allocation2 + $0xcc] sm:$0xf] %vm3232_vm5, %v3167_v9  ;;  %3751 = vrot.lane.b32.xlu1 %v3636_v62, %s7460_s10  ;;  %v4035_v62 = vrot.slane %v3926_v56, 6 }
 0x262   : > { %3749 = vrot.lane.b32.xlu0 %v3633_v3, %s7460_s10  ;;  %v3928_v3 = vld [vmem:[%s7518_s23 + $0x34] sm:$0xf] }
 0x263   : > { %v3173_v10 = vpop.permute.xlu1 %3172  ;;  %v4036_v9 = vsel %vm9000_vm8, %v4034_v61, %v4035_v62  ;;  %v4041_v13 = vrot.slane %v3928_v3, 6 }
 0x264   : > { %3287 = vst.msk [vmem:[#allocation2 + $0xd8] sm:$0xf] %vm3232_vm5, %v3173_v10  ;;  %v3171_v16 = vpop.permute.xlu0 %3170  ;;  %v4033_v10 = vsel %vm9000_vm8, %v4031_v63, %v4032_v52  ;;  %v4531_v52 = vshll.u32 %v4472_v43, 16  ;;  %v4530_v63 = vrot.slane %v4528_v45, 6 }
 0x265   : > { %3286 = vst.msk [vmem:[#allocation2 + $0xd4] sm:$0xf] %vm3232_vm5, %v3171_v16  ;;  %3755 = vrot.lane.b32.xlu1 %v3642_v11, %s7460_s10  ;;  %v4040_v11 = vrot.slane %v4038_v0, 4  ;;  %v4043_v21 = vrot.slane %v4041_v13, 4 }
 0x266   : > { %3753 = vrot.lane.b32.xlu0 %v3639_v14, %s7460_s10  ;;  %v4037_v14 = vrot.slane %v4035_v62, 4  ;;  %v4533_v3 = vrot.slane %v4531_v52, 7  ;;  %v9423_v52 = vld [vmem:[%s7518_s23 + $0x28] sm:$0xf] }
 0x267   : > { %v3347_v1 = vpop.permute.xlu1 %3346  ;;  %v4042_v17 = vsel %vm9000_vm8, %v4040_v11, %v4041_v13  ;;  %v4045_v23 = vsel %vm9000_vm8, %v4043_v21, %v4044_v4 }
 0x268   : > { %v3175_v24 = vpop.permute.xlu0 %3174 }
 0x269   : > { %v3291_v26 = vsel %vm3289_vm10, %v3175_v24, %v3290_v12  ;;  %3759 = vrot.lane.b32.xlu1 %v3648_v42, %s7460_s10  ;;  %v4046_v42 = vrot.slane %v4044_v4, 4  ;;  %v3933_v24 = vld [vmem:[%s7518_s23 + $0x48] sm:$0xf]  ;;  %vm5202_vm10 = vcmask 519616  }
 0x26a   : > { %3292 = vst [vmem:[#allocation2 + $0xdc] sm:$0x7] %v3291_v26  ;;  %3757 = vrot.lane.b32.xlu0 %v3645_v20, %s7460_s10  ;;  %v4039_v20 = vsel %vm9000_vm8, %v4037_v14, %v4038_v0  ;;  %v4056_v31 = vrot.slane %v3933_v24, 6  ;;  %v4475_v14 = vld [vmem:[%s7518_s23 + $0x2c] sm:$0xf] }
 0x26b   : > { %v3351_v32 = vpop.permute.xlu1 %3350  ;;  %v4557_v22 = vshrl.u32 %v4475_v14, 16  ;;  %v4560_v24 = vshll.u32 %v4475_v14, 16 }
 0x26c   : > { %3368 = vst.msk [vmem:[#allocation2 + $0xe4] sm:$0xf] %vm3232_vm5, %v3351_v32  ;;  %v3349_v28 = vpop.permute.xlu0 %3348 }
 0x26d   : > { %3367 = vst.msk [vmem:[#allocation2 + $0xe0] sm:$0xf] %vm3232_vm5, %v3349_v28  ;;  %3763 = vrot.lane.b32.xlu1 %v3652_v29, %s7460_s10  ;;  %v4052_v29 = vrot.slane %v4050_v19, 4  ;;  %v3935_v28 = vld [vmem:[%s7518_s23 + $0x50] sm:$0xf] }
 0x26e   : > { %3761 = vrot.lane.b32.xlu0 %v3651_v33, %s7460_s10  ;;  %v3934_v33 = vld [vmem:[%s7518_s23 + $0x4c] sm:$0xf] }
 0x26f   : > { %v3355_v41 = vpop.permute.xlu1 %3354  ;;  %v4054_v38 = vsel %vm9000_vm8, %v4052_v29, %v4053_v30  ;;  %v4059_v40 = vrot.slane %v3934_v33, 6  ;;  %v9392_v29 = vld [vmem:[%s7518_s23 + $0x68] sm:$0xf] }
 0x270   : > { %3370 = vst.msk [vmem:[#allocation2 + $0xec] sm:$0xf] %vm3232_vm5, %v3355_v41  ;;  %v3353_v27 = vpop.permute.xlu0 %3352  ;;  %v4062_v41 = vrot.slane %v3935_v28, 6 }
 0x271   : > { %v3364_v48 = vld [vmem:[#allocation2 + $0xdc] sm:$0xc]  ;;  %3369 = vst.msk [vmem:[#allocation2 + $0xe8] sm:$0xf] %vm3232_vm5, %v3353_v27  ;;  %3904 = vrot.lane.b32.xlu1 %v3892_v39, %s7460_s10  ;;  %v4058_v39 = vrot.slane %v4056_v31, 4  ;;  %v4055_v27 = vrot.slane %v4053_v30, 4  ;;  %vm9446_vm5 = vmor %vm5501_vm3, %vm5502_vm4 }
 0x272   : > { %v3365_v50 = vsel %vm9284_vm13, %v3347_v1, %v3364_v48  ;;  %3902 = vrot.lane.b32.xlu0 %v3889_v18, %s7460_s10  ;;  %v4047_v18 = vrot.slane %v3930_v7, 6  ;;  %vm4390_vm13 = vcmask 451968   ;;  %vm6870_vm3 = vcmask 519168  }
 0x273   : > { %3366 = vst [vmem:[#allocation2 + $0xdc] sm:$0xc] %v3365_v50  ;;  %v3656_v54 = vpop.permute.xlu1 %3655  ;;  %v3938_v50 = vld [vmem:[%s7518_s23 + $0x5c] sm:$0xf]  ;;  %v4057_v34 = vsel %vm9000_vm8, %v4055_v27, %v4056_v31  ;;  %vm5939_vm4 = vcmask 585217  }
 0x274   : > { %3823 = vst.msk [vmem:[#allocation2 + $0x4] sm:$0xf] %vm3821_vm14, %v3656_v54  ;;  %v3654_v44 = vpop.permute.xlu0 %3653  ;;  %v4048_v26 = vsel %vm9000_vm8, %v4046_v42, %v4047_v18  ;;  %v4049_v32 = vrot.slane %v4047_v18, 4  ;;  %v4060_v54 = vsel %vm9000_vm8, %v4058_v39, %v4059_v40  ;;  %v4071_v0 = vrot.slane %v3938_v50, 6 }
 0x275   : > { %3822 = vst.msk [vmem:[#allocation2] sm:$0xf] %vm3821_vm14, %v3654_v44  ;;  %3908 = vrot.lane.b32.xlu1 %v3898_v49, %s7460_s10  ;;  %v4068_v49 = vrot.slane %v9351_v37, 6  ;;  %v4061_v44 = vrot.slane %v4059_v40, 4  ;;  %v4534_v18 = vor.u32 %v4533_v3, %v4530_v63  ;;  %v4559_v37 = vrot.slane %v4557_v22, 6 }
 0x276   : > { %3906 = vrot.lane.b32.xlu0 %v3895_v55, %s7460_s10  ;;  %v4051_v47 = vsel %vm9000_vm8, %v4049_v32, %v4050_v19  ;;  %v4064_v55 = vrot.slane %v4062_v41, 4  ;;  %v4073_v42 = vrot.slane %v4071_v0, 4  ;;  %v4539_v19 = vrot.slane %v4537_v5, 6 }
 0x277   : > { %v3660_v58 = vpop.permute.xlu1 %3659  ;;  %v4070_v62 = vrot.slane %v4068_v49, 4  ;;  %v4535_v33 = vrot.slane %v4534_v18, 4 }
 0x278   : > { %3825 = vst.msk [vmem:[#allocation2 + $0xc] sm:$0xf] %vm3821_vm14, %v3660_v58  ;;  %v3658_v6 = vpop.permute.xlu0 %3657  ;;  %v4074_v58 = vrot.slane %v3939_v51, 6 }
 0x279   : > { %3824 = vst.msk [vmem:[#allocation2 + $0x8] sm:$0xf] %vm3821_vm14, %v3658_v6  ;;  %4182 = vrot.lane.b32.xlu1 %v4030_v60, %s7461_s11  ;;  %v4474_v60 = vld [vmem:[%s7518_s23 + $0x28] sm:$0xf]  ;;  %v4540_v6 = vshll.u32 %v4473_v59, 16  ;;  %v4072_v15 = vsel %vm9000_vm8, %v4070_v62, %v4071_v0 }
 0x27a   : > { %3910 = vrot.lane.b32.xlu0 %v3901_v2, %s7460_s10  ;;  %v3940_v2 = vld [vmem:[%s7518_s23 + $0x64] sm:$0xf]  ;;  %v4547_v11 = vshrl.u32 %v4474_v60, 16  ;;  %v4550_v13 = vshll.u32 %v4474_v60, 16  ;;  %v4075_v32 = vsel %vm9000_vm8, %v4073_v42, %v4074_v58  ;;  %v7399_v60 = vld [vmem:[%s10805_s2 + $0x10] sm:$0xff]  }
 0x27b   : > { %v3664_v53 = vpop.permute.xlu1 %3663  ;;  %v5398_v59 = vld [vmem:[%s7518_s23 + $0x24] sm:$0xf] }
 0x27c   : > { %3827 = vst.msk [vmem:[#allocation2 + $0x14] sm:$0xf] %vm3821_vm14, %v3664_v53  ;;  %v3662_v16 = vpop.permute.xlu0 %3661  ;;  %v4063_v53 = vsel %vm9000_vm8, %v4061_v44, %v4062_v41  ;;  %v4552_v21 = vrot.slane %v4550_v13, 7 }
 0x27d   : > { %3826 = vst.msk [vmem:[#allocation2 + $0x10] sm:$0xf] %vm3821_vm14, %v3662_v16  ;;  %4186 = vrot.lane.b32.xlu1 %v4036_v9, %s7461_s11  ;;  %v4066_v9 = vsel %vm9000_vm8, %v4064_v55, %v4065_v57  ;;  %v4076_v16 = vrot.slane %v4074_v58, 4  ;;  %v5506_v58 = vrot.slane %v5398_v59, 7 }
 0x27e   : > { %4184 = vrot.lane.b32.xlu0 %v4033_v10, %s7461_s11  ;;  %v4067_v10 = vrot.slane %v4065_v57, 4  ;;  %v5397_v57 = vld [vmem:[%s7518_s23 + $0x20] sm:$0x8] }
 0x27f   : > { %v3668_v1 = vpop.permute.xlu1 %3667  ;;  %v7059_v0 = vrot.slane %v5397_v57, 11  ;;  %v4479_v57 = vld [vmem:[%s7518_s23 + $0x3c] sm:$0xf] }
 0x280   : > { %3829 = vst.msk [vmem:[#allocation2 + $0x1c] sm:$0xf] %vm3821_vm14, %v3668_v1  ;;  %v3666_v12 = vpop.permute.xlu0 %3665  ;;  %v4542_v1 = vrot.slane %v4540_v6, 7 }
 0x281   : > { %3828 = vst.msk [vmem:[#allocation2 + $0x18] sm:$0xf] %vm3821_vm14, %v3666_v12  ;;  %4190 = vrot.lane.b32.xlu1 %v4042_v17, %s7461_s11  ;;  %v4077_v17 = vrot.slane %v3940_v2, 6  ;;  %v5400_v2 = vld [vmem:[%s7518_s23 + $0x2c] sm:$0xf] }
 0x282   : > { %4188 = vrot.lane.b32.xlu0 %v4039_v20, %s7461_s11  ;;  %v4549_v20 = vrot.slane %v4547_v11, 6  ;;  %v4543_v28 = vor.u32 %v4542_v1, %v4539_v19  ;;  %v9453_v11 = vld [vmem:[%s7518_s23 + $0xa0] sm:$0xf]  ;;  %v5512_v14 = vrot.slane %v5400_v2, 7  ;;  %v3956_v19 = vld [vmem:[%s7518_s23 + $0xa4] sm:$0xf] }
 0x283   : > { %v3672_v25 = vpop.permute.xlu1 %3671  ;;  %v4078_v31 = vsel %vm9000_vm8, %v4076_v16, %v4077_v17  ;;  %v4079_v43 = vrot.slane %v4077_v17, 4  ;;  %v5508_v16 = vrot.slane %v5506_v58, 4  ;;  %v4122_v17 = vrot.slane %v9453_v11, 6  ;;  %v9472_v1 = vld [vmem:[%s7518_s23 + $0xa8] sm:$0xf] }
 0x284   : > { %3831 = vst.msk [vmem:[#allocation2 + $0x24] sm:$0xf] %vm3821_vm14, %v3672_v25  ;;  %v3670_v36 = vpop.permute.xlu0 %3669  ;;  %v4476_v25 = vld [vmem:[%s7518_s23 + $0x30] sm:$0xf]  ;;  %v4545_v45 = vrot.slane %v4543_v28, 4 }
 0x285   : > { %3830 = vst.msk [vmem:[#allocation2 + $0x20] sm:$0xf] %vm3821_vm14, %v3670_v36  ;;  %4194 = vrot.lane.b32.xlu1 %v4048_v26, %s7461_s11  ;;  %v4069_v26 = vsel %vm9000_vm8, %v4067_v10, %v4068_v49  ;;  %v4553_v36 = vor.u32 %v4552_v21, %v4549_v20  ;;  %v4570_v27 = vshll.u32 %v4476_v25, 16  ;;  %v4544_v49 = vsel %vm9408_vm2, %v4535_v33, %v4543_v28 }
 0x286   : > { %4192 = vrot.lane.b32.xlu0 %v4045_v23, %s7461_s11  ;;  %v7397_v23 = vld [vmem:[%s10805_s2 + $0x20] ss:$0 sps:$4 sm:$0xff]   ;;  %v4125_v33 = vrot.slane %v3956_v19, 6  ;;  %v4128_v28 = vrot.slane %v9472_v1, 6 }
 0x287   : > { %v3676_v46 = vpop.permute.xlu1 %3675  ;;  %7363 = vmatprep.subr.msk.bf16.mxu0 %vm6293_vm1, %v7397_v23  ;;  %v6295_v39 = vsel %vm6293_vm1, %v7397_v23, 0  ;;  %7364 = vmatprep.subr.msk.bf16.mxu1 %vm6293_vm1, %v7397_v23  ;;  %v4555_v50 = vrot.slane %v4553_v36, 4  ;;  %v4554_v3 = vsel %vm9408_vm2, %v4545_v45, %v4553_v36  ;;  %v4478_v36 = vld [vmem:[%s7518_s23 + $0x38] sm:$0xf]  ;;  %vm5384_vm1 = vsmask.f32 7942 }
 0x288   : > { %3833 = vst.msk [vmem:[#allocation2 + $0x2c] sm:$0xf] %vm3821_vm14, %v3676_v46  ;;  %v3674_v48 = vpop.permute.xlu0 %3673  ;;  %v4080_v46 = vrot.slane %v9392_v29, 6  ;;  %7284 = vmatpush3.bf16.msra.mxu0 %v6295_v39  ;;  %7358 = vmatpush3.bf16.msra.mxu1 %v6295_v39  ;;  %v4590_v45 = vshll.u32 %v4478_v36, 16 }
 0x289   : > { %3832 = vst.msk [vmem:[#allocation2 + $0x28] sm:$0xf] %vm3821_vm14, %v3674_v48  ;;  %4198 = vrot.lane.b32.xlu1 %v4054_v38, %s7461_s11  ;;  %v4562_v38 = vrot.slane %v4560_v24, 7  ;;  %v7398_v48 = vld [vmem:[%s10805_s2 + $0x18] sm:$0xff]   ;;  %v9476_v24 = vld [vmem:[%s7518_s23 + $0x30] sm:$0xf] }
 0x28a   : > { %4196 = vrot.lane.b32.xlu0 %v4051_v47, %s7461_s11  ;;  %v4567_v47 = vshrl.u32 %v4476_v25, 16  ;;  %7285 = vmatprep.subr.bf16.mxu0 %v7398_v48  ;;  %v4081_v55 = vsel %vm9000_vm8, %v4079_v43, %v4080_v46  ;;  %v4505_v25 = vld [vmem:[%s7518_s23 + $0xa4] sm:$0xf]  ;;  %v5515_v39 = vrot.slane %v9476_v24, 7 }
 0x28b   : > { %v3680_v56 = vpop.permute.xlu1 %3679  ;;  %v4563_v51 = vor.u32 %v4562_v38, %v4559_v37  ;;  %7354 = vmatprep.subr.bf16.mxu1 %v7398_v48  ;;  %v5514_v38 = vrot.slane %v5512_v14, 4 }
 0x28c   : > { %3835 = vst.msk [vmem:[#allocation2 + $0x34] sm:$0xf] %vm3821_vm14, %v3680_v56  ;;  %v3678_v61 = vpop.permute.xlu0 %3677  ;;  %v4569_v56 = vrot.slane %v4567_v47, 6  ;;  %7286 = vmatpush3.bf16.msra.mxu0 %v7398_v48  ;;  %7359 = vmatpush3.bf16.msra.mxu1 %v7398_v48 }
 0x28d   : > { %3834 = vst.msk [vmem:[#allocation2 + $0x30] sm:$0xf] %vm3821_vm14, %v3678_v61  ;;  %4202 = vrot.lane.b32.xlu1 %v4060_v54, %s7461_s11  ;;  %v5509_v61 = vrot.slane %v9423_v52, 7  ;;  %v4564_v62 = vsel %vm9408_vm2, %v4555_v50, %v4563_v51  ;;  %7287 = vmatprep.subr.bf16.mxu0 %v7399_v60  ;;  %v4565_v6 = vrot.slane %v4563_v51, 4  ;;  %v4860_v50 = vshll.u32 %v4505_v25, 16 }
 0x28e   : > { %4200 = vrot.lane.b32.xlu0 %v4057_v34, %s7461_s11  ;;  %v4572_v34 = vrot.slane %v4570_v27, 7  ;;  %7355 = vmatprep.subr.bf16.mxu1 %v7399_v60  ;;  %v4587_v51 = vshrl.u32 %v4478_v36, 16 }
 0x28f   : > { %v3684_v4 = vpop.permute.xlu1 %3683  ;;  %v5511_v10 = vrot.slane %v5509_v61, 4  ;;  %v5510_v23 = vsel %vm9446_vm5, %v5508_v16, %v5509_v61 }
 0x290   : > { %3837 = vst.msk [vmem:[#allocation2 + $0x3c] sm:$0xf] %vm3821_vm14, %v3684_v4  ;;  %v3682_v7 = vpop.permute.xlu0 %3681  ;;  %7288 = vmatpush3.bf16.msra.mxu0 %v7399_v60  ;;  %v4477_v4 = vld [vmem:[%s7518_s23 + $0x34] sm:$0xf]  ;;  %7360 = vmatpush3.bf16.msra.mxu1 %v7399_v60  ;;  %v4506_v60 = vld [vmem:[%s7518_s23 + $0xa8] sm:$0xf] }
 0x291   : > { %3836 = vst.msk [vmem:[#allocation2 + $0x38] sm:$0xf] %vm3821_vm14, %v3682_v7  ;;  %4206 = vrot.lane.b32.xlu1 %v4066_v9, %s7461_s11  ;;  %v9450_v9 = vor.u32 %v4572_v34, %v4569_v56  ;;  %v4504_v7 = vld [vmem:[%s7518_s23 + $0xa0] sm:$0xf]  ;;  %v4577_v20 = vshrl.u32 %v4477_v4, 16  ;;  %v4580_v21 = vshll.u32 %v4477_v4, 16  ;;  %v5516_v56 = vsel %vm9446_vm5, %v5514_v38, %v5515_v39 }
 0x292   : > { %4204 = vrot.lane.b32.xlu0 %v4063_v53, %s7461_s11  ;;  %v7400_v53 = vld [vmem:[%s10805_s2 + $0x8] sm:$0xff]   ;;  %v4127_v34 = vrot.slane %v4125_v33, 4 }
 0x293   : > { %v3688_v12 = vpop.permute.xlu1 %3687  ;;  %7289 = vmatprep.subr.bf16.mxu0 %v7400_v53  ;;  %v4574_v18 = vsel %vm9408_vm2, %v4565_v6, %v9450_v9  ;;  %7356 = vmatprep.subr.bf16.mxu1 %v7400_v53  ;;  %v4579_v43 = vrot.slane %v4577_v20, 6  ;;  %v4582_v47 = vrot.slane %v4580_v21, 7  ;;  %v4592_v6 = vrot.slane %v4590_v45, 7  ;;  %v4480_v21 = vld [vmem:[%s7518_s23 + $0x40] sm:$0xf] }
 0x294   : > { %3839 = vst.msk [vmem:[#allocation2 + $0x44] sm:$0xf] %vm3821_vm14, %v3688_v12  ;;  %v3686_v30 = vpop.permute.xlu0 %3685  ;;  %7290 = vmatpush3.bf16.msra.mxu0 %v7400_v53  ;;  %v4847_v12 = vshrl.u32 %v4504_v7, 16  ;;  %7361 = vmatpush3.bf16.msra.mxu1 %v7400_v53  ;;  %v4867_v53 = vshrl.u32 %v4506_v60, 16  ;;  %v4607_v36 = vshrl.u32 %v4480_v21, 16 }
 0x295   : > { %3838 = vst.msk [vmem:[#allocation2 + $0x40] sm:$0xf] %vm3821_vm14, %v3686_v30  ;;  %4210 = vrot.lane.b32.xlu1 %v4072_v15, %s7461_s11  ;;  %v5507_v15 = vsel %vm9446_vm5, %v7059_v0, %v5506_v58  ;;  %v7401_v30 = vld [vmem:[%s10805_s2] sm:$0xff]   ;;  %v9510_v0 = vld [vmem:[%s7518_s23 + $0xb0] sm:$0xf] }
 0x296   : > { %4208 = vrot.lane.b32.xlu0 %v4069_v26, %s7461_s11  ;;  %v4850_v26 = vshll.u32 %v4504_v7, 16  ;;  %7291 = vmatprep.subr.bf16.mxu0 %v7401_v30  ;;  %v4129_v7 = vsel %vm9000_vm8, %v4127_v34, %v4128_v28  ;;  %v4134_v16 = vrot.slane %v9510_v0, 6 }
 0x297   : > { %v3692_v40 = vpop.permute.xlu1 %3691  ;;  %7357 = vmatprep.subr.bf16.mxu1 %v7401_v30 }
 0x298   : > { %3841 = vst.msk [vmem:[#allocation2 + $0x4c] sm:$0xf] %vm3821_vm14, %v3692_v40  ;;  %v3690_v35 = vpop.permute.xlu0 %3689  ;;  %v3958_v40 = vld [vmem:[%s7518_s23 + $0xac] sm:$0xf]  ;;  %7292 = vmatpush3.bf16.msra.mxu0 %v7401_v30  ;;  %v4852_v48 = vrot.slane %v4850_v26, 7  ;;  %7362 = vmatpush3.bf16.msra.mxu1 %v7401_v30 }
 0x299   : > { %3840 = vst.msk [vmem:[#allocation2 + $0x48] sm:$0xf] %vm3821_vm14, %v3690_v35  ;;  %4214 = vrot.lane.b32.xlu1 %v4078_v31, %s7461_s11  ;;  %v5513_v31 = vsel %vm9446_vm5, %v5511_v10, %v5512_v14  ;;  %v4849_v35 = vrot.slane %v4847_v12, 6  ;;  %v4870_v10 = vshll.u32 %v4506_v60, 16 }
 0x29a   : > { %4212 = vrot.lane.b32.xlu0 %v4075_v32, %s7461_s11  ;;  %v4124_v32 = vrot.slane %v4122_v17, 4 }
 0x29b   : > { %v3696_v54 = vpop.permute.xlu1 %3695  ;;  %v9512_v58 = vor.u32 %v4852_v48, %v4849_v35 }
 0x29c   : > { %3843 = vst.msk [vmem:[#allocation2 + $0x54] sm:$0xf] %vm3821_vm14, %v3696_v54  ;;  %v3694_v44 = vpop.permute.xlu0 %3693  ;;  %v4126_v52 = vsel %vm9000_vm8, %v4124_v32, %v4125_v33  ;;  %v4130_v54 = vrot.slane %v4128_v28, 4 }
 0x29d   : > { %3842 = vst.msk [vmem:[#allocation2 + $0x50] sm:$0xf] %vm3821_vm14, %v3694_v44  ;;  %5046 = vrot.lane.b32.xlu1 %v4544_v49, %s7462_s24  ;;  %v4857_v49 = vshrl.u32 %v4505_v25, 16  ;;  %v4575_v44 = vrot.slane %v9450_v9, 4  ;;  %v4600_v9 = vshll.u32 %v4479_v57, 16  ;;  %v4855_v1 = vrot.slane %v9512_v58, 4 }
 0x29e   : > { %4216 = vrot.lane.b32.xlu0 %v4081_v55, %s7461_s11  ;;  %v4131_v55 = vrot.slane %v3958_v40, 6  ;;  %v4872_v25 = vrot.slane %v4870_v10, 7  ;;  %v4508_v40 = vld [vmem:[%s7518_s23 + $0xb0] sm:$0xf] }
 0x29f   : > { %v3700_v63 = vpop.permute.xlu1 %3699  ;;  %v4859_v2 = vrot.slane %v4857_v49, 6  ;;  %v4602_v30 = vrot.slane %v4600_v9, 7 }
 0x2a0   : > { %3845 = vst.msk [vmem:[#allocation2 + $0x5c] sm:$0xf] %vm3821_vm14, %v3700_v63  ;;  %v3698_v13 = vpop.permute.xlu0 %3697  ;;  %v4862_v63 = vrot.slane %v4860_v50, 7  ;;  %v4132_v4 = vsel %vm9000_vm8, %v4130_v54, %v4131_v55 }
 0x2a1   : > { %3844 = vst.msk [vmem:[#allocation2 + $0x58] sm:$0xf] %vm3821_vm14, %v3698_v13  ;;  %5050 = vrot.lane.b32.xlu1 %v4564_v62, %s7462_s24  ;;  %v4583_v62 = vor.u32 %v4582_v47, %v4579_v43  ;;  %v4597_v13 = vshrl.u32 %v4479_v57, 16  ;;  %v4890_v57 = vshll.u32 %v4508_v40, 16 }
 0x2a2   : > { %5048 = vrot.lane.b32.xlu0 %v4554_v3, %s7462_s24  ;;  %v4589_v3 = vrot.slane %v4587_v51, 6 }
 0x2a3   : > { %v3704_v42 = vpop.permute.xlu1 %3703  ;;  %v4584_v19 = vsel %vm9408_vm2, %v4575_v44, %v4583_v62  ;;  %v4585_v20 = vrot.slane %v4583_v62, 4  ;;  %v4599_v26 = vrot.slane %v4597_v13, 6  ;;  %v9556_v13 = vld [vmem:[%s7518_s23 + $0xa0] sm:$0xf] }
 0x2a4   : > { %3847 = vst.msk [vmem:[#allocation2 + $0x64] sm:$0xf] %vm3821_vm14, %v3704_v42  ;;  %v3702_v22 = vpop.permute.xlu0 %3701  ;;  %v4507_v42 = vld [vmem:[%s7518_s23 + $0xac] sm:$0xf]  ;;  %v4593_v12 = vor.u32 %v4592_v6, %v4589_v3  ;;  %v4892_v6 = vrot.slane %v4890_v57, 7 }
 0x2a5   : > { %3846 = vst.msk [vmem:[#allocation2 + $0x60] sm:$0xf] %vm3821_vm14, %v3702_v22  ;;  %5659 = vrot.lane.b32.xlu1 %v5507_v15, %s7463_s29  ;;  %v4133_v15 = vrot.slane %v4131_v55, 4  ;;  %v4863_v22 = vor.u32 %v4862_v63, %v4859_v2  ;;  %v4880_v32 = vshll.u32 %v4507_v42, 16  ;;  %v4603_v48 = vor.u32 %v4602_v30, %v4599_v26  ;;  %v5402_v63 = vld [vmem:[%s7518_s23 + $0x34] sm:$0xf] }
 0x2a6   : > { %5052 = vrot.lane.b32.xlu0 %v4574_v18, %s7462_s24  ;;  %v4594_v47 = vsel %vm9408_vm2, %v4585_v20, %v4593_v12  ;;  %v4887_v55 = vshrl.u32 %v4508_v40, 16  ;;  %v5518_v10 = vrot.slane %v5402_v63, 7  ;;  %v5403_v20 = vld [vmem:[%s7518_s23 + $0x38] sm:$0xf] }
 0x2a7   : > { %v3708_v37 = vpop.permute.xlu1 %3707  ;;  %v4135_v28 = vsel %vm9000_vm8, %v4133_v15, %v4134_v16  ;;  %v4864_v43 = vsel %vm9408_vm2, %v4855_v1, %v4863_v22  ;;  %v4865_v35 = vrot.slane %v4863_v22, 4  ;;  %v4882_v51 = vrot.slane %v4880_v32, 7  ;;  %v3961_v57 = vld [vmem:[%s7518_s23 + $0xb8] sm:$0xf] }
 0x2a8   : > { %3849 = vst.msk [vmem:[#allocation2 + $0x6c] sm:$0xf] %vm3821_vm14, %v3708_v37  ;;  %v3706_v27 = vpop.permute.xlu0 %3705  ;;  %v4610_v37 = vshll.u32 %v4480_v21, 16  ;;  %v4605_v60 = vrot.slane %v4603_v48, 4  ;;  %v4889_v3 = vrot.slane %v4887_v55, 6  ;;  %v5520_v26 = vrot.slane %v5518_v10, 4 }
 0x2a9   : > { %3848 = vst.msk [vmem:[#allocation2 + $0x68] sm:$0xf] %vm3821_vm14, %v3706_v27  ;;  %5663 = vrot.lane.b32.xlu1 %v5513_v31, %s7463_s29  ;;  %v4869_v31 = vrot.slane %v4867_v53, 6  ;;  %v4595_v27 = vrot.slane %v4593_v12, 4  ;;  %v5517_v53 = vrot.slane %v5515_v39, 4  ;;  %v5521_v30 = vrot.slane %v5403_v20, 7 }
 0x2aa   : > { %5661 = vrot.lane.b32.xlu0 %v5510_v23, %s7463_s29  ;;  %v4877_v23 = vshrl.u32 %v4507_v42, 16  ;;  %v4612_v54 = vrot.slane %v4610_v37, 7  ;;  %v3960_v55 = vld [vmem:[%s7518_s23 + $0xb4] sm:$0xf] }
 0x2ab   : > { %v3712_v59 = vpop.permute.xlu1 %3711  ;;  %v4873_v49 = vor.u32 %v4872_v25, %v4869_v31  ;;  %v5519_v24 = vsel %vm9446_vm5, %v5517_v53, %v5518_v10  ;;  %v5404_v31 = vld [vmem:[%s7518_s23 + $0x3c] sm:$0xf]  ;;  %v5522_v37 = vsel %vm9446_vm5, %v5520_v26, %v5521_v30  ;;  %v4137_v63 = vrot.slane %v3960_v55, 6 }
 0x2ac   : > { %3851 = vst.msk [vmem:[#allocation2 + $0x74] sm:$0xf] %vm3821_vm14, %v3712_v59  ;;  %v3710_v61 = vpop.permute.xlu0 %3709  ;;  %v4879_v50 = vrot.slane %v4877_v23, 6  ;;  %v5431_v23 = vld [vmem:[%s7518_s23 + $0xa8] sm:$0xf] }
 0x2ad   : > { %3850 = vst.msk [vmem:[#allocation2 + $0x70] sm:$0xf] %vm3821_vm14, %v3710_v61  ;;  %4246 = vrot.lane.b32.xlu1 %v4126_v52, %s7461_s11  ;;  %v4609_v52 = vrot.slane %v4607_v36, 6  ;;  %v4875_v34 = vrot.slane %v4873_v49, 4  ;;  %v4874_v62 = vsel %vm9408_vm2, %v4865_v35, %v4873_v49  ;;  %v5605_v40 = vrot.slane %v5431_v23, 7 }
 0x2ae   : > { %5665 = vrot.lane.b32.xlu0 %v5516_v56, %s7463_s29  ;;  %v4604_v56 = vsel %vm9408_vm2, %v4595_v27, %v4603_v48  ;;  %v4883_v44 = vor.u32 %v4882_v51, %v4879_v50  ;;  %v9598_v27 = vld [vmem:[%s7518_s23 + $0x40] sm:$0xf]  ;;  %v4481_v35 = vld [vmem:[%s7518_s23 + $0x44] sm:$0xf] }
 0x2af   : > { %v3716_v14 = vpop.permute.xlu1 %3715  ;;  %v9552_v2 = vor.u32 %v4612_v54, %v4609_v52  ;;  %v5607_v49 = vrot.slane %v5605_v40, 4  ;;  %v5527_v54 = vrot.slane %v9598_v27, 7 }
 0x2b0   : > { %3853 = vst.msk [vmem:[#allocation2 + $0x7c] sm:$0xf] %vm3821_vm14, %v3716_v14  ;;  %v3714_v18 = vpop.permute.xlu0 %3713  ;;  %v5599_v14 = vrot.slane %v9556_v13, 7  ;;  %v4885_v42 = vrot.slane %v4883_v44, 4 }
 0x2b1   : > { %3852 = vst.msk [vmem:[#allocation2 + $0x78] sm:$0xf] %vm3821_vm14, %v3714_v18  ;;  %4250 = vrot.lane.b32.xlu1 %v4132_v4, %s7461_s11  ;;  %v4884_v4 = vsel %vm9408_vm2, %v4875_v34, %v4883_v44  ;;  %v4614_v15 = vsel %vm9408_vm2, %v4605_v60, %v9552_v2  ;;  %v9570_v18 = vor.u32 %v4892_v6, %v4889_v3  ;;  %v4617_v34 = vshrl.u32 %v4481_v35, 16  ;;  %v4509_v60 = vld [vmem:[%s7518_s23 + $0xb4] sm:$0xf] }
 0x2b2   : > { %4248 = vrot.lane.b32.xlu0 %v4129_v7, %s7461_s11  ;;  %v5601_v39 = vrot.slane %v5599_v14, 4  ;;  %v4620_v44 = vshll.u32 %v4481_v35, 16  ;;  %v4140_v3 = vrot.slane %v3961_v57, 6  ;;  %v4482_v6 = vld [vmem:[%s7518_s23 + $0x48] sm:$0xf]  ;;  %v4615_v23 = vrot.slane %v9552_v2, 4 }
 0x2b3   : > { %v3720_v33 = vpop.permute.xlu1 %3719  ;;  %v4894_v12 = vsel %vm9408_vm2, %v4885_v42, %v9570_v18  ;;  %v4619_v42 = vrot.slane %v4617_v34, 6  ;;  %v4630_v20 = vshll.u32 %v4482_v6, 16  ;;  %v4895_v57 = vrot.slane %v9570_v18, 4  ;;  %v4484_v34 = vld [vmem:[%s7518_s23 + $0x50] sm:$0xf] }
 0x2b4   : > { %3855 = vst.msk [vmem:[#allocation2 + $0x84] sm:$0xf] %vm3821_vm14, %v3720_v33  ;;  %v3718_v38 = vpop.permute.xlu0 %3717  ;;  %v5523_v33 = vrot.slane %v5521_v30, 4  ;;  %v4622_v0 = vrot.slane %v4620_v44, 7  ;;  %v4139_v30 = vrot.slane %v4137_v63, 4 }
 0x2b5   : > { %3854 = vst.msk [vmem:[#allocation2 + $0x80] sm:$0xf] %vm3821_vm14, %v3718_v38  ;;  %5054 = vrot.lane.b32.xlu1 %v4584_v19, %s7462_s24  ;;  %v5430_v19 = vld [vmem:[%s7518_s23 + $0xa4] sm:$0xf] }
 0x2b6   : > { %4252 = vrot.lane.b32.xlu0 %v4135_v28, %s7461_s11  ;;  %v5602_v21 = vrot.slane %v5430_v19, 7  ;;  %v5524_v28 = vrot.slane %v5404_v31, 7  ;;  %v4900_v19 = vshll.u32 %v4509_v60, 16  ;;  %v4510_v31 = vld [vmem:[%s7518_s23 + $0xb8] sm:$0xf] }
 0x2b7   : > { %v3724_v45 = vpop.permute.xlu1 %3723  ;;  %v4910_v35 = vshll.u32 %v4510_v31, 16 }
 0x2b8   : > { %3857 = vst.msk [vmem:[#allocation2 + $0x8c] sm:$0xf] %vm3821_vm14, %v3724_v45  ;;  %v3722_v59 = vpop.permute.xlu0 %3721  ;;  %v5603_v32 = vsel %vm9446_vm5, %v5601_v39, %v5602_v21  ;;  %v5604_v38 = vrot.slane %v5602_v21, 4  ;;  %v5525_v48 = vsel %vm9446_vm5, %v5523_v33, %v5524_v28  ;;  %v5526_v52 = vrot.slane %v5524_v28, 4  ;;  %v9645_v33 = vld [vmem:[%s7518_s23 + $0xc0] sm:$0xf] }
 0x2b9   : > { %3856 = vst.msk [vmem:[#allocation2 + $0x88] sm:$0xf] %vm3821_vm14, %v3722_v59  ;;  %5110 = vrot.lane.b32.xlu1 %v4864_v43, %s7462_s24  ;;  %v5432_v43 = vld [vmem:[%s7518_s23 + $0xac] sm:$0xf]  ;;  %v4142_v39 = vrot.slane %v4140_v3, 4 }
 0x2ba   : > { %5056 = vrot.lane.b32.xlu0 %v4594_v47, %s7462_s24  ;;  %v5608_v50 = vrot.slane %v5432_v43, 7  ;;  %v5606_v45 = vsel %vm9446_vm5, %v5604_v38, %v5605_v40  ;;  %v4632_v38 = vrot.slane %v4630_v20, 7 }
 0x2bb   : > { %v3728_v61 = vpop.permute.xlu1 %3727 }
 0x2bc   : > { %3859 = vst.msk [vmem:[#allocation2 + $0x94] sm:$0xf] %vm3821_vm14, %v3728_v61  ;;  %v3726_v9 = vpop.permute.xlu0 %3725  ;;  %v5609_v61 = vsel %vm9446_vm5, %v5607_v49, %v5608_v50  ;;  %v5610_v53 = vrot.slane %v5608_v50, 4  ;;  %v4141_v49 = vsel %vm9000_vm8, %v4139_v30, %v4140_v3  ;;  %v4912_v3 = vrot.slane %v4910_v35, 7 }
 0x2bd   : > { %3858 = vst.msk [vmem:[#allocation2 + $0x90] sm:$0xf] %vm3821_vm14, %v3726_v9  ;;  %5058 = vrot.lane.b32.xlu1 %v4604_v56, %s7462_s24  ;;  %v9613_v56 = vld [vmem:[%s7518_s23 + $0xb0] sm:$0xf] }
 0x2be   : > { %5112 = vrot.lane.b32.xlu0 %v4874_v62, %s7462_s24  ;;  %v4136_v62 = vrot.slane %v4134_v16, 4  ;;  %v5611_v10 = vrot.slane %v9613_v56, 7  ;;  %v4897_v16 = vshrl.u32 %v4509_v60, 16 }
 0x2bf   : > { %v3732_v7 = vpop.permute.xlu1 %3731 }
 0x2c0   : > { %3861 = vst.msk [vmem:[#allocation2 + $0x9c] sm:$0xf] %vm3821_vm14, %v3732_v7  ;;  %v3730_v1 = vpop.permute.xlu0 %3729  ;;  %v3962_v7 = vld [vmem:[%s7518_s23 + $0xbc] sm:$0xf]  ;;  %v5612_v26 = vsel %vm9446_vm5, %v5610_v53, %v5611_v10  ;;  %v4899_v28 = vrot.slane %v4897_v16, 6  ;;  %v4647_v53 = vshrl.u32 %v4484_v34, 16 }
 0x2c1   : > { %3860 = vst.msk [vmem:[#allocation2 + $0x98] sm:$0xf] %vm3821_vm14, %v3730_v1  ;;  %5114 = vrot.lane.b32.xlu1 %v4884_v4, %s7462_s24  ;;  %v5528_v4 = vsel %vm9446_vm5, %v5526_v52, %v5527_v54  ;;  %v4627_v1 = vshrl.u32 %v4482_v6, 16  ;;  %v4143_v21 = vrot.slane %v3962_v7, 6  ;;  %v4650_v7 = vshll.u32 %v4484_v34, 16 }
 0x2c2   : > { %5060 = vrot.lane.b32.xlu0 %v4614_v15, %s7462_s24 }
 0x2c3   : > { %v3736_v22 = vpop.permute.xlu1 %3735  ;;  %v4144_v2 = vsel %vm9000_vm8, %v4142_v39, %v4143_v21  ;;  %v4145_v50 = vrot.slane %v4143_v21, 4 }
 0x2c4   : > { %3863 = vst.msk [vmem:[#allocation2 + $0xa4] sm:$0xf] %vm3821_vm14, %v3736_v22  ;;  %v3734_v25 = vpop.permute.xlu0 %3733  ;;  %v4483_v22 = vld [vmem:[%s7518_s23 + $0x4c] sm:$0xf] }
 0x2c5   : > { %3862 = vst.msk [vmem:[#allocation2 + $0xa0] sm:$0xf] %vm3821_vm14, %v3734_v25  ;;  %5667 = vrot.lane.b32.xlu1 %v5519_v24, %s7463_s29  ;;  %v4138_v24 = vsel %vm9000_vm8, %v4136_v62, %v4137_v63  ;;  %v4637_v40 = vshrl.u32 %v4483_v22, 16  ;;  %v4640_v43 = vshll.u32 %v4483_v22, 16 }
 0x2c6   : > { %5116 = vrot.lane.b32.xlu0 %v4894_v12, %s7462_s24 }
 0x2c7   : > { %v3740_v36 = vpop.permute.xlu1 %3739  ;;  %v4642_v62 = vrot.slane %v4640_v43, 7  ;;  %v5406_v43 = vld [vmem:[%s7518_s23 + $0x44] sm:$0xf] }
 0x2c8   : > { %3865 = vst.msk [vmem:[#allocation2 + $0xac] sm:$0xf] %vm3821_vm14, %v3740_v36  ;;  %v3738_v47 = vpop.permute.xlu0 %3737  ;;  %v4902_v36 = vrot.slane %v4900_v19, 7 }
 0x2c9   : > { %3864 = vst.msk [vmem:[#allocation2 + $0xa8] sm:$0xf] %vm3821_vm14, %v3738_v47  ;;  %5723 = vrot.lane.b32.xlu1 %v5603_v32, %s7463_s29  ;;  %v4623_v32 = vor.u32 %v4622_v0, %v4619_v42  ;;  %v4907_v47 = vshrl.u32 %v4510_v31, 16  ;;  %v4512_v42 = vld [vmem:[%s7518_s23 + $0xc0] sm:$0xf] }
 0x2ca   : > { %5669 = vrot.lane.b32.xlu0 %v5522_v37, %s7463_s29  ;;  %v4629_v37 = vrot.slane %v4627_v1, 6  ;;  %v4903_v44 = vor.u32 %v4902_v36, %v4899_v28  ;;  %v4927_v30 = vshrl.u32 %v4512_v42, 16  ;;  %v4930_v31 = vshll.u32 %v4512_v42, 16 }
 0x2cb   : > { %v3744_v51 = vpop.permute.xlu1 %3743  ;;  %v4624_v55 = vsel %vm9408_vm2, %v4615_v23, %v4623_v32  ;;  %v4909_v63 = vrot.slane %v4907_v47, 6 }
 0x2cc   : > { %3867 = vst.msk [vmem:[#allocation2 + $0xb4] sm:$0xf] %vm3821_vm14, %v3744_v51  ;;  %v3742_v59 = vpop.permute.xlu0 %3741  ;;  %v4146_v51 = vrot.slane %v9645_v33, 6  ;;  %v4633_v60 = vor.u32 %v4632_v38, %v4629_v37  ;;  %v4904_v0 = vsel %vm9408_vm2, %v4895_v57, %v4903_v44  ;;  %v4905_v1 = vrot.slane %v4903_v44, 4  ;;  %v5407_v44 = vld [vmem:[%s7518_s23 + $0x48] sm:$0xf] }
 0x2cd   : > { %3866 = vst.msk [vmem:[#allocation2 + $0xb0] sm:$0xf] %vm3821_vm14, %v3742_v59  ;;  %5671 = vrot.lane.b32.xlu1 %v5525_v48, %s7463_s29  ;;  %v4625_v59 = vrot.slane %v4623_v32, 4  ;;  %v4932_v47 = vrot.slane %v4930_v31, 7  ;;  %v9739_v31 = vld [vmem:[%s7518_s23 + $0xc0] sm:$0xf] }
 0x2ce   : > { %5725 = vrot.lane.b32.xlu0 %v5606_v45, %s7463_s29  ;;  %v4511_v45 = vld [vmem:[%s7518_s23 + $0xbc] sm:$0xf]  ;;  %v4147_v18 = vsel %vm9000_vm8, %v4145_v50, %v4146_v51  ;;  %v4635_v19 = vrot.slane %v4633_v60, 4  ;;  %v5530_v50 = vrot.slane %v5406_v43, 7  ;;  %v4148_v43 = vrot.slane %v4146_v51, 4 }
 0x2cf   : > { %v3748_v9 = vpop.permute.xlu1 %3747  ;;  %v4917_v6 = vshrl.u32 %v4511_v45, 16  ;;  %v4634_v16 = vsel %vm9408_vm2, %v4625_v59, %v4633_v60  ;;  %v5434_v59 = vld [vmem:[%s7518_s23 + $0xb4] sm:$0xf]  ;;  %v3965_v33 = vld [vmem:[%s7518_s23 + $0xc8] sm:$0xf] }
 0x2d0   : > { %3869 = vst.msk [vmem:[#allocation2 + $0xbc] sm:$0xf] %vm3821_vm14, %v3748_v9  ;;  %v3746_v15 = vpop.permute.xlu0 %3745  ;;  %v4920_v9 = vshll.u32 %v4511_v45, 16  ;;  %v5614_v60 = vrot.slane %v5434_v59, 7 }
 0x2d1   : > { %3868 = vst.msk [vmem:[#allocation2 + $0xb8] sm:$0xf] %vm3821_vm14, %v3746_v15  ;;  %5727 = vrot.lane.b32.xlu1 %v5609_v61, %s7463_s29  ;;  %v4639_v61 = vrot.slane %v4637_v40, 6  ;;  %v4919_v39 = vrot.slane %v4917_v6, 6  ;;  %v5408_v6 = vld [vmem:[%s7518_s23 + $0x4c] sm:$0xf] }
 0x2d2   : > { %5673 = vrot.lane.b32.xlu0 %v5528_v4, %s7463_s29  ;;  %v4922_v21 = vrot.slane %v4920_v9, 7 }
 0x2d3   : > { %v3752_v12 = vpop.permute.xlu1 %3751  ;;  %v4643_v20 = vor.u32 %v4642_v62, %v4639_v61 }
 0x2d4   : > { %3871 = vst.msk [vmem:[#allocation2 + $0xc4] sm:$0xf] %vm3821_vm14, %v3752_v12  ;;  %v3750_v25 = vpop.permute.xlu0 %3749  ;;  %v4649_v12 = vrot.slane %v4647_v53, 6  ;;  %v4923_v36 = vor.u32 %v4922_v21, %v4919_v39  ;;  %v5436_v53 = vld [vmem:[%s7518_s23 + $0xbc] sm:$0xf] }
 0x2d5   : > { %3870 = vst.msk [vmem:[#allocation2 + $0xc0] sm:$0xf] %vm3821_vm14, %v3750_v25  ;;  %4254 = vrot.lane.b32.xlu1 %v4138_v24, %s7461_s11  ;;  %v4913_v24 = vor.u32 %v4912_v3, %v4909_v63  ;;  %v4644_v23 = vsel %vm9408_vm2, %v4635_v19, %v4643_v20  ;;  %v4645_v38 = vrot.slane %v4643_v20, 4  ;;  %v5532_v63 = vrot.slane %v5530_v50, 4 }
 0x2d6   : > { %5729 = vrot.lane.b32.xlu0 %v5612_v26, %s7463_s29  ;;  %v4652_v26 = vrot.slane %v4650_v7, 7  ;;  %v5533_v3 = vrot.slane %v5407_v44, 7  ;;  %v9723_v7 = vld [vmem:[%s7518_s23 + $0x50] sm:$0xf] }
 0x2d7   : > { %v3756_v48 = vpop.permute.xlu1 %3755  ;;  %v4914_v32 = vsel %vm9408_vm2, %v4905_v1, %v4913_v24  ;;  %v4915_v28 = vrot.slane %v4913_v24, 4  ;;  %v4485_v1 = vld [vmem:[%s7518_s23 + $0x54] sm:$0xf]  ;;  %v5620_v24 = vrot.slane %v5436_v53, 7  ;;  %v5539_v21 = vrot.slane %v9723_v7, 7 }
 0x2d8   : > { %3873 = vst.msk [vmem:[#allocation2 + $0xcc] sm:$0xf] %vm3821_vm14, %v3756_v48  ;;  %v3754_v52 = vpop.permute.xlu0 %3753  ;;  %v9685_v40 = vor.u32 %v4652_v26, %v4649_v12  ;;  %v5534_v42 = vsel %vm9446_vm5, %v5532_v63, %v5533_v3 }
 0x2d9   : > { %3872 = vst.msk [vmem:[#allocation2 + $0xc8] sm:$0xf] %vm3821_vm14, %v3754_v52  ;;  %4258 = vrot.lane.b32.xlu1 %v4144_v2, %s7461_s11  ;;  %v4929_v2 = vrot.slane %v4927_v30, 6  ;;  %v4924_v48 = vsel %vm9408_vm2, %v4915_v28, %v4923_v36  ;;  %v3964_v30 = vld [vmem:[%s7518_s23 + $0xc4] sm:$0xf] }
 0x2da   : > { %4256 = vrot.lane.b32.xlu0 %v4141_v49, %s7461_s11  ;;  %v5529_v49 = vrot.slane %v5527_v54, 4  ;;  %v4654_v52 = vsel %vm9408_vm2, %v4645_v38, %v9685_v40  ;;  %v5613_v54 = vrot.slane %v5611_v10, 4  ;;  %v5535_v10 = vrot.slane %v5533_v3, 4  ;;  %v4486_v28 = vld [vmem:[%s7518_s23 + $0x58] sm:$0xf] }
 0x2db   : > { %v3760_v4 = vpop.permute.xlu1 %3759  ;;  %v9698_v57 = vor.u32 %v4932_v47, %v4929_v2  ;;  %v4513_v38 = vld [vmem:[%s7518_s23 + $0xc4] sm:$0xf]  ;;  %v4149_v2 = vrot.slane %v3964_v30, 6  ;;  %v5622_v47 = vrot.slane %v5620_v24, 4  ;;  %v4670_v59 = vshll.u32 %v4486_v28, 16 }
 0x2dc   : > { %3875 = vst.msk [vmem:[#allocation2 + $0xd4] sm:$0xf] %vm3821_vm14, %v3760_v4  ;;  %v3758_v15 = vpop.permute.xlu0 %3757  ;;  %v5531_v27 = vsel %vm9446_vm5, %v5529_v49, %v5530_v50  ;;  %v5435_v4 = vld [vmem:[%s7518_s23 + $0xb8] sm:$0xf]  ;;  %v5615_v56 = vsel %vm9446_vm5, %v5613_v54, %v5614_v60  ;;  %v9760_v50 = vld [vmem:[%s7518_s23 + $0xcc] sm:$0xf] }
 0x2dd   : > { %3874 = vst.msk [vmem:[#allocation2 + $0xd0] sm:$0xf] %vm3821_vm14, %v3758_v15  ;;  %5062 = vrot.lane.b32.xlu1 %v4624_v55, %s7462_s24  ;;  %v4925_v55 = vrot.slane %v4923_v36, 4  ;;  %v4937_v51 = vshrl.u32 %v4513_v38, 16  ;;  %v4940_v44 = vshll.u32 %v4513_v38, 16  ;;  %v4155_v63 = vrot.slane %v9760_v50, 6 }
 0x2de   : > { %4260 = vrot.lane.b32.xlu0 %v4147_v18, %s7461_s11  ;;  %v5536_v18 = vrot.slane %v5408_v6, 7  ;;  %v4514_v54 = vld [vmem:[%s7518_s23 + $0xc8] sm:$0xf]  ;;  %v4487_v3 = vld [vmem:[%s7518_s23 + $0x5c] sm:$0xf] }
 0x2df   : > { %v3764_v22 = vpop.permute.xlu1 %3763  ;;  %v4934_v62 = vsel %vm9408_vm2, %v4925_v55, %v9698_v57  ;;  %v4667_v55 = vshrl.u32 %v4486_v28, 16 }
 0x2e0   : > { %3878 = vst.msk [vmem:[#allocation2 + $0xdc] sm:$0x3] %vm3877_vm6, %v3764_v22  ;;  %v3762_v25 = vpop.permute.xlu0 %3761  ;;  %v5538_v39 = vrot.slane %v5536_v18, 4  ;;  %v5537_v22 = vsel %vm9446_vm5, %v5535_v10, %v5536_v18  ;;  %v4672_v18 = vrot.slane %v4670_v59, 7 }
 0x2e1   : > { %3876 = vst.msk [vmem:[#allocation2 + $0xd8] sm:$0xf] %vm3821_vm14, %v3762_v25  ;;  %5118 = vrot.lane.b32.xlu1 %v4904_v0, %s7462_s24  ;;  %v5616_v0 = vrot.slane %v5614_v60, 4  ;;  %v4657_v25 = vshrl.u32 %v4485_v1, 16  ;;  %v4150_v60 = vsel %vm9000_vm8, %v4148_v43, %v4149_v2  ;;  %v4669_v10 = vrot.slane %v4667_v55, 6 }
 0x2e2   : > { %5064 = vrot.lane.b32.xlu0 %v4634_v16, %s7462_s24  ;;  %v5617_v16 = vrot.slane %v5435_v4, 7  ;;  %v9778_v4 = vld [vmem:[%s7518_s23 + $0xd0] sm:$0xf] }
 0x2e3   : > { %v3905_v37 = vpop.permute.xlu1 %3904  ;;  %v9792_v28 = vor.u32 %v4672_v18, %v4669_v10 }
 0x2e4   : > { %3919 = vst.msk [vmem:[#allocation2 + $0xe0] sm:$0xf] %vm3821_vm14, %v3905_v37  ;;  %v3903_v35 = vpop.permute.xlu0 %3902  ;;  %v5619_v20 = vrot.slane %v5617_v16, 4  ;;  %v5618_v26 = vsel %vm9446_vm5, %v5616_v0, %v5617_v16  ;;  %v5540_v37 = vsel %vm9446_vm5, %v5538_v39, %v5539_v21  ;;  %v4947_v0 = vshrl.u32 %v4514_v54, 16 }
 0x2e5   : > { %3918 = vst.msk [vmem:[#allocation2 + $0xdc] sm:$0xc] %vm3917_vm7, %v3903_v35  ;;  %5066 = vrot.lane.b32.xlu1 %v4644_v23, %s7462_s24  ;;  %v4660_v23 = vshll.u32 %v4485_v1, 16  ;;  %v5623_v35 = vrot.slane %v9739_v31, 7  ;;  %v4950_v16 = vshll.u32 %v4514_v54, 16  ;;  %v4677_v1 = vshrl.u32 %v4487_v3, 16 }
 0x2e6   : > { %5120 = vrot.lane.b32.xlu0 %v4914_v32, %s7462_s24  ;;  %v5621_v36 = vsel %vm9446_vm5, %v5619_v20, %v5620_v24  ;;  %v4680_v20 = vshll.u32 %v4487_v3, 16  ;;  %v4157_v24 = vrot.slane %v4155_v63, 4  ;;  %v4158_v39 = vrot.slane %v9778_v4, 6 }
 0x2e7   : > { %v3909_v45 = vpop.permute.xlu1 %3908  ;;  %v4952_v38 = vrot.slane %v4950_v16, 7  ;;  %v4679_v43 = vrot.slane %v4677_v1, 6  ;;  %v4082_v4 = vrot.slane %v4080_v46, 4 }
 0x2e8   : > { %3921 = vst.msk [vmem:[#allocation2 + $0xe8] sm:$0xf] %vm3821_vm14, %v3909_v45  ;;  %v3907_v34 = vpop.permute.xlu0 %3906  ;;  %v4659_v45 = vrot.slane %v4657_v25, 6  ;;  %v4159_v50 = vsel %vm9000_vm8, %v4157_v24, %v4158_v39  ;;  %v4675_v24 = vrot.slane %v9792_v28, 4 }
 0x2e9   : > { %3920 = vst.msk [vmem:[#allocation2 + $0xe4] sm:$0xf] %vm3821_vm14, %v3907_v34  ;;  %5122 = vrot.lane.b32.xlu1 %v4924_v48, %s7462_s24  ;;  %v9757_v48 = vld [vmem:[%s7518_s23 + $0xec] sm:$0xf] }
 0x2ea   : > { %5068 = vrot.lane.b32.xlu0 %v4654_v52, %s7462_s24  ;;  %v4662_v52 = vrot.slane %v4660_v23, 7  ;;  %v4515_v23 = vld [vmem:[%s7518_s23 + $0xcc] sm:$0xf] }
 0x2eb   : > { %v4183_v61 = vpop.permute.xlu1 %4182 }
 0x2ec   : > { %4339 = vst.msk [vmem:[#allocation2] sm:$0xf] %vm4338_vm9, %v4183_v61  ;;  %v3911_v9 = vpop.permute.xlu0 %3910  ;;  %v5624_v61 = vsel %vm9446_vm5, %v5622_v47, %v5623_v35 }
 0x2ed   : > { %3922 = vst.msk [vmem:[#allocation2 + $0xec] sm:$0xf] %vm3821_vm14, %v3911_v9  ;;  %5675 = vrot.lane.b32.xlu1 %v5531_v27, %s7463_s29  ;;  %v4179_v27 = vrot.slane %v9757_v48, 6  ;;  %v4152_v9 = vrot.slane %v3965_v33, 6  ;;  %v4516_v33 = vld [vmem:[%s7518_s23 + $0xd0] sm:$0xf] }
 0x2ee   : > { %5124 = vrot.lane.b32.xlu0 %v4934_v62, %s7462_s24  ;;  %v4151_v62 = vrot.slane %v4149_v2, 4  ;;  %v4682_v2 = vrot.slane %v4680_v20, 7  ;;  %vm5254_vm14 = vcmask 517568  }
 0x2ef   : > { %v4187_v15 = vpop.permute.xlu1 %4186  ;;  %v4154_v30 = vrot.slane %v4152_v9, 4  ;;  %vm5255_vm0 = vmand %vm5254_vm14, %vm4524_vm15  ;;  %vm4462_vm15 = vcmask 454018  }
 0x2f0   : > { %4341 = vst.msk [vmem:[#allocation2 + $0x8] sm:$0xf] %vm4338_vm9, %v4187_v15  ;;  %v4185_v19 = vpop.permute.xlu0 %4184  ;;  %v4939_v15 = vrot.slane %v4937_v51, 6 }
 0x2f1   : > { %4340 = vst.msk [vmem:[#allocation2 + $0x4] sm:$0xf] %vm4338_vm9, %v4185_v19  ;;  %5731 = vrot.lane.b32.xlu1 %v5615_v56, %s7463_s29  ;;  %v4663_v56 = vor.u32 %v4662_v52, %v4659_v45  ;;  %v4181_v19 = vrot.slane %v4179_v27, 4  ;;  %v4957_v45 = vshrl.u32 %v4515_v23, 16  ;;  %v4960_v52 = vshll.u32 %v4515_v23, 16 }
 0x2f2   : > { %5677 = vrot.lane.b32.xlu0 %v5534_v42, %s7463_s29  ;;  %v4942_v42 = vrot.slane %v4940_v44, 7  ;;  %v4156_v59 = vsel %vm9000_vm8, %v4154_v30, %v4155_v63 }
 0x2f3   : > { %v4191_v12 = vpop.permute.xlu1 %4190  ;;  %v4665_v25 = vrot.slane %v4663_v56, 4  ;;  %v4962_v63 = vrot.slane %v4960_v52, 7 }
 0x2f4   : > { %4343 = vst.msk [vmem:[#allocation2 + $0x10] sm:$0xf] %vm4338_vm9, %v4191_v12  ;;  %v4189_v32 = vpop.permute.xlu0 %4188 }
 0x2f5   : > { %4342 = vst.msk [vmem:[#allocation2 + $0xc] sm:$0xf] %vm4338_vm9, %v4189_v32  ;;  %5679 = vrot.lane.b32.xlu1 %v5537_v22, %s7463_s29  ;;  %v4488_v22 = vld [vmem:[%s7518_s23 + $0x60] sm:$0xf]  ;;  %v4674_v44 = vsel %vm9408_vm2, %v4665_v25, %v9792_v28 }
 0x2f6   : > { %5733 = vrot.lane.b32.xlu0 %v5618_v26, %s7463_s29  ;;  %v4153_v26 = vsel %vm9000_vm8, %v4151_v62, %v4152_v9  ;;  %v4687_v47 = vshrl.u32 %v4488_v22, 16  ;;  %v4970_v9 = vshll.u32 %v4516_v33, 16 }
 0x2f7   : > { %v4195_v49 = vpop.permute.xlu1 %4194 }
 0x2f8   : > { %4345 = vst.msk [vmem:[#allocation2 + $0x18] sm:$0xf] %vm4338_vm9, %v4195_v49  ;;  %v4193_v34 = vpop.permute.xlu0 %4192  ;;  %v4690_v49 = vshll.u32 %v4488_v22, 16  ;;  %v4689_v62 = vrot.slane %v4687_v47, 6  ;;  %v4972_v1 = vrot.slane %v4970_v9, 7 }
 0x2f9   : > { %4344 = vst.msk [vmem:[#allocation2 + $0x14] sm:$0xf] %vm4338_vm9, %v4193_v34  ;;  %5735 = vrot.lane.b32.xlu1 %v5621_v36, %s7463_s29  ;;  %v4943_v36 = vor.u32 %v4942_v42, %v4939_v15  ;;  %v4655_v34 = vrot.slane %v9685_v40, 4  ;;  %v4959_v40 = vrot.slane %v4957_v45, 6  ;;  %v5410_v22 = vld [vmem:[%s7518_s23 + $0x54] sm:$0xf] }
 0x2fa   : > { %5681 = vrot.lane.b32.xlu0 %v5540_v37, %s7463_s29  ;;  %v4949_v37 = vrot.slane %v4947_v0, 6  ;;  %v4692_v3 = vrot.slane %v4690_v49, 7  ;;  %v5542_v23 = vrot.slane %v5410_v22, 7  ;;  %v4523_v9 = vld [vmem:[%s7518_s23 + $0xec] sm:$0xf] }
 0x2fb   : > { %v4199_v6 = vpop.permute.xlu1 %4198  ;;  %v4945_v54 = vrot.slane %v4943_v36, 4  ;;  %v4664_v18 = vsel %vm9408_vm2, %v4655_v34, %v4663_v56  ;;  %v5412_v34 = vld [vmem:[%s7518_s23 + $0x5c] sm:$0xf] }
 0x2fc   : > { %4347 = vst.msk [vmem:[#allocation2 + $0x20] sm:$0xf] %vm4338_vm9, %v4199_v6  ;;  %v4197_v53 = vpop.permute.xlu0 %4196  ;;  %v4967_v6 = vshrl.u32 %v4516_v33, 16  ;;  %v9821_v16 = vor.u32 %v4692_v3, %v4689_v62  ;;  %v5544_v47 = vrot.slane %v5542_v23, 4  ;;  %v9864_v62 = vld [vmem:[%s7518_s23 + $0x60] sm:$0xf] }
 0x2fd   : > { %4346 = vst.msk [vmem:[#allocation2 + $0x1c] sm:$0xf] %vm4338_vm9, %v4197_v53  ;;  %4262 = vrot.lane.b32.xlu1 %v4150_v60, %s7461_s11  ;;  %v4953_v60 = vor.u32 %v4952_v38, %v4949_v37  ;;  %v4935_v53 = vrot.slane %v9698_v57, 4  ;;  %v5411_v37 = vld [vmem:[%s7518_s23 + $0x58] sm:$0xf]  ;;  %v5551_v31 = vrot.slane %v9864_v62, 7 }
 0x2fe   : > { %5737 = vrot.lane.b32.xlu0 %v5624_v61, %s7463_s29  ;;  %v4683_v61 = vor.u32 %v4682_v2, %v4679_v43  ;;  %v4969_v56 = vrot.slane %v4967_v6, 6  ;;  %v5438_v38 = vld [vmem:[%s7518_s23 + $0xc4] sm:$0xf]  ;;  %v5545_v49 = vrot.slane %v5411_v37, 7  ;;  %v5440_v3 = vld [vmem:[%s7518_s23 + $0xcc] sm:$0xf] }
 0x2ff   : > { %v4203_v12 = vpop.permute.xlu1 %4202  ;;  %v4954_v42 = vsel %vm9408_vm2, %v4945_v54, %v4953_v60  ;;  %v4944_v57 = vsel %vm9408_vm2, %v4935_v53, %v4943_v36  ;;  %v4955_v36 = vrot.slane %v4953_v60, 4 }
 0x300   : > { %4349 = vst.msk [vmem:[#allocation2 + $0x28] sm:$0xf] %vm4338_vm9, %v4203_v12  ;;  %v4201_v32 = vpop.permute.xlu0 %4200  ;;  %v4685_v0 = vrot.slane %v4683_v61, 4  ;;  %v9834_v25 = vor.u32 %v4972_v1, %v4969_v56  ;;  %v4684_v28 = vsel %vm9408_vm2, %v4675_v24, %v4683_v61  ;;  %v5625_v61 = vrot.slane %v5623_v35, 4 }
 0x301   : > { %4348 = vst.msk [vmem:[#allocation2 + $0x24] sm:$0xf] %vm4338_vm9, %v4201_v32  ;;  %4284 = vrot.lane.b32.xlu1 %v4181_v19, %s7461_s11  ;;  %v4963_v19 = vor.u32 %v4962_v63, %v4959_v40  ;;  %v5632_v35 = vrot.slane %v5440_v3, 7  ;;  %v5547_v53 = vrot.slane %v5545_v49, 4  ;;  %v5040_v56 = vshll.u32 %v4523_v9, 16 }
 0x302   : > { %4264 = vrot.lane.b32.xlu0 %v4153_v26, %s7461_s11  ;;  %v4694_v26 = vsel %vm9408_vm2, %v4685_v0, %v9821_v16 }
 0x303   : > { %v4207_v55 = vpop.permute.xlu1 %4206  ;;  %v4965_v30 = vrot.slane %v4963_v19, 4  ;;  %v4964_v52 = vsel %vm9408_vm2, %v4955_v36, %v4963_v19  ;;  %v5037_v19 = vshrl.u32 %v4523_v9, 16  ;;  %v5042_v36 = vrot.slane %v5040_v56, 7  ;;  %v4491_v56 = vld [vmem:[%s7518_s23 + $0x6c] sm:$0xf] }
 0x304   : > { %4351 = vst.msk [vmem:[#allocation2 + $0x30] sm:$0xf] %vm4338_vm9, %v4207_v55  ;;  %v4205_v51 = vpop.permute.xlu0 %4204  ;;  %v5541_v55 = vrot.slane %v5539_v21, 4  ;;  %v5548_v21 = vrot.slane %v5412_v34, 7  ;;  %v4490_v34 = vld [vmem:[%s7518_s23 + $0x68] sm:$0xf] }
 0x305   : > { %4350 = vst.msk [vmem:[#allocation2 + $0x2c] sm:$0xf] %vm4338_vm9, %v4205_v51  ;;  %4268 = vrot.lane.b32.xlu1 %v4159_v50, %s7461_s11  ;;  %v4974_v2 = vsel %vm9408_vm2, %v4965_v30, %v9834_v25  ;;  %v5626_v50 = vrot.slane %v5438_v38, 7  ;;  %v5546_v51 = vsel %vm9446_vm5, %v5544_v47, %v5545_v49  ;;  %v3969_v30 = vld [vmem:[%s7518_s23 + $0xd8] sm:$0xf]  ;;  %v4710_v3 = vshll.u32 %v4490_v34, 16 }
 0x306   : > { %4266 = vrot.lane.b32.xlu0 %v4156_v59, %s7461_s11  ;;  %v5439_v59 = vld [vmem:[%s7518_s23 + $0xc8] sm:$0xf]  ;;  %v5543_v60 = vsel %vm9446_vm5, %v5541_v55, %v5542_v23  ;;  %v5550_v6 = vrot.slane %v5548_v21, 4  ;;  %v3942_v47 = vld [vmem:[%s7518_s23 + $0x6c] sm:$0xf] }
 0x307   : > { %v4211_v10 = vpop.permute.xlu1 %4210  ;;  %v5629_v7 = vrot.slane %v5439_v59, 7 }
 0x308   : > { %4353 = vst.msk [vmem:[#allocation2 + $0x38] sm:$0xf] %vm4338_vm9, %v4211_v10  ;;  %v4209_v15 = vpop.permute.xlu0 %4208  ;;  %v5552_v1 = vsel %vm9446_vm5, %v5550_v6, %v5551_v31 }
 0x309   : > { %4352 = vst.msk [vmem:[#allocation2 + $0x34] sm:$0xf] %vm4338_vm9, %v4209_v15  ;;  %5072 = vrot.lane.b32.xlu1 %v4674_v44, %s7462_s24  ;;  %v5628_v44 = vrot.slane %v5626_v50, 4  ;;  %v9878_v15 = vld [vmem:[%s7518_s23 + $0xd0] sm:$0xf] }
 0x30a   : > { %5070 = vrot.lane.b32.xlu0 %v4664_v18, %s7462_s24  ;;  %v5627_v18 = vsel %vm9446_vm5, %v5625_v61, %v5626_v50  ;;  %v4707_v61 = vshrl.u32 %v4490_v34, 16 }
 0x30b   : > { %v4215_v20 = vpop.permute.xlu1 %4214  ;;  %v5630_v63 = vsel %vm9446_vm5, %v5628_v44, %v5629_v7 }
 0x30c   : > { %4355 = vst.msk [vmem:[#allocation2 + $0x40] sm:$0xf] %vm4338_vm9, %v4215_v20  ;;  %v4213_v12 = vpop.permute.xlu0 %4212  ;;  %v5634_v20 = vrot.slane %v5632_v35, 4 }
 0x30d   : > { %4354 = vst.msk [vmem:[#allocation2 + $0x3c] sm:$0xf] %vm4338_vm9, %v4213_v12  ;;  %5128 = vrot.lane.b32.xlu1 %v4954_v42, %s7462_s24  ;;  %v3968_v42 = vld [vmem:[%s7518_s23 + $0xd4] sm:$0xf]  ;;  %v5549_v12 = vsel %vm9446_vm5, %v5547_v53, %v5548_v21  ;;  %v3970_v21 = vld [vmem:[%s7518_s23 + $0xdc] sm:$0xf] }
 0x30e   : > { %5126 = vrot.lane.b32.xlu0 %v4944_v57, %s7462_s24  ;;  %v5635_v57 = vrot.slane %v9878_v15, 7  ;;  %v4161_v24 = vrot.slane %v3968_v42, 6  ;;  %v4167_v42 = vrot.slane %v3970_v21, 6 }
 0x30f   : > { %v5047_v32 = vpop.permute.xlu1 %5046 }
 0x310   : > { %5203 = vst.msk [vmem:[#allocation2] sm:$0xf] %vm5202_vm10, %v5047_v32  ;;  %v4217_v43 = vpop.permute.xlu0 %4216  ;;  %v4489_v32 = vld [vmem:[%s7518_s23 + $0x64] sm:$0xf]  ;;  %v5636_v37 = vsel %vm9446_vm5, %v5634_v20, %v5635_v57  ;;  %v4163_v38 = vrot.slane %v4161_v24, 4 }
 0x311   : > { %4356 = vst.msk [vmem:[#allocation2 + $0x44] sm:$0xf] %vm4338_vm9, %v4217_v43  ;;  %5076 = vrot.lane.b32.xlu1 %v4694_v26, %s7462_s24  ;;  %v5631_v26 = vrot.slane %v5629_v7, 4  ;;  %v4164_v43 = vrot.slane %v3969_v30, 6  ;;  %v9938_v20 = vld [vmem:[%s7518_s23 + $0xe0] sm:$0xf] }
 0x312   : > { %5074 = vrot.lane.b32.xlu0 %v4684_v28, %s7462_s24  ;;  %v5039_v28 = vrot.slane %v5037_v19, 6  ;;  %v9942_v30 = vld [vmem:[%s8006_s6] sm:$0xf] }
 0x313   : > { %v5051_v45 = vpop.permute.xlu1 %5050  ;;  %v5633_v50 = vsel %vm9446_vm5, %v5631_v26, %v5632_v35  ;;  %v4165_v44 = vsel %vm9000_vm8, %v4163_v38, %v4164_v43  ;;  %v4166_v53 = vrot.slane %v4164_v43, 4  ;;  %v4720_v38 = vshll.u32 %v4491_v56, 16 }
 0x314   : > { %5205 = vst.msk [vmem:[#allocation2 + $0x8] sm:$0xf] %vm5202_vm10, %v5051_v45  ;;  %v5049_v33 = vpop.permute.xlu0 %5048  ;;  %v4697_v45 = vshrl.u32 %v4489_v32, 16 }
 0x315   : > { %5204 = vst.msk [vmem:[#allocation2 + $0x4] sm:$0xf] %vm5202_vm10, %v5049_v33  ;;  %5132 = vrot.lane.b32.xlu1 %v4974_v2, %s7462_s24  ;;  %v4160_v2 = vrot.slane %v4158_v39, 4  ;;  %v4083_v39 = vrot.slane %v3942_v47, 6  ;;  %v9913_v33 = vor.u32 %v5042_v36, %v5039_v28  ;;  %v4168_v43 = vsel %vm9000_vm8, %v4166_v53, %v4167_v42  ;;  %v4492_v47 = vld [vmem:[%s7518_s23 + $0x70] sm:$0xf] }
 0x316   : > { %5130 = vrot.lane.b32.xlu0 %v4964_v52, %s7462_s24  ;;  %v4700_v52 = vshll.u32 %v4489_v32, 16  ;;  %v4699_v29 = vrot.slane %v4697_v45, 6  ;;  %v4169_v45 = vrot.slane %v4167_v42, 4  ;;  %v4722_v21 = vrot.slane %v4720_v38, 7 }
 0x317   : > { %v5660_v54 = vpop.permute.xlu1 %5659  ;;  %v4162_v7 = vsel %vm9000_vm8, %v4160_v2, %v4161_v24  ;;  %v4084_v9 = vsel %vm9000_vm8, %v4082_v4, %v4083_v39 }
 0x318   : > { %5816 = vst.msk [vmem:[#allocation2] sm:$0xf] %vm5815_vm11, %v5660_v54  ;;  %v5053_v40 = vpop.permute.xlu0 %5052  ;;  %v4702_v46 = vrot.slane %v4700_v52, 7  ;;  %v4170_v52 = vrot.slane %v9938_v20, 6 }
 0x319   : > { %5206 = vst.msk [vmem:[#allocation2 + $0xc] sm:$0xf] %vm5202_vm10, %v5053_v40  ;;  %5685 = vrot.lane.b32.xlu1 %v5546_v51, %s7463_s29  ;;  %v4517_v51 = vld [vmem:[%s7518_s23 + $0xd4] sm:$0xf] }
 0x31a   : > { %5683 = vrot.lane.b32.xlu0 %v5543_v60, %s7463_s29  ;;  %v9924_v60 = vld [vmem:[%s7518_s23 + $0x70] sm:$0xf]  ;;  %v4977_v6 = vshrl.u32 %v4517_v51, 16  ;;  %v4980_v35 = vshll.u32 %v4517_v51, 16  ;;  %v4703_v24 = vor.u32 %v4702_v46, %v4699_v29  ;;  %v4730_v29 = vshll.u32 %v4492_v47, 16 }
 0x31b   : > { %v5664_v10 = vpop.permute.xlu1 %5663  ;;  %v4086_v19 = vrot.slane %v9924_v60, 6 }
 0x31c   : > { %5818 = vst.msk [vmem:[#allocation2 + $0x8] sm:$0xf] %vm5815_vm11, %v5664_v10  ;;  %v5662_v0 = vpop.permute.xlu0 %5661  ;;  %v5045_v10 = vrot.slane %v9913_v33, 4  ;;  %v4982_v32 = vrot.slane %v4980_v35, 7 }
 0x31d   : > { %5817 = vst.msk [vmem:[#allocation2 + $0x4] sm:$0xf] %vm5815_vm11, %v5662_v0  ;;  %5741 = vrot.lane.b32.xlu1 %v5630_v63, %s7463_s29  ;;  %v4085_v0 = vrot.slane %v4083_v39, 4 }
 0x31e   : > { %5739 = vrot.lane.b32.xlu0 %v5627_v18, %s7463_s29  ;;  %v4518_v18 = vld [vmem:[%s7518_s23 + $0xd8] sm:$0xf] }
 0x31f   : > { %v4247_v22 = vpop.permute.xlu1 %4246  ;;  %v4987_v28 = vshrl.u32 %v4518_v18, 16  ;;  %v4990_v36 = vshll.u32 %v4518_v18, 16  ;;  %v4087_v2 = vsel %vm9000_vm8, %v4085_v0, %v4086_v19  ;;  %v4732_v0 = vrot.slane %v4730_v29, 7 }
 0x320   : > { %4371 = vst.msk [vmem:[#allocation2 + $0x80] sm:$0xf] %vm4338_vm9, %v4247_v22  ;;  %v5666_v23 = vpop.permute.xlu0 %5665  ;;  %v4709_v22 = vrot.slane %v4707_v61, 6 }
 0x321   : > { %5819 = vst.msk [vmem:[#allocation2 + $0xc] sm:$0xf] %vm5815_vm11, %v5666_v23  ;;  %5689 = vrot.lane.b32.xlu1 %v5552_v1, %s7463_s29  ;;  %v4979_v23 = vrot.slane %v4977_v6, 6  ;;  %v4989_v51 = vrot.slane %v4987_v28, 6  ;;  %v4520_v6 = vld [vmem:[%s7518_s23 + $0xe0] sm:$0xf] }
 0x322   : > { %5687 = vrot.lane.b32.xlu0 %v5549_v12, %s7463_s29  ;;  %v4712_v12 = vrot.slane %v4710_v3, 7 }
 0x323   : > { %v4251_v49 = vpop.permute.xlu1 %4250  ;;  %v4983_v39 = vor.u32 %v4982_v32, %v4979_v23  ;;  %v4975_v23 = vrot.slane %v9834_v25, 4 }
 0x324   : > { %4373 = vst.msk [vmem:[#allocation2 + $0x88] sm:$0xf] %vm4338_vm9, %v4251_v49  ;;  %v4249_v55 = vpop.permute.xlu0 %4248  ;;  %v7402_v59 = vld [vmem:[#allocation2] sm:$0xff]   ;;  %v9958_v4 = vor.u32 %v4712_v12, %v4709_v22  ;;  %v5010_v22 = vshll.u32 %v4520_v6, 16 }
 0x325   : > { %4372 = vst.msk [vmem:[#allocation2 + $0x84] sm:$0xf] %vm4338_vm9, %v4249_v55  ;;  %5745 = vrot.lane.b32.xlu1 %v5636_v37, %s7463_s29  ;;  %7293 = vmatprep.mubr.msk.bf16.mxu0 %vm6202_vm12, %v7402_v59  ;;  %v4717_v37 = vshrl.u32 %v4491_v56, 16  ;;  %v4705_v55 = vrot.slane %v4703_v24, 4  ;;  %v4519_v59 = vld [vmem:[%s7518_s23 + $0xdc] sm:$0xf] }
 0x326   : > { %5743 = vrot.lane.b32.xlu0 %v5633_v50, %s7463_s29  ;;  %v4410_v50 = vrot.slane %v9942_v30, 6  ;;  %v4997_v46 = vshrl.u32 %v4519_v59, 16  ;;  %v5000_v61 = vshll.u32 %v4519_v59, 16 }
 0x327   : > { %v5055_v54 = vpop.permute.xlu1 %5054 }
 0x328   : > { %5207 = vst.msk [vmem:[#allocation2 + $0x10] sm:$0xf] %vm5202_vm10, %v5055_v54  ;;  %v4253_v40 = vpop.permute.xlu0 %4252  ;;  %v7403_v63 = vld [vmem:[#allocation2 + $0x8] sm:$0xff]   ;;  %v4727_v54 = vshrl.u32 %v4492_v47, 16  ;;  %v5002_v56 = vrot.slane %v5000_v61, 7  ;;  %v4715_v47 = vrot.slane %v9958_v4, 4 }
 0x329   : > { %4374 = vst.msk [vmem:[#allocation2 + $0x8c] sm:$0xf] %vm4338_vm9, %v4253_v40  ;;  %4272 = vrot.lane.b32.xlu1 %v4165_v44, %s7461_s11  ;;  %7294 = vmatmul.mubr.msk.bf16.vlgmr.msra.gmra.mxu0 %vm6202_vm12, %v7403_v63  ;;  %v4992_v44 = vrot.slane %v4990_v36, 7  ;;  %v4171_v40 = vsel %vm9000_vm8, %v4169_v45, %v4170_v52  ;;  %v4695_v63 = vrot.slane %v9821_v16, 4  ;;  %v4999_v16 = vrot.slane %v4997_v46, 6 }
 0x32a   : > { %4270 = vrot.lane.b32.xlu0 %v4162_v7, %s7461_s11  ;;  %v4719_v7 = vrot.slane %v4717_v37, 6  ;;  %v4729_v42 = vrot.slane %v4727_v54, 6 }
 0x32b   : > { %v5111_v1 = vpop.permute.xlu1 %5110  ;;  %v4993_v18 = vor.u32 %v4992_v44, %v4989_v51  ;;  %v5003_v38 = vor.u32 %v5002_v56, %v4999_v16 }
 0x32c   : > { %5235 = vst.msk [vmem:[#allocation2 + $0x80] sm:$0xf] %vm5202_vm10, %v5111_v1  ;;  %v5057_v26 = vpop.permute.xlu0 %5056  ;;  %v4723_v53 = vor.u32 %v4722_v21, %v4719_v7  ;;  %v5007_v1 = vshrl.u32 %v4520_v6, 16  ;;  %v9987_v37 = vor.u32 %v4732_v0, %v4729_v42  ;;  %v5415_v21 = vld [vmem:[%s7518_s23 + $0x68] sm:$0xf] }
 0x32d   : > { %5208 = vst.msk [vmem:[#allocation2 + $0x14] sm:$0xf] %vm5202_vm10, %v5057_v26  ;;  %4218 = vrot.lane.b32.xlu1 %v4084_v9, %s7461_s11  ;;  %v4714_v9 = vsel %vm9408_vm2, %v4705_v55, %v9958_v4  ;;  %v4704_v26 = vsel %vm9408_vm2, %v4695_v63, %v4703_v24  ;;  %v5005_v59 = vrot.slane %v5003_v38, 4  ;;  %v5442_v4 = vld [vmem:[%s7518_s23 + $0xd4] sm:$0xf]  ;;  %v4995_v7 = vrot.slane %v4993_v18, 4 }
 0x32e   : > { %5148 = vrot.lane.b32.xlu0 %v5045_v10, %s7462_s24  ;;  %v4985_v10 = vrot.slane %v4983_v39, 4  ;;  %v4725_v36 = vrot.slane %v4723_v53, 4  ;;  %v5009_v24 = vrot.slane %v5007_v1, 6  ;;  %v4724_v44 = vsel %vm9408_vm2, %v4715_v47, %v4723_v53  ;;  %v10031_v1 = vld [vmem:[%s7518_s23 + $0x70] sm:$0xf] }
 0x32f   : > { %v5059_v49 = vpop.permute.xlu1 %5058  ;;  %v5638_v29 = vrot.slane %v5442_v4, 7  ;;  %v5004_v6 = vsel %vm9408_vm2, %v4995_v7, %v5003_v38 }
 0x330   : > { %5209 = vst.msk [vmem:[#allocation2 + $0x18] sm:$0xf] %vm5202_vm10, %v5059_v49  ;;  %v5113_v34 = vpop.permute.xlu0 %5112  ;;  %v4994_v28 = vsel %vm9408_vm2, %v4985_v10, %v4993_v18  ;;  %v5414_v49 = vld [vmem:[%s7518_s23 + $0x64] sm:$0xf]  ;;  %v4734_v55 = vsel %vm9408_vm2, %v4725_v36, %v9987_v37 }
 0x331   : > { %5236 = vst.msk [vmem:[#allocation2 + $0x84] sm:$0xf] %vm5202_vm10, %v5113_v34  ;;  %4274 = vrot.lane.b32.xlu1 %v4168_v43, %s7461_s11  ;;  %v5012_v43 = vrot.slane %v5010_v22, 7  ;;  %v5640_v53 = vrot.slane %v5638_v29, 4  ;;  %v5444_v22 = vld [vmem:[%s7518_s23 + $0xdc] sm:$0xf] }
 0x332   : > { %4220 = vrot.lane.b32.xlu0 %v4087_v2, %s7461_s11  ;;  %v4984_v2 = vsel %vm9408_vm2, %v4975_v23, %v4983_v39  ;;  %v5554_v39 = vrot.slane %v5414_v49, 7  ;;  %v5563_v23 = vrot.slane %v10031_v1, 7 }
 0x333   : > { %v5115_v3 = vpop.permute.xlu1 %5114  ;;  %v10000_v34 = vor.u32 %v5012_v43, %v5009_v24  ;;  %v10045_v24 = vld [vmem:[%s7518_s23 + $0xe0] sm:$0xf]  ;;  %v3944_v43 = vld [vmem:[%s7518_s23 + $0x74] sm:$0xf] }
 0x334   : > { %5237 = vst.msk [vmem:[#allocation2 + $0x88] sm:$0xf] %vm5202_vm10, %v5115_v3  ;;  %v5061_v35 = vpop.permute.xlu0 %5060  ;;  %v5556_v61 = vrot.slane %v5554_v39, 4  ;;  %v5557_v3 = vrot.slane %v5415_v21, 7 }
 0x335   : > { %5210 = vst.msk [vmem:[#allocation2 + $0x1c] sm:$0xf] %vm5202_vm10, %v5061_v35  ;;  %4435 = vrot.lane.b32.xlu1 %v4410_v50, %s7461_s11  ;;  %v5014_v46 = vsel %vm9408_vm2, %v5005_v59, %v10000_v34  ;;  %v5553_v35 = vrot.slane %v5551_v31, 4  ;;  %v5637_v31 = vrot.slane %v5635_v57, 4 }
 0x336   : > { %4276 = vrot.lane.b32.xlu0 %v4171_v40, %s7461_s11  ;;  %v5443_v40 = vld [vmem:[%s7518_s23 + $0xd8] sm:$0xf]  ;;  %v5558_v62 = vsel %vm9446_vm5, %v5556_v61, %v5557_v3 }
 0x337   : > { %v5668_v12 = vpop.permute.xlu1 %5667  ;;  %v5641_v42 = vrot.slane %v5443_v40, 7  ;;  %v5555_v56 = vsel %vm9446_vm5, %v5553_v35, %v5554_v39  ;;  %v5639_v38 = vsel %vm9446_vm5, %v5637_v31, %v5638_v29  ;;  %v3973_v35 = vld [vmem:[%s7518_s23 + $0xe8] sm:$0xf]  ;;  %v4521_v31 = vld [vmem:[%s7518_s23 + $0xe4] sm:$0xf] }
 0x338   : > { %5820 = vst.msk [vmem:[#allocation2 + $0x10] sm:$0xf] %vm5815_vm11, %v5668_v12  ;;  %v5117_v32 = vpop.permute.xlu0 %5116 }
 0x339   : > { %5238 = vst.msk [vmem:[#allocation2 + $0x8c] sm:$0xf] %vm5202_vm10, %v5117_v32  ;;  %5080 = vrot.lane.b32.xlu1 %v4714_v9, %s7462_s24  ;;  %v5416_v9 = vld [vmem:[%s7518_s23 + $0x6c] sm:$0xf]  ;;  %v5642_v15 = vsel %vm9446_vm5, %v5640_v53, %v5641_v42  ;;  %v5559_v32 = vrot.slane %v5557_v3, 4  ;;  %v5643_v4 = vrot.slane %v5641_v42, 4 }
 0x33a   : > { %5078 = vrot.lane.b32.xlu0 %v4704_v26, %s7462_s24  ;;  %v5560_v0 = vrot.slane %v5416_v9, 7  ;;  %v3946_v9 = vld [vmem:[%s7518_s23 + $0x7c] sm:$0xf] }
 0x33b   : > { %v5724_v25 = vpop.permute.xlu1 %5723 }
 0x33c   : > { %5848 = vst.msk [vmem:[#allocation2 + $0x80] sm:$0xf] %vm5815_vm11, %v5724_v25  ;;  %v5670_v45 = vpop.permute.xlu0 %5669  ;;  %v5562_v57 = vrot.slane %v5560_v0, 4  ;;  %v5561_v39 = vsel %vm9446_vm5, %v5559_v32, %v5560_v0  ;;  %v5017_v32 = vshrl.u32 %v4521_v31, 16 }
 0x33d   : > { %5821 = vst.msk [vmem:[#allocation2 + $0x14] sm:$0xf] %vm5815_vm11, %v5670_v45  ;;  %5136 = vrot.lane.b32.xlu1 %v4994_v28, %s7462_s24  ;;  %v5644_v28 = vrot.slane %v5444_v22, 7  ;;  %v5647_v45 = vrot.slane %v10045_v24, 7  ;;  %v10090_v22 = vld [vmem:[%s7518_s23 + $0x80] sm:$0xf] }
 0x33e   : > { %5134 = vrot.lane.b32.xlu0 %v4984_v2, %s7462_s24  ;;  %v5564_v47 = vsel %vm9446_vm5, %v5562_v57, %v5563_v23  ;;  %v4494_v57 = vld [vmem:[%s7518_s23 + $0x78] sm:$0xf] }
 0x33f   : > { %v5672_v51 = vpop.permute.xlu1 %5671  ;;  %v5646_v49 = vrot.slane %v5644_v28, 4 }
 0x340   : > { %5822 = vst.msk [vmem:[#allocation2 + $0x18] sm:$0xf] %vm5815_vm11, %v5672_v51  ;;  %v5726_v54 = vpop.permute.xlu0 %5725  ;;  %v3945_v51 = vld [vmem:[%s7518_s23 + $0x78] sm:$0xf] }
 0x341   : > { %5849 = vst.msk [vmem:[#allocation2 + $0x84] sm:$0xf] %vm5815_vm11, %v5726_v54  ;;  %5084 = vrot.lane.b32.xlu1 %v4734_v55, %s7462_s24  ;;  %v4089_v55 = vrot.slane %v3944_v43, 6  ;;  %v4493_v54 = vld [vmem:[%s7518_s23 + $0x74] sm:$0xf]  ;;  %v5648_v29 = vsel %vm9446_vm5, %v5646_v49, %v5647_v45  ;;  %v4092_v61 = vrot.slane %v3945_v51, 6 }
 0x342   : > { %5082 = vrot.lane.b32.xlu0 %v4724_v44, %s7462_s24  ;;  %v3972_v44 = vld [vmem:[%s7518_s23 + $0xe4] sm:$0xf]  ;;  %v4740_v53 = vshll.u32 %v4493_v54, 16  ;;  %v4495_v49 = vld [vmem:[%s7518_s23 + $0x7c] sm:$0xf] }
 0x343   : > { %v5728_v63 = vpop.permute.xlu1 %5727  ;;  %v4173_v3 = vrot.slane %v3972_v44, 6  ;;  %v4522_v51 = vld [vmem:[%s7518_s23 + $0xe8] sm:$0xf]  ;;  %v5019_v44 = vrot.slane %v5017_v32, 6 }
 0x344   : > { %5850 = vst.msk [vmem:[#allocation2 + $0x88] sm:$0xf] %vm5815_vm11, %v5728_v63  ;;  %v5674_v10 = vpop.permute.xlu0 %5673  ;;  %v7404_v18 = vld [vmem:[#allocation2 + $0x10] sm:$0xff]   ;;  %v5645_v63 = vsel %vm9446_vm5, %v5643_v4, %v5644_v28  ;;  %v5020_v28 = vshll.u32 %v4521_v31, 16 }
 0x345   : > { %5823 = vst.msk [vmem:[#allocation2 + $0x1c] sm:$0xf] %vm5815_vm11, %v5674_v10  ;;  %5140 = vrot.lane.b32.xlu1 %v5014_v46, %s7462_s24  ;;  %7297 = vmatprep.mubr.msk.bf16.mxu0 %vm6202_vm12, %v7404_v18  ;;  %v4091_v46 = vrot.slane %v4089_v55, 4  ;;  %v4737_v18 = vshrl.u32 %v4493_v54, 16  ;;  %v4175_v60 = vrot.slane %v4173_v3, 4 }
 0x346   : > { %5138 = vrot.lane.b32.xlu0 %v5004_v6, %s7462_s24  ;;  %v4088_v6 = vrot.slane %v4086_v19, 4  ;;  %v4176_v19 = vrot.slane %v3973_v35, 6  ;;  %v5259_v54 = vld [vmem:[%s8006_s6] sm:$0xf] }
 0x347   : > { %v4255_v16 = vpop.permute.xlu1 %4254  ;;  %v4093_v42 = vsel %vm9000_vm8, %v4091_v46, %v4092_v61  ;;  %v4760_v46 = vshll.u32 %v4495_v49, 16  ;;  %v4496_v35 = vld [vmem:[%s7518_s23 + $0x80] sm:$0xf] }
 0x348   : > { %4375 = vst.msk [vmem:[#allocation2 + $0x90] sm:$0xf] %vm4338_vm9, %v4255_v16  ;;  %v5730_v12 = vpop.permute.xlu0 %5729  ;;  %v7405_v26 = vld [vmem:[#allocation2 + $0x80] sm:$0xff]   ;;  %v4090_v16 = vsel %vm9000_vm8, %v4088_v6, %v4089_v55  ;;  %v4177_v20 = vsel %vm9000_vm8, %v4175_v60, %v4176_v19  ;;  %v4178_v4 = vrot.slane %v4176_v19, 4  ;;  %v5030_v6 = vshll.u32 %v4522_v51, 16 }
 0x349   : > { %5851 = vst.msk [vmem:[#allocation2 + $0x8c] sm:$0xf] %vm5815_vm11, %v5730_v12  ;;  %5693 = vrot.lane.b32.xlu1 %v5558_v62, %s7463_s29  ;;  %7325 = vmatprep.mubr.msk.bf16.mxu1 %vm6202_vm12, %v7405_v26  ;;  %v4095_v62 = vrot.slane %v3946_v9, 6  ;;  %v4739_v26 = vrot.slane %v4737_v18, 6  ;;  %v5269_v60 = vshrl.u32 %v5259_v54, 16  ;;  %v5272_v19 = vshll.u32 %v5259_v54, 16 }
 0x34a   : > { %5691 = vrot.lane.b32.xlu0 %v5555_v56, %s7463_s29  ;;  %v4172_v56 = vrot.slane %v4170_v52, 4  ;;  %v4180_v18 = vsel %vm9000_vm8, %v4178_v4, %v4179_v27  ;;  %v4762_v31 = vrot.slane %v4760_v46, 7  ;;  %v5032_v27 = vrot.slane %v5030_v6, 7 }
 0x34b   : > { %v4259_v36 = vpop.permute.xlu1 %4258  ;;  %v4097_v52 = vrot.slane %v4095_v62, 4  ;;  %v5565_v54 = vrot.slane %v5563_v23, 4  ;;  %v5649_v23 = vrot.slane %v5647_v45, 4 }
 0x34c   : > { %4377 = vst.msk [vmem:[#allocation2 + $0x98] sm:$0xf] %vm4338_vm9, %v4259_v36  ;;  %v4257_v25 = vpop.permute.xlu0 %4256  ;;  %v7406_v2 = vld [vmem:[#allocation2 + $0x18] sm:$0xff]   ;;  %v4098_v36 = vrot.slane %v10090_v22, 6 }
 0x34d   : > { %4376 = vst.msk [vmem:[#allocation2 + $0x94] sm:$0xf] %vm4338_vm9, %v4257_v25  ;;  %5749 = vrot.lane.b32.xlu1 %v5642_v15, %s7463_s29  ;;  %7298 = vmatmul.mubr.msk.bf16.gmra.mxu0 %vm6202_vm12, %v7406_v2  ;;  %v4742_v15 = vrot.slane %v4740_v53, 7  ;;  %v4174_v25 = vsel %vm9000_vm8, %v4172_v56, %v4173_v3  ;;  %v4747_v2 = vshrl.u32 %v4494_v57, 16  ;;  %v5015_v53 = vrot.slane %v10000_v34, 4 }
 0x34e   : > { %5747 = vrot.lane.b32.xlu0 %v5639_v38, %s7463_s29  ;;  %v4094_v38 = vrot.slane %v4092_v61, 4  ;;  %v5271_v34 = vrot.slane %v5269_v60, 6  ;;  %v5420_v60 = vld [vmem:[%s7518_s23 + $0x7c] sm:$0xf] }
 0x34f   : > { %v5063_v59 = vpop.permute.xlu1 %5062  ;;  %v4749_v3 = vrot.slane %v4747_v2, 6  ;;  %v5572_v45 = vrot.slane %v5420_v60, 7  ;;  %v10242_v60 = vld [vmem:[%s7518_s23 + $0x90] sm:$0xf] }
 0x350   : > { %5211 = vst.msk [vmem:[#allocation2 + $0x20] sm:$0xf] %vm5202_vm10, %v5063_v59  ;;  %v4261_v7 = vpop.permute.xlu0 %4260  ;;  %v7407_v21 = vld [vmem:[#allocation2 + $0x88] sm:$0xff]   ;;  %v4735_v59 = vrot.slane %v9987_v37, 4  ;;  %v4096_v37 = vsel %vm9000_vm8, %v4094_v38, %v4095_v62 }
 0x351   : > { %4378 = vst.msk [vmem:[#allocation2 + $0x9c] sm:$0xf] %vm4338_vm9, %v4261_v7  ;;  %5697 = vrot.lane.b32.xlu1 %v5564_v47, %s7463_s29  ;;  %7326 = vmatmul.mubr.msk.bf16.vlgmr.msra.gmra.mxu1 %vm6202_vm12, %v7407_v21  ;;  %v4750_v47 = vshll.u32 %v4494_v57, 16  ;;  %v5022_v7 = vrot.slane %v5020_v28, 7  ;;  %v4099_v21 = vsel %vm9000_vm8, %v4097_v52, %v4098_v36  ;;  %v5274_v57 = vrot.slane %v5272_v19, 7 }
 0x352   : > { %5695 = vrot.lane.b32.xlu0 %v5561_v39, %s7463_s29  ;;  %v4743_v39 = vor.u32 %v4742_v15, %v4739_v26 }
 0x353   : > { %v5119_v40 = vpop.permute.xlu1 %5118 }
 0x354   : > { %5239 = vst.msk [vmem:[#allocation2 + $0x90] sm:$0xf] %vm5202_vm10, %v5119_v40  ;;  %v5065_v10 = vpop.permute.xlu0 %5064  ;;  %v4752_v40 = vrot.slane %v4750_v47, 7  ;;  %v4745_v48 = vrot.slane %v4743_v39, 4 }
 0x355   : > { %5212 = vst.msk [vmem:[#allocation2 + $0x24] sm:$0xf] %vm5202_vm10, %v5065_v10  ;;  %5753 = vrot.lane.b32.xlu1 %v5648_v29, %s7463_s29  ;;  %v4757_v29 = vshrl.u32 %v4495_v49, 16  ;;  %v4744_v10 = vsel %vm9408_vm2, %v4735_v59, %v4743_v39  ;;  %v10139_v49 = vor.u32 %v5274_v57, %v5271_v34 }
 0x356   : > { %5751 = vrot.lane.b32.xlu0 %v5645_v63, %s7463_s29  ;;  %v5027_v63 = vshrl.u32 %v4522_v51, 16 }
 0x357   : > { %v5067_v0 = vpop.permute.xlu1 %5066  ;;  %v4759_v62 = vrot.slane %v4757_v29, 6 }
 0x358   : > { %5213 = vst.msk [vmem:[#allocation2 + $0x28] sm:$0xf] %vm5202_vm10, %v5067_v0  ;;  %v5121_v12 = vpop.permute.xlu0 %5120  ;;  %v4767_v0 = vshrl.u32 %v4496_v35, 16  ;;  %v5029_v26 = vrot.slane %v5027_v63, 6 }
 0x359   : > { %5240 = vst.msk [vmem:[#allocation2 + $0x94] sm:$0xf] %vm5202_vm10, %v5121_v12  ;;  %4224 = vrot.lane.b32.xlu1 %v4093_v42, %s7461_s11  ;;  %v5023_v42 = vor.u32 %v5022_v7, %v5019_v44  ;;  %v4753_v12 = vor.u32 %v4752_v40, %v4749_v3  ;;  %v4763_v28 = vor.u32 %v4762_v31, %v4759_v62  ;;  %v5418_v44 = vld [vmem:[%s7518_s23 + $0x74] sm:$0xf]  ;;  %v5446_v40 = vld [vmem:[%s7518_s23 + $0xe4] sm:$0xf] }
 0x35a   : > { %4222 = vrot.lane.b32.xlu0 %v4090_v16, %s7461_s11  ;;  %v4770_v16 = vshll.u32 %v4496_v35, 16  ;;  %v5033_v2 = vor.u32 %v5032_v27, %v5029_v26  ;;  %v5566_v29 = vrot.slane %v5418_v44, 7  ;;  %v5419_v35 = vld [vmem:[%s7518_s23 + $0x78] sm:$0xf]  ;;  %v5447_v31 = vld [vmem:[%s7518_s23 + $0xe8] sm:$0xf] }
 0x35b   : > { %v5123_v43 = vpop.permute.xlu1 %5122  ;;  %v5024_v32 = vsel %vm9408_vm2, %v5015_v53, %v5023_v42  ;;  %v4755_v51 = vrot.slane %v4753_v12, 4  ;;  %v3949_v44 = vld [vmem:[%s7518_s23 + $0x88] sm:$0xf] }
 0x35c   : > { %5241 = vst.msk [vmem:[#allocation2 + $0x98] sm:$0xf] %vm5202_vm10, %v5123_v43  ;;  %v5069_v55 = vpop.permute.xlu0 %5068  ;;  %v4772_v52 = vrot.slane %v4770_v16, 7  ;;  %v4754_v43 = vsel %vm9408_vm2, %v4745_v48, %v4753_v12  ;;  %v5035_v3 = vrot.slane %v5033_v2, 4  ;;  %v5567_v1 = vsel %vm9446_vm5, %v5565_v54, %v5566_v29  ;;  %v5448_v12 = vld [vmem:[%s7518_s23 + $0xec] sm:$0xf] }
 0x35d   : > { %5214 = vst.msk [vmem:[#allocation2 + $0x2c] sm:$0xf] %vm5202_vm10, %v5069_v55  ;;  %4280 = vrot.lane.b32.xlu1 %v4177_v20, %s7461_s11  ;;  %v4769_v20 = vrot.slane %v4767_v0, 6  ;;  %v4765_v55 = vrot.slane %v4763_v28, 4  ;;  %v5568_v53 = vrot.slane %v5566_v29, 4  ;;  %v5653_v48 = vrot.slane %v5447_v31, 7 }
 0x35e   : > { %4278 = vrot.lane.b32.xlu0 %v4174_v25, %s7461_s11  ;;  %v5025_v25 = vrot.slane %v5023_v42, 4  ;;  %v5569_v42 = vrot.slane %v5419_v35, 7  ;;  %v10245_v31 = vld [vmem:[%s8006_s6 + $0xc] sm:$0xf] }
 0x35f   : > { %v5676_v61 = vpop.permute.xlu1 %5675  ;;  %v10142_v59 = vor.u32 %v4772_v52, %v4769_v20  ;;  %v5655_v57 = vrot.slane %v5653_v48, 4  ;;  %v5574_v52 = vrot.slane %v5572_v45, 4 }
 0x360   : > { %5824 = vst.msk [vmem:[#allocation2 + $0x20] sm:$0xf] %vm5815_vm11, %v5676_v61  ;;  %v5125_v9 = vpop.permute.xlu0 %5124  ;;  %v5034_v4 = vsel %vm9408_vm2, %v5025_v25, %v5033_v2  ;;  %v4764_v61 = vsel %vm9408_vm2, %v4755_v51, %v4763_v28  ;;  %v5571_v24 = vrot.slane %v5569_v42, 4  ;;  %v5570_v16 = vsel %vm9446_vm5, %v5568_v53, %v5569_v42 }
 0x361   : > { %5242 = vst.msk [vmem:[#allocation2 + $0x9c] sm:$0xf] %vm5202_vm10, %v5125_v9  ;;  %4228 = vrot.lane.b32.xlu1 %v4099_v21, %s7461_s11  ;;  %v5650_v9 = vrot.slane %v5446_v40, 7  ;;  %v10223_v40 = vld [vmem:[%s8006_s6 + $0x8] sm:$0xf]  ;;  %v4411_v42 = vrot.slane %v4410_v50, 4 }
 0x362   : > { %4226 = vrot.lane.b32.xlu0 %v4096_v37, %s7461_s11  ;;  %v4774_v37 = vsel %vm9408_vm2, %v4765_v55, %v10142_v59  ;;  %v5573_v34 = vsel %vm9446_vm5, %v5571_v24, %v5572_v45  ;;  %v5261_v50 = vld [vmem:[%s8006_s6 + $0x8] sm:$0xf] }
 0x363   : > { %v5732_v56 = vpop.permute.xlu1 %5731 }
 0x364   : > { %5852 = vst.msk [vmem:[#allocation2 + $0x90] sm:$0xf] %vm5815_vm11, %v5732_v56  ;;  %v5678_v15 = vpop.permute.xlu0 %5677  ;;  %v5652_v56 = vrot.slane %v5650_v9, 4 }
 0x365   : > { %5825 = vst.msk [vmem:[#allocation2 + $0x24] sm:$0xf] %vm5815_vm11, %v5678_v15  ;;  %5086 = vrot.lane.b32.xlu1 %v4744_v10, %s7462_s24  ;;  %v10187_v15 = vld [vmem:[%s7518_s23 + $0x80] sm:$0xf] }
 0x366   : > { %4282 = vrot.lane.b32.xlu0 %v4180_v18, %s7461_s11  ;;  %v5044_v18 = vsel %vm9408_vm2, %v5035_v3, %v9913_v33  ;;  %v5651_v33 = vsel %vm9446_vm5, %v5649_v23, %v5650_v9  ;;  %v5654_v20 = vsel %vm9446_vm5, %v5652_v56, %v5653_v48  ;;  %v4100_v3 = vrot.slane %v4098_v36, 4  ;;  %v4498_v9 = vld [vmem:[%s7518_s23 + $0x88] sm:$0xf] }
 0x367   : > { %v5680_v38 = vpop.permute.xlu1 %5679  ;;  %v4415_v36 = vrot.slane %v10223_v40, 6  ;;  %v4787_v45 = vshrl.u32 %v4498_v9, 16 }
 0x368   : > { %5826 = vst.msk [vmem:[#allocation2 + $0x28] sm:$0xf] %vm5815_vm11, %v5680_v38  ;;  %v5734_v47 = vpop.permute.xlu0 %5733  ;;  %v5575_v38 = vrot.slane %v10187_v15, 7 }
 0x369   : > { %5853 = vst.msk [vmem:[#allocation2 + $0x94] sm:$0xf] %vm5815_vm11, %v5734_v47  ;;  %5142 = vrot.lane.b32.xlu1 %v5024_v32, %s7462_s24  ;;  %v5656_v32 = vrot.slane %v5448_v12, 7  ;;  %v10206_v47 = vld [vmem:[%s8006_s6] sm:$0xf]  ;;  %v4417_v40 = vrot.slane %v4415_v36, 4 }
 0x36a   : > { %5088 = vrot.lane.b32.xlu0 %v4754_v43, %s7462_s24  ;;  %v3948_v43 = vld [vmem:[%s7518_s23 + $0x84] sm:$0xf]  ;;  %v5576_v51 = vsel %vm9446_vm5, %v5574_v52, %v5575_v38 }
 0x36b   : > { %v5736_v39 = vpop.permute.xlu1 %5735  ;;  %v5657_v2 = vsel %vm9446_vm5, %v5655_v57, %v5656_v32  ;;  %v4101_v55 = vrot.slane %v3948_v43, 6  ;;  %v5658_v29 = vrot.slane %v5656_v32, 4  ;;  %v4499_v57 = vld [vmem:[%s7518_s23 + $0x8c] sm:$0xf]  ;;  %v4789_v43 = vrot.slane %v4787_v45, 6 }
 0x36c   : > { %5854 = vst.msk [vmem:[#allocation2 + $0x98] sm:$0xf] %vm5815_vm11, %v5736_v39  ;;  %v5682_v7 = vpop.permute.xlu0 %5681  ;;  %v7408_v21 = vld [vmem:[#allocation2 + $0x20] sm:$0xff]   ;;  %v5263_v45 = vld [vmem:[%s8006_s6 + $0x10] sm:$0xf] }
 0x36d   : > { %5827 = vst.msk [vmem:[#allocation2 + $0x2c] sm:$0xf] %vm5815_vm11, %v5682_v7  ;;  %5356 = vrot.lane.b32.xlu1 %v10139_v49, %s7462_s24  ;;  %7301 = vmatprep.mubr.msk.bf16.mxu0 %vm6202_vm12, %v7408_v21  ;;  %v4393_v39 = vld [vmem:[%s8006_s6 + $0x4] sm:$0xf]  ;;  %v4102_v53 = vsel %vm9000_vm8, %v4100_v3, %v4101_v55 }
 0x36e   : > { %5144 = vrot.lane.b32.xlu0 %v5034_v4, %s7462_s24  ;;  %v4497_v21 = vld [vmem:[%s7518_s23 + $0x84] sm:$0xf]  ;;  %v4412_v54 = vrot.slane %v4393_v39, 6 }
 0x36f   : > { %v4263_v46 = vpop.permute.xlu1 %4262  ;;  %v4777_v35 = vshrl.u32 %v4497_v21, 16 }
 0x370   : > { %4379 = vst.msk [vmem:[#allocation2 + $0xa0] sm:$0xf] %vm4338_vm9, %v4263_v46  ;;  %v5738_v63 = vpop.permute.xlu0 %5737  ;;  %v7409_v6 = vld [vmem:[#allocation2 + $0x90] sm:$0xff]   ;;  %v4103_v46 = vrot.slane %v4101_v55, 4  ;;  %v4414_v22 = vrot.slane %v4412_v54, 4  ;;  %v4413_v12 = vsel %vm9000_vm8, %v4411_v42, %v4412_v54 }
 0x371   : > { %5855 = vst.msk [vmem:[#allocation2 + $0x9c] sm:$0xf] %vm5815_vm11, %v5738_v63  ;;  %5092 = vrot.lane.b32.xlu1 %v4774_v37, %s7462_s24  ;;  %7329 = vmatprep.mubr.msk.bf16.mxu1 %vm6202_vm12, %v7409_v6  ;;  %v5887_v37 = vrot.slane %v10206_v47, 7  ;;  %v3950_v6 = vld [vmem:[%s7518_s23 + $0x8c] sm:$0xf] }
 0x372   : > { %5090 = vrot.lane.b32.xlu0 %v4764_v61, %s7462_s24  ;;  %v4104_v61 = vrot.slane %v3949_v44, 6  ;;  %v4416_v30 = vsel %vm9000_vm8, %v4414_v22, %v4415_v36  ;;  %v4797_v44 = vshrl.u32 %v4499_v57, 16  ;;  %v10366_v47 = vld [vmem:[%s8006_s6 + $0x10] sm:$0xf] }
 0x373   : > { %v4285_v10 = vpop.permute.xlu1 %4284 }
 0x374   : > { %4391 = vst.msk [vmem:[#allocation2 + $0xcc] sm:$0x3] %vm4390_vm13, %v4285_v10  ;;  %v4265_v19 = vpop.permute.xlu0 %4264  ;;  %v7410_v62 = vld [vmem:[#allocation2 + $0x28] sm:$0xff]   ;;  %v5260_v10 = vld [vmem:[%s8006_s6 + $0x4] sm:$0xf] }
 0x375   : > { %4380 = vst.msk [vmem:[#allocation2 + $0xa4] sm:$0xf] %vm4338_vm9, %v4265_v19  ;;  %5699 = vrot.lane.b32.xlu1 %v5567_v1, %s7463_s29  ;;  %7302 = vmatmul.mubr.msk.bf16.gmra.mxu0 %vm6202_vm12, %v7410_v62  ;;  %v4780_v1 = vshll.u32 %v4497_v21, 16  ;;  %v4107_v19 = vrot.slane %v3950_v6, 6  ;;  %v5278_v56 = vshrl.u32 %v5260_v10, 16  ;;  %v5281_v48 = vshll.u32 %v5260_v10, 16 }
 0x376   : > { %5146 = vrot.lane.b32.xlu0 %v5044_v18, %s7462_s24  ;;  %v4105_v18 = vsel %vm9000_vm8, %v4103_v46, %v4104_v61  ;;  %v4500_v46 = vld [vmem:[%s7518_s23 + $0x90] sm:$0xf]  ;;  %v5262_v6 = vld [vmem:[%s8006_s6 + $0xc] sm:$0xf]  ;;  %v4799_v10 = vrot.slane %v4797_v44, 6 }
 0x377   : > { %v4269_v0 = vpop.permute.xlu1 %4268  ;;  %v4782_v24 = vrot.slane %v4780_v1, 7  ;;  %v5280_v55 = vrot.slane %v5278_v56, 6  ;;  %v5283_v39 = vrot.slane %v5281_v48, 7  ;;  %v4810_v42 = vshll.u32 %v4500_v46, 16 }
 0x378   : > { %4382 = vst.msk [vmem:[#allocation2 + $0xac] sm:$0xf] %vm4338_vm9, %v4269_v0  ;;  %v4267_v26 = vpop.permute.xlu0 %4266  ;;  %v7411_v27 = vld [vmem:[#allocation2 + $0x98] sm:$0xff]   ;;  %v4790_v0 = vshll.u32 %v4498_v9, 16 }
 0x379   : > { %4381 = vst.msk [vmem:[#allocation2 + $0xa8] sm:$0xf] %vm4338_vm9, %v4267_v26  ;;  %5755 = vrot.lane.b32.xlu1 %v5651_v33, %s7463_s29  ;;  %7330 = vmatmul.mubr.msk.bf16.gmra.mxu1 %vm6202_vm12, %v7411_v27  ;;  %v4779_v33 = vrot.slane %v4777_v35, 6  ;;  %v4109_v26 = vrot.slane %v4107_v19, 4  ;;  %v4110_v27 = vrot.slane %v10242_v60, 6 }
 0x37a   : > { %5701 = vrot.lane.b32.xlu0 %v5570_v16, %s7463_s29  ;;  %v4502_v60 = vld [vmem:[%s7518_s23 + $0x98] sm:$0xf] }
 0x37b   : > { %v5073_v28 = vpop.permute.xlu1 %5072  ;;  %v4783_v52 = vor.u32 %v4782_v24, %v4779_v33  ;;  %v4111_v21 = vsel %vm9000_vm8, %v4109_v26, %v4110_v27  ;;  %v4775_v24 = vrot.slane %v10142_v59, 4  ;;  %v4812_v26 = vrot.slane %v4810_v42, 7 }
 0x37c   : > { %5216 = vst.msk [vmem:[#allocation2 + $0x34] sm:$0xf] %vm5202_vm10, %v5073_v28  ;;  %v5071_v25 = vpop.permute.xlu0 %5070  ;;  %v4106_v28 = vrot.slane %v4104_v61, 4 }
 0x37d   : > { %5215 = vst.msk [vmem:[#allocation2 + $0x30] sm:$0xf] %vm5202_vm10, %v5071_v25  ;;  %5703 = vrot.lane.b32.xlu1 %v5573_v34, %s7463_s29  ;;  %v4418_v34 = vrot.slane %v10245_v31, 6  ;;  %v4792_v25 = vrot.slane %v4790_v0, 7 }
 0x37e   : > { %5757 = vrot.lane.b32.xlu0 %v5654_v20, %s7463_s29  ;;  %v10260_v20 = vld [vmem:[%s8006_s6 + $0x10] sm:$0xf]  ;;  %v4108_v3 = vsel %vm9000_vm8, %v4106_v28, %v4107_v19  ;;  %v5298_v19 = vshrl.u32 %v5262_v6, 16 }
 0x37f   : > { %v5129_v4 = vpop.permute.xlu1 %5128  ;;  %v4420_v54 = vrot.slane %v4418_v34, 4  ;;  %v10276_v1 = vor.u32 %v4792_v25, %v4789_v43  ;;  %v4419_v33 = vsel %vm9000_vm8, %v4417_v40, %v4418_v34  ;;  %v4784_v43 = vsel %vm9408_vm2, %v4775_v24, %v4783_v52 }
 0x380   : > { %5244 = vst.msk [vmem:[#allocation2 + $0xa4] sm:$0xf] %vm5202_vm10, %v5129_v4  ;;  %v5127_v7 = vpop.permute.xlu0 %5126  ;;  %v5288_v4 = vshrl.u32 %v5261_v50, 16  ;;  %v5300_v59 = vrot.slane %v5298_v19, 6  ;;  %v5276_v25 = vrot.slane %v10139_v49, 4 }
 0x381   : > { %5243 = vst.msk [vmem:[#allocation2 + $0xa0] sm:$0xf] %vm5202_vm10, %v5127_v7  ;;  %5759 = vrot.lane.b32.xlu1 %v5657_v2, %s7463_s29  ;;  %v4800_v7 = vshll.u32 %v4499_v57, 16  ;;  %v5308_v57 = vshrl.u32 %v5263_v45, 16 }
 0x382   : > { %5705 = vrot.lane.b32.xlu0 %v5576_v51, %s7463_s29  ;;  %v5291_v51 = vshll.u32 %v5261_v50, 16  ;;  %v5290_v9 = vrot.slane %v5288_v4, 6 }
 0x383   : > { %v5077_v63 = vpop.permute.xlu1 %5076 }
 0x384   : > { %5218 = vst.msk [vmem:[#allocation2 + $0x3c] sm:$0xf] %vm5202_vm10, %v5077_v63  ;;  %v5075_v23 = vpop.permute.xlu0 %5074  ;;  %v4785_v63 = vrot.slane %v4783_v52, 4  ;;  %v5293_v22 = vrot.slane %v5291_v51, 7  ;;  %v5310_v51 = vrot.slane %v5308_v57, 6 }
 0x385   : > { %5217 = vst.msk [vmem:[#allocation2 + $0x38] sm:$0xf] %vm5202_vm10, %v5075_v23  ;;  %5912 = vrot.lane.b32.xlu1 %v5887_v37, %s7463_s29  ;;  %v5284_v23 = vor.u32 %v5283_v39, %v5280_v55  ;;  %v10357_v57 = vld [vmem:[%s7518_s23 + $0x90] sm:$0xf] }
 0x386   : > { %5761 = vrot.lane.b32.xlu0 %v5658_v29, %s7463_s29  ;;  %v4421_v29 = vrot.slane %v10260_v20, 6  ;;  %v4794_v56 = vsel %vm9408_vm2, %v4785_v63, %v10276_v1 }
 0x387   : > { %v5133_v62 = vpop.permute.xlu1 %5132  ;;  %v5286_v48 = vrot.slane %v5284_v23, 4 }
 0x388   : > { %5246 = vst.msk [vmem:[#allocation2 + $0xac] sm:$0xf] %vm5202_vm10, %v5133_v62  ;;  %v5131_v16 = vpop.permute.xlu0 %5130  ;;  %v4422_v36 = vsel %vm9000_vm8, %v4420_v54, %v4421_v29  ;;  %v5301_v62 = vshll.u32 %v5262_v6, 16  ;;  %v4795_v54 = vrot.slane %v10276_v1, 4 }
 0x389   : > { %5245 = vst.msk [vmem:[#allocation2 + $0xa8] sm:$0xf] %vm5202_vm10, %v5131_v16  ;;  %4232 = vrot.lane.b32.xlu1 %v4105_v18, %s7461_s11  ;;  %v4802_v18 = vrot.slane %v4800_v7, 7 }
 0x38a   : > { %4230 = vrot.lane.b32.xlu0 %v4102_v53, %s7461_s11  ;;  %v4807_v53 = vshrl.u32 %v4500_v46, 16  ;;  %v5303_v34 = vrot.slane %v5301_v62, 7  ;;  %v5422_v46 = vld [vmem:[%s7518_s23 + $0x84] sm:$0xf] }
 0x38b   : > { %v5686_v32 = vpop.permute.xlu1 %5685  ;;  %v4803_v50 = vor.u32 %v4802_v18, %v4799_v10  ;;  %v5578_v1 = vrot.slane %v5422_v46, 7  ;;  %v5870_v10 = vld [vmem:[%s8006_s6 + $0x4] sm:$0xf] }
 0x38c   : > { %5829 = vst.msk [vmem:[#allocation2 + $0x34] sm:$0xf] %vm5815_vm11, %v5686_v32  ;;  %v5684_v2 = vpop.permute.xlu0 %5683  ;;  %v5311_v32 = vshll.u32 %v5263_v45, 16  ;;  %v5304_v52 = vor.u32 %v5303_v34, %v5300_v59  ;;  %v5888_v34 = vrot.slane %v5887_v37, 4 }
 0x38d   : > { %5828 = vst.msk [vmem:[#allocation2 + $0x30] sm:$0xf] %vm5815_vm11, %v5684_v2  ;;  %4439 = vrot.lane.b32.xlu1 %v4416_v30, %s7461_s11  ;;  %v10295_v30 = vor.u32 %v5293_v22, %v5290_v9  ;;  %v4805_v39 = vrot.slane %v4803_v50, 4  ;;  %v4804_v9 = vsel %vm9408_vm2, %v4795_v54, %v4803_v50  ;;  %v5423_v22 = vld [vmem:[%s7518_s23 + $0x88] sm:$0xf]  ;;  %v5580_v62 = vrot.slane %v5578_v1, 4 }
 0x38e   : > { %4437 = vrot.lane.b32.xlu0 %v4413_v12, %s7461_s11  ;;  %v4809_v12 = vrot.slane %v4807_v53, 6  ;;  %v5313_v44 = vrot.slane %v5311_v32, 7  ;;  %v5306_v63 = vrot.slane %v5304_v52, 4  ;;  %v5256_v53 = vld [vmem:[#allocation2 + $0xcc] sm:$0x3] }
 0x38f   : > { %v5742_v61 = vpop.permute.xlu1 %5741  ;;  %v5295_v49 = vsel %vm9408_vm2, %v5286_v48, %v10295_v30 }
 0x390   : > { %5857 = vst.msk [vmem:[#allocation2 + $0xa4] sm:$0xf] %vm5815_vm11, %v5742_v61  ;;  %v5740_v35 = vpop.permute.xlu0 %5739  ;;  %v10305_v4 = vor.u32 %v4812_v26, %v4809_v12  ;;  %v10325_v6 = vor.u32 %v5313_v44, %v5310_v51  ;;  %v5898_v44 = vrot.slane %v10366_v47, 7 }
 0x391   : > { %5856 = vst.msk [vmem:[#allocation2 + $0xa0] sm:$0xf] %vm5815_vm11, %v5740_v35  ;;  %4236 = vrot.lane.b32.xlu1 %v4111_v21, %s7461_s11  ;;  %v5285_v21 = vsel %vm9408_vm2, %v5276_v25, %v5284_v23  ;;  %v5296_v35 = vrot.slane %v10295_v30, 4 }
 0x392   : > { %4234 = vrot.lane.b32.xlu0 %v4108_v3, %s7461_s11  ;;  %v4814_v40 = vsel %vm9408_vm2, %v4805_v39, %v10305_v4  ;;  %v5315_v19 = vsel %vm9408_vm2, %v5306_v63, %v10325_v6 }
 0x393   : > { %v5690_v31 = vpop.permute.xlu1 %5689  ;;  %v5305_v45 = vsel %vm9408_vm2, %v5296_v35, %v5304_v52  ;;  %v4501_v35 = vld [vmem:[%s7518_s23 + $0x94] sm:$0xf] }
 0x394   : > { %5831 = vst.msk [vmem:[#allocation2 + $0x3c] sm:$0xf] %vm5815_vm11, %v5690_v31  ;;  %v5688_v0 = vpop.permute.xlu0 %5687  ;;  %v7412_v16 = vld [vmem:[#allocation2 + $0x30] sm:$0xff]   ;;  %v5581_v31 = vrot.slane %v5423_v22, 7  ;;  %v4112_v22 = vrot.slane %v4110_v27, 4 }
 0x395   : > { %5830 = vst.msk [vmem:[#allocation2 + $0x38] sm:$0xf] %vm5815_vm11, %v5688_v0  ;;  %4443 = vrot.lane.b32.xlu1 %v4422_v36, %s7461_s11  ;;  %7305 = vmatprep.mubr.msk.bf16.mxu0 %vm6202_vm12, %v7412_v16  ;;  %v5577_v0 = vrot.slane %v5575_v38, 4  ;;  %v5871_v16 = vld [vmem:[%s8006_s6 + $0x8] sm:$0xf] }
 0x396   : > { %4441 = vrot.lane.b32.xlu0 %v4419_v33, %s7461_s11  ;;  %v5889_v33 = vrot.slane %v5870_v10, 7  ;;  %v5582_v30 = vsel %vm9446_vm5, %v5580_v62, %v5581_v31  ;;  %v5892_v12 = vrot.slane %v5871_v16, 7  ;;  %v5872_v38 = vld [vmem:[%s8006_s6 + $0xc] sm:$0xf]  ;;  %v5583_v39 = vrot.slane %v5581_v31, 4 }
 0x397   : > { %v5746_v28 = vpop.permute.xlu1 %5745  ;;  %v5579_v59 = vsel %vm9446_vm5, %v5577_v0, %v5578_v1  ;;  %v4820_v62 = vshll.u32 %v4501_v35, 16  ;;  %v5264_v0 = vld [vmem:[%s8006_s6 + $0x14] sm:$0xf] }
 0x398   : > { %5859 = vst.msk [vmem:[#allocation2 + $0xac] sm:$0xf] %vm5815_vm11, %v5746_v28  ;;  %v5744_v2 = vpop.permute.xlu0 %5743  ;;  %v7413_v55 = vld [vmem:[#allocation2 + $0xa0] sm:$0xff]   ;;  %v5891_v50 = vrot.slane %v5889_v33, 4  ;;  %v5895_v28 = vrot.slane %v5872_v38, 7  ;;  %v4827_v38 = vshrl.u32 %v4502_v60, 16 }
 0x399   : > { %5858 = vst.msk [vmem:[#allocation2 + $0xa8] sm:$0xf] %vm5815_vm11, %v5744_v2  ;;  %5096 = vrot.lane.b32.xlu1 %v4794_v56, %s7462_s24  ;;  %7333 = vmatprep.mubr.msk.bf16.mxu1 %vm6202_vm12, %v7413_v55  ;;  %v5424_v56 = vld [vmem:[%s7518_s23 + $0x8c] sm:$0xf]  ;;  %v5587_v2 = vrot.slane %v10357_v57, 7  ;;  %v5890_v55 = vsel %vm9446_vm5, %v5888_v34, %v5889_v33  ;;  %v5318_v34 = vshrl.u32 %v5264_v0, 16 }
 0x39a   : > { %5094 = vrot.lane.b32.xlu0 %v4784_v43, %s7462_s24  ;;  %v5584_v15 = vrot.slane %v5424_v56, 7  ;;  %v5893_v43 = vsel %vm9446_vm5, %v5891_v50, %v5892_v12  ;;  %v5897_v51 = vrot.slane %v5895_v28, 4 }
 0x39b   : > { %v4273_v7 = vpop.permute.xlu1 %4272 }
 0x39c   : > { %4384 = vst.msk [vmem:[#allocation2 + $0xb4] sm:$0xf] %vm4338_vm9, %v4273_v7  ;;  %v4271_v61 = vpop.permute.xlu0 %4270  ;;  %v7414_v3 = vld [vmem:[#allocation2 + $0x38] sm:$0xff]   ;;  %v5586_v25 = vrot.slane %v5584_v15, 4  ;;  %v5585_v46 = vsel %vm9446_vm5, %v5583_v39, %v5584_v15  ;;  %v5899_v1 = vsel %vm9446_vm5, %v5897_v51, %v5898_v44  ;;  %v4400_v39 = vld [vmem:[%s8006_s6 + $0x20] sm:$0x3] }
 0x39d   : > { %4383 = vst.msk [vmem:[#allocation2 + $0xb0] sm:$0xf] %vm4338_vm9, %v4271_v61  ;;  %5360 = vrot.lane.b32.xlu1 %v5295_v49, %s7462_s24  ;;  %7306 = vmatmul.mubr.msk.bf16.gmra.mxu0 %vm6202_vm12, %v7414_v3  ;;  %v3952_v49 = vld [vmem:[%s7518_s23 + $0x94] sm:$0xf]  ;;  %v5894_v61 = vrot.slane %v5892_v12, 4  ;;  %v4822_v12 = vrot.slane %v4820_v62, 7 }
 0x39e   : > { %5358 = vrot.lane.b32.xlu0 %v5285_v21, %s7462_s24  ;;  %v5588_v7 = vsel %vm9446_vm5, %v5586_v25, %v5587_v2  ;;  %v4113_v21 = vrot.slane %v3952_v49, 6  ;;  %v3953_v3 = vld [vmem:[%s7518_s23 + $0x98] sm:$0xf]  ;;  %v4829_v51 = vrot.slane %v4827_v38, 6 }
 0x39f   : > { %v4219_v23 = vpop.permute.xlu1 %4218 }
 0x3a0   : > { %4357 = vst.msk [vmem:[#allocation2 + $0x48] sm:$0xf] %vm4338_vm9, %v4219_v23  ;;  %v5149_v18 = vpop.permute.xlu0 %5148  ;;  %v7415_v42 = vld [vmem:[#allocation2 + $0xa8] sm:$0xff]   ;;  %v4115_v23 = vrot.slane %v4113_v21, 4  ;;  %v4114_v56 = vsel %vm9000_vm8, %v4112_v22, %v4113_v21 }
 0x3a1   : > { %v5257_v36 = vsel %vm5255_vm0, %v5149_v18, %v5256_v53  ;;  %5100 = vrot.lane.b32.xlu1 %v4814_v40, %s7462_s24  ;;  %7334 = vmatmul.mubr.msk.bf16.gmra.mxu1 %vm6202_vm12, %v7415_v42  ;;  %v4397_v40 = vld [vmem:[%s8006_s6 + $0x14] sm:$0xf]  ;;  %v5896_v53 = vsel %vm9446_vm5, %v5894_v61, %v5895_v28  ;;  %v4398_v42 = vld [vmem:[%s8006_s6 + $0x18] sm:$0xf] }
 0x3a2   : > { %5258 = vst [vmem:[#allocation2 + $0xcc] sm:$0x3] %v5257_v36  ;;  %5098 = vrot.lane.b32.xlu0 %v4804_v9, %s7462_s24  ;;  %v4116_v9 = vrot.slane %v3953_v3, 6  ;;  %v4424_v10 = vrot.slane %v4397_v40, 6  ;;  %v3954_v36 = vld [vmem:[%s7518_s23 + $0x9c] sm:$0xf] }
 0x3a3   : > { %v4275_v24 = vpop.permute.xlu1 %4274 }
 0x3a4   : > { %4385 = vst.msk [vmem:[#allocation2 + $0xb8] sm:$0xf] %vm4338_vm9, %v4275_v24  ;;  %v4221_v48 = vpop.permute.xlu0 %4220  ;;  %v4117_v27 = vsel %vm9000_vm8, %v4115_v23, %v4116_v9  ;;  %v4426_v33 = vrot.slane %v4424_v10, 4  ;;  %v4427_v24 = vrot.slane %v4398_v42, 6 }
 0x3a5   : > { %4358 = vst.msk [vmem:[#allocation2 + $0x4c] sm:$0xf] %vm4338_vm9, %v4221_v48  ;;  %5364 = vrot.lane.b32.xlu1 %v5315_v19, %s7462_s24  ;;  %v4817_v19 = vshrl.u32 %v4501_v35, 16  ;;  %v4423_v48 = vrot.slane %v4421_v29, 4 }
 0x3a6   : > { %5362 = vrot.lane.b32.xlu0 %v5305_v45, %s7462_s24  ;;  %v4119_v45 = vrot.slane %v3954_v36, 6  ;;  %v4428_v20 = vsel %vm9000_vm8, %v4426_v33, %v4427_v24  ;;  %v4429_v22 = vrot.slane %v4427_v24, 4 }
 0x3a7   : > { %v4436_v26 = vpop.permute.xlu1 %4435  ;;  %v4819_v50 = vrot.slane %v4817_v19, 6 }
 0x3a8   : > { %4463 = vst.msk [vmem:[#allocation2 + $0xcc] sm:$0xc] %vm4462_vm15, %v4436_v26  ;;  %v4277_v32 = vpop.permute.xlu0 %4276  ;;  %v4830_v26 = vshll.u32 %v4502_v60, 16  ;;  %v4121_v29 = vrot.slane %v4119_v45, 4 }
 0x3a9   : > { %4386 = vst.msk [vmem:[#allocation2 + $0xbc] sm:$0xf] %vm4338_vm9, %v4277_v32  ;;  %5709 = vrot.lane.b32.xlu1 %v5582_v30, %s7463_s29  ;;  %v4399_v30 = vld [vmem:[%s8006_s6 + $0x1c] sm:$0xf]  ;;  %v5321_v32 = vshll.u32 %v5264_v0, 16  ;;  %v4823_v49 = vor.u32 %v4822_v12, %v4819_v50 }
 0x3aa   : > { %5707 = vrot.lane.b32.xlu0 %v5579_v59, %s7463_s29  ;;  %v5265_v59 = vld [vmem:[%s8006_s6 + $0x18] sm:$0xf]  ;;  %v4430_v28 = vrot.slane %v4399_v30, 6  ;;  %v5267_v0 = vld [vmem:[%s8006_s6 + $0x20] sm:$0x7] }
 0x3ab   : > { %v5081_v37 = vpop.permute.xlu1 %5080  ;;  %v5328_v21 = vshrl.u32 %v5265_v59, 16  ;;  %v5323_v61 = vrot.slane %v5321_v32, 7  ;;  %v5351_v38 = vshll.u32 %v5267_v0, 16 }
 0x3ac   : > { %5220 = vst.msk [vmem:[#allocation2 + $0x44] sm:$0xf] %vm5202_vm10, %v5081_v37  ;;  %v5079_v52 = vpop.permute.xlu0 %5078  ;;  %v4425_v37 = vsel %vm9000_vm8, %v4423_v48, %v4424_v10  ;;  %v4432_v35 = vrot.slane %v4430_v28, 4  ;;  %v5266_v10 = vld [vmem:[%s8006_s6 + $0x1c] sm:$0xf]  ;;  %v4431_v24 = vsel %vm9000_vm8, %v4429_v22, %v4430_v28 }
 0x3ad   : > { %5219 = vst.msk [vmem:[#allocation2 + $0x40] sm:$0xf] %vm5202_vm10, %v5079_v52  ;;  %5916 = vrot.lane.b32.xlu1 %v5893_v43, %s7463_s29  ;;  %v4503_v43 = vld [vmem:[%s7518_s23 + $0x9c] sm:$0xf]  ;;  %v5330_v36 = vrot.slane %v5328_v21, 6  ;;  %v5338_v60 = vshrl.u32 %v5266_v10, 16 }
 0x3ae   : > { %5914 = vrot.lane.b32.xlu0 %v5890_v55, %s7463_s29  ;;  %v4118_v55 = vrot.slane %v4116_v9, 4  ;;  %v4837_v3 = vshrl.u32 %v4503_v43, 16  ;;  %v4840_v40 = vshll.u32 %v4503_v43, 16 }
 0x3af   : > { %v5137_v54 = vpop.permute.xlu1 %5136  ;;  %v5340_v8 = vrot.slane %v5338_v60, 6 }
 0x3b0   : > { %5248 = vst.msk [vmem:[#allocation2 + $0xb4] sm:$0xf] %vm5202_vm10, %v5137_v54  ;;  %v5135_v63 = vpop.permute.xlu0 %5134  ;;  %v5331_v54 = vshll.u32 %v5265_v59, 16  ;;  %v4120_v9 = vsel %vm9000_vm8, %v4118_v55, %v4119_v45  ;;  %v4839_v19 = vrot.slane %v4837_v3, 6  ;;  %v4842_v62 = vrot.slane %v4840_v40, 7 }
 0x3b1   : > { %5247 = vst.msk [vmem:[#allocation2 + $0xb0] sm:$0xf] %vm5202_vm10, %v5135_v63  ;;  %5713 = vrot.lane.b32.xlu1 %v5588_v7, %s7463_s29  ;;  %v4832_v7 = vrot.slane %v4830_v26, 7  ;;  %v4123_v63 = vsel %vm9000_vm8, %v4121_v29, %v4122_v17  ;;  %v4815_v45 = vrot.slane %v10305_v4, 4 }
 0x3b2   : > { %5711 = vrot.lane.b32.xlu0 %v5585_v46, %s7463_s29  ;;  %v5320_v46 = vrot.slane %v5318_v34, 6  ;;  %v5333_v17 = vrot.slane %v5331_v54, 7  ;;  %v4843_v12 = vor.u32 %v4842_v62, %v4839_v19  ;;  %v5316_v34 = vrot.slane %v10325_v6, 4 }
 0x3b3   : > { %v5085_v18 = vpop.permute.xlu1 %5084  ;;  %v10435_v42 = vor.u32 %v4832_v7, %v4829_v51  ;;  %v4824_v59 = vsel %vm9408_vm2, %v4815_v45, %v4823_v49  ;;  %v5353_v6 = vrot.slane %v5351_v38, 7 }
 0x3b4   : > { %5222 = vst.msk [vmem:[#allocation2 + $0x4c] sm:$0xf] %vm5202_vm10, %v5085_v18  ;;  %v5083_v31 = vpop.permute.xlu0 %5082  ;;  %v5324_v11 = vor.u32 %v5323_v61, %v5320_v46  ;;  %v5334_v50 = vor.u32 %v5333_v17, %v5330_v36  ;;  %v4845_v28 = vrot.slane %v4843_v12, 4  ;;  %v5874_v61 = vld [vmem:[%s8006_s6 + $0x14] sm:$0xf]  ;;  %v5589_v36 = vrot.slane %v5587_v2, 4 }
 0x3b5   : > { %5221 = vst.msk [vmem:[#allocation2 + $0x48] sm:$0xf] %vm5202_vm10, %v5083_v31  ;;  %5920 = vrot.lane.b32.xlu1 %v5899_v1, %s7463_s29  ;;  %v4433_v1 = vrot.slane %v4400_v39, 6  ;;  %v4835_v39 = vrot.slane %v10435_v42, 4  ;;  %v5900_v2 = vrot.slane %v5898_v44, 4 }
 0x3b6   : > { %5918 = vrot.lane.b32.xlu0 %v5896_v53, %s7463_s29  ;;  %v4825_v53 = vrot.slane %v4823_v49, 4  ;;  %v5326_v30 = vrot.slane %v5324_v11, 4  ;;  %v5325_v55 = vsel %vm9408_vm2, %v5316_v34, %v5324_v11  ;;  %v5426_v49 = vld [vmem:[%s7518_s23 + $0x94] sm:$0xf]  ;;  %v4854_v7 = vsel %vm9408_vm2, %v4845_v28, %v9512_v58  ;;  %v5428_v11 = vld [vmem:[%s7518_s23 + $0x9c] sm:$0xf] }
 0x3b7   : > { %v5141_v16 = vpop.permute.xlu1 %5140  ;;  %v4434_v31 = vsel %vm9000_vm8, %v4432_v35, %v4433_v1  ;;  %v5590_v46 = vrot.slane %v5426_v49, 7  ;;  %v4844_v40 = vsel %vm9408_vm2, %v4835_v39, %v4843_v12  ;;  %v5427_v35 = vld [vmem:[%s7518_s23 + $0x98] sm:$0xf]  ;;  %v5901_v58 = vrot.slane %v5874_v61, 7  ;;  %v10538_v28 = vld [vmem:[%s10806_s3] ss:$0 sm:$0xff] }
 0x3b8   : > { %5250 = vst.msk [vmem:[#allocation2 + $0xbc] sm:$0xf] %vm5202_vm10, %v5141_v16  ;;  %v5139_v15 = vpop.permute.xlu0 %5138  ;;  %v4834_v48 = vsel %vm9408_vm2, %v4825_v53, %v10435_v42  ;;  %v5335_v29 = vsel %vm9408_vm2, %v5326_v30, %v5334_v50  ;;  %vm5383_vm8 = vcmask 519617  }
 0x3b9   : > { %5249 = vst.msk [vmem:[#allocation2 + $0xb8] sm:$0xf] %vm5202_vm10, %v5139_v15  ;;  %4240 = vrot.lane.b32.xlu1 %v4117_v27, %s7461_s11  ;;  %v5341_v27 = vshll.u32 %v5266_v10, 16  ;;  %v5348_v15 = vshrl.u32 %v5267_v0, 16  ;;  %v5592_v22 = vrot.slane %v5590_v46, 4  ;;  %v5593_v10 = vrot.slane %v5427_v35, 7 }
 0x3ba   : > { %4238 = vrot.lane.b32.xlu0 %v4114_v56, %s7461_s11  ;;  %v5903_v19 = vrot.slane %v5901_v58, 4  ;;  %v5591_v57 = vsel %vm9446_vm5, %v5589_v36, %v5590_v46  ;;  %v5902_v44 = vsel %vm9446_vm5, %v5900_v2, %v5901_v58 }
 0x3bb   : > { %v5694_v25 = vpop.permute.xlu1 %5693  ;;  %v5343_v4 = vrot.slane %v5341_v27, 7  ;;  %v5594_v41 = vsel %vm9446_vm5, %v5592_v22, %v5593_v10  ;;  %v5876_v27 = vld [vmem:[%s8006_s6 + $0x1c] sm:$0xf] }
 0x3bc   : > { %5833 = vst.msk [vmem:[#allocation2 + $0x44] sm:$0xf] %vm5815_vm11, %v5694_v25  ;;  %v5692_v52 = vpop.permute.xlu0 %5691  ;;  %v5350_v25 = vrot.slane %v5348_v15, 6  ;;  %v5907_v0 = vrot.slane %v5876_v27, 7 }
 0x3bd   : > { %5832 = vst.msk [vmem:[#allocation2 + $0x40] sm:$0xf] %vm5815_vm11, %v5692_v52  ;;  %4447 = vrot.lane.b32.xlu1 %v4428_v20, %s7461_s11  ;;  %v5344_v43 = vor.u32 %v5343_v4, %v5340_v8  ;;  %v5386_v4 = vld [vmem:[#allocation2 + $0xcc] sm:$0xe] }
 0x3be   : > { %4445 = vrot.lane.b32.xlu0 %v4425_v37, %s7461_s11  ;;  %v5354_v54 = vor.u32 %v5353_v6, %v5350_v25 }
 0x3bf   : > { %v5750_v23 = vpop.permute.xlu1 %5749  ;;  %v5346_v21 = vrot.slane %v5344_v43, 4 }
 0x3c0   : > { %5861 = vst.msk [vmem:[#allocation2 + $0xb4] sm:$0xf] %vm5815_vm11, %v5750_v23  ;;  %v5748_v18 = vpop.permute.xlu0 %5747 }
 0x3c1   : > { %5860 = vst.msk [vmem:[#allocation2 + $0xb0] sm:$0xf] %vm5815_vm11, %v5748_v18  ;;  %4244 = vrot.lane.b32.xlu1 %v4123_v63, %s7461_s11  ;;  %v5336_v63 = vrot.slane %v5334_v50, 4  ;;  %v5875_v18 = vld [vmem:[%s8006_s6 + $0x18] sm:$0xf]  ;;  %v5909_v50 = vrot.slane %v5907_v0, 4 }
 0x3c2   : > { %4242 = vrot.lane.b32.xlu0 %v4120_v9, %s7461_s11  ;;  %v5355_v9 = vsel %vm9408_vm2, %v5346_v21, %v5354_v54  ;;  %v5904_v62 = vrot.slane %v5875_v18, 7 }
 0x3c3   : > { %v5698_v33 = vpop.permute.xlu1 %5697  ;;  %v5345_v42 = vsel %vm9408_vm2, %v5336_v63, %v5344_v43  ;;  %vm5385_vm2 = vmand %vm5383_vm8, %vm5384_vm1 }
 0x3c4   : > { %5835 = vst.msk [vmem:[#allocation2 + $0x4c] sm:$0xf] %vm5815_vm11, %v5698_v33  ;;  %v5696_v16 = vpop.permute.xlu0 %5695  ;;  %v7416_v56 = vld [vmem:[#allocation2 + $0x40] sm:$0xff]   ;;  %v5906_v38 = vrot.slane %v5904_v62, 4 }
 0x3c5   : > { %5834 = vst.msk [vmem:[#allocation2 + $0x48] sm:$0xf] %vm5815_vm11, %v5696_v16  ;;  %4451 = vrot.lane.b32.xlu1 %v4434_v31, %s7461_s11  ;;  %7309 = vmatprep.mubr.msk.bf16.mxu0 %vm6202_vm12, %v7416_v56  ;;  %v5596_v31 = vrot.slane %v5428_v11, 7  ;;  %v5595_v16 = vrot.slane %v5593_v10, 4  ;;  %v5877_v56 = vld [vmem:[%s8006_s6 + $0x20] sm:$0x7] }
 0x3c6   : > { %4449 = vrot.lane.b32.xlu0 %v4431_v24, %s7461_s11  ;;  %v5905_v24 = vsel %vm9446_vm5, %v5903_v19, %v5904_v62  ;;  %v5910_v12 = vrot.slane %v5877_v56, 7  ;;  %v5908_v34 = vsel %vm9446_vm5, %v5906_v38, %v5907_v0 }
 0x3c7   : > { %v5754_v26 = vpop.permute.xlu1 %5753  ;;  %v5598_v45 = vrot.slane %v5596_v31, 4  ;;  %v5597_v15 = vsel %vm9446_vm5, %v5595_v16, %v5596_v31 }
 0x3c8   : > { %5863 = vst.msk [vmem:[#allocation2 + $0xbc] sm:$0xf] %vm5815_vm11, %v5754_v26  ;;  %v5752_v32 = vpop.permute.xlu0 %5751  ;;  %v7417_v20 = vld [vmem:[#allocation2 + $0xb0] sm:$0xff]   ;;  %v5911_v13 = vsel %vm9446_vm5, %v5909_v50, %v5910_v12 }
 0x3c9   : > { %5862 = vst.msk [vmem:[#allocation2 + $0xb8] sm:$0xf] %vm5815_vm11, %v5752_v32  ;;  %5104 = vrot.lane.b32.xlu1 %v4834_v48, %s7462_s24  ;;  %7337 = vmatprep.mubr.msk.bf16.mxu1 %vm6202_vm12, %v7417_v20  ;;  %v5600_v30 = vsel %vm9446_vm5, %v5598_v45, %v5599_v14  ;;  %vm5867_vm5 = vcmask 582144  }
 0x3ca   : > { %5102 = vrot.lane.b32.xlu0 %v4824_v59, %s7462_s24 }
 0x3cb   : > { %v4225_v37 = vpop.permute.xlu1 %4224 }
 0x3cc   : > { %4360 = vst.msk [vmem:[#allocation2 + $0x54] sm:$0xf] %vm4338_vm9, %v4225_v37  ;;  %v4223_v52 = vpop.permute.xlu0 %4222  ;;  %v7418_v51 = vld [vmem:[#allocation2 + $0x48] sm:$0xff]  }
 0x3cd   : > { %4359 = vst.msk [vmem:[#allocation2 + $0x50] sm:$0xf] %vm4338_vm9, %v4223_v52  ;;  %5368 = vrot.lane.b32.xlu1 %v5335_v29, %s7462_s24  ;;  %7310 = vmatmul.mubr.msk.bf16.gmra.mxu0 %vm6202_vm12, %v7418_v51 }
 0x3ce   : > { %5366 = vrot.lane.b32.xlu0 %v5325_v55, %s7462_s24 }
 0x3cf   : > { %v4281_v3 = vpop.permute.xlu1 %4280 }
 0x3d0   : > { %4388 = vst.msk [vmem:[#allocation2 + $0xc4] sm:$0xf] %vm4338_vm9, %v4281_v3  ;;  %v4279_v1 = vpop.permute.xlu0 %4278  ;;  %v7419_v23 = vld [vmem:[#allocation2 + $0xb8] sm:$0xff]  }
 0x3d1   : > { %4387 = vst.msk [vmem:[#allocation2 + $0xc0] sm:$0xf] %vm4338_vm9, %v4279_v1  ;;  %5108 = vrot.lane.b32.xlu1 %v4854_v7, %s7462_s24  ;;  %7338 = vmatmul.mubr.msk.bf16.gmra.mxu1 %vm6202_vm12, %v7419_v23 }
 0x3d2   : > { %5106 = vrot.lane.b32.xlu0 %v4844_v40, %s7462_s24 }
 0x3d3   : > { %v4229_v53 = vpop.permute.xlu1 %4228 }
 0x3d4   : > { %4362 = vst.msk [vmem:[#allocation2 + $0x5c] sm:$0xf] %vm4338_vm9, %v4229_v53  ;;  %v4227_v17 = vpop.permute.xlu0 %4226 }
 0x3d5   : > { %4361 = vst.msk [vmem:[#allocation2 + $0x58] sm:$0xf] %vm4338_vm9, %v4227_v17  ;;  %5372 = vrot.lane.b32.xlu1 %v5355_v9, %s7462_s24 }
 0x3d6   : > { %5370 = vrot.lane.b32.xlu0 %v5345_v42, %s7462_s24 }
 0x3d7   : > { %v5087_v60 = vpop.permute.xlu1 %5086 }
 0x3d8   : > { %5223 = vst.msk [vmem:[#allocation2 + $0x50] sm:$0xf] %vm5202_vm10, %v5087_v60  ;;  %v4283_v33 = vpop.permute.xlu0 %4282 }
 0x3d9   : > { %4389 = vst.msk [vmem:[#allocation2 + $0xc8] sm:$0xf] %vm4338_vm9, %v4283_v33  ;;  %5717 = vrot.lane.b32.xlu1 %v5594_v41, %s7463_s29 }
 0x3da   : > { %5715 = vrot.lane.b32.xlu0 %v5591_v57, %s7463_s29 }
 0x3db   : > { %v5143_v47 = vpop.permute.xlu1 %5142 }
 0x3dc   : > { %5251 = vst.msk [vmem:[#allocation2 + $0xc0] sm:$0xf] %vm5202_vm10, %v5143_v47  ;;  %v5089_v48 = vpop.permute.xlu0 %5088 }
 0x3dd   : > { %5224 = vst.msk [vmem:[#allocation2 + $0x54] sm:$0xf] %vm5202_vm10, %v5089_v48  ;;  %5924 = vrot.lane.b32.xlu1 %v5905_v24, %s7463_s29 }
 0x3de   : > { %5922 = vrot.lane.b32.xlu0 %v5902_v44, %s7463_s29 }
 0x3df   : > { %v5357_v8 = vpop.permute.xlu1 %5356 }
 0x3e0   : > { %v5387_v26 = vsel %vm5385_vm2, %v5357_v8, %v5386_v4  ;;  %v5145_v59 = vpop.permute.xlu0 %5144 }
 0x3e1   : > { %5388 = vst [vmem:[#allocation2 + $0xcc] sm:$0xe] %v5387_v26  ;;  %5252 = vst.msk [vmem:[#allocation2 + $0xc4] sm:$0xf] %vm5202_vm10, %v5145_v59  ;;  %5721 = vrot.lane.b32.xlu1 %v5600_v30, %s7463_s29 }
 0x3e2   : > { %5719 = vrot.lane.b32.xlu0 %v5597_v15, %s7463_s29 }
 0x3e3   : > { %v5093_v14 = vpop.permute.xlu1 %5092 }
 0x3e4   : > { %5226 = vst.msk [vmem:[#allocation2 + $0x5c] sm:$0xf] %vm5202_vm10, %v5093_v14  ;;  %v5091_v32 = vpop.permute.xlu0 %5090 }
 0x3e5   : > { %5225 = vst.msk [vmem:[#allocation2 + $0x58] sm:$0xf] %vm5202_vm10, %v5091_v32  ;;  %5928 = vrot.lane.b32.xlu1 %v5911_v13, %s7463_s29 }
 0x3e6   : > { %5926 = vrot.lane.b32.xlu0 %v5908_v34, %s7463_s29 }
 0x3e7   : > { %v5700_v20 = vpop.permute.xlu1 %5699 }
 0x3e8   : > { %5836 = vst.msk [vmem:[#allocation2 + $0x50] sm:$0xf] %vm5815_vm11, %v5700_v20  ;;  %v5147_v29 = vpop.permute.xlu0 %5146 }
 0x3e9   : > { %5253 = vst.msk [vmem:[#allocation2 + $0xc8] sm:$0xf] %vm5202_vm10, %v5147_v29  ;;  %v7295_v5 = vpop.f32.mrf.mxu0 }
 0x3ea   : > { %v6340_v43 = vadd.f32 %v7295_v5, %v10538_v28 }
 0x3eb   : > { %v5756_v25 = vpop.permute.xlu1 %5755  ;;  %v6331_v37 = vpop.f32.mrf.mxu0 }
 0x3ec   : > { %5864 = vst.msk [vmem:[#allocation2 + $0xc0] sm:$0xf] %vm5815_vm11, %v5756_v25  ;;  %v5702_v6 = vpop.permute.xlu0 %5701  ;;  %v6572_v55 = vmax.f32 %v6340_v43, 0.0  ;;  %v6332_v39 = vadd.f32 %v10538_v28, %v6331_v37 }
 0x3ed   : > { %5837 = vst.msk [vmem:[#allocation2 + $0x54] sm:$0xf] %vm5815_vm11, %v5702_v6  ;;  %v7296_v49 = vpop.f32.mrf.mxu0 }
 0x3ee   : > { %v7190_v52 = vpack.c.bf16 %v6572_v55, %v6572_v55  ;;  %v6570_v51 = vmax.f32 %v6332_v39, 0.0  ;;  %v6343_v7 = vadd.f32 %v7296_v49, %v10538_v28 }
 0x3ef   : > { %v5704_v21 = vpop.permute.xlu1 %5703  ;;  %v6334_v46 = vpop.f32.mrf.mxu0 }
 0x3f0   : > { %5838 = vst.msk [vmem:[#allocation2 + $0x58] sm:$0xf] %vm5815_vm11, %v5704_v21  ;;  %v5758_v54 = vpop.permute.xlu0 %5757  ;;  %v7188_v61 = vpack.c.bf16 %v6570_v51, %v6570_v51  ;;  %v6573_v3 = vmax.f32 %v6343_v7, 0.0  ;;  %v6335_v40 = vadd.f32 %v10538_v28, %v6334_v46 }
 0x3f1   : > { %6873 = vst.msk [vmem:[%s10550_s7 + $0x8] sm:$0xf] %vm6870_vm3, %v7190_v52 }
 0x3f2   : > { %5865 = vst.msk [vmem:[#allocation2 + $0xc4] sm:$0xf] %vm5815_vm11, %v5758_v54  ;;  %v7191_v63 = vpack.c.bf16 %v6573_v3, %v6573_v3  ;;  %v6571_v35 = vmax.f32 %v6335_v40, 0.0 }
 0x3f3   : > { %6871 = vst.msk [vmem:[%s10550_s7] sm:$0xf] %vm6870_vm3, %v7188_v61  ;;  %v5760_v1 = vpop.permute.xlu1 %5759 }
 0x3f4   : > { %5866 = vst.msk [vmem:[#allocation2 + $0xc8] sm:$0xf] %vm5815_vm11, %v5760_v1  ;;  %v5706_v23 = vpop.permute.xlu0 %5705  ;;  %v7420_v58 = vld [vmem:[#allocation2 + $0x50] sm:$0xff]   ;;  %v7189_v9 = vpack.c.bf16 %v6571_v35, %v6571_v35 }
 0x3f5   : > { %6874 = vst.msk [vmem:[%s10550_s7 + $0xc] sm:$0xf] %vm6870_vm3, %v7191_v63  ;;  %7313 = vmatprep.mubr.msk.bf16.mxu0 %vm6202_vm12, %v7420_v58 }
 0x3f6   : > { %5839 = vst.msk [vmem:[#allocation2 + $0x5c] sm:$0xf] %vm5815_vm11, %v5706_v23 }
 0x3f7   : > { %6872 = vst.msk [vmem:[%s10550_s7 + $0x4] sm:$0xf] %vm6870_vm3, %v7189_v9  ;;  %v5913_v22 = vpop.permute.xlu1 %5912 }
 0x3f8   : > { %5940 = vst.msk [vmem:[#allocation2 + $0xcc] sm:$0xe] %vm5939_vm4, %v5913_v22  ;;  %v5762_v10 = vpop.permute.xlu0 %5761 }
 0x3f9   : > { %v7421_v18 = vld [vmem:[#allocation2 + $0xc0] sm:$0xff]   ;;  %5868 = vst.msk [vmem:[#allocation2 + $0xcc] sm:$0x1] %vm5867_vm5, %v5762_v10 }
 0x3fa   : > { %7341 = vmatprep.mubr.msk.bf16.mxu1 %vm6202_vm12, %v7421_v18 }
 0x3fb   : > { %v4233_v53 = vpop.permute.xlu1 %4232 }
 0x3fc   : > { %4364 = vst.msk [vmem:[#allocation2 + $0x64] sm:$0xf] %vm4338_vm9, %v4233_v53  ;;  %v4231_v42 = vpop.permute.xlu0 %4230 }
 0x3fd   : > { %v7422_v36 = vld [vmem:[#allocation2 + $0x58] sm:$0xff]   ;;  %4363 = vst.msk [vmem:[#allocation2 + $0x60] sm:$0xf] %vm4338_vm9, %v4231_v42 }
 0x3fe   : > { %7314 = vmatmul.mubr.msk.bf16.gmra.mxu0 %vm6202_vm12, %v7422_v36 }
 0x3ff   : > { %v4440_v11 = vpop.permute.xlu1 %4439 }
 0x400   : > { %4465 = vst.msk [vmem:[#allocation2 + $0xd4] sm:$0xf] %vm4338_vm9, %v4440_v11  ;;  %v4438_v17 = vpop.permute.xlu0 %4437  ;;  %v7423_v19 = vld [vmem:[#allocation2 + $0xc8] sm:$0xff]  }
 0x401   : > { %4464 = vst.msk [vmem:[#allocation2 + $0xd0] sm:$0xf] %vm4338_vm9, %v4438_v17  ;;  %7342 = vmatmul.mubr.msk.bf16.gmra.mxu1 %vm6202_vm12, %v7423_v19 }
 0x403   : > { %v4237_v62 = vpop.permute.xlu1 %4236 }
 0x404   : > { %4366 = vst.msk [vmem:[#allocation2 + $0x6c] sm:$0xf] %vm4338_vm9, %v4237_v62  ;;  %v4235_v41 = vpop.permute.xlu0 %4234 }
 0x405   : > { %4365 = vst.msk [vmem:[#allocation2 + $0x68] sm:$0xf] %vm4338_vm9, %v4235_v41 }
 0x407   : > { %v4444_v31 = vpop.permute.xlu1 %4443 }
 0x408   : > { %4467 = vst.msk [vmem:[#allocation2 + $0xdc] sm:$0xf] %vm4338_vm9, %v4444_v31  ;;  %v4442_v60 = vpop.permute.xlu0 %4441 }
 0x409   : > { %4466 = vst.msk [vmem:[#allocation2 + $0xd8] sm:$0xf] %vm4338_vm9, %v4442_v60 }
 0x40b   : > { %v5097_v57 = vpop.permute.xlu1 %5096 }
 0x40c   : > { %5228 = vst.msk [vmem:[#allocation2 + $0x64] sm:$0xf] %vm5202_vm10, %v5097_v57  ;;  %v5095_v2 = vpop.permute.xlu0 %5094 }
 0x40d   : > { %5227 = vst.msk [vmem:[#allocation2 + $0x60] sm:$0xf] %vm5202_vm10, %v5095_v2  ;;  %v7299_v27 = vpop.f32.mrf.mxu0 }
 0x40e   : > { %v6356_v33 = vadd.f32 %v7299_v27, %v10538_v28 }
 0x40f   : > { %v5361_v24 = vpop.permute.xlu1 %5360  ;;  %v6347_v0 = vpop.f32.mrf.mxu0 }
 0x410   : > { %5390 = vst.msk [vmem:[#allocation2 + $0xd4] sm:$0xf] %vm5202_vm10, %v5361_v24  ;;  %v5359_v45 = vpop.permute.xlu0 %5358  ;;  %v6576_v47 = vmax.f32 %v6356_v33, 0.0  ;;  %v6348_v44 = vadd.f32 %v10538_v28, %v6347_v0 }
 0x411   : > { %5389 = vst.msk [vmem:[#allocation2 + $0xd0] sm:$0xf] %vm5202_vm10, %v5359_v45  ;;  %v7300_v16 = vpop.f32.mrf.mxu0  ;;  %v7327_v56 = vpop.f32.mrf.mxu1 }
 0x412   : > { %v7194_v48 = vpack.c.bf16 %v6576_v47, %v6576_v47  ;;  %v6574_v30 = vmax.f32 %v6348_v44, 0.0  ;;  %v6359_v50 = vadd.f32 %v7300_v16, %v10538_v28  ;;  %v6468_v12 = vadd.f32 %v7327_v56, %v10538_v28 }
 0x413   : > { %v5101_v8 = vpop.permute.xlu1 %5100  ;;  %v6350_v15 = vpop.f32.mrf.mxu0 }
 0x414   : > { %5230 = vst.msk [vmem:[#allocation2 + $0x6c] sm:$0xf] %vm5202_vm10, %v5101_v8  ;;  %v5099_v4 = vpop.permute.xlu0 %5098  ;;  %v7192_v38 = vpack.c.bf16 %v6574_v30, %v6574_v30  ;;  %v6577_v26 = vmax.f32 %v6359_v50, 0.0  ;;  %v6604_v59 = vmax.f32 %v6468_v12, 0.0  ;;  %v6351_v13 = vadd.f32 %v10538_v28, %v6350_v15  ;;  %v6459_v14 = vpop.f32.mrf.mxu1 }
 0x415   : > { %6877 = vst.msk [vmem:[%s10550_s7 + $0x18] sm:$0xf] %vm6870_vm3, %v7194_v48  ;;  %v6460_v34 = vadd.f32 %v10538_v28, %v6459_v14 }
 0x416   : > { %5229 = vst.msk [vmem:[#allocation2 + $0x68] sm:$0xf] %vm5202_vm10, %v5099_v4  ;;  %v7195_v32 = vpack.c.bf16 %v6577_v26, %v6577_v26  ;;  %v7222_v20 = vpack.c.bf16 %v6604_v59, %v6604_v59  ;;  %v6575_v29 = vmax.f32 %v6351_v13, 0.0  ;;  %v7328_v5 = vpop.f32.mrf.mxu1 }
 0x417   : > { %6875 = vst.msk [vmem:[%s10550_s7 + $0x10] sm:$0xf] %vm6870_vm3, %v7192_v38  ;;  %v5365_v43 = vpop.permute.xlu1 %5364  ;;  %v6602_v25 = vmax.f32 %v6460_v34, 0.0  ;;  %v6471_v6 = vadd.f32 %v7328_v5, %v10538_v28 }
 0x418   : > { %5392 = vst.msk [vmem:[#allocation2 + $0xdc] sm:$0xf] %vm5202_vm10, %v5365_v43  ;;  %v5363_v37 = vpop.permute.xlu0 %5362  ;;  %v7193_v55 = vpack.c.bf16 %v6575_v29, %v6575_v29  ;;  %v6462_v39 = vpop.f32.mrf.mxu1 }
 0x419   : > { %6878 = vst.msk [vmem:[%s10550_s7 + $0x1c] sm:$0xf] %vm6870_vm3, %v7195_v32  ;;  %6905 = vst.msk [vmem:[%s10550_s7 + $0x88] sm:$0xf] %vm6870_vm3, %v7222_v20  ;;  %v7220_v49 = vpack.c.bf16 %v6602_v25, %v6602_v25  ;;  %v6605_v52 = vmax.f32 %v6471_v6, 0.0  ;;  %v6463_v51 = vadd.f32 %v10538_v28, %v6462_v39 }
 0x41a   : > { %5391 = vst.msk [vmem:[#allocation2 + $0xd8] sm:$0xf] %vm5202_vm10, %v5363_v37 }
 0x41b   : > { %6876 = vst.msk [vmem:[%s10550_s7 + $0x14] sm:$0xf] %vm6870_vm3, %v7193_v55  ;;  %v5710_v7 = vpop.permute.xlu1 %5709  ;;  %6903 = vst.msk [vmem:[%s10550_s7 + $0x80] sm:$0xf] %vm6870_vm3, %v7220_v49  ;;  %v7223_v21 = vpack.c.bf16 %v6605_v52, %v6605_v52  ;;  %v6603_v54 = vmax.f32 %v6463_v51, 0.0 }
 0x41c   : > { %5841 = vst.msk [vmem:[#allocation2 + $0x64] sm:$0xf] %vm5815_vm11, %v5710_v7  ;;  %v5708_v46 = vpop.permute.xlu0 %5707 }
 0x41d   : > { %5840 = vst.msk [vmem:[#allocation2 + $0x60] sm:$0xf] %vm5815_vm11, %v5708_v46  ;;  %v7221_v61 = vpack.c.bf16 %v6603_v54, %v6603_v54 }
 0x41e   : > { %6906 = vst.msk [vmem:[%s10550_s7 + $0x8c] sm:$0xf] %vm6870_vm3, %v7223_v21 }
 0x41f   : > { %v5917_v3 = vpop.permute.xlu1 %5916  ;;  %6904 = vst.msk [vmem:[%s10550_s7 + $0x84] sm:$0xf] %vm6870_vm3, %v7221_v61 }
 0x420   : > { %5942 = vst.msk [vmem:[#allocation2 + $0xd4] sm:$0xf] %vm5815_vm11, %v5917_v3  ;;  %v5915_v40 = vpop.permute.xlu0 %5914 }
 0x421   : > { %5941 = vst.msk [vmem:[#allocation2 + $0xd0] sm:$0xf] %vm5815_vm11, %v5915_v40 }
 0x423   : > { %v5714_v63 = vpop.permute.xlu1 %5713 }
 0x424   : > { %5843 = vst.msk [vmem:[#allocation2 + $0x6c] sm:$0xf] %vm5815_vm11, %v5714_v63  ;;  %v5712_v35 = vpop.permute.xlu0 %5711  ;;  %v7424_v1 = vld [vmem:[#allocation2 + $0x60] sm:$0xff]  }
 0x425   : > { %5842 = vst.msk [vmem:[#allocation2 + $0x68] sm:$0xf] %vm5815_vm11, %v5712_v35  ;;  %7317 = vmatprep.mubr.msk.bf16.mxu0 %vm6202_vm12, %v7424_v1 }
 0x427   : > { %v5921_v23 = vpop.permute.xlu1 %5920 }
 0x428   : > { %5944 = vst.msk [vmem:[#allocation2 + $0xdc] sm:$0xf] %vm5815_vm11, %v5921_v23  ;;  %v5919_v58 = vpop.permute.xlu0 %5918  ;;  %v7425_v9 = vld [vmem:[#allocation2 + $0xd0] sm:$0xff]  }
 0x429   : > { %5943 = vst.msk [vmem:[#allocation2 + $0xd8] sm:$0xf] %vm5815_vm11, %v5919_v58  ;;  %7345 = vmatprep.mubr.msk.bf16.mxu1 %vm6202_vm12, %v7425_v9 }
 0x42b   : > { %v4241_v22 = vpop.permute.xlu1 %4240 }
 0x42c   : > { %4368 = vst.msk [vmem:[#allocation2 + $0x74] sm:$0xf] %vm4338_vm9, %v4241_v22  ;;  %v4239_v10 = vpop.permute.xlu0 %4238  ;;  %v7426_v18 = vld [vmem:[#allocation2 + $0x68] sm:$0xff]  }
 0x42d   : > { %4367 = vst.msk [vmem:[#allocation2 + $0x70] sm:$0xf] %vm4338_vm9, %v4239_v10  ;;  %7318 = vmatmul.mubr.msk.bf16.gmra.mxu0 %vm6202_vm12, %v7426_v18 }
 0x42f   : > { %v4448_v53 = vpop.permute.xlu1 %4447 }
 0x430   : > { %4469 = vst.msk [vmem:[#allocation2 + $0xe4] sm:$0xf] %vm4338_vm9, %v4448_v53  ;;  %v4446_v42 = vpop.permute.xlu0 %4445  ;;  %v7427_v36 = vld [vmem:[#allocation2 + $0xd8] sm:$0xff]  }
 0x431   : > { %4468 = vst.msk [vmem:[#allocation2 + $0xe0] sm:$0xf] %vm4338_vm9, %v4446_v42  ;;  %7346 = vmatmul.mubr.msk.bf16.gmra.mxu1 %vm6202_vm12, %v7427_v36 }
 0x433   : > { %v4245_v11 = vpop.permute.xlu1 %4244 }
 0x434   : > { %4370 = vst.msk [vmem:[#allocation2 + $0x7c] sm:$0xf] %vm4338_vm9, %v4245_v11  ;;  %v4243_v17 = vpop.permute.xlu0 %4242 }
 0x435   : > { %4369 = vst.msk [vmem:[#allocation2 + $0x78] sm:$0xf] %vm4338_vm9, %v4243_v17  ;;  %v7303_v19 = vpop.f32.mrf.mxu0 }
 0x436   : > { %v6372_v62 = vadd.f32 %v7303_v19, %v10538_v28 }
 0x437   : > { %v4452_v41 = vpop.permute.xlu1 %4451  ;;  %v6363_v60 = vpop.f32.mrf.mxu0 }
 0x438   : > { %4471 = vst.msk [vmem:[#allocation2 + $0xec] sm:$0xf] %vm4338_vm9, %v4452_v41  ;;  %v4450_v31 = vpop.permute.xlu0 %4449  ;;  %v6580_v57 = vmax.f32 %v6372_v62, 0.0  ;;  %v6364_v2 = vadd.f32 %v10538_v28, %v6363_v60 }
 0x439   : > { %4470 = vst.msk [vmem:[#allocation2 + $0xe8] sm:$0xf] %vm4338_vm9, %v4450_v31  ;;  %v7304_v27 = vpop.f32.mrf.mxu0  ;;  %v7331_v33 = vpop.f32.mrf.mxu1 }
 0x43a   : > { %v7198_v24 = vpack.c.bf16 %v6580_v57, %v6580_v57  ;;  %v6578_v45 = vmax.f32 %v6364_v2, 0.0  ;;  %v6375_v0 = vadd.f32 %v7304_v27, %v10538_v28  ;;  %v6484_v47 = vadd.f32 %v7331_v33, %v10538_v28 }
 0x43b   : > { %v5105_v44 = vpop.permute.xlu1 %5104  ;;  %v6366_v56 = vpop.f32.mrf.mxu0 }
 0x43c   : > { %5232 = vst.msk [vmem:[#allocation2 + $0x74] sm:$0xf] %vm5202_vm10, %v5105_v44  ;;  %v5103_v16 = vpop.permute.xlu0 %5102  ;;  %v7196_v48 = vpack.c.bf16 %v6578_v45, %v6578_v45  ;;  %v6581_v30 = vmax.f32 %v6375_v0, 0.0  ;;  %v6608_v50 = vmax.f32 %v6484_v47, 0.0  ;;  %v6367_v12 = vadd.f32 %v10538_v28, %v6366_v56  ;;  %v6475_v8 = vpop.f32.mrf.mxu1 }
 0x43d   : > { %6881 = vst.msk [vmem:[%s10550_s7 + $0x28] sm:$0xf] %vm6870_vm3, %v7198_v24  ;;  %v6476_v4 = vadd.f32 %v10538_v28, %v6475_v8 }
 0x43e   : > { %5231 = vst.msk [vmem:[#allocation2 + $0x70] sm:$0xf] %vm5202_vm10, %v5103_v16  ;;  %v7199_v15 = vpack.c.bf16 %v6581_v30, %v6581_v30  ;;  %v7226_v38 = vpack.c.bf16 %v6608_v50, %v6608_v50  ;;  %v6579_v26 = vmax.f32 %v6367_v12, 0.0  ;;  %v7332_v59 = vpop.f32.mrf.mxu1 }
 0x43f   : > { %6879 = vst.msk [vmem:[%s10550_s7 + $0x20] sm:$0xf] %vm6870_vm3, %v7196_v48  ;;  %v5369_v13 = vpop.permute.xlu1 %5368  ;;  %v6606_v14 = vmax.f32 %v6476_v4, 0.0  ;;  %v6487_v34 = vadd.f32 %v7332_v59, %v10538_v28 }
 0x440   : > { %5394 = vst.msk [vmem:[#allocation2 + $0xe4] sm:$0xf] %vm5202_vm10, %v5369_v13  ;;  %v5367_v32 = vpop.permute.xlu0 %5366  ;;  %v7197_v20 = vpack.c.bf16 %v6579_v26, %v6579_v26  ;;  %v6478_v29 = vpop.f32.mrf.mxu1 }
 0x441   : > { %6882 = vst.msk [vmem:[%s10550_s7 + $0x2c] sm:$0xf] %vm6870_vm3, %v7199_v15  ;;  %6909 = vst.msk [vmem:[%s10550_s7 + $0x98] sm:$0xf] %vm6870_vm3, %v7226_v38  ;;  %v7224_v5 = vpack.c.bf16 %v6606_v14, %v6606_v14  ;;  %v6609_v43 = vmax.f32 %v6487_v34, 0.0  ;;  %v6479_v25 = vadd.f32 %v10538_v28, %v6478_v29 }
 0x442   : > { %5393 = vst.msk [vmem:[#allocation2 + $0xe0] sm:$0xf] %vm5202_vm10, %v5367_v32 }
 0x443   : > { %6880 = vst.msk [vmem:[%s10550_s7 + $0x24] sm:$0xf] %vm6870_vm3, %v7197_v20  ;;  %v5109_v6 = vpop.permute.xlu1 %5108  ;;  %6907 = vst.msk [vmem:[%s10550_s7 + $0x90] sm:$0xf] %vm6870_vm3, %v7224_v5  ;;  %v7227_v37 = vpack.c.bf16 %v6609_v43, %v6609_v43  ;;  %v6607_v55 = vmax.f32 %v6479_v25, 0.0 }
 0x444   : > { %5234 = vst.msk [vmem:[#allocation2 + $0x7c] sm:$0xf] %vm5202_vm10, %v5109_v6  ;;  %v5107_v39 = vpop.permute.xlu0 %5106 }
 0x445   : > { %5233 = vst.msk [vmem:[#allocation2 + $0x78] sm:$0xf] %vm5202_vm10, %v5107_v39  ;;  %v7225_v49 = vpack.c.bf16 %v6607_v55, %v6607_v55 }
 0x446   : > { %6910 = vst.msk [vmem:[%s10550_s7 + $0x9c] sm:$0xf] %vm6870_vm3, %v7227_v37 }
 0x447   : > { %v5373_v52 = vpop.permute.xlu1 %5372  ;;  %6908 = vst.msk [vmem:[%s10550_s7 + $0x94] sm:$0xf] %vm6870_vm3, %v7225_v49 }
 0x448   : > { %5396 = vst.msk [vmem:[#allocation2 + $0xec] sm:$0xf] %vm5202_vm10, %v5373_v52  ;;  %v5371_v51 = vpop.permute.xlu0 %5370 }
 0x449   : > { %5395 = vst.msk [vmem:[#allocation2 + $0xe8] sm:$0xf] %vm5202_vm10, %v5371_v51 }
 0x44b   : > { %v5718_v7 = vpop.permute.xlu1 %5717 }
 0x44c   : > { %5845 = vst.msk [vmem:[#allocation2 + $0x74] sm:$0xf] %vm5815_vm11, %v5718_v7  ;;  %v5716_v21 = vpop.permute.xlu0 %5715 }
 0x44d   : > { %5844 = vst.msk [vmem:[#allocation2 + $0x70] sm:$0xf] %vm5815_vm11, %v5716_v21 }
 0x44f   : > { %v5925_v54 = vpop.permute.xlu1 %5924 }
 0x450   : > { %5946 = vst.msk [vmem:[#allocation2 + $0xe4] sm:$0xf] %vm5815_vm11, %v5925_v54  ;;  %v5923_v46 = vpop.permute.xlu0 %5922 }
 0x451   : > { %5945 = vst.msk [vmem:[#allocation2 + $0xe0] sm:$0xf] %vm5815_vm11, %v5923_v46 }
 0x453   : > { %v5722_v61 = vpop.permute.xlu1 %5721 }
 0x454   : > { %5847 = vst.msk [vmem:[#allocation2 + $0x7c] sm:$0xf] %vm5815_vm11, %v5722_v61  ;;  %v5720_v3 = vpop.permute.xlu0 %5719  ;;  %v7428_v40 = vld [vmem:[#allocation2 + $0x70] sm:$0xff]  }
 0x455   : > { %5846 = vst.msk [vmem:[#allocation2 + $0x78] sm:$0xf] %vm5815_vm11, %v5720_v3  ;;  %7321 = vmatprep.mubr.msk.bf16.mxu0 %vm6202_vm12, %v7428_v40 }
 0x457   : > { %v5929_v63 = vpop.permute.xlu1 %5928 }
 0x458   : > { %5948 = vst.msk [vmem:[#allocation2 + $0xec] sm:$0xf] %vm5815_vm11, %v5929_v63  ;;  %v5927_v35 = vpop.permute.xlu0 %5926  ;;  %v7429_v1 = vld [vmem:[#allocation2 + $0xe0] sm:$0xff]  }
 0x459   : > { %5947 = vst.msk [vmem:[#allocation2 + $0xe8] sm:$0xf] %vm5815_vm11, %v5927_v35  ;;  %7349 = vmatprep.mubr.msk.bf16.mxu1 %vm6202_vm12, %v7429_v1 }
 0x45c   : > { %v7430_v23 = vld [vmem:[#allocation2 + $0x78] sm:$0xff]  }
 0x45d   : > { %v7307_v58 = vpop.f32.mrf.mxu0  ;;  %7322 = vmatmul.mubr.msk.bf16.gmra.mxu0 %vm6202_vm12, %v7430_v23 }
 0x45e   : > { %v6388_v9 = vadd.f32 %v7307_v58, %v10538_v28 }
 0x45f   : > { %v6379_v22 = vpop.f32.mrf.mxu0 }
 0x460   : > { %v7431_v10 = vld [vmem:[#allocation2 + $0xe8] sm:$0xff]   ;;  %v6584_v18 = vmax.f32 %v6388_v9, 0.0  ;;  %v6380_v53 = vadd.f32 %v10538_v28, %v6379_v22 }
 0x461   : > { %v7308_v42 = vpop.f32.mrf.mxu0  ;;  %v7335_v36 = vpop.f32.mrf.mxu1  ;;  %7350 = vmatmul.mubr.msk.bf16.gmra.mxu1 %vm6202_vm12, %v7431_v10 }
 0x462   : > { %v7202_v11 = vpack.c.bf16 %v6584_v18, %v6584_v18  ;;  %v6582_v17 = vmax.f32 %v6380_v53, 0.0  ;;  %v6391_v19 = vadd.f32 %v7308_v42, %v10538_v28  ;;  %v6500_v62 = vadd.f32 %v7335_v36, %v10538_v28 }
 0x463   : > { %v6382_v41 = vpop.f32.mrf.mxu0  ;;  %v6491_v31 = vpop.f32.mrf.mxu1 }
 0x464   : > { %6885 = vst.msk [vmem:[%s10550_s7 + $0x38] sm:$0xf] %vm6870_vm3, %v7202_v11  ;;  %v7200_v60 = vpack.c.bf16 %v6582_v17, %v6582_v17  ;;  %v6585_v57 = vmax.f32 %v6391_v19, 0.0  ;;  %v6612_v2 = vmax.f32 %v6500_v62, 0.0  ;;  %v6383_v27 = vadd.f32 %v10538_v28, %v6382_v41 }
 0x465   : > { %v6492_v33 = vadd.f32 %v10538_v28, %v6491_v31  ;;  %v7336_v24 = vpop.f32.mrf.mxu1 }
 0x466   : > { %6883 = vst.msk [vmem:[%s10550_s7 + $0x30] sm:$0xf] %vm6870_vm3, %v7200_v60  ;;  %v7203_v45 = vpack.c.bf16 %v6585_v57, %v6585_v57  ;;  %v7230_v0 = vpack.c.bf16 %v6612_v2, %v6612_v2  ;;  %v6583_v47 = vmax.f32 %v6383_v27, 0.0  ;;  %v6503_v44 = vadd.f32 %v7336_v24, %v10538_v28 }
 0x467   : > { %v6610_v16 = vmax.f32 %v6492_v33, 0.0  ;;  %v6494_v56 = vpop.f32.mrf.mxu1 }
 0x468   : > { %6886 = vst.msk [vmem:[%s10550_s7 + $0x3c] sm:$0xf] %vm6870_vm3, %v7203_v45  ;;  %6913 = vst.msk [vmem:[%s10550_s7 + $0xa8] sm:$0xf] %vm6870_vm3, %v7230_v0  ;;  %v7201_v48 = vpack.c.bf16 %v6583_v47, %v6583_v47  ;;  %v6613_v30 = vmax.f32 %v6503_v44, 0.0  ;;  %v6495_v50 = vadd.f32 %v10538_v28, %v6494_v56 }
 0x469   : > { %v7228_v12 = vpack.c.bf16 %v6610_v16, %v6610_v16 }
 0x46a   : > { %6884 = vst.msk [vmem:[%s10550_s7 + $0x34] sm:$0xf] %vm6870_vm3, %v7201_v48  ;;  %v7231_v8 = vpack.c.bf16 %v6613_v30, %v6613_v30  ;;  %v6611_v4 = vmax.f32 %v6495_v50, 0.0 }
 0x46b   : > { %6911 = vst.msk [vmem:[%s10550_s7 + $0xa0] sm:$0xf] %vm6870_vm3, %v7228_v12 }
 0x46c   : > { %6914 = vst.msk [vmem:[%s10550_s7 + $0xac] sm:$0xf] %vm6870_vm3, %v7231_v8  ;;  %v7229_v15 = vpack.c.bf16 %v6611_v4, %v6611_v4 }
 0x46e   : > { %6912 = vst.msk [vmem:[%s10550_s7 + $0xa4] sm:$0xf] %vm6870_vm3, %v7229_v15 }
 0x48d   : > { %v7311_v38 = vpop.f32.mrf.mxu0 }
 0x48e   : > { %v6404_v26 = vadd.f32 %v7311_v38, %v10538_v28 }
 0x48f   : > { %v6395_v59 = vpop.f32.mrf.mxu0 }
 0x490   : > { %v6588_v13 = vmax.f32 %v6404_v26, 0.0  ;;  %v6396_v14 = vadd.f32 %v10538_v28, %v6395_v59 }
 0x491   : > { %v7312_v34 = vpop.f32.mrf.mxu0  ;;  %v7339_v32 = vpop.f32.mrf.mxu1 }
 0x492   : > { %v7206_v20 = vpack.c.bf16 %v6588_v13, %v6588_v13  ;;  %v6586_v29 = vmax.f32 %v6396_v14, 0.0  ;;  %v6407_v5 = vadd.f32 %v7312_v34, %v10538_v28  ;;  %v6516_v43 = vadd.f32 %v7339_v32, %v10538_v28 }
 0x493   : > { %v6398_v25 = vpop.f32.mrf.mxu0  ;;  %v6507_v6 = vpop.f32.mrf.mxu1 }
 0x494   : > { %6889 = vst.msk [vmem:[%s10550_s7 + $0x48] sm:$0xf] %vm6870_vm3, %v7206_v20  ;;  %v7204_v37 = vpack.c.bf16 %v6586_v29, %v6586_v29  ;;  %v6589_v55 = vmax.f32 %v6407_v5, 0.0  ;;  %v6616_v39 = vmax.f32 %v6516_v43, 0.0  ;;  %v6399_v49 = vadd.f32 %v10538_v28, %v6398_v25 }
 0x495   : > { %v6508_v52 = vadd.f32 %v10538_v28, %v6507_v6  ;;  %v7340_v51 = vpop.f32.mrf.mxu1 }
 0x496   : > { %6887 = vst.msk [vmem:[%s10550_s7 + $0x40] sm:$0xf] %vm6870_vm3, %v7204_v37  ;;  %v7207_v7 = vpack.c.bf16 %v6589_v55, %v6589_v55  ;;  %v7234_v21 = vpack.c.bf16 %v6616_v39, %v6616_v39  ;;  %v6587_v54 = vmax.f32 %v6399_v49, 0.0  ;;  %v6519_v46 = vadd.f32 %v7340_v51, %v10538_v28 }
 0x497   : > { %v6614_v61 = vmax.f32 %v6508_v52, 0.0  ;;  %v6510_v3 = vpop.f32.mrf.mxu1 }
 0x498   : > { %6890 = vst.msk [vmem:[%s10550_s7 + $0x4c] sm:$0xf] %vm6870_vm3, %v7207_v7  ;;  %6917 = vst.msk [vmem:[%s10550_s7 + $0xb8] sm:$0xf] %vm6870_vm3, %v7234_v21  ;;  %v7205_v40 = vpack.c.bf16 %v6587_v54, %v6587_v54  ;;  %v6617_v63 = vmax.f32 %v6519_v46, 0.0  ;;  %v6511_v35 = vadd.f32 %v10538_v28, %v6510_v3 }
 0x499   : > { %v7232_v1 = vpack.c.bf16 %v6614_v61, %v6614_v61 }
 0x49a   : > { %6888 = vst.msk [vmem:[%s10550_s7 + $0x44] sm:$0xf] %vm6870_vm3, %v7205_v40  ;;  %v7235_v23 = vpack.c.bf16 %v6617_v63, %v6617_v63  ;;  %v6615_v58 = vmax.f32 %v6511_v35, 0.0 }
 0x49b   : > { %6915 = vst.msk [vmem:[%s10550_s7 + $0xb0] sm:$0xf] %vm6870_vm3, %v7232_v1 }
 0x49c   : > { %6918 = vst.msk [vmem:[%s10550_s7 + $0xbc] sm:$0xf] %vm6870_vm3, %v7235_v23  ;;  %v7233_v9 = vpack.c.bf16 %v6615_v58, %v6615_v58 }
 0x49e   : > { %6916 = vst.msk [vmem:[%s10550_s7 + $0xb4] sm:$0xf] %vm6870_vm3, %v7233_v9 }
 0x4be   : > { %v7315_v22 = vpop.f32.mrf.mxu0 }
 0x4bf   : > { %v6420_v10 = vadd.f32 %v7315_v22, %v10538_v28 }
 0x4c0   : > { %v6411_v18 = vpop.f32.mrf.mxu0 }
 0x4c1   : > { %v6592_v53 = vmax.f32 %v6420_v10, 0.0  ;;  %v6412_v42 = vadd.f32 %v10538_v28, %v6411_v18  ;;  %v7343_v11 = vpop.f32.mrf.mxu1 }
 0x4c2   : > { %v7316_v36 = vpop.f32.mrf.mxu0  ;;  %v6532_v41 = vadd.f32 %v7343_v11, %v10538_v28 }
 0x4c3   : > { %v7210_v17 = vpack.c.bf16 %v6592_v53, %v6592_v53  ;;  %v6590_v19 = vmax.f32 %v6412_v42, 0.0  ;;  %v6423_v62 = vadd.f32 %v7316_v36, %v10538_v28  ;;  %v6523_v60 = vpop.f32.mrf.mxu1 }
 0x4c4   : > { %v6414_v31 = vpop.f32.mrf.mxu0  ;;  %v6620_v27 = vmax.f32 %v6532_v41, 0.0  ;;  %v6524_v24 = vadd.f32 %v10538_v28, %v6523_v60 }
 0x4c5   : > { %6893 = vst.msk [vmem:[%s10550_s7 + $0x58] sm:$0xf] %vm6870_vm3, %v7210_v17  ;;  %v7208_v57 = vpack.c.bf16 %v6590_v19, %v6590_v19  ;;  %v6593_v2 = vmax.f32 %v6423_v62, 0.0  ;;  %v6415_v33 = vadd.f32 %v10538_v28, %v6414_v31  ;;  %v7344_v45 = vpop.f32.mrf.mxu1 }
 0x4c6   : > { %v7238_v47 = vpack.c.bf16 %v6620_v27, %v6620_v27  ;;  %v6535_v16 = vadd.f32 %v7344_v45, %v10538_v28  ;;  %v6618_v56 = vmax.f32 %v6524_v24, 0.0 }
 0x4c7   : > { %6891 = vst.msk [vmem:[%s10550_s7 + $0x50] sm:$0xf] %vm6870_vm3, %v7208_v57  ;;  %v7211_v0 = vpack.c.bf16 %v6593_v2, %v6593_v2  ;;  %v6591_v44 = vmax.f32 %v6415_v33, 0.0  ;;  %v6526_v48 = vpop.f32.mrf.mxu1 }
 0x4c8   : > { %6921 = vst.msk [vmem:[%s10550_s7 + $0xc8] sm:$0xf] %vm6870_vm3, %v7238_v47  ;;  %v6621_v50 = vmax.f32 %v6535_v16, 0.0  ;;  %v6527_v12 = vadd.f32 %v10538_v28, %v6526_v48  ;;  %v7236_v8 = vpack.c.bf16 %v6618_v56, %v6618_v56 }
 0x4c9   : > { %6894 = vst.msk [vmem:[%s10550_s7 + $0x5c] sm:$0xf] %vm6870_vm3, %v7211_v0  ;;  %v7209_v30 = vpack.c.bf16 %v6591_v44, %v6591_v44 }
 0x4ca   : > { %v7239_v4 = vpack.c.bf16 %v6621_v50, %v6621_v50  ;;  %v6619_v15 = vmax.f32 %v6527_v12, 0.0  ;;  %6919 = vst.msk [vmem:[%s10550_s7 + $0xc0] sm:$0xf] %vm6870_vm3, %v7236_v8 }
 0x4cb   : > { %6892 = vst.msk [vmem:[%s10550_s7 + $0x54] sm:$0xf] %vm6870_vm3, %v7209_v30 }
 0x4cc   : > { %6922 = vst.msk [vmem:[%s10550_s7 + $0xcc] sm:$0xf] %vm6870_vm3, %v7239_v4  ;;  %v7237_v38 = vpack.c.bf16 %v6619_v15, %v6619_v15 }
 0x4ce   : > { %6920 = vst.msk [vmem:[%s10550_s7 + $0xc4] sm:$0xf] %vm6870_vm3, %v7237_v38 }
 0x4ed   : > { %v7319_v26 = vpop.f32.mrf.mxu0 }
 0x4ee   : > { %v6436_v59 = vadd.f32 %v7319_v26, %v10538_v28 }
 0x4ef   : > { %v6427_v13 = vpop.f32.mrf.mxu0 }
 0x4f0   : > { %v6596_v14 = vmax.f32 %v6436_v59, 0.0  ;;  %v6428_v34 = vadd.f32 %v10538_v28, %v6427_v13 }
 0x4f1   : > { %v7320_v32 = vpop.f32.mrf.mxu0  ;;  %v7347_v20 = vpop.f32.mrf.mxu1 }
 0x4f2   : > { %v7214_v29 = vpack.c.bf16 %v6596_v14, %v6596_v14  ;;  %v6594_v5 = vmax.f32 %v6428_v34, 0.0  ;;  %v6439_v43 = vadd.f32 %v7320_v32, %v10538_v28  ;;  %v6548_v25 = vadd.f32 %v7347_v20, %v10538_v28 }
 0x4f3   : > { %v6430_v6 = vpop.f32.mrf.mxu0  ;;  %v6539_v37 = vpop.f32.mrf.mxu1 }
 0x4f4   : > { %6897 = vst.msk [vmem:[%s10550_s7 + $0x68] sm:$0xf] %vm6870_vm3, %v7214_v29  ;;  %v7212_v55 = vpack.c.bf16 %v6594_v5, %v6594_v5  ;;  %v6597_v39 = vmax.f32 %v6439_v43, 0.0  ;;  %v6624_v49 = vmax.f32 %v6548_v25, 0.0  ;;  %v6431_v52 = vadd.f32 %v10538_v28, %v6430_v6 }
 0x4f5   : > { %v6540_v51 = vadd.f32 %v10538_v28, %v6539_v37  ;;  %v7348_v7 = vpop.f32.mrf.mxu1 }
 0x4f6   : > { %6895 = vst.msk [vmem:[%s10550_s7 + $0x60] sm:$0xf] %vm6870_vm3, %v7212_v55  ;;  %v7215_v21 = vpack.c.bf16 %v6597_v39, %v6597_v39  ;;  %v7242_v54 = vpack.c.bf16 %v6624_v49, %v6624_v49  ;;  %v6595_v46 = vmax.f32 %v6431_v52, 0.0  ;;  %v6551_v61 = vadd.f32 %v7348_v7, %v10538_v28 }
 0x4f7   : > { %v6622_v3 = vmax.f32 %v6540_v51, 0.0  ;;  %v6542_v40 = vpop.f32.mrf.mxu1 }
 0x4f8   : > { %6898 = vst.msk [vmem:[%s10550_s7 + $0x6c] sm:$0xf] %vm6870_vm3, %v7215_v21  ;;  %6925 = vst.msk [vmem:[%s10550_s7 + $0xd8] sm:$0xf] %vm6870_vm3, %v7242_v54  ;;  %v7213_v63 = vpack.c.bf16 %v6595_v46, %v6595_v46  ;;  %v6625_v35 = vmax.f32 %v6551_v61, 0.0  ;;  %v6543_v1 = vadd.f32 %v10538_v28, %v6542_v40 }
 0x4f9   : > { %v7240_v23 = vpack.c.bf16 %v6622_v3, %v6622_v3 }
 0x4fa   : > { %6896 = vst.msk [vmem:[%s10550_s7 + $0x64] sm:$0xf] %vm6870_vm3, %v7213_v63  ;;  %v7243_v58 = vpack.c.bf16 %v6625_v35, %v6625_v35  ;;  %v6623_v9 = vmax.f32 %v6543_v1, 0.0 }
 0x4fb   : > { %6923 = vst.msk [vmem:[%s10550_s7 + $0xd0] sm:$0xf] %vm6870_vm3, %v7240_v23 }
 0x4fc   : > { %6926 = vst.msk [vmem:[%s10550_s7 + $0xdc] sm:$0xf] %vm6870_vm3, %v7243_v58  ;;  %v7241_v22 = vpack.c.bf16 %v6623_v9, %v6623_v9 }
 0x4fe   : > { %6924 = vst.msk [vmem:[%s10550_s7 + $0xd4] sm:$0xf] %vm6870_vm3, %v7241_v22 }
 0x51d   : > { %v7323_v10 = vpop.f32.mrf.mxu0 }
 0x51e   : > { %v6452_v18 = vadd.f32 %v7323_v10, %v10538_v28 }
 0x51f   : > { %v6443_v53 = vpop.f32.mrf.mxu0 }
 0x520   : > { %v6600_v42 = vmax.f32 %v6452_v18, 0.0  ;;  %v6444_v36 = vadd.f32 %v10538_v28, %v6443_v53 }
 0x521   : > { %v7324_v11 = vpop.f32.mrf.mxu0  ;;  %v7351_v17 = vpop.f32.mrf.mxu1 }
 0x522   : > { %v7218_v19 = vpack.c.bf16 %v6600_v42, %v6600_v42  ;;  %v6598_v62 = vmax.f32 %v6444_v36, 0.0  ;;  %v6455_v41 = vadd.f32 %v7324_v11, %v10538_v28  ;;  %v6564_v31 = vadd.f32 %v7351_v17, %v10538_v28 }
 0x523   : > { %v6446_v60 = vpop.f32.mrf.mxu0  ;;  %v6555_v57 = vpop.f32.mrf.mxu1 }
 0x524   : > { %6901 = vst.msk [vmem:[%s10550_s7 + $0x78] sm:$0xf] %vm6870_vm3, %v7218_v19  ;;  %v7216_v2 = vpack.c.bf16 %v6598_v62, %v6598_v62  ;;  %v6601_v27 = vmax.f32 %v6455_v41, 0.0  ;;  %v6628_v33 = vmax.f32 %v6564_v31, 0.0  ;;  %v6447_v24 = vadd.f32 %v10538_v28, %v6446_v60 }
 0x525   : > { %v6556_v45 = vadd.f32 %v10538_v28, %v6555_v57  ;;  %v7352_v0 = vpop.f32.mrf.mxu1 }
 0x526   : > { %6899 = vst.msk [vmem:[%s10550_s7 + $0x70] sm:$0xf] %vm6870_vm3, %v7216_v2  ;;  %v7219_v47 = vpack.c.bf16 %v6601_v27, %v6601_v27  ;;  %v7246_v44 = vpack.c.bf16 %v6628_v33, %v6628_v33  ;;  %v6599_v16 = vmax.f32 %v6447_v24, 0.0  ;;  %v6567_v56 = vadd.f32 %v7352_v0, %v10538_v28 }
 0x527   : > { %v6626_v48 = vmax.f32 %v6556_v45, 0.0  ;;  %v6558_v30 = vpop.f32.mrf.mxu1 }
 0x528   : > { %6902 = vst.msk [vmem:[%s10550_s7 + $0x7c] sm:$0xf] %vm6870_vm3, %v7219_v47  ;;  %6929 = vst.msk [vmem:[%s10550_s7 + $0xe8] sm:$0xf] %vm6870_vm3, %v7246_v44  ;;  %v7217_v50 = vpack.c.bf16 %v6599_v16, %v6599_v16  ;;  %v6629_v12 = vmax.f32 %v6567_v56, 0.0  ;;  %v6559_v8 = vadd.f32 %v10538_v28, %v6558_v30 }
 0x529   : > { %v7244_v4 = vpack.c.bf16 %v6626_v48, %v6626_v48 }
 0x52a   : > { %6900 = vst.msk [vmem:[%s10550_s7 + $0x74] sm:$0xf] %vm6870_vm3, %v7217_v50  ;;  %v7247_v15 = vpack.c.bf16 %v6629_v12, %v6629_v12  ;;  %v6627_v38 = vmax.f32 %v6559_v8, 0.0 }
 0x52b   : > { %6927 = vst.msk [vmem:[%s10550_s7 + $0xe0] sm:$0xf] %vm6870_vm3, %v7244_v4 }
 0x52c   : > { %6930 = vst.msk [vmem:[%s10550_s7 + $0xec] sm:$0xf] %vm6870_vm3, %v7247_v15  ;;  %v7245_v26 = vpack.c.bf16 %v6627_v38, %v6627_v38 }
 0x52e   : > { %6928 = vst.msk [vmem:[%s10550_s7 + $0xe4] sm:$0xf] %vm6870_vm3, %v7245_v26 }
 0x52f PF: > { %s14_s17 = sadd.s32 1, %s7454_s17   ;;  %s10825_s15 = smov %s7450_s16 }
 0x530   : > { %p11_p7 = scmp.ge.s32.totalorder %s14_s17, 7   ;;  %s10826_s16 = smov %s10828_s18 }
 0x532   :  { %13 = sbr.rel (!%p11_p7) target bundleno = 2 (0x2), region = 75 }

</bundles_post_ra>
